<compile_context>
chip_gen: v6e
topology: v6e:2x2x1
jax: 0.10.0
libtpu: 0.0.40
codegen_flags: <defaults>
</compile_context>

<pallas_src>
import numpy as np
import jax
import jax.numpy as jnp
from jax.experimental import pallas as pl
from jax.experimental.pallas import tpu as pltpu


_TAPS = [(kh, kw) for kh in (-1, 0, 1) for kw in (-1, 0, 1)]   # t = (kh+1)*3 + (kw+1)


# ----------------------------------------------------------------------------
# Host-built structural constants (depend only on static shapes)
# ----------------------------------------------------------------------------
def _border_masks_np(H, W):
    """(9, 1, H*W): mask[t, 0, d] = 1 iff source pixel (h+kh, w+kw) of output pixel
    d is inside the image (implements the zero 'same' padding after a lane roll)."""
    HW = H * W
    d = np.arange(HW)
    dh, dw = d // W, d % W
    m = np.zeros((9, 1, HW), np.float32)
    for t, (kh, kw) in enumerate(_TAPS):
        valid = (dh + kh >= 0) & (dh + kh < H) & (dw + kw >= 0) & (dw + kw < W)
        m[t, 0, valid] = 1.0
    return m


def _shift_mats_np(H, W):
    """(9, HW, HW) 0/1 shift matrices — fallback for small levels (HW < 128 lanes)
    where a lane roll is not guaranteed to lower; these matrices are only a few KB."""
    HW = H * W
    d = np.arange(HW)
    dh, dw = d // W, d % W
    S = np.zeros((9, HW, HW), np.float32)
    for t, (kh, kw) in enumerate(_TAPS):
        valid = (dh + kh >= 0) & (dh + kh < H) & (dw + kw >= 0) & (dw + kw < W)
        src = (dh + kh) * W + (dw + kw)
        S[t, src[valid], d[valid]] = 1.0
    return S


def _pool_mat_np(H, W):
    """(H*W, Ho*Wo): F.avg_pool2d(x, 2) as a right matmul in (C, H*W) layout."""
    Ho, Wo = H // 2, W // 2
    P = np.zeros((H * W, Ho * Wo), np.float32)
    for h in range(H):
        for w in range(W):
            P[h * W + w, (h // 2) * Wo + (w // 2)] = 0.25
    return P


def _scatter_mats_np(Hs, Ws):
    """(4, Hs*Ws, (2Hs)*(2Ws)): ConvTranspose2d(k=2, s=2) stride-2 scatter, t=dh*2+dw."""
    H2, W2 = 2 * Hs, 2 * Ws
    S = np.zeros((4, Hs * Ws, H2 * W2), np.float32)
    for t, (dh, dw) in enumerate([(0, 0), (0, 1), (1, 0), (1, 1)]):
        for h in range(Hs):
            for w in range(Ws):
                S[t, h * Ws + w, (2 * h + dh) * W2 + (2 * w + dw)] = 1.0
    return S


# ----------------------------------------------------------------------------
# The single fused kernel
# ----------------------------------------------------------------------------
def _make_kernel(plan):
    depth = plan["depth"]
    levels = plan["levels"]           # list of (H, W, use_roll) per resolution level

    def im2col(x, lvl, struct_ref):
        """(Cin, HW) f32 -> (9*Cin, HW) f32 patch matrix for a 3x3 'same' conv.
        struct_ref: border masks (9,1,HW) if roll path, else shift matrices (9,HW,HW)."""
        H, W, use_roll = levels[lvl]
        hw = H * W
        cols = []
        for t, (kh, kw) in enumerate(_TAPS):
            if kh == 0 and kw == 0:            # center tap: no shift, no mask
                cols.append(x)
            elif use_roll:                     # XLU roll + VPU border mask (no MXU)
                shift = (-(kh * W + kw)) % hw
                rolled = pltpu.roll(x, shift=shift, axis=1)
                cols.append(rolled * struct_ref[t])
            else:                              # tiny-level fallback: 0/1 shift matmul
                cols.append(jnp.dot(x, struct_ref[t],
                                    preferred_element_type=jnp.float32))
        return jnp.concatenate(cols, axis=0)   # sublane concat, Cin multiples of 8

    def conv3x3_relu(parts, b_ref, lvl, struct_ref):
        """3x3 'same' conv + bias + ReLU; parts = list of (x (Cin_i,HW) f32,
        w_ref (Cout, 9*Cin_i) bf16) — multiple parts fuse torch.cat along channels."""
        acc = None
        for x, w_ref in parts:
            xcol = im2col(x, lvl, struct_ref).astype(jnp.bfloat16)
            z = jnp.dot(w_ref[...], xcol, preferred_element_type=jnp.float32)
            acc = z if acc is None else acc + z
        return jnp.maximum(acc + b_ref[...], 0.0)          # f32 activations

    def kernel(*refs):
        mask_ref, pred_ref = refs[-2], refs[-1]
        it = iter(refs[:-2])
        x_ref = next(it)
        struct_refs = [next(it) for _ in range(depth)]       # per resolution level
        pool_refs = [next(it) for _ in range(depth - 1)]     # level i -> i+1
        scat_refs = [next(it) for _ in range(depth - 1)]     # up block j

        x = x_ref[0].astype(jnp.float32)                     # (Cin_pad, H*W)
        blocks = []
        # ---- down path ----
        for i in range(depth):
            w1, b1, w2, b2 = next(it), next(it), next(it), next(it)
            x = conv3x3_relu([(x, w1)], b1, i, struct_refs[i])
            x = conv3x3_relu([(x, w2)], b2, i, struct_refs[i])
            if i != depth - 1:
                blocks.append(x)
                x = jnp.dot(x.astype(jnp.bfloat16), pool_refs[i][...],
                            preferred_element_type=jnp.float32)
        # dropout=False, batch_norm=False -> identities

        # ---- up path ----
        for j in range(depth - 1):
            wt4, bt = next(it), next(it)
            w1u, w1b, b1 = next(it), next(it), next(it)
            w2, b2 = next(it), next(it)
            lvl = depth - 2 - j
            # ConvTranspose2d(k=2, s=2): one fused (4*Cout, Cin) channel-mix matmul,
            # then 4 tiny 0/1 scatter matmuls, bias added exactly once per pixel.
            z = jnp.dot(wt4[...], x.astype(jnp.bfloat16),
                        preferred_element_type=jnp.float32)   # (4*Cout, HWs)
            cout = bt.shape[0]
            up = None
            for t in range(4):
                zt = z[t * cout:(t + 1) * cout, :].astype(jnp.bfloat16)
                term = jnp.dot(zt, scat_refs[j][t], preferred_element_type=jnp.float32)
                up = term if up is None else up + term
            up = up + bt[...]
            # TODO(synk): F.interpolate(up, size=bridge.shape[2:], mode='bilinear') is
            # an exact identity at these even power-of-two pyramid sizes, so it is
            # skipped.
            bridge = blocks[-j - 1]
            # torch.cat([up, bridge], 1) fused into the conv as two K-splits (up first):
            x = conv3x3_relu([(up, w1u), (bridge, w1b)], b1, lvl, struct_refs[lvl])
            x = conv3x3_relu([(x, w2)], b2, lvl, struct_refs[lvl])

        # ---- head: mask = last(x); pred = last(GMP(x)); shared 1x1 weights ----
        wl, bl = next(it), next(it)
        xb = x.astype(jnp.bfloat16)
        mask = jnp.dot(wl[...], xb, preferred_element_type=jnp.float32) + bl[...]
        g = jnp.max(x, axis=1, keepdims=True).astype(jnp.bfloat16)   # AdaptiveMaxPool2d
        pred = jnp.dot(wl[...], g, preferred_element_type=jnp.float32) + bl[...]
        mask_ref[0] = mask.astype(mask_ref.dtype)            # (NC, H*W) lane-dense
        pred_ref[0] = pred.astype(pred_ref.dtype)            # (NC, 1)

    return kernel


# ----------------------------------------------------------------------------
# Weight packing (tiny one-time layout plumbing outside the kernel)
# ----------------------------------------------------------------------------
def _pack_conv_w(w, pad_cin_to=None):
    # w: HWIO (3,3,Cin,Cout) -> (Cout, 9*Cin) bf16, column index = t*Cin + cin
    kh, kw, cin, cout = w.shape
    if pad_cin_to is not None and cin < pad_cin_to:
        w = jnp.concatenate(
            [w, jnp.zeros((kh, kw, pad_cin_to - cin, cout), w.dtype)], axis=2)
        cin = pad_cin_to
    wp = jnp.transpose(w, (3, 0, 1, 2)).reshape(cout, kh * kw * cin)
    return wp.astype(jnp.bfloat16)


def _pack_upconv_w(wt):
    # wt: PyTorch ConvTranspose2d layout (Cin, Cout, 2, 2) -> (4*Cout, Cin), row t*Cout+cout
    cin, cout = wt.shape[0], wt.shape[1]
    wp = jnp.transpose(wt, (2, 3, 1, 0)).reshape(4 * cout, cin)
    return wp.astype(jnp.bfloat16)


def _pack_bias(b):
    return b.reshape(-1, 1).astype(jnp.float32)


def _const_index_map(ndim):
    zeros = (0,) * ndim
    return lambda b: zeros


# ----------------------------------------------------------------------------
# GP_UNet forward (eval mode: returns (pred, mask)) — one fused pallas_call
# ----------------------------------------------------------------------------
def gp_unet_forward(params, x_nchw):
    B, cin, H, W = x_nchw.shape
    depth = len(params["down"])
    assert H % (2 ** (depth - 1)) == 0 and W % (2 ** (depth - 1)) == 0, (
        "skipped F.interpolate is only an identity for even pyramid resolutions")

    HW0 = H * W
    cin_pad = max(8, ((cin + 7) // 8) * 8)                   # aligned sublane pieces
    x2 = x_nchw.reshape(B, cin, HW0).astype(jnp.float32)     # NCHW already matches
    if cin_pad > cin:
        x2 = jnp.concatenate(
            [x2, jnp.zeros((B, cin_pad - cin, HW0), jnp.float32)], axis=1)

    # structural constants (built once on the host)
    levels, structs = [], []
    for i in range(depth):
        Hi, Wi = H >> i, W >> i
        use_roll = (Hi * Wi) % 128 == 0      # roll+mask when the lane dim is 128-aligned
        levels.append((Hi, Wi, use_roll))
        if use_roll:
            structs.append(jnp.asarray(_border_masks_np(Hi, Wi), jnp.float32))
        else:
            structs.append(jnp.asarray(_shift_mats_np(Hi, Wi), jnp.float32))
    pool_mats = [jnp.asarray(_pool_mat_np(H >> i, W >> i), jnp.bfloat16)
                 for i in range(depth - 1)]
    scat_mats = [jnp.asarray(_scatter_mats_np(H >> (depth - 1 - j),
                                              W >> (depth - 1 - j)), jnp.bfloat16)
                 for j in range(depth - 1)]

    # flat weight list in the exact order the kernel consumes it
    flat = []
    for i, ((w1, b1), (w2, b2)) in enumerate(params["down"]):
        flat += [_pack_conv_w(w1, cin_pad if i == 0 else None), _pack_bias(b1),
                 _pack_conv_w(w2), _pack_bias(b2)]
    for (wt, bt), (w1, b1), (w2, b2) in params["up"]:
        c = wt.shape[1]
        flat += [_pack_upconv_w(wt), _pack_bias(bt),
                 _pack_conv_w(w1[:, :, :c, :]),              # 'up' half of torch.cat
                 _pack_conv_w(w1[:, :, c:, :]),              # 'bridge' half
                 _pack_bias(b1),
                 _pack_conv_w(w2), _pack_bias(b2)]
    wl, bl = params["last"]
    nc = wl.shape[1]
    flat += [wl.T.astype(jnp.bfloat16), _pack_bias(bl)]

    inputs = [x2] + structs + pool_mats + scat_mats + flat

    in_specs = [pl.BlockSpec((1, cin_pad, HW0), lambda b: (b, 0, 0))]
    for a in inputs[1:]:
        # grid-invariant constants: constant index map -> DMA'd once, no refetch
        in_specs.append(pl.BlockSpec(a.shape, _const_index_map(a.ndim)))

    out_shapes = (jax.ShapeDtypeStruct((B, nc, HW0), jnp.float32),   # mask (NCHW order)
                  jax.ShapeDtypeStruct((B, nc, 1), jnp.float32))     # pred
    out_specs = (pl.BlockSpec((1, nc, HW0), lambda b: (b, 0, 0)),
                 pl.BlockSpec((1, nc, 1), lambda b: (b, 0, 0)))

    plan = {"depth": depth, "levels": levels}
    mask, pred = pl.pallas_call(
        _make_kernel(plan),
        out_shape=out_shapes,
        grid=(B,),
        in_specs=in_specs,
        out_specs=out_specs,
        compiler_params=pltpu.CompilerParams(
            dimension_semantics=("parallel",),               # both TCs busy on v7x
            vmem_limit_bytes=32 * 1024 * 1024),
    )(*inputs)

    return pred.reshape(B, nc), mask.reshape(B, nc, H, W)    # free reshapes, no transpose


# ----------------------------------------------------------------------------
# Parameters (deterministic, PyTorch-like uniform(-1/sqrt(fan_in), +1/sqrt(fan_in)))
# ----------------------------------------------------------------------------
def _conv_params(key, kh, kw, cin, cout):
    scale = 1.0 / float(np.sqrt(kh * kw * cin))
    kw_, kb_ = jax.random.split(key)
    w = jax.random.uniform(kw_, (kh, kw, cin, cout), jnp.float32, -scale, scale)
    b = jax.random.uniform(kb_, (cout,), jnp.float32, -scale, scale)
    return w, b


def init_params(key, in_channels=1, n_classes=1, depth=3, wf=4):
    keys = iter(jax.random.split(key, 32))
    params = {"down": [], "up": [], "last": None}
    prev = in_channels
    for i in range(depth):
        ch = 2 ** (wf + i)
        params["down"].append((_conv_params(next(keys), 3, 3, prev, ch),
                               _conv_params(next(keys), 3, 3, ch, ch)))
        prev = ch
    for i in reversed(range(depth - 1)):
        ch = 2 ** (wf + i)
        scale = 1.0 / float(np.sqrt(prev * 4))
        ka, kb = jax.random.split(next(keys))
        wt = jax.random.uniform(ka, (prev, ch, 2, 2), jnp.float32, -scale, scale)
        bt = jax.random.uniform(kb, (ch,), jnp.float32, -scale, scale)
        cb1 = _conv_params(next(keys), 3, 3, prev, ch)       # after concat: ch+ch=prev
        cb2 = _conv_params(next(keys), 3, 3, ch, ch)
        params["up"].append(((wt, bt), cb1, cb2))
        prev = ch
    wl, bl = _conv_params(next(keys), 1, 1, prev, n_classes)
    params["last"] = (wl.reshape(prev, n_classes), bl)
    return params


if __name__ == "__main__":
    IN_CH, N_CLASSES, DEPTH, WF = 1, 1, 3, 4
    B, H, W = 2, 16, 16
    key = jax.random.PRNGKey(0)
    kp, kx = jax.random.split(key)
    params = init_params(kp, IN_CH, N_CLASSES, DEPTH, WF)
    x = jax.random.normal(kx, (B, IN_CH, H, W), jnp.float32)   # NCHW, like PyTorch

    pred, mask = jax.jit(gp_unet_forward)(params, x)
    jax.block_until_ready((pred, mask))

    assert pred.shape == (B, N_CLASSES), pred.shape
    assert mask.shape == (B, N_CLASSES, H, W), mask.shape
    assert bool(jnp.all(jnp.isfinite(pred))) and bool(jnp.all(jnp.isfinite(mask)))
    print("KERNEL_OK")
</pallas_src>

<mosaic_0001>
module attributes {stable_mosaic.version = 11 : i64} {
  func.func @kernel(%arg0: i32, %arg1: memref<1x8x256xf32, #tpu.memory_space<vmem>>, %arg2: memref<9x1x256xf32, #tpu.memory_space<vmem>>, %arg3: memref<9x64x64xf32, #tpu.memory_space<vmem>>, %arg4: memref<9x16x16xf32, #tpu.memory_space<vmem>>, %arg5: memref<256x64xbf16, #tpu.memory_space<vmem>>, %arg6: memref<64x16xbf16, #tpu.memory_space<vmem>>, %arg7: memref<4x16x64xbf16, #tpu.memory_space<vmem>>, %arg8: memref<4x64x256xbf16, #tpu.memory_space<vmem>>, %arg9: memref<16x72xbf16, #tpu.memory_space<vmem>>, %arg10: memref<16x1xf32, #tpu.memory_space<vmem>>, %arg11: memref<16x144xbf16, #tpu.memory_space<vmem>>, %arg12: memref<16x1xf32, #tpu.memory_space<vmem>>, %arg13: memref<32x144xbf16, #tpu.memory_space<vmem>>, %arg14: memref<32x1xf32, #tpu.memory_space<vmem>>, %arg15: memref<32x288xbf16, #tpu.memory_space<vmem>>, %arg16: memref<32x1xf32, #tpu.memory_space<vmem>>, %arg17: memref<64x288xbf16, #tpu.memory_space<vmem>>, %arg18: memref<64x1xf32, #tpu.memory_space<vmem>>, %arg19: memref<64x576xbf16, #tpu.memory_space<vmem>>, %arg20: memref<64x1xf32, #tpu.memory_space<vmem>>, %arg21: memref<128x64xbf16, #tpu.memory_space<vmem>>, %arg22: memref<32x1xf32, #tpu.memory_space<vmem>>, %arg23: memref<32x288xbf16, #tpu.memory_space<vmem>>, %arg24: memref<32x288xbf16, #tpu.memory_space<vmem>>, %arg25: memref<32x1xf32, #tpu.memory_space<vmem>>, %arg26: memref<32x288xbf16, #tpu.memory_space<vmem>>, %arg27: memref<32x1xf32, #tpu.memory_space<vmem>>, %arg28: memref<64x32xbf16, #tpu.memory_space<vmem>>, %arg29: memref<16x1xf32, #tpu.memory_space<vmem>>, %arg30: memref<16x144xbf16, #tpu.memory_space<vmem>>, %arg31: memref<16x144xbf16, #tpu.memory_space<vmem>>, %arg32: memref<16x1xf32, #tpu.memory_space<vmem>>, %arg33: memref<16x144xbf16, #tpu.memory_space<vmem>>, %arg34: memref<16x1xf32, #tpu.memory_space<vmem>>, %arg35: memref<1x16xbf16, #tpu.memory_space<vmem>>, %arg36: memref<1x1xf32, #tpu.memory_space<vmem>>, %arg37: memref<1x1x256xf32, #tpu.memory_space<vmem>>, %arg38: memref<1x1x1xf32, #tpu.memory_space<vmem>>) attributes {dimension_semantics = [#tpu.dimension_semantics<parallel>], iteration_bounds = array<i64: 2>, scalar_prefetch = 0 : i64, scratch_operands = 0 : i64, tpu.core_type = #tpu.core_type<tc>, window_params = [{transform_indices = @transform_0, window_bounds = array<i64: 1, 8, 256>}, {pipeline_mode = #tpu.pipeline_mode<synchronous>, transform_indices = @transform_1, window_bounds = array<i64: 9, 1, 256>}, {pipeline_mode = #tpu.pipeline_mode<synchronous>, transform_indices = @transform_2, window_bounds = array<i64: 9, 64, 64>}, {pipeline_mode = #tpu.pipeline_mode<synchronous>, transform_indices = @transform_3, window_bounds = array<i64: 9, 16, 16>}, {pipeline_mode = #tpu.pipeline_mode<synchronous>, transform_indices = @transform_4, window_bounds = array<i64: 256, 64>}, {pipeline_mode = #tpu.pipeline_mode<synchronous>, transform_indices = @transform_5, window_bounds = array<i64: 64, 16>}, {pipeline_mode = #tpu.pipeline_mode<synchronous>, transform_indices = @transform_6, window_bounds = array<i64: 4, 16, 64>}, {pipeline_mode = #tpu.pipeline_mode<synchronous>, transform_indices = @transform_7, window_bounds = array<i64: 4, 64, 256>}, {pipeline_mode = #tpu.pipeline_mode<synchronous>, transform_indices = @transform_8, window_bounds = array<i64: 16, 72>}, {pipeline_mode = #tpu.pipeline_mode<synchronous>, transform_indices = @transform_9, window_bounds = array<i64: 16, 1>}, {pipeline_mode = #tpu.pipeline_mode<synchronous>, transform_indices = @transform_10, window_bounds = array<i64: 16, 144>}, {pipeline_mode = #tpu.pipeline_mode<synchronous>, transform_indices = @transform_11, window_bounds = array<i64: 16, 1>}, {pipeline_mode = #tpu.pipeline_mode<synchronous>, transform_indices = @transform_12, window_bounds = array<i64: 32, 144>}, {pipeline_mode = #tpu.pipeline_mode<synchronous>, transform_indices = @transform_13, window_bounds = array<i64: 32, 1>}, {pipeline_mode = #tpu.pipeline_mode<synchronous>, transform_indices = @transform_14, window_bounds = array<i64: 32, 288>}, {pipeline_mode = #tpu.pipeline_mode<synchronous>, transform_indices = @transform_15, window_bounds = array<i64: 32, 1>}, {pipeline_mode = #tpu.pipeline_mode<synchronous>, transform_indices = @transform_16, window_bounds = array<i64: 64, 288>}, {pipeline_mode = #tpu.pipeline_mode<synchronous>, transform_indices = @transform_17, window_bounds = array<i64: 64, 1>}, {pipeline_mode = #tpu.pipeline_mode<synchronous>, transform_indices = @transform_18, window_bounds = array<i64: 64, 576>}, {pipeline_mode = #tpu.pipeline_mode<synchronous>, transform_indices = @transform_19, window_bounds = array<i64: 64, 1>}, {pipeline_mode = #tpu.pipeline_mode<synchronous>, transform_indices = @transform_20, window_bounds = array<i64: 128, 64>}, {pipeline_mode = #tpu.pipeline_mode<synchronous>, transform_indices = @transform_21, window_bounds = array<i64: 32, 1>}, {pipeline_mode = #tpu.pipeline_mode<synchronous>, transform_indices = @transform_22, window_bounds = array<i64: 32, 288>}, {pipeline_mode = #tpu.pipeline_mode<synchronous>, transform_indices = @transform_23, window_bounds = array<i64: 32, 288>}, {pipeline_mode = #tpu.pipeline_mode<synchronous>, transform_indices = @transform_24, window_bounds = array<i64: 32, 1>}, {pipeline_mode = #tpu.pipeline_mode<synchronous>, transform_indices = @transform_25, window_bounds = array<i64: 32, 288>}, {pipeline_mode = #tpu.pipeline_mode<synchronous>, transform_indices = @transform_26, window_bounds = array<i64: 32, 1>}, {pipeline_mode = #tpu.pipeline_mode<synchronous>, transform_indices = @transform_27, window_bounds = array<i64: 64, 32>}, {pipeline_mode = #tpu.pipeline_mode<synchronous>, transform_indices = @transform_28, window_bounds = array<i64: 16, 1>}, {pipeline_mode = #tpu.pipeline_mode<synchronous>, transform_indices = @transform_29, window_bounds = array<i64: 16, 144>}, {pipeline_mode = #tpu.pipeline_mode<synchronous>, transform_indices = @transform_30, window_bounds = array<i64: 16, 144>}, {pipeline_mode = #tpu.pipeline_mode<synchronous>, transform_indices = @transform_31, window_bounds = array<i64: 16, 1>}, {pipeline_mode = #tpu.pipeline_mode<synchronous>, transform_indices = @transform_32, window_bounds = array<i64: 16, 144>}, {pipeline_mode = #tpu.pipeline_mode<synchronous>, transform_indices = @transform_33, window_bounds = array<i64: 16, 1>}, {pipeline_mode = #tpu.pipeline_mode<synchronous>, transform_indices = @transform_34, window_bounds = array<i64: 1, 16>}, {pipeline_mode = #tpu.pipeline_mode<synchronous>, transform_indices = @transform_35, window_bounds = array<i64: 1, 1>}, {transform_indices = @transform_36, window_bounds = array<i64: 1, 1, 256>}, {transform_indices = @transform_37, window_bounds = array<i64: 1, 1, 1>}]} {
    %c0 = arith.constant 0 : index
    %c0_0 = arith.constant 0 : index
    %c0_1 = arith.constant 0 : index
    %0 = vector.load %arg1[%c0, %c0_0, %c0_1] : memref<1x8x256xf32, #tpu.memory_space<vmem>>, vector<1x8x256xf32>
    %1 = vector.shape_cast %0 : vector<1x8x256xf32> to vector<8x256xf32>
    %c17_i32 = arith.constant 17 : i32
    %2 = tpu.dynamic_rotate %1 by %c17_i32 dim 1 : vector<8x256xf32>, i32 -> vector<8x256xf32>
    %c0_2 = arith.constant 0 : index
    %c0_3 = arith.constant 0 : index
    %c0_4 = arith.constant 0 : index
    %3 = vector.load %arg2[%c0_2, %c0_3, %c0_4] : memref<9x1x256xf32, #tpu.memory_space<vmem>>, vector<1x1x256xf32>
    %4 = vector.shape_cast %3 : vector<1x1x256xf32> to vector<1x256xf32>
    %5 = vector.broadcast %4 : vector<1x256xf32> to vector<8x256xf32>
    %6 = arith.mulf %2, %5 : vector<8x256xf32>
    %c16_i32 = arith.constant 16 : i32
    %7 = tpu.dynamic_rotate %1 by %c16_i32 dim 1 : vector<8x256xf32>, i32 -> vector<8x256xf32>
    %c1 = arith.constant 1 : index
    %c0_5 = arith.constant 0 : index
    %c0_6 = arith.constant 0 : index
    %8 = vector.load %arg2[%c1, %c0_5, %c0_6] : memref<9x1x256xf32, #tpu.memory_space<vmem>>, vector<1x1x256xf32>
    %9 = vector.shape_cast %8 : vector<1x1x256xf32> to vector<1x256xf32>
    %10 = vector.broadcast %9 : vector<1x256xf32> to vector<8x256xf32>
    %11 = arith.mulf %7, %10 : vector<8x256xf32>
    %c15_i32 = arith.constant 15 : i32
    %12 = tpu.dynamic_rotate %1 by %c15_i32 dim 1 : vector<8x256xf32>, i32 -> vector<8x256xf32>
    %c2 = arith.constant 2 : index
    %c0_7 = arith.constant 0 : index
    %c0_8 = arith.constant 0 : index
    %13 = vector.load %arg2[%c2, %c0_7, %c0_8] : memref<9x1x256xf32, #tpu.memory_space<vmem>>, vector<1x1x256xf32>
    %14 = vector.shape_cast %13 : vector<1x1x256xf32> to vector<1x256xf32>
    %15 = vector.broadcast %14 : vector<1x256xf32> to vector<8x256xf32>
    %16 = arith.mulf %12, %15 : vector<8x256xf32>
    %c1_i32 = arith.constant 1 : i32
    %17 = tpu.dynamic_rotate %1 by %c1_i32 dim 1 : vector<8x256xf32>, i32 -> vector<8x256xf32>
    %c3 = arith.constant 3 : index
    %c0_9 = arith.constant 0 : index
    %c0_10 = arith.constant 0 : index
    %18 = vector.load %arg2[%c3, %c0_9, %c0_10] : memref<9x1x256xf32, #tpu.memory_space<vmem>>, vector<1x1x256xf32>
    %19 = vector.shape_cast %18 : vector<1x1x256xf32> to vector<1x256xf32>
    %20 = vector.broadcast %19 : vector<1x256xf32> to vector<8x256xf32>
    %21 = arith.mulf %17, %20 : vector<8x256xf32>
    %c255_i32 = arith.constant 255 : i32
    %22 = tpu.dynamic_rotate %1 by %c255_i32 dim 1 : vector<8x256xf32>, i32 -> vector<8x256xf32>
    %c5 = arith.constant 5 : index
    %c0_11 = arith.constant 0 : index
    %c0_12 = arith.constant 0 : index
    %23 = vector.load %arg2[%c5, %c0_11, %c0_12] : memref<9x1x256xf32, #tpu.memory_space<vmem>>, vector<1x1x256xf32>
    %24 = vector.shape_cast %23 : vector<1x1x256xf32> to vector<1x256xf32>
    %25 = vector.broadcast %24 : vector<1x256xf32> to vector<8x256xf32>
    %26 = arith.mulf %22, %25 : vector<8x256xf32>
    %c241_i32 = arith.constant 241 : i32
    %27 = tpu.dynamic_rotate %1 by %c241_i32 dim 1 : vector<8x256xf32>, i32 -> vector<8x256xf32>
    %c6 = arith.constant 6 : index
    %c0_13 = arith.constant 0 : index
    %c0_14 = arith.constant 0 : index
    %28 = vector.load %arg2[%c6, %c0_13, %c0_14] : memref<9x1x256xf32, #tpu.memory_space<vmem>>, vector<1x1x256xf32>
    %29 = vector.shape_cast %28 : vector<1x1x256xf32> to vector<1x256xf32>
    %30 = vector.broadcast %29 : vector<1x256xf32> to vector<8x256xf32>
    %31 = arith.mulf %27, %30 : vector<8x256xf32>
    %c240_i32 = arith.constant 240 : i32
    %32 = tpu.dynamic_rotate %1 by %c240_i32 dim 1 : vector<8x256xf32>, i32 -> vector<8x256xf32>
    %c7 = arith.constant 7 : index
    %c0_15 = arith.constant 0 : index
    %c0_16 = arith.constant 0 : index
    %33 = vector.load %arg2[%c7, %c0_15, %c0_16] : memref<9x1x256xf32, #tpu.memory_space<vmem>>, vector<1x1x256xf32>
    %34 = vector.shape_cast %33 : vector<1x1x256xf32> to vector<1x256xf32>
    %35 = vector.broadcast %34 : vector<1x256xf32> to vector<8x256xf32>
    %36 = arith.mulf %32, %35 : vector<8x256xf32>
    %c239_i32 = arith.constant 239 : i32
    %37 = tpu.dynamic_rotate %1 by %c239_i32 dim 1 : vector<8x256xf32>, i32 -> vector<8x256xf32>
    %c8 = arith.constant 8 : index
    %c0_17 = arith.constant 0 : index
    %c0_18 = arith.constant 0 : index
    %38 = vector.load %arg2[%c8, %c0_17, %c0_18] : memref<9x1x256xf32, #tpu.memory_space<vmem>>, vector<1x1x256xf32>
    %39 = vector.shape_cast %38 : vector<1x1x256xf32> to vector<1x256xf32>
    %40 = vector.broadcast %39 : vector<1x256xf32> to vector<8x256xf32>
    %41 = arith.mulf %37, %40 : vector<8x256xf32>
    %42 = tpu.concatenate %6, %11, %16, %21, %1, %26, %31, %36, %41 in 0 : vector<8x256xf32>, vector<8x256xf32>, vector<8x256xf32>, vector<8x256xf32>, vector<8x256xf32>, vector<8x256xf32>, vector<8x256xf32>, vector<8x256xf32>, vector<8x256xf32> -> vector<72x256xf32>
    %43 = arith.truncf %42 : vector<72x256xf32> to vector<72x256xbf16>
    %c0_19 = arith.constant 0 : index
    %c0_20 = arith.constant 0 : index
    %44 = vector.load %arg9[%c0_19, %c0_20] : memref<16x72xbf16, #tpu.memory_space<vmem>>, vector<16x72xbf16>
    %cst = arith.constant dense<0.000000e+00> : vector<16x256xf32>
    %45 = tpu.matmul %44, %43, %cst {dimension_numbers = #tpu.dot_dimension_numbers<[1], [0], [0], [1], [0, 0, 1, 1], [], []>} : vector<16x72xbf16>, vector<72x256xbf16>, vector<16x256xf32> -> vector<16x256xf32>
    %c0_21 = arith.constant 0 : index
    %c0_22 = arith.constant 0 : index
    %46 = vector.load %arg10[%c0_21, %c0_22] : memref<16x1xf32, #tpu.memory_space<vmem>>, vector<16x1xf32>
    %47 = vector.broadcast %46 : vector<16x1xf32> to vector<16x256xf32>
    %48 = arith.addf %45, %47 : vector<16x256xf32>
    %cst_23 = arith.constant 0.000000e+00 : f32
    %49 = vector.broadcast %cst_23 : f32 to vector<16x256xf32>
    %50 = arith.maximumf %48, %49 : vector<16x256xf32>
    %c17_i32_24 = arith.constant 17 : i32
    %51 = tpu.dynamic_rotate %50 by %c17_i32_24 dim 1 : vector<16x256xf32>, i32 -> vector<16x256xf32>
    %c0_25 = arith.constant 0 : index
    %c0_26 = arith.constant 0 : index
    %c0_27 = arith.constant 0 : index
    %52 = vector.load %arg2[%c0_25, %c0_26, %c0_27] : memref<9x1x256xf32, #tpu.memory_space<vmem>>, vector<1x1x256xf32>
    %53 = vector.shape_cast %52 : vector<1x1x256xf32> to vector<1x256xf32>
    %54 = vector.broadcast %53 : vector<1x256xf32> to vector<16x256xf32>
    %55 = arith.mulf %51, %54 : vector<16x256xf32>
    %c16_i32_28 = arith.constant 16 : i32
    %56 = tpu.dynamic_rotate %50 by %c16_i32_28 dim 1 : vector<16x256xf32>, i32 -> vector<16x256xf32>
    %c1_29 = arith.constant 1 : index
    %c0_30 = arith.constant 0 : index
    %c0_31 = arith.constant 0 : index
    %57 = vector.load %arg2[%c1_29, %c0_30, %c0_31] : memref<9x1x256xf32, #tpu.memory_space<vmem>>, vector<1x1x256xf32>
    %58 = vector.shape_cast %57 : vector<1x1x256xf32> to vector<1x256xf32>
    %59 = vector.broadcast %58 : vector<1x256xf32> to vector<16x256xf32>
    %60 = arith.mulf %56, %59 : vector<16x256xf32>
    %c15_i32_32 = arith.constant 15 : i32
    %61 = tpu.dynamic_rotate %50 by %c15_i32_32 dim 1 : vector<16x256xf32>, i32 -> vector<16x256xf32>
    %c2_33 = arith.constant 2 : index
    %c0_34 = arith.constant 0 : index
    %c0_35 = arith.constant 0 : index
    %62 = vector.load %arg2[%c2_33, %c0_34, %c0_35] : memref<9x1x256xf32, #tpu.memory_space<vmem>>, vector<1x1x256xf32>
    %63 = vector.shape_cast %62 : vector<1x1x256xf32> to vector<1x256xf32>
    %64 = vector.broadcast %63 : vector<1x256xf32> to vector<16x256xf32>
    %65 = arith.mulf %61, %64 : vector<16x256xf32>
    %c1_i32_36 = arith.constant 1 : i32
    %66 = tpu.dynamic_rotate %50 by %c1_i32_36 dim 1 : vector<16x256xf32>, i32 -> vector<16x256xf32>
    %c3_37 = arith.constant 3 : index
    %c0_38 = arith.constant 0 : index
    %c0_39 = arith.constant 0 : index
    %67 = vector.load %arg2[%c3_37, %c0_38, %c0_39] : memref<9x1x256xf32, #tpu.memory_space<vmem>>, vector<1x1x256xf32>
    %68 = vector.shape_cast %67 : vector<1x1x256xf32> to vector<1x256xf32>
    %69 = vector.broadcast %68 : vector<1x256xf32> to vector<16x256xf32>
    %70 = arith.mulf %66, %69 : vector<16x256xf32>
    %c255_i32_40 = arith.constant 255 : i32
    %71 = tpu.dynamic_rotate %50 by %c255_i32_40 dim 1 : vector<16x256xf32>, i32 -> vector<16x256xf32>
    %c5_41 = arith.constant 5 : index
    %c0_42 = arith.constant 0 : index
    %c0_43 = arith.constant 0 : index
    %72 = vector.load %arg2[%c5_41, %c0_42, %c0_43] : memref<9x1x256xf32, #tpu.memory_space<vmem>>, vector<1x1x256xf32>
    %73 = vector.shape_cast %72 : vector<1x1x256xf32> to vector<1x256xf32>
    %74 = vector.broadcast %73 : vector<1x256xf32> to vector<16x256xf32>
    %75 = arith.mulf %71, %74 : vector<16x256xf32>
    %c241_i32_44 = arith.constant 241 : i32
    %76 = tpu.dynamic_rotate %50 by %c241_i32_44 dim 1 : vector<16x256xf32>, i32 -> vector<16x256xf32>
    %c6_45 = arith.constant 6 : index
    %c0_46 = arith.constant 0 : index
    %c0_47 = arith.constant 0 : index
    %77 = vector.load %arg2[%c6_45, %c0_46, %c0_47] : memref<9x1x256xf32, #tpu.memory_space<vmem>>, vector<1x1x256xf32>
    %78 = vector.shape_cast %77 : vector<1x1x256xf32> to vector<1x256xf32>
    %79 = vector.broadcast %78 : vector<1x256xf32> to vector<16x256xf32>
    %80 = arith.mulf %76, %79 : vector<16x256xf32>
    %c240_i32_48 = arith.constant 240 : i32
    %81 = tpu.dynamic_rotate %50 by %c240_i32_48 dim 1 : vector<16x256xf32>, i32 -> vector<16x256xf32>
    %c7_49 = arith.constant 7 : index
    %c0_50 = arith.constant 0 : index
    %c0_51 = arith.constant 0 : index
    %82 = vector.load %arg2[%c7_49, %c0_50, %c0_51] : memref<9x1x256xf32, #tpu.memory_space<vmem>>, vector<1x1x256xf32>
    %83 = vector.shape_cast %82 : vector<1x1x256xf32> to vector<1x256xf32>
    %84 = vector.broadcast %83 : vector<1x256xf32> to vector<16x256xf32>
    %85 = arith.mulf %81, %84 : vector<16x256xf32>
    %c239_i32_52 = arith.constant 239 : i32
    %86 = tpu.dynamic_rotate %50 by %c239_i32_52 dim 1 : vector<16x256xf32>, i32 -> vector<16x256xf32>
    %c8_53 = arith.constant 8 : index
    %c0_54 = arith.constant 0 : index
    %c0_55 = arith.constant 0 : index
    %87 = vector.load %arg2[%c8_53, %c0_54, %c0_55] : memref<9x1x256xf32, #tpu.memory_space<vmem>>, vector<1x1x256xf32>
    %88 = vector.shape_cast %87 : vector<1x1x256xf32> to vector<1x256xf32>
    %89 = vector.broadcast %88 : vector<1x256xf32> to vector<16x256xf32>
    %90 = arith.mulf %86, %89 : vector<16x256xf32>
    %91 = tpu.concatenate %55, %60, %65, %70, %50, %75, %80, %85, %90 in 0 : vector<16x256xf32>, vector<16x256xf32>, vector<16x256xf32>, vector<16x256xf32>, vector<16x256xf32>, vector<16x256xf32>, vector<16x256xf32>, vector<16x256xf32>, vector<16x256xf32> -> vector<144x256xf32>
    %92 = arith.truncf %91 : vector<144x256xf32> to vector<144x256xbf16>
    %c0_56 = arith.constant 0 : index
    %c0_57 = arith.constant 0 : index
    %93 = vector.load %arg11[%c0_56, %c0_57] : memref<16x144xbf16, #tpu.memory_space<vmem>>, vector<16x144xbf16>
    %cst_58 = arith.constant dense<0.000000e+00> : vector<16x256xf32>
    %94 = tpu.matmul %93, %92, %cst_58 {dimension_numbers = #tpu.dot_dimension_numbers<[1], [0], [0], [1], [0, 0, 1, 1], [], []>} : vector<16x144xbf16>, vector<144x256xbf16>, vector<16x256xf32> -> vector<16x256xf32>
    %c0_59 = arith.constant 0 : index
    %c0_60 = arith.constant 0 : index
    %95 = vector.load %arg12[%c0_59, %c0_60] : memref<16x1xf32, #tpu.memory_space<vmem>>, vector<16x1xf32>
    %96 = vector.broadcast %95 : vector<16x1xf32> to vector<16x256xf32>
    %97 = arith.addf %94, %96 : vector<16x256xf32>
    %cst_61 = arith.constant 0.000000e+00 : f32
    %98 = vector.broadcast %cst_61 : f32 to vector<16x256xf32>
    %99 = arith.maximumf %97, %98 : vector<16x256xf32>
    %100 = arith.truncf %99 : vector<16x256xf32> to vector<16x256xbf16>
    %c0_62 = arith.constant 0 : index
    %c0_63 = arith.constant 0 : index
    %101 = vector.load %arg5[%c0_62, %c0_63] : memref<256x64xbf16, #tpu.memory_space<vmem>>, vector<256x64xbf16>
    %cst_64 = arith.constant dense<0.000000e+00> : vector<16x64xf32>
    %102 = tpu.matmul %100, %101, %cst_64 {dimension_numbers = #tpu.dot_dimension_numbers<[1], [0], [0], [1], [0, 0, 1, 1], [], []>} : vector<16x256xbf16>, vector<256x64xbf16>, vector<16x64xf32> -> vector<16x64xf32>
    %c0_65 = arith.constant 0 : index
    %c0_66 = arith.constant 0 : index
    %c0_67 = arith.constant 0 : index
    %103 = vector.load %arg3[%c0_65, %c0_66, %c0_67] : memref<9x64x64xf32, #tpu.memory_space<vmem>>, vector<1x64x64xf32>
    %104 = vector.shape_cast %103 : vector<1x64x64xf32> to vector<64x64xf32>
    %cst_68 = arith.constant dense<0.000000e+00> : vector<16x64xf32>
    %105 = tpu.matmul %102, %104, %cst_68 {dimension_numbers = #tpu.dot_dimension_numbers<[1], [0], [0], [1], [0, 0, 1, 1], [], []>} : vector<16x64xf32>, vector<64x64xf32>, vector<16x64xf32> -> vector<16x64xf32>
    %c1_69 = arith.constant 1 : index
    %c0_70 = arith.constant 0 : index
    %c0_71 = arith.constant 0 : index
    %106 = vector.load %arg3[%c1_69, %c0_70, %c0_71] : memref<9x64x64xf32, #tpu.memory_space<vmem>>, vector<1x64x64xf32>
    %107 = vector.shape_cast %106 : vector<1x64x64xf32> to vector<64x64xf32>
    %cst_72 = arith.constant dense<0.000000e+00> : vector<16x64xf32>
    %108 = tpu.matmul %102, %107, %cst_72 {dimension_numbers = #tpu.dot_dimension_numbers<[1], [0], [0], [1], [0, 0, 1, 1], [], []>} : vector<16x64xf32>, vector<64x64xf32>, vector<16x64xf32> -> vector<16x64xf32>
    %c2_73 = arith.constant 2 : index
    %c0_74 = arith.constant 0 : index
    %c0_75 = arith.constant 0 : index
    %109 = vector.load %arg3[%c2_73, %c0_74, %c0_75] : memref<9x64x64xf32, #tpu.memory_space<vmem>>, vector<1x64x64xf32>
    %110 = vector.shape_cast %109 : vector<1x64x64xf32> to vector<64x64xf32>
    %cst_76 = arith.constant dense<0.000000e+00> : vector<16x64xf32>
    %111 = tpu.matmul %102, %110, %cst_76 {dimension_numbers = #tpu.dot_dimension_numbers<[1], [0], [0], [1], [0, 0, 1, 1], [], []>} : vector<16x64xf32>, vector<64x64xf32>, vector<16x64xf32> -> vector<16x64xf32>
    %c3_77 = arith.constant 3 : index
    %c0_78 = arith.constant 0 : index
    %c0_79 = arith.constant 0 : index
    %112 = vector.load %arg3[%c3_77, %c0_78, %c0_79] : memref<9x64x64xf32, #tpu.memory_space<vmem>>, vector<1x64x64xf32>
    %113 = vector.shape_cast %112 : vector<1x64x64xf32> to vector<64x64xf32>
    %cst_80 = arith.constant dense<0.000000e+00> : vector<16x64xf32>
    %114 = tpu.matmul %102, %113, %cst_80 {dimension_numbers = #tpu.dot_dimension_numbers<[1], [0], [0], [1], [0, 0, 1, 1], [], []>} : vector<16x64xf32>, vector<64x64xf32>, vector<16x64xf32> -> vector<16x64xf32>
    %c5_81 = arith.constant 5 : index
    %c0_82 = arith.constant 0 : index
    %c0_83 = arith.constant 0 : index
    %115 = vector.load %arg3[%c5_81, %c0_82, %c0_83] : memref<9x64x64xf32, #tpu.memory_space<vmem>>, vector<1x64x64xf32>
    %116 = vector.shape_cast %115 : vector<1x64x64xf32> to vector<64x64xf32>
    %cst_84 = arith.constant dense<0.000000e+00> : vector<16x64xf32>
    %117 = tpu.matmul %102, %116, %cst_84 {dimension_numbers = #tpu.dot_dimension_numbers<[1], [0], [0], [1], [0, 0, 1, 1], [], []>} : vector<16x64xf32>, vector<64x64xf32>, vector<16x64xf32> -> vector<16x64xf32>
    %c6_85 = arith.constant 6 : index
    %c0_86 = arith.constant 0 : index
    %c0_87 = arith.constant 0 : index
    %118 = vector.load %arg3[%c6_85, %c0_86, %c0_87] : memref<9x64x64xf32, #tpu.memory_space<vmem>>, vector<1x64x64xf32>
    %119 = vector.shape_cast %118 : vector<1x64x64xf32> to vector<64x64xf32>
    %cst_88 = arith.constant dense<0.000000e+00> : vector<16x64xf32>
    %120 = tpu.matmul %102, %119, %cst_88 {dimension_numbers = #tpu.dot_dimension_numbers<[1], [0], [0], [1], [0, 0, 1, 1], [], []>} : vector<16x64xf32>, vector<64x64xf32>, vector<16x64xf32> -> vector<16x64xf32>
    %c7_89 = arith.constant 7 : index
    %c0_90 = arith.constant 0 : index
    %c0_91 = arith.constant 0 : index
    %121 = vector.load %arg3[%c7_89, %c0_90, %c0_91] : memref<9x64x64xf32, #tpu.memory_space<vmem>>, vector<1x64x64xf32>
    %122 = vector.shape_cast %121 : vector<1x64x64xf32> to vector<64x64xf32>
    %cst_92 = arith.constant dense<0.000000e+00> : vector<16x64xf32>
    %123 = tpu.matmul %102, %122, %cst_92 {dimension_numbers = #tpu.dot_dimension_numbers<[1], [0], [0], [1], [0, 0, 1, 1], [], []>} : vector<16x64xf32>, vector<64x64xf32>, vector<16x64xf32> -> vector<16x64xf32>
    %c8_93 = arith.constant 8 : index
    %c0_94 = arith.constant 0 : index
    %c0_95 = arith.constant 0 : index
    %124 = vector.load %arg3[%c8_93, %c0_94, %c0_95] : memref<9x64x64xf32, #tpu.memory_space<vmem>>, vector<1x64x64xf32>
    %125 = vector.shape_cast %124 : vector<1x64x64xf32> to vector<64x64xf32>
    %cst_96 = arith.constant dense<0.000000e+00> : vector<16x64xf32>
    %126 = tpu.matmul %102, %125, %cst_96 {dimension_numbers = #tpu.dot_dimension_numbers<[1], [0], [0], [1], [0, 0, 1, 1], [], []>} : vector<16x64xf32>, vector<64x64xf32>, vector<16x64xf32> -> vector<16x64xf32>
    %127 = tpu.concatenate %105, %108, %111, %114, %102, %117, %120, %123, %126 in 0 : vector<16x64xf32>, vector<16x64xf32>, vector<16x64xf32>, vector<16x64xf32>, vector<16x64xf32>, vector<16x64xf32>, vector<16x64xf32>, vector<16x64xf32>, vector<16x64xf32> -> vector<144x64xf32>
    %128 = arith.truncf %127 : vector<144x64xf32> to vector<144x64xbf16>
    %c0_97 = arith.constant 0 : index
    %c0_98 = arith.constant 0 : index
    %129 = vector.load %arg13[%c0_97, %c0_98] : memref<32x144xbf16, #tpu.memory_space<vmem>>, vector<32x144xbf16>
    %cst_99 = arith.constant dense<0.000000e+00> : vector<32x64xf32>
    %130 = tpu.matmul %129, %128, %cst_99 {dimension_numbers = #tpu.dot_dimension_numbers<[1], [0], [0], [1], [0, 0, 1, 1], [], []>} : vector<32x144xbf16>, vector<144x64xbf16>, vector<32x64xf32> -> vector<32x64xf32>
    %c0_100 = arith.constant 0 : index
    %c0_101 = arith.constant 0 : index
    %131 = vector.load %arg14[%c0_100, %c0_101] : memref<32x1xf32, #tpu.memory_space<vmem>>, vector<32x1xf32>
    %132 = vector.broadcast %131 : vector<32x1xf32> to vector<32x64xf32>
    %133 = arith.addf %130, %132 : vector<32x64xf32>
    %cst_102 = arith.constant 0.000000e+00 : f32
    %134 = vector.broadcast %cst_102 : f32 to vector<32x64xf32>
    %135 = arith.maximumf %133, %134 : vector<32x64xf32>
    %c0_103 = arith.constant 0 : index
    %c0_104 = arith.constant 0 : index
    %c0_105 = arith.constant 0 : index
    %136 = vector.load %arg3[%c0_103, %c0_104, %c0_105] : memref<9x64x64xf32, #tpu.memory_space<vmem>>, vector<1x64x64xf32>
    %137 = vector.shape_cast %136 : vector<1x64x64xf32> to vector<64x64xf32>
    %cst_106 = arith.constant dense<0.000000e+00> : vector<32x64xf32>
    %138 = tpu.matmul %135, %137, %cst_106 {dimension_numbers = #tpu.dot_dimension_numbers<[1], [0], [0], [1], [0, 0, 1, 1], [], []>} : vector<32x64xf32>, vector<64x64xf32>, vector<32x64xf32> -> vector<32x64xf32>
    %c1_107 = arith.constant 1 : index
    %c0_108 = arith.constant 0 : index
    %c0_109 = arith.constant 0 : index
    %139 = vector.load %arg3[%c1_107, %c0_108, %c0_109] : memref<9x64x64xf32, #tpu.memory_space<vmem>>, vector<1x64x64xf32>
    %140 = vector.shape_cast %139 : vector<1x64x64xf32> to vector<64x64xf32>
    %cst_110 = arith.constant dense<0.000000e+00> : vector<32x64xf32>
    %141 = tpu.matmul %135, %140, %cst_110 {dimension_numbers = #tpu.dot_dimension_numbers<[1], [0], [0], [1], [0, 0, 1, 1], [], []>} : vector<32x64xf32>, vector<64x64xf32>, vector<32x64xf32> -> vector<32x64xf32>
    %c2_111 = arith.constant 2 : index
    %c0_112 = arith.constant 0 : index
    %c0_113 = arith.constant 0 : index
    %142 = vector.load %arg3[%c2_111, %c0_112, %c0_113] : memref<9x64x64xf32, #tpu.memory_space<vmem>>, vector<1x64x64xf32>
    %143 = vector.shape_cast %142 : vector<1x64x64xf32> to vector<64x64xf32>
    %cst_114 = arith.constant dense<0.000000e+00> : vector<32x64xf32>
    %144 = tpu.matmul %135, %143, %cst_114 {dimension_numbers = #tpu.dot_dimension_numbers<[1], [0], [0], [1], [0, 0, 1, 1], [], []>} : vector<32x64xf32>, vector<64x64xf32>, vector<32x64xf32> -> vector<32x64xf32>
    %c3_115 = arith.constant 3 : index
    %c0_116 = arith.constant 0 : index
    %c0_117 = arith.constant 0 : index
    %145 = vector.load %arg3[%c3_115, %c0_116, %c0_117] : memref<9x64x64xf32, #tpu.memory_space<vmem>>, vector<1x64x64xf32>
    %146 = vector.shape_cast %145 : vector<1x64x64xf32> to vector<64x64xf32>
    %cst_118 = arith.constant dense<0.000000e+00> : vector<32x64xf32>
    %147 = tpu.matmul %135, %146, %cst_118 {dimension_numbers = #tpu.dot_dimension_numbers<[1], [0], [0], [1], [0, 0, 1, 1], [], []>} : vector<32x64xf32>, vector<64x64xf32>, vector<32x64xf32> -> vector<32x64xf32>
    %c5_119 = arith.constant 5 : index
    %c0_120 = arith.constant 0 : index
    %c0_121 = arith.constant 0 : index
    %148 = vector.load %arg3[%c5_119, %c0_120, %c0_121] : memref<9x64x64xf32, #tpu.memory_space<vmem>>, vector<1x64x64xf32>
    %149 = vector.shape_cast %148 : vector<1x64x64xf32> to vector<64x64xf32>
    %cst_122 = arith.constant dense<0.000000e+00> : vector<32x64xf32>
    %150 = tpu.matmul %135, %149, %cst_122 {dimension_numbers = #tpu.dot_dimension_numbers<[1], [0], [0], [1], [0, 0, 1, 1], [], []>} : vector<32x64xf32>, vector<64x64xf32>, vector<32x64xf32> -> vector<32x64xf32>
    %c6_123 = arith.constant 6 : index
    %c0_124 = arith.constant 0 : index
    %c0_125 = arith.constant 0 : index
    %151 = vector.load %arg3[%c6_123, %c0_124, %c0_125] : memref<9x64x64xf32, #tpu.memory_space<vmem>>, vector<1x64x64xf32>
    %152 = vector.shape_cast %151 : vector<1x64x64xf32> to vector<64x64xf32>
    %cst_126 = arith.constant dense<0.000000e+00> : vector<32x64xf32>
    %153 = tpu.matmul %135, %152, %cst_126 {dimension_numbers = #tpu.dot_dimension_numbers<[1], [0], [0], [1], [0, 0, 1, 1], [], []>} : vector<32x64xf32>, vector<64x64xf32>, vector<32x64xf32> -> vector<32x64xf32>
    %c7_127 = arith.constant 7 : index
    %c0_128 = arith.constant 0 : index
    %c0_129 = arith.constant 0 : index
    %154 = vector.load %arg3[%c7_127, %c0_128, %c0_129] : memref<9x64x64xf32, #tpu.memory_space<vmem>>, vector<1x64x64xf32>
    %155 = vector.shape_cast %154 : vector<1x64x64xf32> to vector<64x64xf32>
    %cst_130 = arith.constant dense<0.000000e+00> : vector<32x64xf32>
    %156 = tpu.matmul %135, %155, %cst_130 {dimension_numbers = #tpu.dot_dimension_numbers<[1], [0], [0], [1], [0, 0, 1, 1], [], []>} : vector<32x64xf32>, vector<64x64xf32>, vector<32x64xf32> -> vector<32x64xf32>
    %c8_131 = arith.constant 8 : index
    %c0_132 = arith.constant 0 : index
    %c0_133 = arith.constant 0 : index
    %157 = vector.load %arg3[%c8_131, %c0_132, %c0_133] : memref<9x64x64xf32, #tpu.memory_space<vmem>>, vector<1x64x64xf32>
    %158 = vector.shape_cast %157 : vector<1x64x64xf32> to vector<64x64xf32>
    %cst_134 = arith.constant dense<0.000000e+00> : vector<32x64xf32>
    %159 = tpu.matmul %135, %158, %cst_134 {dimension_numbers = #tpu.dot_dimension_numbers<[1], [0], [0], [1], [0, 0, 1, 1], [], []>} : vector<32x64xf32>, vector<64x64xf32>, vector<32x64xf32> -> vector<32x64xf32>
    %160 = tpu.concatenate %138, %141, %144, %147, %135, %150, %153, %156, %159 in 0 : vector<32x64xf32>, vector<32x64xf32>, vector<32x64xf32>, vector<32x64xf32>, vector<32x64xf32>, vector<32x64xf32>, vector<32x64xf32>, vector<32x64xf32>, vector<32x64xf32> -> vector<288x64xf32>
    %161 = arith.truncf %160 : vector<288x64xf32> to vector<288x64xbf16>
    %c0_135 = arith.constant 0 : index
    %c0_136 = arith.constant 0 : index
    %162 = vector.load %arg15[%c0_135, %c0_136] : memref<32x288xbf16, #tpu.memory_space<vmem>>, vector<32x288xbf16>
    %cst_137 = arith.constant dense<0.000000e+00> : vector<32x64xf32>
    %163 = tpu.matmul %162, %161, %cst_137 {dimension_numbers = #tpu.dot_dimension_numbers<[1], [0], [0], [1], [0, 0, 1, 1], [], []>} : vector<32x288xbf16>, vector<288x64xbf16>, vector<32x64xf32> -> vector<32x64xf32>
    %c0_138 = arith.constant 0 : index
    %c0_139 = arith.constant 0 : index
    %164 = vector.load %arg16[%c0_138, %c0_139] : memref<32x1xf32, #tpu.memory_space<vmem>>, vector<32x1xf32>
    %165 = vector.broadcast %164 : vector<32x1xf32> to vector<32x64xf32>
    %166 = arith.addf %163, %165 : vector<32x64xf32>
    %cst_140 = arith.constant 0.000000e+00 : f32
    %167 = vector.broadcast %cst_140 : f32 to vector<32x64xf32>
    %168 = arith.maximumf %166, %167 : vector<32x64xf32>
    %169 = arith.truncf %168 : vector<32x64xf32> to vector<32x64xbf16>
    %c0_141 = arith.constant 0 : index
    %c0_142 = arith.constant 0 : index
    %170 = vector.load %arg6[%c0_141, %c0_142] : memref<64x16xbf16, #tpu.memory_space<vmem>>, vector<64x16xbf16>
    %cst_143 = arith.constant dense<0.000000e+00> : vector<32x16xf32>
    %171 = tpu.matmul %169, %170, %cst_143 {dimension_numbers = #tpu.dot_dimension_numbers<[1], [0], [0], [1], [0, 0, 1, 1], [], []>} : vector<32x64xbf16>, vector<64x16xbf16>, vector<32x16xf32> -> vector<32x16xf32>
    %c0_144 = arith.constant 0 : index
    %c0_145 = arith.constant 0 : index
    %c0_146 = arith.constant 0 : index
    %172 = vector.load %arg4[%c0_144, %c0_145, %c0_146] : memref<9x16x16xf32, #tpu.memory_space<vmem>>, vector<1x16x16xf32>
    %173 = vector.shape_cast %172 : vector<1x16x16xf32> to vector<16x16xf32>
    %cst_147 = arith.constant dense<0.000000e+00> : vector<32x16xf32>
    %174 = tpu.matmul %171, %173, %cst_147 {dimension_numbers = #tpu.dot_dimension_numbers<[1], [0], [0], [1], [0, 0, 1, 1], [], []>} : vector<32x16xf32>, vector<16x16xf32>, vector<32x16xf32> -> vector<32x16xf32>
    %c1_148 = arith.constant 1 : index
    %c0_149 = arith.constant 0 : index
    %c0_150 = arith.constant 0 : index
    %175 = vector.load %arg4[%c1_148, %c0_149, %c0_150] : memref<9x16x16xf32, #tpu.memory_space<vmem>>, vector<1x16x16xf32>
    %176 = vector.shape_cast %175 : vector<1x16x16xf32> to vector<16x16xf32>
    %cst_151 = arith.constant dense<0.000000e+00> : vector<32x16xf32>
    %177 = tpu.matmul %171, %176, %cst_151 {dimension_numbers = #tpu.dot_dimension_numbers<[1], [0], [0], [1], [0, 0, 1, 1], [], []>} : vector<32x16xf32>, vector<16x16xf32>, vector<32x16xf32> -> vector<32x16xf32>
    %c2_152 = arith.constant 2 : index
    %c0_153 = arith.constant 0 : index
    %c0_154 = arith.constant 0 : index
    %178 = vector.load %arg4[%c2_152, %c0_153, %c0_154] : memref<9x16x16xf32, #tpu.memory_space<vmem>>, vector<1x16x16xf32>
    %179 = vector.shape_cast %178 : vector<1x16x16xf32> to vector<16x16xf32>
    %cst_155 = arith.constant dense<0.000000e+00> : vector<32x16xf32>
    %180 = tpu.matmul %171, %179, %cst_155 {dimension_numbers = #tpu.dot_dimension_numbers<[1], [0], [0], [1], [0, 0, 1, 1], [], []>} : vector<32x16xf32>, vector<16x16xf32>, vector<32x16xf32> -> vector<32x16xf32>
    %c3_156 = arith.constant 3 : index
    %c0_157 = arith.constant 0 : index
    %c0_158 = arith.constant 0 : index
    %181 = vector.load %arg4[%c3_156, %c0_157, %c0_158] : memref<9x16x16xf32, #tpu.memory_space<vmem>>, vector<1x16x16xf32>
    %182 = vector.shape_cast %181 : vector<1x16x16xf32> to vector<16x16xf32>
    %cst_159 = arith.constant dense<0.000000e+00> : vector<32x16xf32>
    %183 = tpu.matmul %171, %182, %cst_159 {dimension_numbers = #tpu.dot_dimension_numbers<[1], [0], [0], [1], [0, 0, 1, 1], [], []>} : vector<32x16xf32>, vector<16x16xf32>, vector<32x16xf32> -> vector<32x16xf32>
    %c5_160 = arith.constant 5 : index
    %c0_161 = arith.constant 0 : index
    %c0_162 = arith.constant 0 : index
    %184 = vector.load %arg4[%c5_160, %c0_161, %c0_162] : memref<9x16x16xf32, #tpu.memory_space<vmem>>, vector<1x16x16xf32>
    %185 = vector.shape_cast %184 : vector<1x16x16xf32> to vector<16x16xf32>
    %cst_163 = arith.constant dense<0.000000e+00> : vector<32x16xf32>
    %186 = tpu.matmul %171, %185, %cst_163 {dimension_numbers = #tpu.dot_dimension_numbers<[1], [0], [0], [1], [0, 0, 1, 1], [], []>} : vector<32x16xf32>, vector<16x16xf32>, vector<32x16xf32> -> vector<32x16xf32>
    %c6_164 = arith.constant 6 : index
    %c0_165 = arith.constant 0 : index
    %c0_166 = arith.constant 0 : index
    %187 = vector.load %arg4[%c6_164, %c0_165, %c0_166] : memref<9x16x16xf32, #tpu.memory_space<vmem>>, vector<1x16x16xf32>
    %188 = vector.shape_cast %187 : vector<1x16x16xf32> to vector<16x16xf32>
    %cst_167 = arith.constant dense<0.000000e+00> : vector<32x16xf32>
    %189 = tpu.matmul %171, %188, %cst_167 {dimension_numbers = #tpu.dot_dimension_numbers<[1], [0], [0], [1], [0, 0, 1, 1], [], []>} : vector<32x16xf32>, vector<16x16xf32>, vector<32x16xf32> -> vector<32x16xf32>
    %c7_168 = arith.constant 7 : index
    %c0_169 = arith.constant 0 : index
    %c0_170 = arith.constant 0 : index
    %190 = vector.load %arg4[%c7_168, %c0_169, %c0_170] : memref<9x16x16xf32, #tpu.memory_space<vmem>>, vector<1x16x16xf32>
    %191 = vector.shape_cast %190 : vector<1x16x16xf32> to vector<16x16xf32>
    %cst_171 = arith.constant dense<0.000000e+00> : vector<32x16xf32>
    %192 = tpu.matmul %171, %191, %cst_171 {dimension_numbers = #tpu.dot_dimension_numbers<[1], [0], [0], [1], [0, 0, 1, 1], [], []>} : vector<32x16xf32>, vector<16x16xf32>, vector<32x16xf32> -> vector<32x16xf32>
    %c8_172 = arith.constant 8 : index
    %c0_173 = arith.constant 0 : index
    %c0_174 = arith.constant 0 : index
    %193 = vector.load %arg4[%c8_172, %c0_173, %c0_174] : memref<9x16x16xf32, #tpu.memory_space<vmem>>, vector<1x16x16xf32>
    %194 = vector.shape_cast %193 : vector<1x16x16xf32> to vector<16x16xf32>
    %cst_175 = arith.constant dense<0.000000e+00> : vector<32x16xf32>
    %195 = tpu.matmul %171, %194, %cst_175 {dimension_numbers = #tpu.dot_dimension_numbers<[1], [0], [0], [1], [0, 0, 1, 1], [], []>} : vector<32x16xf32>, vector<16x16xf32>, vector<32x16xf32> -> vector<32x16xf32>
    %196 = tpu.concatenate %174, %177, %180, %183, %171, %186, %189, %192, %195 in 0 : vector<32x16xf32>, vector<32x16xf32>, vector<32x16xf32>, vector<32x16xf32>, vector<32x16xf32>, vector<32x16xf32>, vector<32x16xf32>, vector<32x16xf32>, vector<32x16xf32> -> vector<288x16xf32>
    %197 = arith.truncf %196 : vector<288x16xf32> to vector<288x16xbf16>
    %c0_176 = arith.constant 0 : index
    %c0_177 = arith.constant 0 : index
    %198 = vector.load %arg17[%c0_176, %c0_177] : memref<64x288xbf16, #tpu.memory_space<vmem>>, vector<64x288xbf16>
    %cst_178 = arith.constant dense<0.000000e+00> : vector<64x16xf32>
    %199 = tpu.matmul %198, %197, %cst_178 {dimension_numbers = #tpu.dot_dimension_numbers<[1], [0], [0], [1], [0, 0, 1, 1], [], []>} : vector<64x288xbf16>, vector<288x16xbf16>, vector<64x16xf32> -> vector<64x16xf32>
    %c0_179 = arith.constant 0 : index
    %c0_180 = arith.constant 0 : index
    %200 = vector.load %arg18[%c0_179, %c0_180] : memref<64x1xf32, #tpu.memory_space<vmem>>, vector<64x1xf32>
    %201 = vector.broadcast %200 : vector<64x1xf32> to vector<64x16xf32>
    %202 = arith.addf %199, %201 : vector<64x16xf32>
    %cst_181 = arith.constant 0.000000e+00 : f32
    %203 = vector.broadcast %cst_181 : f32 to vector<64x16xf32>
    %204 = arith.maximumf %202, %203 : vector<64x16xf32>
    %c0_182 = arith.constant 0 : index
    %c0_183 = arith.constant 0 : index
    %c0_184 = arith.constant 0 : index
    %205 = vector.load %arg4[%c0_182, %c0_183, %c0_184] : memref<9x16x16xf32, #tpu.memory_space<vmem>>, vector<1x16x16xf32>
    %206 = vector.shape_cast %205 : vector<1x16x16xf32> to vector<16x16xf32>
    %cst_185 = arith.constant dense<0.000000e+00> : vector<64x16xf32>
    %207 = tpu.matmul %204, %206, %cst_185 {dimension_numbers = #tpu.dot_dimension_numbers<[1], [0], [0], [1], [0, 0, 1, 1], [], []>} : vector<64x16xf32>, vector<16x16xf32>, vector<64x16xf32> -> vector<64x16xf32>
    %c1_186 = arith.constant 1 : index
    %c0_187 = arith.constant 0 : index
    %c0_188 = arith.constant 0 : index
    %208 = vector.load %arg4[%c1_186, %c0_187, %c0_188] : memref<9x16x16xf32, #tpu.memory_space<vmem>>, vector<1x16x16xf32>
    %209 = vector.shape_cast %208 : vector<1x16x16xf32> to vector<16x16xf32>
    %cst_189 = arith.constant dense<0.000000e+00> : vector<64x16xf32>
    %210 = tpu.matmul %204, %209, %cst_189 {dimension_numbers = #tpu.dot_dimension_numbers<[1], [0], [0], [1], [0, 0, 1, 1], [], []>} : vector<64x16xf32>, vector<16x16xf32>, vector<64x16xf32> -> vector<64x16xf32>
    %c2_190 = arith.constant 2 : index
    %c0_191 = arith.constant 0 : index
    %c0_192 = arith.constant 0 : index
    %211 = vector.load %arg4[%c2_190, %c0_191, %c0_192] : memref<9x16x16xf32, #tpu.memory_space<vmem>>, vector<1x16x16xf32>
    %212 = vector.shape_cast %211 : vector<1x16x16xf32> to vector<16x16xf32>
    %cst_193 = arith.constant dense<0.000000e+00> : vector<64x16xf32>
    %213 = tpu.matmul %204, %212, %cst_193 {dimension_numbers = #tpu.dot_dimension_numbers<[1], [0], [0], [1], [0, 0, 1, 1], [], []>} : vector<64x16xf32>, vector<16x16xf32>, vector<64x16xf32> -> vector<64x16xf32>
    %c3_194 = arith.constant 3 : index
    %c0_195 = arith.constant 0 : index
    %c0_196 = arith.constant 0 : index
    %214 = vector.load %arg4[%c3_194, %c0_195, %c0_196] : memref<9x16x16xf32, #tpu.memory_space<vmem>>, vector<1x16x16xf32>
    %215 = vector.shape_cast %214 : vector<1x16x16xf32> to vector<16x16xf32>
    %cst_197 = arith.constant dense<0.000000e+00> : vector<64x16xf32>
    %216 = tpu.matmul %204, %215, %cst_197 {dimension_numbers = #tpu.dot_dimension_numbers<[1], [0], [0], [1], [0, 0, 1, 1], [], []>} : vector<64x16xf32>, vector<16x16xf32>, vector<64x16xf32> -> vector<64x16xf32>
    %c5_198 = arith.constant 5 : index
    %c0_199 = arith.constant 0 : index
    %c0_200 = arith.constant 0 : index
    %217 = vector.load %arg4[%c5_198, %c0_199, %c0_200] : memref<9x16x16xf32, #tpu.memory_space<vmem>>, vector<1x16x16xf32>
    %218 = vector.shape_cast %217 : vector<1x16x16xf32> to vector<16x16xf32>
    %cst_201 = arith.constant dense<0.000000e+00> : vector<64x16xf32>
    %219 = tpu.matmul %204, %218, %cst_201 {dimension_numbers = #tpu.dot_dimension_numbers<[1], [0], [0], [1], [0, 0, 1, 1], [], []>} : vector<64x16xf32>, vector<16x16xf32>, vector<64x16xf32> -> vector<64x16xf32>
    %c6_202 = arith.constant 6 : index
    %c0_203 = arith.constant 0 : index
    %c0_204 = arith.constant 0 : index
    %220 = vector.load %arg4[%c6_202, %c0_203, %c0_204] : memref<9x16x16xf32, #tpu.memory_space<vmem>>, vector<1x16x16xf32>
    %221 = vector.shape_cast %220 : vector<1x16x16xf32> to vector<16x16xf32>
    %cst_205 = arith.constant dense<0.000000e+00> : vector<64x16xf32>
    %222 = tpu.matmul %204, %221, %cst_205 {dimension_numbers = #tpu.dot_dimension_numbers<[1], [0], [0], [1], [0, 0, 1, 1], [], []>} : vector<64x16xf32>, vector<16x16xf32>, vector<64x16xf32> -> vector<64x16xf32>
    %c7_206 = arith.constant 7 : index
    %c0_207 = arith.constant 0 : index
    %c0_208 = arith.constant 0 : index
    %223 = vector.load %arg4[%c7_206, %c0_207, %c0_208] : memref<9x16x16xf32, #tpu.memory_space<vmem>>, vector<1x16x16xf32>
    %224 = vector.shape_cast %223 : vector<1x16x16xf32> to vector<16x16xf32>
    %cst_209 = arith.constant dense<0.000000e+00> : vector<64x16xf32>
    %225 = tpu.matmul %204, %224, %cst_209 {dimension_numbers = #tpu.dot_dimension_numbers<[1], [0], [0], [1], [0, 0, 1, 1], [], []>} : vector<64x16xf32>, vector<16x16xf32>, vector<64x16xf32> -> vector<64x16xf32>
    %c8_210 = arith.constant 8 : index
    %c0_211 = arith.constant 0 : index
    %c0_212 = arith.constant 0 : index
    %226 = vector.load %arg4[%c8_210, %c0_211, %c0_212] : memref<9x16x16xf32, #tpu.memory_space<vmem>>, vector<1x16x16xf32>
    %227 = vector.shape_cast %226 : vector<1x16x16xf32> to vector<16x16xf32>
    %cst_213 = arith.constant dense<0.000000e+00> : vector<64x16xf32>
    %228 = tpu.matmul %204, %227, %cst_213 {dimension_numbers = #tpu.dot_dimension_numbers<[1], [0], [0], [1], [0, 0, 1, 1], [], []>} : vector<64x16xf32>, vector<16x16xf32>, vector<64x16xf32> -> vector<64x16xf32>
    %229 = tpu.concatenate %207, %210, %213, %216, %204, %219, %222, %225, %228 in 0 : vector<64x16xf32>, vector<64x16xf32>, vector<64x16xf32>, vector<64x16xf32>, vector<64x16xf32>, vector<64x16xf32>, vector<64x16xf32>, vector<64x16xf32>, vector<64x16xf32> -> vector<576x16xf32>
    %230 = arith.truncf %229 : vector<576x16xf32> to vector<576x16xbf16>
    %c0_214 = arith.constant 0 : index
    %c0_215 = arith.constant 0 : index
    %231 = vector.load %arg19[%c0_214, %c0_215] : memref<64x576xbf16, #tpu.memory_space<vmem>>, vector<64x576xbf16>
    %cst_216 = arith.constant dense<0.000000e+00> : vector<64x16xf32>
    %232 = tpu.matmul %231, %230, %cst_216 {dimension_numbers = #tpu.dot_dimension_numbers<[1], [0], [0], [1], [0, 0, 1, 1], [], []>} : vector<64x576xbf16>, vector<576x16xbf16>, vector<64x16xf32> -> vector<64x16xf32>
    %c0_217 = arith.constant 0 : index
    %c0_218 = arith.constant 0 : index
    %233 = vector.load %arg20[%c0_217, %c0_218] : memref<64x1xf32, #tpu.memory_space<vmem>>, vector<64x1xf32>
    %234 = vector.broadcast %233 : vector<64x1xf32> to vector<64x16xf32>
    %235 = arith.addf %232, %234 : vector<64x16xf32>
    %cst_219 = arith.constant 0.000000e+00 : f32
    %236 = vector.broadcast %cst_219 : f32 to vector<64x16xf32>
    %237 = arith.maximumf %235, %236 : vector<64x16xf32>
    %c0_220 = arith.constant 0 : index
    %c0_221 = arith.constant 0 : index
    %238 = vector.load %arg21[%c0_220, %c0_221] : memref<128x64xbf16, #tpu.memory_space<vmem>>, vector<128x64xbf16>
    %239 = arith.truncf %237 : vector<64x16xf32> to vector<64x16xbf16>
    %cst_222 = arith.constant dense<0.000000e+00> : vector<128x16xf32>
    %240 = tpu.matmul %238, %239, %cst_222 {dimension_numbers = #tpu.dot_dimension_numbers<[1], [0], [0], [1], [0, 0, 1, 1], [], []>} : vector<128x64xbf16>, vector<64x16xbf16>, vector<128x16xf32> -> vector<128x16xf32>
    %241 = vector.extract_strided_slice %240 {offsets = [0, 0], sizes = [32, 16], strides = [1, 1]} : vector<128x16xf32> to vector<32x16xf32>
    %242 = arith.truncf %241 : vector<32x16xf32> to vector<32x16xbf16>
    %c0_223 = arith.constant 0 : index
    %c0_224 = arith.constant 0 : index
    %c0_225 = arith.constant 0 : index
    %243 = vector.load %arg7[%c0_223, %c0_224, %c0_225] : memref<4x16x64xbf16, #tpu.memory_space<vmem>>, vector<1x16x64xbf16>
    %244 = vector.shape_cast %243 : vector<1x16x64xbf16> to vector<16x64xbf16>
    %cst_226 = arith.constant dense<0.000000e+00> : vector<32x64xf32>
    %245 = tpu.matmul %242, %244, %cst_226 {dimension_numbers = #tpu.dot_dimension_numbers<[1], [0], [0], [1], [0, 0, 1, 1], [], []>} : vector<32x16xbf16>, vector<16x64xbf16>, vector<32x64xf32> -> vector<32x64xf32>
    %246 = vector.extract_strided_slice %240 {offsets = [32, 0], sizes = [32, 16], strides = [1, 1]} : vector<128x16xf32> to vector<32x16xf32>
    %247 = arith.truncf %246 : vector<32x16xf32> to vector<32x16xbf16>
    %c1_227 = arith.constant 1 : index
    %c0_228 = arith.constant 0 : index
    %c0_229 = arith.constant 0 : index
    %248 = vector.load %arg7[%c1_227, %c0_228, %c0_229] : memref<4x16x64xbf16, #tpu.memory_space<vmem>>, vector<1x16x64xbf16>
    %249 = vector.shape_cast %248 : vector<1x16x64xbf16> to vector<16x64xbf16>
    %cst_230 = arith.constant dense<0.000000e+00> : vector<32x64xf32>
    %250 = tpu.matmul %247, %249, %cst_230 {dimension_numbers = #tpu.dot_dimension_numbers<[1], [0], [0], [1], [0, 0, 1, 1], [], []>} : vector<32x16xbf16>, vector<16x64xbf16>, vector<32x64xf32> -> vector<32x64xf32>
    %251 = arith.addf %245, %250 : vector<32x64xf32>
    %252 = vector.extract_strided_slice %240 {offsets = [64, 0], sizes = [32, 16], strides = [1, 1]} : vector<128x16xf32> to vector<32x16xf32>
    %253 = arith.truncf %252 : vector<32x16xf32> to vector<32x16xbf16>
    %c2_231 = arith.constant 2 : index
    %c0_232 = arith.constant 0 : index
    %c0_233 = arith.constant 0 : index
    %254 = vector.load %arg7[%c2_231, %c0_232, %c0_233] : memref<4x16x64xbf16, #tpu.memory_space<vmem>>, vector<1x16x64xbf16>
    %255 = vector.shape_cast %254 : vector<1x16x64xbf16> to vector<16x64xbf16>
    %cst_234 = arith.constant dense<0.000000e+00> : vector<32x64xf32>
    %256 = tpu.matmul %253, %255, %cst_234 {dimension_numbers = #tpu.dot_dimension_numbers<[1], [0], [0], [1], [0, 0, 1, 1], [], []>} : vector<32x16xbf16>, vector<16x64xbf16>, vector<32x64xf32> -> vector<32x64xf32>
    %257 = arith.addf %251, %256 : vector<32x64xf32>
    %258 = vector.extract_strided_slice %240 {offsets = [96, 0], sizes = [32, 16], strides = [1, 1]} : vector<128x16xf32> to vector<32x16xf32>
    %259 = arith.truncf %258 : vector<32x16xf32> to vector<32x16xbf16>
    %c3_235 = arith.constant 3 : index
    %c0_236 = arith.constant 0 : index
    %c0_237 = arith.constant 0 : index
    %260 = vector.load %arg7[%c3_235, %c0_236, %c0_237] : memref<4x16x64xbf16, #tpu.memory_space<vmem>>, vector<1x16x64xbf16>
    %261 = vector.shape_cast %260 : vector<1x16x64xbf16> to vector<16x64xbf16>
    %cst_238 = arith.constant dense<0.000000e+00> : vector<32x64xf32>
    %262 = tpu.matmul %259, %261, %cst_238 {dimension_numbers = #tpu.dot_dimension_numbers<[1], [0], [0], [1], [0, 0, 1, 1], [], []>} : vector<32x16xbf16>, vector<16x64xbf16>, vector<32x64xf32> -> vector<32x64xf32>
    %263 = arith.addf %257, %262 : vector<32x64xf32>
    %c0_239 = arith.constant 0 : index
    %c0_240 = arith.constant 0 : index
    %264 = vector.load %arg22[%c0_239, %c0_240] : memref<32x1xf32, #tpu.memory_space<vmem>>, vector<32x1xf32>
    %265 = vector.broadcast %264 : vector<32x1xf32> to vector<32x64xf32>
    %266 = arith.addf %263, %265 : vector<32x64xf32>
    %c0_241 = arith.constant 0 : index
    %c0_242 = arith.constant 0 : index
    %c0_243 = arith.constant 0 : index
    %267 = vector.load %arg3[%c0_241, %c0_242, %c0_243] : memref<9x64x64xf32, #tpu.memory_space<vmem>>, vector<1x64x64xf32>
    %268 = vector.shape_cast %267 : vector<1x64x64xf32> to vector<64x64xf32>
    %cst_244 = arith.constant dense<0.000000e+00> : vector<32x64xf32>
    %269 = tpu.matmul %266, %268, %cst_244 {dimension_numbers = #tpu.dot_dimension_numbers<[1], [0], [0], [1], [0, 0, 1, 1], [], []>} : vector<32x64xf32>, vector<64x64xf32>, vector<32x64xf32> -> vector<32x64xf32>
    %c1_245 = arith.constant 1 : index
    %c0_246 = arith.constant 0 : index
    %c0_247 = arith.constant 0 : index
    %270 = vector.load %arg3[%c1_245, %c0_246, %c0_247] : memref<9x64x64xf32, #tpu.memory_space<vmem>>, vector<1x64x64xf32>
    %271 = vector.shape_cast %270 : vector<1x64x64xf32> to vector<64x64xf32>
    %cst_248 = arith.constant dense<0.000000e+00> : vector<32x64xf32>
    %272 = tpu.matmul %266, %271, %cst_248 {dimension_numbers = #tpu.dot_dimension_numbers<[1], [0], [0], [1], [0, 0, 1, 1], [], []>} : vector<32x64xf32>, vector<64x64xf32>, vector<32x64xf32> -> vector<32x64xf32>
    %c2_249 = arith.constant 2 : index
    %c0_250 = arith.constant 0 : index
    %c0_251 = arith.constant 0 : index
    %273 = vector.load %arg3[%c2_249, %c0_250, %c0_251] : memref<9x64x64xf32, #tpu.memory_space<vmem>>, vector<1x64x64xf32>
    %274 = vector.shape_cast %273 : vector<1x64x64xf32> to vector<64x64xf32>
    %cst_252 = arith.constant dense<0.000000e+00> : vector<32x64xf32>
    %275 = tpu.matmul %266, %274, %cst_252 {dimension_numbers = #tpu.dot_dimension_numbers<[1], [0], [0], [1], [0, 0, 1, 1], [], []>} : vector<32x64xf32>, vector<64x64xf32>, vector<32x64xf32> -> vector<32x64xf32>
    %c3_253 = arith.constant 3 : index
    %c0_254 = arith.constant 0 : index
    %c0_255 = arith.constant 0 : index
    %276 = vector.load %arg3[%c3_253, %c0_254, %c0_255] : memref<9x64x64xf32, #tpu.memory_space<vmem>>, vector<1x64x64xf32>
    %277 = vector.shape_cast %276 : vector<1x64x64xf32> to vector<64x64xf32>
    %cst_256 = arith.constant dense<0.000000e+00> : vector<32x64xf32>
    %278 = tpu.matmul %266, %277, %cst_256 {dimension_numbers = #tpu.dot_dimension_numbers<[1], [0], [0], [1], [0, 0, 1, 1], [], []>} : vector<32x64xf32>, vector<64x64xf32>, vector<32x64xf32> -> vector<32x64xf32>
    %c5_257 = arith.constant 5 : index
    %c0_258 = arith.constant 0 : index
    %c0_259 = arith.constant 0 : index
    %279 = vector.load %arg3[%c5_257, %c0_258, %c0_259] : memref<9x64x64xf32, #tpu.memory_space<vmem>>, vector<1x64x64xf32>
    %280 = vector.shape_cast %279 : vector<1x64x64xf32> to vector<64x64xf32>
    %cst_260 = arith.constant dense<0.000000e+00> : vector<32x64xf32>
    %281 = tpu.matmul %266, %280, %cst_260 {dimension_numbers = #tpu.dot_dimension_numbers<[1], [0], [0], [1], [0, 0, 1, 1], [], []>} : vector<32x64xf32>, vector<64x64xf32>, vector<32x64xf32> -> vector<32x64xf32>
    %c6_261 = arith.constant 6 : index
    %c0_262 = arith.constant 0 : index
    %c0_263 = arith.constant 0 : index
    %282 = vector.load %arg3[%c6_261, %c0_262, %c0_263] : memref<9x64x64xf32, #tpu.memory_space<vmem>>, vector<1x64x64xf32>
    %283 = vector.shape_cast %282 : vector<1x64x64xf32> to vector<64x64xf32>
    %cst_264 = arith.constant dense<0.000000e+00> : vector<32x64xf32>
    %284 = tpu.matmul %266, %283, %cst_264 {dimension_numbers = #tpu.dot_dimension_numbers<[1], [0], [0], [1], [0, 0, 1, 1], [], []>} : vector<32x64xf32>, vector<64x64xf32>, vector<32x64xf32> -> vector<32x64xf32>
    %c7_265 = arith.constant 7 : index
    %c0_266 = arith.constant 0 : index
    %c0_267 = arith.constant 0 : index
    %285 = vector.load %arg3[%c7_265, %c0_266, %c0_267] : memref<9x64x64xf32, #tpu.memory_space<vmem>>, vector<1x64x64xf32>
    %286 = vector.shape_cast %285 : vector<1x64x64xf32> to vector<64x64xf32>
    %cst_268 = arith.constant dense<0.000000e+00> : vector<32x64xf32>
    %287 = tpu.matmul %266, %286, %cst_268 {dimension_numbers = #tpu.dot_dimension_numbers<[1], [0], [0], [1], [0, 0, 1, 1], [], []>} : vector<32x64xf32>, vector<64x64xf32>, vector<32x64xf32> -> vector<32x64xf32>
    %c8_269 = arith.constant 8 : index
    %c0_270 = arith.constant 0 : index
    %c0_271 = arith.constant 0 : index
    %288 = vector.load %arg3[%c8_269, %c0_270, %c0_271] : memref<9x64x64xf32, #tpu.memory_space<vmem>>, vector<1x64x64xf32>
    %289 = vector.shape_cast %288 : vector<1x64x64xf32> to vector<64x64xf32>
    %cst_272 = arith.constant dense<0.000000e+00> : vector<32x64xf32>
    %290 = tpu.matmul %266, %289, %cst_272 {dimension_numbers = #tpu.dot_dimension_numbers<[1], [0], [0], [1], [0, 0, 1, 1], [], []>} : vector<32x64xf32>, vector<64x64xf32>, vector<32x64xf32> -> vector<32x64xf32>
    %291 = tpu.concatenate %269, %272, %275, %278, %266, %281, %284, %287, %290 in 0 : vector<32x64xf32>, vector<32x64xf32>, vector<32x64xf32>, vector<32x64xf32>, vector<32x64xf32>, vector<32x64xf32>, vector<32x64xf32>, vector<32x64xf32>, vector<32x64xf32> -> vector<288x64xf32>
    %292 = arith.truncf %291 : vector<288x64xf32> to vector<288x64xbf16>
    %c0_273 = arith.constant 0 : index
    %c0_274 = arith.constant 0 : index
    %293 = vector.load %arg23[%c0_273, %c0_274] : memref<32x288xbf16, #tpu.memory_space<vmem>>, vector<32x288xbf16>
    %cst_275 = arith.constant dense<0.000000e+00> : vector<32x64xf32>
    %294 = tpu.matmul %293, %292, %cst_275 {dimension_numbers = #tpu.dot_dimension_numbers<[1], [0], [0], [1], [0, 0, 1, 1], [], []>} : vector<32x288xbf16>, vector<288x64xbf16>, vector<32x64xf32> -> vector<32x64xf32>
    %c0_276 = arith.constant 0 : index
    %c0_277 = arith.constant 0 : index
    %c0_278 = arith.constant 0 : index
    %295 = vector.load %arg3[%c0_276, %c0_277, %c0_278] : memref<9x64x64xf32, #tpu.memory_space<vmem>>, vector<1x64x64xf32>
    %296 = vector.shape_cast %295 : vector<1x64x64xf32> to vector<64x64xf32>
    %cst_279 = arith.constant dense<0.000000e+00> : vector<32x64xf32>
    %297 = tpu.matmul %168, %296, %cst_279 {dimension_numbers = #tpu.dot_dimension_numbers<[1], [0], [0], [1], [0, 0, 1, 1], [], []>} : vector<32x64xf32>, vector<64x64xf32>, vector<32x64xf32> -> vector<32x64xf32>
    %c1_280 = arith.constant 1 : index
    %c0_281 = arith.constant 0 : index
    %c0_282 = arith.constant 0 : index
    %298 = vector.load %arg3[%c1_280, %c0_281, %c0_282] : memref<9x64x64xf32, #tpu.memory_space<vmem>>, vector<1x64x64xf32>
    %299 = vector.shape_cast %298 : vector<1x64x64xf32> to vector<64x64xf32>
    %cst_283 = arith.constant dense<0.000000e+00> : vector<32x64xf32>
    %300 = tpu.matmul %168, %299, %cst_283 {dimension_numbers = #tpu.dot_dimension_numbers<[1], [0], [0], [1], [0, 0, 1, 1], [], []>} : vector<32x64xf32>, vector<64x64xf32>, vector<32x64xf32> -> vector<32x64xf32>
    %c2_284 = arith.constant 2 : index
    %c0_285 = arith.constant 0 : index
    %c0_286 = arith.constant 0 : index
    %301 = vector.load %arg3[%c2_284, %c0_285, %c0_286] : memref<9x64x64xf32, #tpu.memory_space<vmem>>, vector<1x64x64xf32>
    %302 = vector.shape_cast %301 : vector<1x64x64xf32> to vector<64x64xf32>
    %cst_287 = arith.constant dense<0.000000e+00> : vector<32x64xf32>
    %303 = tpu.matmul %168, %302, %cst_287 {dimension_numbers = #tpu.dot_dimension_numbers<[1], [0], [0], [1], [0, 0, 1, 1], [], []>} : vector<32x64xf32>, vector<64x64xf32>, vector<32x64xf32> -> vector<32x64xf32>
    %c3_288 = arith.constant 3 : index
    %c0_289 = arith.constant 0 : index
    %c0_290 = arith.constant 0 : index
    %304 = vector.load %arg3[%c3_288, %c0_289, %c0_290] : memref<9x64x64xf32, #tpu.memory_space<vmem>>, vector<1x64x64xf32>
    %305 = vector.shape_cast %304 : vector<1x64x64xf32> to vector<64x64xf32>
    %cst_291 = arith.constant dense<0.000000e+00> : vector<32x64xf32>
    %306 = tpu.matmul %168, %305, %cst_291 {dimension_numbers = #tpu.dot_dimension_numbers<[1], [0], [0], [1], [0, 0, 1, 1], [], []>} : vector<32x64xf32>, vector<64x64xf32>, vector<32x64xf32> -> vector<32x64xf32>
    %c5_292 = arith.constant 5 : index
    %c0_293 = arith.constant 0 : index
    %c0_294 = arith.constant 0 : index
    %307 = vector.load %arg3[%c5_292, %c0_293, %c0_294] : memref<9x64x64xf32, #tpu.memory_space<vmem>>, vector<1x64x64xf32>
    %308 = vector.shape_cast %307 : vector<1x64x64xf32> to vector<64x64xf32>
    %cst_295 = arith.constant dense<0.000000e+00> : vector<32x64xf32>
    %309 = tpu.matmul %168, %308, %cst_295 {dimension_numbers = #tpu.dot_dimension_numbers<[1], [0], [0], [1], [0, 0, 1, 1], [], []>} : vector<32x64xf32>, vector<64x64xf32>, vector<32x64xf32> -> vector<32x64xf32>
    %c6_296 = arith.constant 6 : index
    %c0_297 = arith.constant 0 : index
    %c0_298 = arith.constant 0 : index
    %310 = vector.load %arg3[%c6_296, %c0_297, %c0_298] : memref<9x64x64xf32, #tpu.memory_space<vmem>>, vector<1x64x64xf32>
    %311 = vector.shape_cast %310 : vector<1x64x64xf32> to vector<64x64xf32>
    %cst_299 = arith.constant dense<0.000000e+00> : vector<32x64xf32>
    %312 = tpu.matmul %168, %311, %cst_299 {dimension_numbers = #tpu.dot_dimension_numbers<[1], [0], [0], [1], [0, 0, 1, 1], [], []>} : vector<32x64xf32>, vector<64x64xf32>, vector<32x64xf32> -> vector<32x64xf32>
    %c7_300 = arith.constant 7 : index
    %c0_301 = arith.constant 0 : index
    %c0_302 = arith.constant 0 : index
    %313 = vector.load %arg3[%c7_300, %c0_301, %c0_302] : memref<9x64x64xf32, #tpu.memory_space<vmem>>, vector<1x64x64xf32>
    %314 = vector.shape_cast %313 : vector<1x64x64xf32> to vector<64x64xf32>
    %cst_303 = arith.constant dense<0.000000e+00> : vector<32x64xf32>
    %315 = tpu.matmul %168, %314, %cst_303 {dimension_numbers = #tpu.dot_dimension_numbers<[1], [0], [0], [1], [0, 0, 1, 1], [], []>} : vector<32x64xf32>, vector<64x64xf32>, vector<32x64xf32> -> vector<32x64xf32>
    %c8_304 = arith.constant 8 : index
    %c0_305 = arith.constant 0 : index
    %c0_306 = arith.constant 0 : index
    %316 = vector.load %arg3[%c8_304, %c0_305, %c0_306] : memref<9x64x64xf32, #tpu.memory_space<vmem>>, vector<1x64x64xf32>
    %317 = vector.shape_cast %316 : vector<1x64x64xf32> to vector<64x64xf32>
    %cst_307 = arith.constant dense<0.000000e+00> : vector<32x64xf32>
    %318 = tpu.matmul %168, %317, %cst_307 {dimension_numbers = #tpu.dot_dimension_numbers<[1], [0], [0], [1], [0, 0, 1, 1], [], []>} : vector<32x64xf32>, vector<64x64xf32>, vector<32x64xf32> -> vector<32x64xf32>
    %319 = tpu.concatenate %297, %300, %303, %306, %168, %309, %312, %315, %318 in 0 : vector<32x64xf32>, vector<32x64xf32>, vector<32x64xf32>, vector<32x64xf32>, vector<32x64xf32>, vector<32x64xf32>, vector<32x64xf32>, vector<32x64xf32>, vector<32x64xf32> -> vector<288x64xf32>
    %320 = arith.truncf %319 : vector<288x64xf32> to vector<288x64xbf16>
    %c0_308 = arith.constant 0 : index
    %c0_309 = arith.constant 0 : index
    %321 = vector.load %arg24[%c0_308, %c0_309] : memref<32x288xbf16, #tpu.memory_space<vmem>>, vector<32x288xbf16>
    %cst_310 = arith.constant dense<0.000000e+00> : vector<32x64xf32>
    %322 = tpu.matmul %321, %320, %cst_310 {dimension_numbers = #tpu.dot_dimension_numbers<[1], [0], [0], [1], [0, 0, 1, 1], [], []>} : vector<32x288xbf16>, vector<288x64xbf16>, vector<32x64xf32> -> vector<32x64xf32>
    %323 = arith.addf %294, %322 : vector<32x64xf32>
    %c0_311 = arith.constant 0 : index
    %c0_312 = arith.constant 0 : index
    %324 = vector.load %arg25[%c0_311, %c0_312] : memref<32x1xf32, #tpu.memory_space<vmem>>, vector<32x1xf32>
    %325 = vector.broadcast %324 : vector<32x1xf32> to vector<32x64xf32>
    %326 = arith.addf %323, %325 : vector<32x64xf32>
    %cst_313 = arith.constant 0.000000e+00 : f32
    %327 = vector.broadcast %cst_313 : f32 to vector<32x64xf32>
    %328 = arith.maximumf %326, %327 : vector<32x64xf32>
    %c0_314 = arith.constant 0 : index
    %c0_315 = arith.constant 0 : index
    %c0_316 = arith.constant 0 : index
    %329 = vector.load %arg3[%c0_314, %c0_315, %c0_316] : memref<9x64x64xf32, #tpu.memory_space<vmem>>, vector<1x64x64xf32>
    %330 = vector.shape_cast %329 : vector<1x64x64xf32> to vector<64x64xf32>
    %cst_317 = arith.constant dense<0.000000e+00> : vector<32x64xf32>
    %331 = tpu.matmul %328, %330, %cst_317 {dimension_numbers = #tpu.dot_dimension_numbers<[1], [0], [0], [1], [0, 0, 1, 1], [], []>} : vector<32x64xf32>, vector<64x64xf32>, vector<32x64xf32> -> vector<32x64xf32>
    %c1_318 = arith.constant 1 : index
    %c0_319 = arith.constant 0 : index
    %c0_320 = arith.constant 0 : index
    %332 = vector.load %arg3[%c1_318, %c0_319, %c0_320] : memref<9x64x64xf32, #tpu.memory_space<vmem>>, vector<1x64x64xf32>
    %333 = vector.shape_cast %332 : vector<1x64x64xf32> to vector<64x64xf32>
    %cst_321 = arith.constant dense<0.000000e+00> : vector<32x64xf32>
    %334 = tpu.matmul %328, %333, %cst_321 {dimension_numbers = #tpu.dot_dimension_numbers<[1], [0], [0], [1], [0, 0, 1, 1], [], []>} : vector<32x64xf32>, vector<64x64xf32>, vector<32x64xf32> -> vector<32x64xf32>
    %c2_322 = arith.constant 2 : index
    %c0_323 = arith.constant 0 : index
    %c0_324 = arith.constant 0 : index
    %335 = vector.load %arg3[%c2_322, %c0_323, %c0_324] : memref<9x64x64xf32, #tpu.memory_space<vmem>>, vector<1x64x64xf32>
    %336 = vector.shape_cast %335 : vector<1x64x64xf32> to vector<64x64xf32>
    %cst_325 = arith.constant dense<0.000000e+00> : vector<32x64xf32>
    %337 = tpu.matmul %328, %336, %cst_325 {dimension_numbers = #tpu.dot_dimension_numbers<[1], [0], [0], [1], [0, 0, 1, 1], [], []>} : vector<32x64xf32>, vector<64x64xf32>, vector<32x64xf32> -> vector<32x64xf32>
    %c3_326 = arith.constant 3 : index
    %c0_327 = arith.constant 0 : index
    %c0_328 = arith.constant 0 : index
    %338 = vector.load %arg3[%c3_326, %c0_327, %c0_328] : memref<9x64x64xf32, #tpu.memory_space<vmem>>, vector<1x64x64xf32>
    %339 = vector.shape_cast %338 : vector<1x64x64xf32> to vector<64x64xf32>
    %cst_329 = arith.constant dense<0.000000e+00> : vector<32x64xf32>
    %340 = tpu.matmul %328, %339, %cst_329 {dimension_numbers = #tpu.dot_dimension_numbers<[1], [0], [0], [1], [0, 0, 1, 1], [], []>} : vector<32x64xf32>, vector<64x64xf32>, vector<32x64xf32> -> vector<32x64xf32>
    %c5_330 = arith.constant 5 : index
    %c0_331 = arith.constant 0 : index
    %c0_332 = arith.constant 0 : index
    %341 = vector.load %arg3[%c5_330, %c0_331, %c0_332] : memref<9x64x64xf32, #tpu.memory_space<vmem>>, vector<1x64x64xf32>
    %342 = vector.shape_cast %341 : vector<1x64x64xf32> to vector<64x64xf32>
    %cst_333 = arith.constant dense<0.000000e+00> : vector<32x64xf32>
    %343 = tpu.matmul %328, %342, %cst_333 {dimension_numbers = #tpu.dot_dimension_numbers<[1], [0], [0], [1], [0, 0, 1, 1], [], []>} : vector<32x64xf32>, vector<64x64xf32>, vector<32x64xf32> -> vector<32x64xf32>
    %c6_334 = arith.constant 6 : index
    %c0_335 = arith.constant 0 : index
    %c0_336 = arith.constant 0 : index
    %344 = vector.load %arg3[%c6_334, %c0_335, %c0_336] : memref<9x64x64xf32, #tpu.memory_space<vmem>>, vector<1x64x64xf32>
    %345 = vector.shape_cast %344 : vector<1x64x64xf32> to vector<64x64xf32>
    %cst_337 = arith.constant dense<0.000000e+00> : vector<32x64xf32>
    %346 = tpu.matmul %328, %345, %cst_337 {dimension_numbers = #tpu.dot_dimension_numbers<[1], [0], [0], [1], [0, 0, 1, 1], [], []>} : vector<32x64xf32>, vector<64x64xf32>, vector<32x64xf32> -> vector<32x64xf32>
    %c7_338 = arith.constant 7 : index
    %c0_339 = arith.constant 0 : index
    %c0_340 = arith.constant 0 : index
    %347 = vector.load %arg3[%c7_338, %c0_339, %c0_340] : memref<9x64x64xf32, #tpu.memory_space<vmem>>, vector<1x64x64xf32>
    %348 = vector.shape_cast %347 : vector<1x64x64xf32> to vector<64x64xf32>
    %cst_341 = arith.constant dense<0.000000e+00> : vector<32x64xf32>
    %349 = tpu.matmul %328, %348, %cst_341 {dimension_numbers = #tpu.dot_dimension_numbers<[1], [0], [0], [1], [0, 0, 1, 1], [], []>} : vector<32x64xf32>, vector<64x64xf32>, vector<32x64xf32> -> vector<32x64xf32>
    %c8_342 = arith.constant 8 : index
    %c0_343 = arith.constant 0 : index
    %c0_344 = arith.constant 0 : index
    %350 = vector.load %arg3[%c8_342, %c0_343, %c0_344] : memref<9x64x64xf32, #tpu.memory_space<vmem>>, vector<1x64x64xf32>
    %351 = vector.shape_cast %350 : vector<1x64x64xf32> to vector<64x64xf32>
    %cst_345 = arith.constant dense<0.000000e+00> : vector<32x64xf32>
    %352 = tpu.matmul %328, %351, %cst_345 {dimension_numbers = #tpu.dot_dimension_numbers<[1], [0], [0], [1], [0, 0, 1, 1], [], []>} : vector<32x64xf32>, vector<64x64xf32>, vector<32x64xf32> -> vector<32x64xf32>
    %353 = tpu.concatenate %331, %334, %337, %340, %328, %343, %346, %349, %352 in 0 : vector<32x64xf32>, vector<32x64xf32>, vector<32x64xf32>, vector<32x64xf32>, vector<32x64xf32>, vector<32x64xf32>, vector<32x64xf32>, vector<32x64xf32>, vector<32x64xf32> -> vector<288x64xf32>
    %354 = arith.truncf %353 : vector<288x64xf32> to vector<288x64xbf16>
    %c0_346 = arith.constant 0 : index
    %c0_347 = arith.constant 0 : index
    %355 = vector.load %arg26[%c0_346, %c0_347] : memref<32x288xbf16, #tpu.memory_space<vmem>>, vector<32x288xbf16>
    %cst_348 = arith.constant dense<0.000000e+00> : vector<32x64xf32>
    %356 = tpu.matmul %355, %354, %cst_348 {dimension_numbers = #tpu.dot_dimension_numbers<[1], [0], [0], [1], [0, 0, 1, 1], [], []>} : vector<32x288xbf16>, vector<288x64xbf16>, vector<32x64xf32> -> vector<32x64xf32>
    %c0_349 = arith.constant 0 : index
    %c0_350 = arith.constant 0 : index
    %357 = vector.load %arg27[%c0_349, %c0_350] : memref<32x1xf32, #tpu.memory_space<vmem>>, vector<32x1xf32>
    %358 = vector.broadcast %357 : vector<32x1xf32> to vector<32x64xf32>
    %359 = arith.addf %356, %358 : vector<32x64xf32>
    %cst_351 = arith.constant 0.000000e+00 : f32
    %360 = vector.broadcast %cst_351 : f32 to vector<32x64xf32>
    %361 = arith.maximumf %359, %360 : vector<32x64xf32>
    %c0_352 = arith.constant 0 : index
    %c0_353 = arith.constant 0 : index
    %362 = vector.load %arg28[%c0_352, %c0_353] : memref<64x32xbf16, #tpu.memory_space<vmem>>, vector<64x32xbf16>
    %363 = arith.truncf %361 : vector<32x64xf32> to vector<32x64xbf16>
    %cst_354 = arith.constant dense<0.000000e+00> : vector<64x64xf32>
    %364 = tpu.matmul %362, %363, %cst_354 {dimension_numbers = #tpu.dot_dimension_numbers<[1], [0], [0], [1], [0, 0, 1, 1], [], []>} : vector<64x32xbf16>, vector<32x64xbf16>, vector<64x64xf32> -> vector<64x64xf32>
    %365 = vector.extract_strided_slice %364 {offsets = [0, 0], sizes = [16, 64], strides = [1, 1]} : vector<64x64xf32> to vector<16x64xf32>
    %366 = arith.truncf %365 : vector<16x64xf32> to vector<16x64xbf16>
    %c0_355 = arith.constant 0 : index
    %c0_356 = arith.constant 0 : index
    %c0_357 = arith.constant 0 : index
    %367 = vector.load %arg8[%c0_355, %c0_356, %c0_357] : memref<4x64x256xbf16, #tpu.memory_space<vmem>>, vector<1x64x256xbf16>
    %368 = vector.shape_cast %367 : vector<1x64x256xbf16> to vector<64x256xbf16>
    %cst_358 = arith.constant dense<0.000000e+00> : vector<16x256xf32>
    %369 = tpu.matmul %366, %368, %cst_358 {dimension_numbers = #tpu.dot_dimension_numbers<[1], [0], [0], [1], [0, 0, 1, 1], [], []>} : vector<16x64xbf16>, vector<64x256xbf16>, vector<16x256xf32> -> vector<16x256xf32>
    %370 = vector.extract_strided_slice %364 {offsets = [16, 0], sizes = [16, 64], strides = [1, 1]} : vector<64x64xf32> to vector<16x64xf32>
    %371 = arith.truncf %370 : vector<16x64xf32> to vector<16x64xbf16>
    %c1_359 = arith.constant 1 : index
    %c0_360 = arith.constant 0 : index
    %c0_361 = arith.constant 0 : index
    %372 = vector.load %arg8[%c1_359, %c0_360, %c0_361] : memref<4x64x256xbf16, #tpu.memory_space<vmem>>, vector<1x64x256xbf16>
    %373 = vector.shape_cast %372 : vector<1x64x256xbf16> to vector<64x256xbf16>
    %cst_362 = arith.constant dense<0.000000e+00> : vector<16x256xf32>
    %374 = tpu.matmul %371, %373, %cst_362 {dimension_numbers = #tpu.dot_dimension_numbers<[1], [0], [0], [1], [0, 0, 1, 1], [], []>} : vector<16x64xbf16>, vector<64x256xbf16>, vector<16x256xf32> -> vector<16x256xf32>
    %375 = arith.addf %369, %374 : vector<16x256xf32>
    %376 = vector.extract_strided_slice %364 {offsets = [32, 0], sizes = [16, 64], strides = [1, 1]} : vector<64x64xf32> to vector<16x64xf32>
    %377 = arith.truncf %376 : vector<16x64xf32> to vector<16x64xbf16>
    %c2_363 = arith.constant 2 : index
    %c0_364 = arith.constant 0 : index
    %c0_365 = arith.constant 0 : index
    %378 = vector.load %arg8[%c2_363, %c0_364, %c0_365] : memref<4x64x256xbf16, #tpu.memory_space<vmem>>, vector<1x64x256xbf16>
    %379 = vector.shape_cast %378 : vector<1x64x256xbf16> to vector<64x256xbf16>
    %cst_366 = arith.constant dense<0.000000e+00> : vector<16x256xf32>
    %380 = tpu.matmul %377, %379, %cst_366 {dimension_numbers = #tpu.dot_dimension_numbers<[1], [0], [0], [1], [0, 0, 1, 1], [], []>} : vector<16x64xbf16>, vector<64x256xbf16>, vector<16x256xf32> -> vector<16x256xf32>
    %381 = arith.addf %375, %380 : vector<16x256xf32>
    %382 = vector.extract_strided_slice %364 {offsets = [48, 0], sizes = [16, 64], strides = [1, 1]} : vector<64x64xf32> to vector<16x64xf32>
    %383 = arith.truncf %382 : vector<16x64xf32> to vector<16x64xbf16>
    %c3_367 = arith.constant 3 : index
    %c0_368 = arith.constant 0 : index
    %c0_369 = arith.constant 0 : index
    %384 = vector.load %arg8[%c3_367, %c0_368, %c0_369] : memref<4x64x256xbf16, #tpu.memory_space<vmem>>, vector<1x64x256xbf16>
    %385 = vector.shape_cast %384 : vector<1x64x256xbf16> to vector<64x256xbf16>
    %cst_370 = arith.constant dense<0.000000e+00> : vector<16x256xf32>
    %386 = tpu.matmul %383, %385, %cst_370 {dimension_numbers = #tpu.dot_dimension_numbers<[1], [0], [0], [1], [0, 0, 1, 1], [], []>} : vector<16x64xbf16>, vector<64x256xbf16>, vector<16x256xf32> -> vector<16x256xf32>
    %387 = arith.addf %381, %386 : vector<16x256xf32>
    %c0_371 = arith.constant 0 : index
    %c0_372 = arith.constant 0 : index
    %388 = vector.load %arg29[%c0_371, %c0_372] : memref<16x1xf32, #tpu.memory_space<vmem>>, vector<16x1xf32>
    %389 = vector.broadcast %388 : vector<16x1xf32> to vector<16x256xf32>
    %390 = arith.addf %387, %389 : vector<16x256xf32>
    %c17_i32_373 = arith.constant 17 : i32
    %391 = tpu.dynamic_rotate %390 by %c17_i32_373 dim 1 : vector<16x256xf32>, i32 -> vector<16x256xf32>
    %c0_374 = arith.constant 0 : index
    %c0_375 = arith.constant 0 : index
    %c0_376 = arith.constant 0 : index
    %392 = vector.load %arg2[%c0_374, %c0_375, %c0_376] : memref<9x1x256xf32, #tpu.memory_space<vmem>>, vector<1x1x256xf32>
    %393 = vector.shape_cast %392 : vector<1x1x256xf32> to vector<1x256xf32>
    %394 = vector.broadcast %393 : vector<1x256xf32> to vector<16x256xf32>
    %395 = arith.mulf %391, %394 : vector<16x256xf32>
    %c16_i32_377 = arith.constant 16 : i32
    %396 = tpu.dynamic_rotate %390 by %c16_i32_377 dim 1 : vector<16x256xf32>, i32 -> vector<16x256xf32>
    %c1_378 = arith.constant 1 : index
    %c0_379 = arith.constant 0 : index
    %c0_380 = arith.constant 0 : index
    %397 = vector.load %arg2[%c1_378, %c0_379, %c0_380] : memref<9x1x256xf32, #tpu.memory_space<vmem>>, vector<1x1x256xf32>
    %398 = vector.shape_cast %397 : vector<1x1x256xf32> to vector<1x256xf32>
    %399 = vector.broadcast %398 : vector<1x256xf32> to vector<16x256xf32>
    %400 = arith.mulf %396, %399 : vector<16x256xf32>
    %c15_i32_381 = arith.constant 15 : i32
    %401 = tpu.dynamic_rotate %390 by %c15_i32_381 dim 1 : vector<16x256xf32>, i32 -> vector<16x256xf32>
    %c2_382 = arith.constant 2 : index
    %c0_383 = arith.constant 0 : index
    %c0_384 = arith.constant 0 : index
    %402 = vector.load %arg2[%c2_382, %c0_383, %c0_384] : memref<9x1x256xf32, #tpu.memory_space<vmem>>, vector<1x1x256xf32>
    %403 = vector.shape_cast %402 : vector<1x1x256xf32> to vector<1x256xf32>
    %404 = vector.broadcast %403 : vector<1x256xf32> to vector<16x256xf32>
    %405 = arith.mulf %401, %404 : vector<16x256xf32>
    %c1_i32_385 = arith.constant 1 : i32
    %406 = tpu.dynamic_rotate %390 by %c1_i32_385 dim 1 : vector<16x256xf32>, i32 -> vector<16x256xf32>
    %c3_386 = arith.constant 3 : index
    %c0_387 = arith.constant 0 : index
    %c0_388 = arith.constant 0 : index
    %407 = vector.load %arg2[%c3_386, %c0_387, %c0_388] : memref<9x1x256xf32, #tpu.memory_space<vmem>>, vector<1x1x256xf32>
    %408 = vector.shape_cast %407 : vector<1x1x256xf32> to vector<1x256xf32>
    %409 = vector.broadcast %408 : vector<1x256xf32> to vector<16x256xf32>
    %410 = arith.mulf %406, %409 : vector<16x256xf32>
    %c255_i32_389 = arith.constant 255 : i32
    %411 = tpu.dynamic_rotate %390 by %c255_i32_389 dim 1 : vector<16x256xf32>, i32 -> vector<16x256xf32>
    %c5_390 = arith.constant 5 : index
    %c0_391 = arith.constant 0 : index
    %c0_392 = arith.constant 0 : index
    %412 = vector.load %arg2[%c5_390, %c0_391, %c0_392] : memref<9x1x256xf32, #tpu.memory_space<vmem>>, vector<1x1x256xf32>
    %413 = vector.shape_cast %412 : vector<1x1x256xf32> to vector<1x256xf32>
    %414 = vector.broadcast %413 : vector<1x256xf32> to vector<16x256xf32>
    %415 = arith.mulf %411, %414 : vector<16x256xf32>
    %c241_i32_393 = arith.constant 241 : i32
    %416 = tpu.dynamic_rotate %390 by %c241_i32_393 dim 1 : vector<16x256xf32>, i32 -> vector<16x256xf32>
    %c6_394 = arith.constant 6 : index
    %c0_395 = arith.constant 0 : index
    %c0_396 = arith.constant 0 : index
    %417 = vector.load %arg2[%c6_394, %c0_395, %c0_396] : memref<9x1x256xf32, #tpu.memory_space<vmem>>, vector<1x1x256xf32>
    %418 = vector.shape_cast %417 : vector<1x1x256xf32> to vector<1x256xf32>
    %419 = vector.broadcast %418 : vector<1x256xf32> to vector<16x256xf32>
    %420 = arith.mulf %416, %419 : vector<16x256xf32>
    %c240_i32_397 = arith.constant 240 : i32
    %421 = tpu.dynamic_rotate %390 by %c240_i32_397 dim 1 : vector<16x256xf32>, i32 -> vector<16x256xf32>
    %c7_398 = arith.constant 7 : index
    %c0_399 = arith.constant 0 : index
    %c0_400 = arith.constant 0 : index
    %422 = vector.load %arg2[%c7_398, %c0_399, %c0_400] : memref<9x1x256xf32, #tpu.memory_space<vmem>>, vector<1x1x256xf32>
    %423 = vector.shape_cast %422 : vector<1x1x256xf32> to vector<1x256xf32>
    %424 = vector.broadcast %423 : vector<1x256xf32> to vector<16x256xf32>
    %425 = arith.mulf %421, %424 : vector<16x256xf32>
    %c239_i32_401 = arith.constant 239 : i32
    %426 = tpu.dynamic_rotate %390 by %c239_i32_401 dim 1 : vector<16x256xf32>, i32 -> vector<16x256xf32>
    %c8_402 = arith.constant 8 : index
    %c0_403 = arith.constant 0 : index
    %c0_404 = arith.constant 0 : index
    %427 = vector.load %arg2[%c8_402, %c0_403, %c0_404] : memref<9x1x256xf32, #tpu.memory_space<vmem>>, vector<1x1x256xf32>
    %428 = vector.shape_cast %427 : vector<1x1x256xf32> to vector<1x256xf32>
    %429 = vector.broadcast %428 : vector<1x256xf32> to vector<16x256xf32>
    %430 = arith.mulf %426, %429 : vector<16x256xf32>
    %431 = tpu.concatenate %395, %400, %405, %410, %390, %415, %420, %425, %430 in 0 : vector<16x256xf32>, vector<16x256xf32>, vector<16x256xf32>, vector<16x256xf32>, vector<16x256xf32>, vector<16x256xf32>, vector<16x256xf32>, vector<16x256xf32>, vector<16x256xf32> -> vector<144x256xf32>
    %432 = arith.truncf %431 : vector<144x256xf32> to vector<144x256xbf16>
    %c0_405 = arith.constant 0 : index
    %c0_406 = arith.constant 0 : index
    %433 = vector.load %arg30[%c0_405, %c0_406] : memref<16x144xbf16, #tpu.memory_space<vmem>>, vector<16x144xbf16>
    %cst_407 = arith.constant dense<0.000000e+00> : vector<16x256xf32>
    %434 = tpu.matmul %433, %432, %cst_407 {dimension_numbers = #tpu.dot_dimension_numbers<[1], [0], [0], [1], [0, 0, 1, 1], [], []>} : vector<16x144xbf16>, vector<144x256xbf16>, vector<16x256xf32> -> vector<16x256xf32>
    %c17_i32_408 = arith.constant 17 : i32
    %435 = tpu.dynamic_rotate %99 by %c17_i32_408 dim 1 : vector<16x256xf32>, i32 -> vector<16x256xf32>
    %c0_409 = arith.constant 0 : index
    %c0_410 = arith.constant 0 : index
    %c0_411 = arith.constant 0 : index
    %436 = vector.load %arg2[%c0_409, %c0_410, %c0_411] : memref<9x1x256xf32, #tpu.memory_space<vmem>>, vector<1x1x256xf32>
    %437 = vector.shape_cast %436 : vector<1x1x256xf32> to vector<1x256xf32>
    %438 = vector.broadcast %437 : vector<1x256xf32> to vector<16x256xf32>
    %439 = arith.mulf %435, %438 : vector<16x256xf32>
    %c16_i32_412 = arith.constant 16 : i32
    %440 = tpu.dynamic_rotate %99 by %c16_i32_412 dim 1 : vector<16x256xf32>, i32 -> vector<16x256xf32>
    %c1_413 = arith.constant 1 : index
    %c0_414 = arith.constant 0 : index
    %c0_415 = arith.constant 0 : index
    %441 = vector.load %arg2[%c1_413, %c0_414, %c0_415] : memref<9x1x256xf32, #tpu.memory_space<vmem>>, vector<1x1x256xf32>
    %442 = vector.shape_cast %441 : vector<1x1x256xf32> to vector<1x256xf32>
    %443 = vector.broadcast %442 : vector<1x256xf32> to vector<16x256xf32>
    %444 = arith.mulf %440, %443 : vector<16x256xf32>
    %c15_i32_416 = arith.constant 15 : i32
    %445 = tpu.dynamic_rotate %99 by %c15_i32_416 dim 1 : vector<16x256xf32>, i32 -> vector<16x256xf32>
    %c2_417 = arith.constant 2 : index
    %c0_418 = arith.constant 0 : index
    %c0_419 = arith.constant 0 : index
    %446 = vector.load %arg2[%c2_417, %c0_418, %c0_419] : memref<9x1x256xf32, #tpu.memory_space<vmem>>, vector<1x1x256xf32>
    %447 = vector.shape_cast %446 : vector<1x1x256xf32> to vector<1x256xf32>
    %448 = vector.broadcast %447 : vector<1x256xf32> to vector<16x256xf32>
    %449 = arith.mulf %445, %448 : vector<16x256xf32>
    %c1_i32_420 = arith.constant 1 : i32
    %450 = tpu.dynamic_rotate %99 by %c1_i32_420 dim 1 : vector<16x256xf32>, i32 -> vector<16x256xf32>
    %c3_421 = arith.constant 3 : index
    %c0_422 = arith.constant 0 : index
    %c0_423 = arith.constant 0 : index
    %451 = vector.load %arg2[%c3_421, %c0_422, %c0_423] : memref<9x1x256xf32, #tpu.memory_space<vmem>>, vector<1x1x256xf32>
    %452 = vector.shape_cast %451 : vector<1x1x256xf32> to vector<1x256xf32>
    %453 = vector.broadcast %452 : vector<1x256xf32> to vector<16x256xf32>
    %454 = arith.mulf %450, %453 : vector<16x256xf32>
    %c255_i32_424 = arith.constant 255 : i32
    %455 = tpu.dynamic_rotate %99 by %c255_i32_424 dim 1 : vector<16x256xf32>, i32 -> vector<16x256xf32>
    %c5_425 = arith.constant 5 : index
    %c0_426 = arith.constant 0 : index
    %c0_427 = arith.constant 0 : index
    %456 = vector.load %arg2[%c5_425, %c0_426, %c0_427] : memref<9x1x256xf32, #tpu.memory_space<vmem>>, vector<1x1x256xf32>
    %457 = vector.shape_cast %456 : vector<1x1x256xf32> to vector<1x256xf32>
    %458 = vector.broadcast %457 : vector<1x256xf32> to vector<16x256xf32>
    %459 = arith.mulf %455, %458 : vector<16x256xf32>
    %c241_i32_428 = arith.constant 241 : i32
    %460 = tpu.dynamic_rotate %99 by %c241_i32_428 dim 1 : vector<16x256xf32>, i32 -> vector<16x256xf32>
    %c6_429 = arith.constant 6 : index
    %c0_430 = arith.constant 0 : index
    %c0_431 = arith.constant 0 : index
    %461 = vector.load %arg2[%c6_429, %c0_430, %c0_431] : memref<9x1x256xf32, #tpu.memory_space<vmem>>, vector<1x1x256xf32>
    %462 = vector.shape_cast %461 : vector<1x1x256xf32> to vector<1x256xf32>
    %463 = vector.broadcast %462 : vector<1x256xf32> to vector<16x256xf32>
    %464 = arith.mulf %460, %463 : vector<16x256xf32>
    %c240_i32_432 = arith.constant 240 : i32
    %465 = tpu.dynamic_rotate %99 by %c240_i32_432 dim 1 : vector<16x256xf32>, i32 -> vector<16x256xf32>
    %c7_433 = arith.constant 7 : index
    %c0_434 = arith.constant 0 : index
    %c0_435 = arith.constant 0 : index
    %466 = vector.load %arg2[%c7_433, %c0_434, %c0_435] : memref<9x1x256xf32, #tpu.memory_space<vmem>>, vector<1x1x256xf32>
    %467 = vector.shape_cast %466 : vector<1x1x256xf32> to vector<1x256xf32>
    %468 = vector.broadcast %467 : vector<1x256xf32> to vector<16x256xf32>
    %469 = arith.mulf %465, %468 : vector<16x256xf32>
    %c239_i32_436 = arith.constant 239 : i32
    %470 = tpu.dynamic_rotate %99 by %c239_i32_436 dim 1 : vector<16x256xf32>, i32 -> vector<16x256xf32>
    %c8_437 = arith.constant 8 : index
    %c0_438 = arith.constant 0 : index
    %c0_439 = arith.constant 0 : index
    %471 = vector.load %arg2[%c8_437, %c0_438, %c0_439] : memref<9x1x256xf32, #tpu.memory_space<vmem>>, vector<1x1x256xf32>
    %472 = vector.shape_cast %471 : vector<1x1x256xf32> to vector<1x256xf32>
    %473 = vector.broadcast %472 : vector<1x256xf32> to vector<16x256xf32>
    %474 = arith.mulf %470, %473 : vector<16x256xf32>
    %475 = tpu.concatenate %439, %444, %449, %454, %99, %459, %464, %469, %474 in 0 : vector<16x256xf32>, vector<16x256xf32>, vector<16x256xf32>, vector<16x256xf32>, vector<16x256xf32>, vector<16x256xf32>, vector<16x256xf32>, vector<16x256xf32>, vector<16x256xf32> -> vector<144x256xf32>
    %476 = arith.truncf %475 : vector<144x256xf32> to vector<144x256xbf16>
    %c0_440 = arith.constant 0 : index
    %c0_441 = arith.constant 0 : index
    %477 = vector.load %arg31[%c0_440, %c0_441] : memref<16x144xbf16, #tpu.memory_space<vmem>>, vector<16x144xbf16>
    %cst_442 = arith.constant dense<0.000000e+00> : vector<16x256xf32>
    %478 = tpu.matmul %477, %476, %cst_442 {dimension_numbers = #tpu.dot_dimension_numbers<[1], [0], [0], [1], [0, 0, 1, 1], [], []>} : vector<16x144xbf16>, vector<144x256xbf16>, vector<16x256xf32> -> vector<16x256xf32>
    %479 = arith.addf %434, %478 : vector<16x256xf32>
    %c0_443 = arith.constant 0 : index
    %c0_444 = arith.constant 0 : index
    %480 = vector.load %arg32[%c0_443, %c0_444] : memref<16x1xf32, #tpu.memory_space<vmem>>, vector<16x1xf32>
    %481 = vector.broadcast %480 : vector<16x1xf32> to vector<16x256xf32>
    %482 = arith.addf %479, %481 : vector<16x256xf32>
    %cst_445 = arith.constant 0.000000e+00 : f32
    %483 = vector.broadcast %cst_445 : f32 to vector<16x256xf32>
    %484 = arith.maximumf %482, %483 : vector<16x256xf32>
    %c17_i32_446 = arith.constant 17 : i32
    %485 = tpu.dynamic_rotate %484 by %c17_i32_446 dim 1 : vector<16x256xf32>, i32 -> vector<16x256xf32>
    %c0_447 = arith.constant 0 : index
    %c0_448 = arith.constant 0 : index
    %c0_449 = arith.constant 0 : index
    %486 = vector.load %arg2[%c0_447, %c0_448, %c0_449] : memref<9x1x256xf32, #tpu.memory_space<vmem>>, vector<1x1x256xf32>
    %487 = vector.shape_cast %486 : vector<1x1x256xf32> to vector<1x256xf32>
    %488 = vector.broadcast %487 : vector<1x256xf32> to vector<16x256xf32>
    %489 = arith.mulf %485, %488 : vector<16x256xf32>
    %c16_i32_450 = arith.constant 16 : i32
    %490 = tpu.dynamic_rotate %484 by %c16_i32_450 dim 1 : vector<16x256xf32>, i32 -> vector<16x256xf32>
    %c1_451 = arith.constant 1 : index
    %c0_452 = arith.constant 0 : index
    %c0_453 = arith.constant 0 : index
    %491 = vector.load %arg2[%c1_451, %c0_452, %c0_453] : memref<9x1x256xf32, #tpu.memory_space<vmem>>, vector<1x1x256xf32>
    %492 = vector.shape_cast %491 : vector<1x1x256xf32> to vector<1x256xf32>
    %493 = vector.broadcast %492 : vector<1x256xf32> to vector<16x256xf32>
    %494 = arith.mulf %490, %493 : vector<16x256xf32>
    %c15_i32_454 = arith.constant 15 : i32
    %495 = tpu.dynamic_rotate %484 by %c15_i32_454 dim 1 : vector<16x256xf32>, i32 -> vector<16x256xf32>
    %c2_455 = arith.constant 2 : index
    %c0_456 = arith.constant 0 : index
    %c0_457 = arith.constant 0 : index
    %496 = vector.load %arg2[%c2_455, %c0_456, %c0_457] : memref<9x1x256xf32, #tpu.memory_space<vmem>>, vector<1x1x256xf32>
    %497 = vector.shape_cast %496 : vector<1x1x256xf32> to vector<1x256xf32>
    %498 = vector.broadcast %497 : vector<1x256xf32> to vector<16x256xf32>
    %499 = arith.mulf %495, %498 : vector<16x256xf32>
    %c1_i32_458 = arith.constant 1 : i32
    %500 = tpu.dynamic_rotate %484 by %c1_i32_458 dim 1 : vector<16x256xf32>, i32 -> vector<16x256xf32>
    %c3_459 = arith.constant 3 : index
    %c0_460 = arith.constant 0 : index
    %c0_461 = arith.constant 0 : index
    %501 = vector.load %arg2[%c3_459, %c0_460, %c0_461] : memref<9x1x256xf32, #tpu.memory_space<vmem>>, vector<1x1x256xf32>
    %502 = vector.shape_cast %501 : vector<1x1x256xf32> to vector<1x256xf32>
    %503 = vector.broadcast %502 : vector<1x256xf32> to vector<16x256xf32>
    %504 = arith.mulf %500, %503 : vector<16x256xf32>
    %c255_i32_462 = arith.constant 255 : i32
    %505 = tpu.dynamic_rotate %484 by %c255_i32_462 dim 1 : vector<16x256xf32>, i32 -> vector<16x256xf32>
    %c5_463 = arith.constant 5 : index
    %c0_464 = arith.constant 0 : index
    %c0_465 = arith.constant 0 : index
    %506 = vector.load %arg2[%c5_463, %c0_464, %c0_465] : memref<9x1x256xf32, #tpu.memory_space<vmem>>, vector<1x1x256xf32>
    %507 = vector.shape_cast %506 : vector<1x1x256xf32> to vector<1x256xf32>
    %508 = vector.broadcast %507 : vector<1x256xf32> to vector<16x256xf32>
    %509 = arith.mulf %505, %508 : vector<16x256xf32>
    %c241_i32_466 = arith.constant 241 : i32
    %510 = tpu.dynamic_rotate %484 by %c241_i32_466 dim 1 : vector<16x256xf32>, i32 -> vector<16x256xf32>
    %c6_467 = arith.constant 6 : index
    %c0_468 = arith.constant 0 : index
    %c0_469 = arith.constant 0 : index
    %511 = vector.load %arg2[%c6_467, %c0_468, %c0_469] : memref<9x1x256xf32, #tpu.memory_space<vmem>>, vector<1x1x256xf32>
    %512 = vector.shape_cast %511 : vector<1x1x256xf32> to vector<1x256xf32>
    %513 = vector.broadcast %512 : vector<1x256xf32> to vector<16x256xf32>
    %514 = arith.mulf %510, %513 : vector<16x256xf32>
    %c240_i32_470 = arith.constant 240 : i32
    %515 = tpu.dynamic_rotate %484 by %c240_i32_470 dim 1 : vector<16x256xf32>, i32 -> vector<16x256xf32>
    %c7_471 = arith.constant 7 : index
    %c0_472 = arith.constant 0 : index
    %c0_473 = arith.constant 0 : index
    %516 = vector.load %arg2[%c7_471, %c0_472, %c0_473] : memref<9x1x256xf32, #tpu.memory_space<vmem>>, vector<1x1x256xf32>
    %517 = vector.shape_cast %516 : vector<1x1x256xf32> to vector<1x256xf32>
    %518 = vector.broadcast %517 : vector<1x256xf32> to vector<16x256xf32>
    %519 = arith.mulf %515, %518 : vector<16x256xf32>
    %c239_i32_474 = arith.constant 239 : i32
    %520 = tpu.dynamic_rotate %484 by %c239_i32_474 dim 1 : vector<16x256xf32>, i32 -> vector<16x256xf32>
    %c8_475 = arith.constant 8 : index
    %c0_476 = arith.constant 0 : index
    %c0_477 = arith.constant 0 : index
    %521 = vector.load %arg2[%c8_475, %c0_476, %c0_477] : memref<9x1x256xf32, #tpu.memory_space<vmem>>, vector<1x1x256xf32>
    %522 = vector.shape_cast %521 : vector<1x1x256xf32> to vector<1x256xf32>
    %523 = vector.broadcast %522 : vector<1x256xf32> to vector<16x256xf32>
    %524 = arith.mulf %520, %523 : vector<16x256xf32>
    %525 = tpu.concatenate %489, %494, %499, %504, %484, %509, %514, %519, %524 in 0 : vector<16x256xf32>, vector<16x256xf32>, vector<16x256xf32>, vector<16x256xf32>, vector<16x256xf32>, vector<16x256xf32>, vector<16x256xf32>, vector<16x256xf32>, vector<16x256xf32> -> vector<144x256xf32>
    %526 = arith.truncf %525 : vector<144x256xf32> to vector<144x256xbf16>
    %c0_478 = arith.constant 0 : index
    %c0_479 = arith.constant 0 : index
    %527 = vector.load %arg33[%c0_478, %c0_479] : memref<16x144xbf16, #tpu.memory_space<vmem>>, vector<16x144xbf16>
    %cst_480 = arith.constant dense<0.000000e+00> : vector<16x256xf32>
    %528 = tpu.matmul %527, %526, %cst_480 {dimension_numbers = #tpu.dot_dimension_numbers<[1], [0], [0], [1], [0, 0, 1, 1], [], []>} : vector<16x144xbf16>, vector<144x256xbf16>, vector<16x256xf32> -> vector<16x256xf32>
    %c0_481 = arith.constant 0 : index
    %c0_482 = arith.constant 0 : index
    %529 = vector.load %arg34[%c0_481, %c0_482] : memref<16x1xf32, #tpu.memory_space<vmem>>, vector<16x1xf32>
    %530 = vector.broadcast %529 : vector<16x1xf32> to vector<16x256xf32>
    %531 = arith.addf %528, %530 : vector<16x256xf32>
    %cst_483 = arith.constant 0.000000e+00 : f32
    %532 = vector.broadcast %cst_483 : f32 to vector<16x256xf32>
    %533 = arith.maximumf %531, %532 : vector<16x256xf32>
    %534 = arith.truncf %533 : vector<16x256xf32> to vector<16x256xbf16>
    %c0_484 = arith.constant 0 : index
    %c0_485 = arith.constant 0 : index
    %535 = vector.load %arg35[%c0_484, %c0_485] : memref<1x16xbf16, #tpu.memory_space<vmem>>, vector<1x16xbf16>
    %cst_486 = arith.constant dense<0.000000e+00> : vector<1x256xf32>
    %536 = tpu.matmul %535, %534, %cst_486 {dimension_numbers = #tpu.dot_dimension_numbers<[1], [0], [0], [1], [0, 0, 1, 1], [], []>} : vector<1x16xbf16>, vector<16x256xbf16>, vector<1x256xf32> -> vector<1x256xf32>
    %c0_487 = arith.constant 0 : index
    %c0_488 = arith.constant 0 : index
    %537 = vector.load %arg36[%c0_487, %c0_488] : memref<1x1xf32, #tpu.memory_space<vmem>>, vector<1x1xf32>
    %538 = vector.broadcast %537 : vector<1x1xf32> to vector<1x256xf32>
    %539 = arith.addf %536, %538 : vector<1x256xf32>
    %cst_489 = arith.constant dense<0xFF800000> : vector<16xf32>
    %540 = vector.multi_reduction <maximumf>, %533, %cst_489 [1] : vector<16x256xf32> to vector<16xf32>
    %541 = vector.shape_cast %540 : vector<16xf32> to vector<16x1xf32>
    %542 = arith.truncf %541 : vector<16x1xf32> to vector<16x1xbf16>
    %c0_490 = arith.constant 0 : index
    %c0_491 = arith.constant 0 : index
    %543 = vector.load %arg35[%c0_490, %c0_491] : memref<1x16xbf16, #tpu.memory_space<vmem>>, vector<1x16xbf16>
    %cst_492 = arith.constant dense<0.000000e+00> : vector<1x1xf32>
    %544 = tpu.matmul %543, %542, %cst_492 {dimension_numbers = #tpu.dot_dimension_numbers<[1], [0], [0], [1], [0, 0, 1, 1], [], []>} : vector<1x16xbf16>, vector<16x1xbf16>, vector<1x1xf32> -> vector<1x1xf32>
    %c0_493 = arith.constant 0 : index
    %c0_494 = arith.constant 0 : index
    %545 = vector.load %arg36[%c0_493, %c0_494] : memref<1x1xf32, #tpu.memory_space<vmem>>, vector<1x1xf32>
    %546 = arith.addf %544, %545 : vector<1x1xf32>
    %c0_495 = arith.constant 0 : index
    %c0_496 = arith.constant 0 : index
    %c0_497 = arith.constant 0 : index
    %547 = vector.load %arg37[%c0_495, %c0_496, %c0_497] : memref<1x1x256xf32, #tpu.memory_space<vmem>>, vector<1x1x256xf32>
    %548 = vector.shape_cast %547 : vector<1x1x256xf32> to vector<1x256xf32>
    %549 = vector.shape_cast %539 : vector<1x256xf32> to vector<1x1x256xf32>
    tpu.vector_store %arg37[%c0_495, %c0_496, %c0_497], %549 {strides = array<i32>} : memref<1x1x256xf32, #tpu.memory_space<vmem>>, vector<1x1x256xf32>,
    %c0_498 = arith.constant 0 : index
    %c0_499 = arith.constant 0 : index
    %c0_500 = arith.constant 0 : index
    %550 = vector.load %arg38[%c0_498, %c0_499, %c0_500] : memref<1x1x1xf32, #tpu.memory_space<vmem>>, vector<1x1x1xf32>
    %551 = vector.shape_cast %550 : vector<1x1x1xf32> to vector<1x1xf32>
    %552 = vector.shape_cast %546 : vector<1x1xf32> to vector<1x1x1xf32>
    tpu.vector_store %arg38[%c0_498, %c0_499, %c0_500], %552 {strides = array<i32>} : memref<1x1x1xf32, #tpu.memory_space<vmem>>, vector<1x1x1xf32>,
    return
  }
  func.func @transform_0(%arg0: i32) -> (i32, i32, i32) {
    %c0_i32 = arith.constant 0 : i32
    %c0_i32_0 = arith.constant 0 : i32
    %c0_i32_1 = arith.constant 0 : i32
    return %arg0, %c0_i32, %c0_i32_0 : i32, i32, i32
  }
  func.func @transform_1(%arg0: i32) -> (i32, i32, i32) {
    %c0_i32 = arith.constant 0 : i32
    %c0_i32_0 = arith.constant 0 : i32
    %c0_i32_1 = arith.constant 0 : i32
    %c0_i32_2 = arith.constant 0 : i32
    return %c0_i32, %c0_i32_0, %c0_i32_1 : i32, i32, i32
  }
  func.func @transform_2(%arg0: i32) -> (i32, i32, i32) {
    %c0_i32 = arith.constant 0 : i32
    %c0_i32_0 = arith.constant 0 : i32
    %c0_i32_1 = arith.constant 0 : i32
    %c0_i32_2 = arith.constant 0 : i32
    return %c0_i32, %c0_i32_0, %c0_i32_1 : i32, i32, i32
  }
  func.func @transform_3(%arg0: i32) -> (i32, i32, i32) {
    %c0_i32 = arith.constant 0 : i32
    %c0_i32_0 = arith.constant 0 : i32
    %c0_i32_1 = arith.constant 0 : i32
    %c0_i32_2 = arith.constant 0 : i32
    return %c0_i32, %c0_i32_0, %c0_i32_1 : i32, i32, i32
  }
  func.func @transform_4(%arg0: i32) -> (i32, i32) {
    %c0_i32 = arith.constant 0 : i32
    %c0_i32_0 = arith.constant 0 : i32
    %c0_i32_1 = arith.constant 0 : i32
    return %c0_i32, %c0_i32_0 : i32, i32
  }
  func.func @transform_5(%arg0: i32) -> (i32, i32) {
    %c0_i32 = arith.constant 0 : i32
    %c0_i32_0 = arith.constant 0 : i32
    %c0_i32_1 = arith.constant 0 : i32
    return %c0_i32, %c0_i32_0 : i32, i32
  }
  func.func @transform_6(%arg0: i32) -> (i32, i32, i32) {
    %c0_i32 = arith.constant 0 : i32
    %c0_i32_0 = arith.constant 0 : i32
    %c0_i32_1 = arith.constant 0 : i32
    %c0_i32_2 = arith.constant 0 : i32
    return %c0_i32, %c0_i32_0, %c0_i32_1 : i32, i32, i32
  }
  func.func @transform_7(%arg0: i32) -> (i32, i32, i32) {
    %c0_i32 = arith.constant 0 : i32
    %c0_i32_0 = arith.constant 0 : i32
    %c0_i32_1 = arith.constant 0 : i32
    %c0_i32_2 = arith.constant 0 : i32
    return %c0_i32, %c0_i32_0, %c0_i32_1 : i32, i32, i32
  }
  func.func @transform_8(%arg0: i32) -> (i32, i32) {
    %c0_i32 = arith.constant 0 : i32
    %c0_i32_0 = arith.constant 0 : i32
    %c0_i32_1 = arith.constant 0 : i32
    return %c0_i32, %c0_i32_0 : i32, i32
  }
  func.func @transform_9(%arg0: i32) -> (i32, i32) {
    %c0_i32 = arith.constant 0 : i32
    %c0_i32_0 = arith.constant 0 : i32
    %c0_i32_1 = arith.constant 0 : i32
    return %c0_i32, %c0_i32_0 : i32, i32
  }
  func.func @transform_10(%arg0: i32) -> (i32, i32) {
    %c0_i32 = arith.constant 0 : i32
    %c0_i32_0 = arith.constant 0 : i32
    %c0_i32_1 = arith.constant 0 : i32
    return %c0_i32, %c0_i32_0 : i32, i32
  }
  func.func @transform_11(%arg0: i32) -> (i32, i32) {
    %c0_i32 = arith.constant 0 : i32
    %c0_i32_0 = arith.constant 0 : i32
    %c0_i32_1 = arith.constant 0 : i32
    return %c0_i32, %c0_i32_0 : i32, i32
  }
  func.func @transform_12(%arg0: i32) -> (i32, i32) {
    %c0_i32 = arith.constant 0 : i32
    %c0_i32_0 = arith.constant 0 : i32
    %c0_i32_1 = arith.constant 0 : i32
    return %c0_i32, %c0_i32_0 : i32, i32
  }
  func.func @transform_13(%arg0: i32) -> (i32, i32) {
    %c0_i32 = arith.constant 0 : i32
    %c0_i32_0 = arith.constant 0 : i32
    %c0_i32_1 = arith.constant 0 : i32
    return %c0_i32, %c0_i32_0 : i32, i32
  }
  func.func @transform_14(%arg0: i32) -> (i32, i32) {
    %c0_i32 = arith.constant 0 : i32
    %c0_i32_0 = arith.constant 0 : i32
    %c0_i32_1 = arith.constant 0 : i32
    return %c0_i32, %c0_i32_0 : i32, i32
  }
  func.func @transform_15(%arg0: i32) -> (i32, i32) {
    %c0_i32 = arith.constant 0 : i32
    %c0_i32_0 = arith.constant 0 : i32
    %c0_i32_1 = arith.constant 0 : i32
    return %c0_i32, %c0_i32_0 : i32, i32
  }
  func.func @transform_16(%arg0: i32) -> (i32, i32) {
    %c0_i32 = arith.constant 0 : i32
    %c0_i32_0 = arith.constant 0 : i32
    %c0_i32_1 = arith.constant 0 : i32
    return %c0_i32, %c0_i32_0 : i32, i32
  }
  func.func @transform_17(%arg0: i32) -> (i32, i32) {
    %c0_i32 = arith.constant 0 : i32
    %c0_i32_0 = arith.constant 0 : i32
    %c0_i32_1 = arith.constant 0 : i32
    return %c0_i32, %c0_i32_0 : i32, i32
  }
  func.func @transform_18(%arg0: i32) -> (i32, i32) {
    %c0_i32 = arith.constant 0 : i32
    %c0_i32_0 = arith.constant 0 : i32
    %c0_i32_1 = arith.constant 0 : i32
    return %c0_i32, %c0_i32_0 : i32, i32
  }
  func.func @transform_19(%arg0: i32) -> (i32, i32) {
    %c0_i32 = arith.constant 0 : i32
    %c0_i32_0 = arith.constant 0 : i32
    %c0_i32_1 = arith.constant 0 : i32
    return %c0_i32, %c0_i32_0 : i32, i32
  }
  func.func @transform_20(%arg0: i32) -> (i32, i32) {
    %c0_i32 = arith.constant 0 : i32
    %c0_i32_0 = arith.constant 0 : i32
    %c0_i32_1 = arith.constant 0 : i32
    return %c0_i32, %c0_i32_0 : i32, i32
  }
  func.func @transform_21(%arg0: i32) -> (i32, i32) {
    %c0_i32 = arith.constant 0 : i32
    %c0_i32_0 = arith.constant 0 : i32
    %c0_i32_1 = arith.constant 0 : i32
    return %c0_i32, %c0_i32_0 : i32, i32
  }
  func.func @transform_22(%arg0: i32) -> (i32, i32) {
    %c0_i32 = arith.constant 0 : i32
    %c0_i32_0 = arith.constant 0 : i32
    %c0_i32_1 = arith.constant 0 : i32
    return %c0_i32, %c0_i32_0 : i32, i32
  }
  func.func @transform_23(%arg0: i32) -> (i32, i32) {
    %c0_i32 = arith.constant 0 : i32
    %c0_i32_0 = arith.constant 0 : i32
    %c0_i32_1 = arith.constant 0 : i32
    return %c0_i32, %c0_i32_0 : i32, i32
  }
  func.func @transform_24(%arg0: i32) -> (i32, i32) {
    %c0_i32 = arith.constant 0 : i32
    %c0_i32_0 = arith.constant 0 : i32
    %c0_i32_1 = arith.constant 0 : i32
    return %c0_i32, %c0_i32_0 : i32, i32
  }
  func.func @transform_25(%arg0: i32) -> (i32, i32) {
    %c0_i32 = arith.constant 0 : i32
    %c0_i32_0 = arith.constant 0 : i32
    %c0_i32_1 = arith.constant 0 : i32
    return %c0_i32, %c0_i32_0 : i32, i32
  }
  func.func @transform_26(%arg0: i32) -> (i32, i32) {
    %c0_i32 = arith.constant 0 : i32
    %c0_i32_0 = arith.constant 0 : i32
    %c0_i32_1 = arith.constant 0 : i32
    return %c0_i32, %c0_i32_0 : i32, i32
  }
  func.func @transform_27(%arg0: i32) -> (i32, i32) {
    %c0_i32 = arith.constant 0 : i32
    %c0_i32_0 = arith.constant 0 : i32
    %c0_i32_1 = arith.constant 0 : i32
    return %c0_i32, %c0_i32_0 : i32, i32
  }
  func.func @transform_28(%arg0: i32) -> (i32, i32) {
    %c0_i32 = arith.constant 0 : i32
    %c0_i32_0 = arith.constant 0 : i32
    %c0_i32_1 = arith.constant 0 : i32
    return %c0_i32, %c0_i32_0 : i32, i32
  }
  func.func @transform_29(%arg0: i32) -> (i32, i32) {
    %c0_i32 = arith.constant 0 : i32
    %c0_i32_0 = arith.constant 0 : i32
    %c0_i32_1 = arith.constant 0 : i32
    return %c0_i32, %c0_i32_0 : i32, i32
  }
  func.func @transform_30(%arg0: i32) -> (i32, i32) {
    %c0_i32 = arith.constant 0 : i32
    %c0_i32_0 = arith.constant 0 : i32
    %c0_i32_1 = arith.constant 0 : i32
    return %c0_i32, %c0_i32_0 : i32, i32
  }
  func.func @transform_31(%arg0: i32) -> (i32, i32) {
    %c0_i32 = arith.constant 0 : i32
    %c0_i32_0 = arith.constant 0 : i32
    %c0_i32_1 = arith.constant 0 : i32
    return %c0_i32, %c0_i32_0 : i32, i32
  }
  func.func @transform_32(%arg0: i32) -> (i32, i32) {
    %c0_i32 = arith.constant 0 : i32
    %c0_i32_0 = arith.constant 0 : i32
    %c0_i32_1 = arith.constant 0 : i32
    return %c0_i32, %c0_i32_0 : i32, i32
  }
  func.func @transform_33(%arg0: i32) -> (i32, i32) {
    %c0_i32 = arith.constant 0 : i32
    %c0_i32_0 = arith.constant 0 : i32
    %c0_i32_1 = arith.constant 0 : i32
    return %c0_i32, %c0_i32_0 : i32, i32
  }
  func.func @transform_34(%arg0: i32) -> (i32, i32) {
    %c0_i32 = arith.constant 0 : i32
    %c0_i32_0 = arith.constant 0 : i32
    %c0_i32_1 = arith.constant 0 : i32
    return %c0_i32, %c0_i32_0 : i32, i32
  }
  func.func @transform_35(%arg0: i32) -> (i32, i32) {
    %c0_i32 = arith.constant 0 : i32
    %c0_i32_0 = arith.constant 0 : i32
    %c0_i32_1 = arith.constant 0 : i32
    return %c0_i32, %c0_i32_0 : i32, i32
  }
  func.func @transform_36(%arg0: i32) -> (i32, i32, i32) {
    %c0_i32 = arith.constant 0 : i32
    %c0_i32_0 = arith.constant 0 : i32
    %c0_i32_1 = arith.constant 0 : i32
    return %arg0, %c0_i32, %c0_i32_0 : i32, i32, i32
  }
  func.func @transform_37(%arg0: i32) -> (i32, i32, i32) {
    %c0_i32 = arith.constant 0 : i32
    %c0_i32_0 = arith.constant 0 : i32
    %c0_i32_1 = arith.constant 0 : i32
    return %arg0, %c0_i32, %c0_i32_0 : i32, i32, i32
  }
}

</mosaic_0001>

<bundles_post_ra>
// kernel: gp_unet_forward.1
= control target key start
LH: loop header
LB: loop body
LE: loop exit
PB: predicated region body
PF: predicated region fallthrough
CT: control target
= control target key end

     0   :  { %s13386_s6 = smov 1   ;;  %s13387_s10 = smov 2   ;;  %s16856_s0 = inlined_call_operand.smem [shape: u32[38], index: -1, kind: input, shape index: {}] }
   0x1   :  { %s13443_s5 = sld [smem:[%s16856_s0]]   ;;  %s13388_s14 = smov 3  }
   0x2   :  { %s13448_s9 = sld [smem:[%s16856_s0 + %s13386_s6]]   ;;  %s13389_s18 = smov 4  }
   0x3   :  { %s13453_s13 = sld [smem:[%s16856_s0 + %s13387_s10]]   ;;  %s13390_s22 = smov 5  }
   0x4   :  { %s13458_s17 = sld [smem:[%s16856_s0 + %s13388_s14]]   ;;  %s13391_s26 = smov 6  }
   0x5   :  { %s13463_s21 = sld [smem:[%s16856_s0 + %s13389_s18]]   ;;  %s13392_s30 = smov 7  }
   0x6   :  { %s13468_s25 = sld [smem:[%s16856_s0 + %s13390_s22]]   ;;  %s13393_s4 = smov 8  }
   0x7   :  { %17005 = sst [smem:[#allocation3_spill]] %s13443_s5  ;;  %s13394_s10 = smov 9  }
   0x8   :  { %17006 = sst [smem:[#allocation4_spill]] %s13448_s9  ;;  %s13395_s15 = smov 10  }
   0x9   :  { %17007 = sst [smem:[#allocation5_spill]] %s13453_s13  ;;  %s13396_s20 = smov 11  }
   0xa   :  { %17008 = sst [smem:[#allocation6_spill]] %s13458_s17  ;;  %s13398_s1 = smov 13  }
   0xb   :  { %17009 = sst [smem:[#allocation7_spill]] %s13463_s21  ;;  %s13399_s7 = smov 14  }
   0xc   :  { %17010 = sst [smem:[#allocation8_spill]] %s13468_s25  ;;  %s13401_s22 = smov 16  }
   0xd   :  { %s13473_s29 = sld [smem:[%s16856_s0 + %s13391_s26]]   ;;  %s13397_s26 = smov 12  }
   0xe   :  { %s13478_s3 = sld [smem:[%s16856_s0 + %s13392_s30]]   ;;  %s13402_s28 = smov 17  }
   0xf   :  { %s13483_s8 = sld [smem:[%s16856_s0 + %s13393_s4]]   ;;  %s13421_s23 = smov 36  }
  0x10   :  { %s13488_s14 = sld [smem:[%s16856_s0 + %s13394_s10]]  }
  0x11   :  { %s13493_s19 = sld [smem:[%s16856_s0 + %s13395_s15]]   ;;  %s13400_s15 = smov 15  }
  0x12   :  { %s13498_s24 = sld [smem:[%s16856_s0 + %s13396_s20]]  }
  0x13   :  { %17011 = sst [smem:[#allocation9_spill]] %s13473_s29 }
  0x14   :  { %17012 = sst [smem:[#allocation10_spill]] %s13478_s3 }
  0x15   :  { %17013 = sst [smem:[#allocation11_spill]] %s13483_s8 }
  0x16   :  { %17014 = sst [smem:[#allocation12_spill]] %s13488_s14 }
  0x17   :  { %s13503_s30 = sld [smem:[%s16856_s0 + %s13397_s26]]  }
  0x18   :  { %s13508_s6 = sld [smem:[%s16856_s0 + %s13398_s1]]   ;;  %s13422_s1 = smov 37  }
  0x19   :  { %s13513_s12 = sld [smem:[%s16856_s0 + %s13399_s7]]   ;;  %s13403_s7 = smov 18  }
  0x1a   :  { %s13518_s20 = sld [smem:[%s16856_s0 + %s13400_s15]]   ;;  %s13404_s15 = smov 19  }
  0x1b   :  { %s13523_s27 = sld [smem:[%s16856_s0 + %s13401_s22]]   ;;  %s13405_s22 = smov 20  }
  0x1c   :  { %s13528_s4 = sld [smem:[%s16856_s0 + %s13402_s28]]   ;;  %s13406_s28 = smov 21  }
  0x1d   :  { %17015 = sst [smem:[#allocation13_spill]] %s13503_s30 }
  0x1e   :  { %17016 = sst [smem:[#allocation14_spill]] %s13508_s6 }
  0x1f   :  { %17017 = sst [smem:[#allocation15_spill]] %s13513_s12 }
  0x20   :  { %s13533_s3 = sld [smem:[%s16856_s0 + %s13403_s7]]   ;;  %s13407_s7 = smov 22  }
  0x21   :  { %17018 = sst [smem:[#allocation16_spill]] %s13523_s27 }
  0x22   :  { %17019 = sst [smem:[#allocation17_spill]] %s13528_s4 }
  0x23   :  { %s13538_s29 = sld [smem:[%s16856_s0 + %s13404_s15]]   ;;  %s13408_s15 = smov 23  }
  0x24   :  { %s13543_s27 = sld [smem:[%s16856_s0 + %s13405_s22]]   ;;  %s13409_s22 = smov 24  }
  0x25   :  { %s13548_s17 = sld [smem:[%s16856_s0 + %s13406_s28]]   ;;  %s13410_s28 = smov 25  }
  0x26   :  { %17020 = sst [smem:[#allocation18_spill]] %s13533_s3 }
  0x27   :  { %s13553_s3 = sld [smem:[%s16856_s0 + %s13407_s7]]   ;;  %s13411_s7 = smov 26  }
  0x28   :  { %s13558_s25 = sld [smem:[%s16856_s0 + %s13408_s15]]   ;;  %s13412_s15 = smov 27  }
  0x29   :  { %s13568_s12 = sld [smem:[%s16856_s0 + %s13410_s28]]   ;;  %s13414_s28 = smov 29  }
  0x2a   :  { %17021 = sst [smem:[#allocation19_spill]] %s13543_s27 }
  0x2b   :  { %s13563_s27 = sld [smem:[%s16856_s0 + %s13409_s22]]   ;;  %s13413_s22 = smov 28  }
  0x2c   :  { %s13583_s30 = sld [smem:[%s16856_s0 + %s13413_s22]]   ;;  %s13417_s22 = smov 32  }
  0x2d   :  { %17022 = sst [smem:[#allocation20_spill]] %s13553_s3 }
  0x2e   :  { %17023 = sst [smem:[#allocation21_spill]] %s13558_s25 }
  0x2f   :  { %17024 = sst [smem:[#allocation22_spill]] %s13568_s12 }
  0x30   :  { %s13573_s3 = sld [smem:[%s16856_s0 + %s13411_s7]]   ;;  %s13415_s7 = smov 30  }
  0x31   :  { %s13578_s25 = sld [smem:[%s16856_s0 + %s13412_s15]]   ;;  %s13416_s15 = smov 31  }
  0x32   :  { %s13588_s12 = sld [smem:[%s16856_s0 + %s13414_s28]]   ;;  %s13418_s28 = smov 33  }
  0x33   :  { %s13593_s13 = sld [smem:[%s16856_s0 + %s13415_s7]]   ;;  %s13419_s7 = smov 34  }
  0x34   :  { %s13603_s21 = sld [smem:[%s16856_s0 + %s13417_s22]]  }
  0x36   :  { %17025 = sst [smem:[#allocation23_spill]] %s13573_s3 }
  0x37   :  { %17026 = sst [smem:[#allocation24_spill]] %s13578_s25 }
  0x38   :  { %17027 = sst [smem:[#allocation25_spill]] %s13588_s12 }
  0x39   :  { %17028 = sst [smem:[#allocation26_spill]] %s13593_s13 }
  0x3a   :  { %s13598_s25 = sld [smem:[%s16856_s0 + %s13416_s15]]   ;;  %s13420_s15 = smov 35  }
  0x3b   :  { %17030 = sst [smem:[#allocation28_spill]] %s13603_s21 }
  0x3c   :  { %s13608_s12 = sld [smem:[%s16856_s0 + %s13418_s28]]  }
  0x3d   :  { %s13613_s13 = sld [smem:[%s16856_s0 + %s13419_s7]]   ;;  %s13628_s7 = smov 0  }
  0x3e   :  { %s13621_s21 = sld [smem:[%s16856_s0 + %s13421_s23]]  }
  0x40   :  { %17029 = sst [smem:[#allocation27_spill]] %s13598_s25 }
  0x41   :  { %s10342_s25 = sld [smem:[%s16856_s0 + %s13420_s15]]  }
  0x42   :  { %17031 = sst [smem:[#allocation29_spill]] %s13608_s12 }
  0x43   :  { %s13626_s12 = sld [smem:[%s16856_s0 + %s13422_s1]]  }
  0x47   :  { %v81_v0 = vstv %s10342_s25 }
  0x48   :  { %82 = vst [vmem:[#allocation2] sm:$0x1] %v81_v0 }
  0x49 LB: > { %s17032_s14 = sld [smem:[#allocation12_spill]]  ;;  %s10345_s10 = sadd.s32 4294967295, %s13384_s7   ;;  %s13384_s7 = sphi %s13628_s7, %s88_s7  }
  0x4a   : > { %s17033_s9 = sld [smem:[#allocation4_spill]]  ;;  %p10349_p0 = scmp.ge.s32.totalorder %s13384_s7, 1 }
  0x4b   : > { %s17034_s6 = sld [smem:[#allocation14_spill]]  ;;  %p1030_p1 = scmp.lt.s32.totalorder %s13384_s7, 3 }
  0x4c   : > { %s17035_s4 = sld [smem:[#allocation17_spill]] }
  0x4d   : > { %s17036_s3 = sld [smem:[#allocation23_spill]]  ;;  %p1031_p2 = pnand %p10349_p0, %p1030_p1 }
  0x4f   : > { %1034 = sbr.rel (%p1031_p2) target bundleno = 6334 (0x18be), region = 164 }
  0x54   : > { %p1124_p3 = scmp.lt.s32.totalorder %s10345_s10, 1  ;;  %s17037_s5 = sld [smem:[#allocation3_spill]]  ;;  %v16878_v3 = vmov 0   ;;  %v1328_v4 = vld [vmem:[%s17032_s14] sm:$0xff]  ;;  %v1329_v5 = vld [vmem:[%s17032_s14 + $0x8] sm:$0xff]  ;;  %v16877_v6 = vlaneseq  ;;  %vm1349_vm3 = vcmask 1043456  }
  0x55   : > { %s16976_s11 = smov 113   ;;  %s16946_s15 = smov 111   ;;  %1388 = vmatprep.mubr.bf16.mxu0 %v16878_v3  ;;  %13069 = vset.pattern.permute.xlu0 %v16878_v3  ;;  %v10359_v11 = vld [vmem:[%s17033_s9 + $0x10] sm:$0x3]  ;;  %v10357_v14 = vld [vmem:[%s17033_s9 + $0xc] sm:$0x3] }
  0x56   : > { %s17198_s10 = smov (!%p1124_p3, %s10345_s10), 1  ;;  %s16986_s16 = smov 112   ;;  %13070 = vset.pattern.permute.xlu1 %v16878_v3  ;;  %v13682_v7 = vshrl.u32 %v16877_v6, 7  ;;  %v13685_v8 = vand.u32 127, %v16877_v6  ;;  %v10358_v15 = vld [vmem:[%s17033_s9 + $0xe] sm:$0x3] }
  0x57   : > { %s10891_s0 = sshll.u32 %s17198_s10, 4  ;;  %s16957_s18 = smov 127   ;;  %v10356_v25 = vld [vmem:[%s17033_s9 + $0xa] sm:$0x3]  ;;  %v10354_v52 = vld [vmem:[%s17033_s9 + $0x4] sm:$0x3] }
  0x58   : > { %s16953_s23 = smov 15   ;;  %s16955_s22 = smov 1   ;;  %17038 = vst [vmem:[#allocation30_spill] sm:$0xff] %v13682_v7  ;;  %17039 = vst [vmem:[#allocation31_spill] sm:$0xff] %v13685_v8  ;;  %v13688_v9 = vsub.s32 0, %v13682_v7  ;;  %v13691_v10 = vsub.s32 1, %v13682_v7 }
  0x59   : > { %s16948_s26 = smov 17   ;;  %s16950_s1 = smov 16   ;;  %vm1298_vm0 = vcmp.lt.s32.totalorder %v13685_v8, 111  ;;  %vm1254_vm1 = vcmp.lt.s32.totalorder %v13685_v8, 113  ;;  %vm1276_vm2 = vcmp.lt.s32.totalorder %v13685_v8, 112  ;;  %vm1232_vm4 = vcmp.lt.s32.totalorder %v13685_v8, 127 }
  0x5a   : > { %s1128_s25 = scalar_lea.vmem %s17037_s5, %s10891_s0  ;;  %17040 = vst [vmem:[#allocation32_spill] sm:$0xff] %v13688_v9  ;;  %v13698_v16 = vrot.slane %v10359_v11, %v13691_v10  ;;  %v13701_v17 = vrot.slane %v10359_v11, %v13688_v9  ;;  %v13705_v18 = vrot.slane %v10357_v14, %v13688_v9  ;;  %v13709_v21 = vrot.slane %v10357_v14, %v13691_v10  ;;  %v10355_v53 = vld [vmem:[%s17033_s9 + $0x6] sm:$0x3]  ;;  %v1148_v14 = vld [vmem:[%s17033_s9] sm:$0x3]  ;;  %s17056_s8 = sld [smem:[#allocation11_spill]] }
  0x5b   : > { %v13640_v1 = vld [vmem:[%s1128_s25] sm:$0xff]  ;;  %v13646_v2 = vld [vmem:[%s1128_s25 + $0x8] sm:$0xff]  ;;  %v13714_v23 = vrot.slane %v10358_v15, %v13688_v9  ;;  %v13722_v27 = vrot.slane %v10358_v15, %v13691_v10  ;;  %v13730_v35 = vrot.slane %v10356_v25, %v13688_v9  ;;  %v13738_v39 = vrot.slane %v10356_v25, %v13691_v10  ;;  %s17058_s28 = sld [smem:[#allocation7_spill]]  ;;  %s17182_s5 = smov 16  }
  0x5c   : > { %1250 = vrot.lane.b32.xlu1 %v13640_v1, %s16976_s11  ;;  %1294 = vrot.lane.b32.xlu0 %v13640_v1, %s16946_s15  ;;  %17041 = vst [vmem:[#allocation33_spill] sm:$0xff] %v13698_v16  ;;  %17042 = vst [vmem:[#allocation34_spill] sm:$0xff] %v13701_v17  ;;  %vm1188_vm5 = vcmp.lt.s32.totalorder %v13685_v8, 15  ;;  %v13755_v58 = vrot.slane %v10354_v52, %v13688_v9  ;;  %v13758_v59 = vrot.slane %v10354_v52, %v13691_v10  ;;  %v10353_v15 = vld [vmem:[%s17033_s9 + $0x2] sm:$0x3]  ;;  %vm1345_vm9 = vcmask 588800  }
  0x5d   : > { %17043 = vst [vmem:[#allocation35_spill] sm:$0xff] %v13705_v18  ;;  %17044 = vst [vmem:[#allocation36_spill] sm:$0xff] %v13709_v21  ;;  %vm1210_vm6 = vcmp.lt.s32.totalorder %v13685_v8, 1  ;;  %v13762_v60 = vrot.slane %v10355_v53, %v13688_v9  ;;  %v13765_v61 = vrot.slane %v10355_v53, %v13691_v10  ;;  %vm1145_vm7 = vcmp.lt.s32.totalorder %v13685_v8, 17  ;;  %s17063_s2 = sld [smem:[#allocation5_spill]] }
  0x5e   : > { %17045 = vst [vmem:[#allocation37_spill] sm:$0xff] %v13714_v23  ;;  %17046 = vst [vmem:[#allocation38_spill] sm:$0xff] %v13722_v27  ;;  %v13783_v25 = vrot.slane %v1148_v14, %v13688_v9  ;;  %vm1166_vm8 = vcmp.lt.s32.totalorder %v13685_v8, 16  ;;  %vm1572_vm10 = vcmask 130048   ;;  %vm1802_vm11 = vcmask 523264   ;;  %s17078_s0 = sld [smem:[#allocation13_spill]] }
  0x5f   : > { %17047 = vst [vmem:[#allocation39_spill] sm:$0xff] %v13730_v35  ;;  %17048 = vst [vmem:[#allocation40_spill] sm:$0xff] %v13738_v39  ;;  %s17088_s25 = sld [smem:[#allocation15_spill]]  ;;  %vm3358_vm12 = vcmask 261120   ;;  %vm13433_vm13 = vmmov 0   ;;  %vm10228_vm15 = vcmask 0  }
  0x60   : > { %1252 = vrot.lane.b32.xlu1 %v13646_v2, %s16976_s11  ;;  %1296 = vrot.lane.b32.xlu0 %v13646_v2, %s16946_s15  ;;  %17049 = vst [vmem:[#allocation41_spill] sm:$0xff] %v13755_v58  ;;  %17050 = vst [vmem:[#allocation42_spill] sm:$0xff] %v13758_v59  ;;  %s17185_s9 = sld [smem:[#allocation26_spill]] }
  0x61   : > { %17051 = vst [vmem:[#allocation43_spill] sm:$0xff] %v13762_v60  ;;  %17052 = vst [vmem:[#allocation44_spill] sm:$0xff] %v13765_v61  ;;  %s17187_s14 = sld [smem:[#allocation27_spill]] }
  0x62   : > { %17053 = vst [vmem:[#allocation45_spill] sm:$0xff] %v13783_v25 }
  0x63   : > { %v14356_v6 = vld [vmem:[%s17063_s2 + $0x168] sm:$0xff]  ;;  %v14366_v3 = vld [vmem:[%s17063_s2 + $0x160] sm:$0xff] }
  0x64   : > { %1274 = vrot.lane.b32.xlu1 %v13646_v2, %s16986_s16  ;;  %1272 = vrot.lane.b32.xlu0 %v13640_v1, %s16986_s16  ;;  %v14369_v7 = vld [vmem:[%s17063_s2 + $0x1a0] sm:$0xff]  ;;  %v14487_v8 = vld [vmem:[%s17063_s2 + $0x208] sm:$0xff] }
  0x65   : > { %17064 = vst [vmem:[#allocation53_spill] sm:$0xff] %v14369_v7  ;;  %17075 = vst [vmem:[#allocation64_spill] sm:$0xff] %v14487_v8 }
  0x68   : > { %1230 = vrot.lane.b32.xlu1 %v13646_v2, %s16957_s18  ;;  %1228 = vrot.lane.b32.xlu0 %v13640_v1, %s16957_s18 }
  0x6c   : > { %1186 = vrot.lane.b32.xlu1 %v13646_v2, %s16953_s23  ;;  %1184 = vrot.lane.b32.xlu0 %v13640_v1, %s16953_s23 }
  0x70   : > { %1208 = vrot.lane.b32.xlu1 %v13646_v2, %s16955_s22  ;;  %1206 = vrot.lane.b32.xlu0 %v13640_v1, %s16955_s22 }
  0x74   : > { %1141 = vrot.lane.b32.xlu1 %v13646_v2, %s16948_s26  ;;  %1139 = vrot.lane.b32.xlu0 %v13640_v1, %s16948_s26 }
  0x78   : > { %1164 = vrot.lane.b32.xlu1 %v13646_v2, %s16950_s1  ;;  %1162 = vrot.lane.b32.xlu0 %v13640_v1, %s16950_s1 }
  0x7c   : > { %1332 = vperm.xlu0 %13069, %v1328_v4   ;;  %1337 = vperm.xlu1 %13070, %v1329_v5  }
  0xce   : > { %v1251_v12 = vpop.permute.xlu1 %1250  ;;  %v1295_v13 = vpop.permute.xlu0 %1294 }
  0xd2   : > { %v1253_v19 = vpop.permute.xlu1 %1252  ;;  %v1297_v20 = vpop.permute.xlu0 %1296 }
  0xd3   : > { %v1299_v22 = vsel %vm1298_vm0, %v1295_v13, %v1297_v20  ;;  %v1300_v24 = vsel %vm1298_vm0, %v1297_v20, %v1295_v13  ;;  %v1255_v26 = vsel %vm1254_vm1, %v1251_v12, %v1253_v19  ;;  %v1256_v30 = vsel %vm1254_vm1, %v1253_v19, %v1251_v12 }
  0xd4   : > { %v1315_v28 = vmul.f32 %v13698_v16, %v1300_v24  ;;  %v1314_v29 = vmul.f32 %v13701_v17, %v1299_v22  ;;  %v1270_v36 = vmul.f32 %v13705_v18, %v1255_v26  ;;  %v1271_v40 = vmul.f32 %v13709_v21, %v1256_v30 }
  0xd5   : > { %v13786_v26 = vrot.slane %v1148_v14, %v13691_v10  ;;  %v3305_v14 = vld [vmem:[%s13518_s20 + $0x8] sm:$0xff] }
  0xd6   : > { %v1275_v31 = vpop.permute.xlu1 %1274  ;;  %v1273_v32 = vpop.permute.xlu0 %1272  ;;  %v1325_v33 = vpack.c.bf16 %v1315_v28, %v1315_v28  ;;  %v1324_v34 = vpack.c.bf16 %v1314_v29, %v1314_v29  ;;  %v13790_v28 = vrot.slane %v10353_v15, %v13688_v9  ;;  %v13793_v29 = vrot.slane %v10353_v15, %v13691_v10  ;;  %v3306_v15 = vld [vmem:[%s13518_s20 + $0x10] sm:$0xff]  ;;  %v14376_v9 = vld [vmem:[%s17063_s2 + $0x158] sm:$0xff] }
  0xd7   : > { %v1277_v37 = vsel %vm1276_vm2, %v1273_v32, %v1275_v31  ;;  %v1278_v38 = vsel %vm1276_vm2, %v1275_v31, %v1273_v32  ;;  %17054 = vst [vmem:[#allocation46_spill] sm:$0xff] %v13786_v26 }
  0xd8   : > { %v1292_v41 = vmul.f32 %v13714_v23, %v1277_v37  ;;  %v1293_v42 = vmul.f32 %v13722_v27, %v1278_v38  ;;  %10361 = vmatprep.subr.msk.bf16.mxu0 %vm1349_vm3, %v1325_v33  ;;  %v1351_v43 = vsel %vm1349_vm3, %v1324_v34, 0  ;;  %17055 = vst [vmem:[#allocation47_spill] sm:$0xff] %v13790_v28  ;;  %17057 = vst [vmem:[#allocation48_spill] sm:$0xff] %v13793_v29 }
  0xd9   : > { %1363 = vmatpush1.bf16.msra.mxu0 %v1351_v43  ;;  %v13071_v43 = vld [vmem:[%s17056_s8] sm:$0xff]   ;;  %s17184_s8 = smov 111  }
  0xda   : > { %v1231_v44 = vpop.permute.xlu1 %1230  ;;  %v1229_v45 = vpop.permute.xlu0 %1228  ;;  %v1323_v46 = vpack.c.bf16 %v1293_v42, %v1271_v40  ;;  %v1322_v47 = vpack.c.bf16 %v1292_v41, %v1270_v36 }
  0xdb   : > { %v1233_v48 = vsel %vm1232_vm4, %v1229_v45, %v1231_v44  ;;  %v1234_v49 = vsel %vm1232_vm4, %v1231_v44, %v1229_v45 }
  0xdc   : > { %v1248_v50 = vmul.f32 %v13730_v35, %v1233_v48  ;;  %v1249_v51 = vmul.f32 %v13738_v39, %v1234_v49  ;;  %1364 = vmatprep.subr.bf16.mxu0 %v1323_v46 }
  0xdd   : > { %1365 = vmatpush1.bf16.msra.mxu0 %v1322_v47 }
  0xde   : > { %v1187_v54 = vpop.permute.xlu1 %1186  ;;  %v1185_v55 = vpop.permute.xlu0 %1184  ;;  %v1321_v56 = vpack.c.bf16 %v1249_v51, %v13646_v2  ;;  %v1320_v57 = vpack.c.bf16 %v1248_v50, %v13640_v1 }
  0xdf   : > { %v1189_v62 = vsel %vm1188_vm5, %v1185_v55, %v1187_v54  ;;  %v1190_v63 = vsel %vm1188_vm5, %v1187_v54, %v1185_v55 }
  0xe0   : > { %1366 = vmatprep.subr.bf16.mxu0 %v1321_v56  ;;  %v1204_v5 = vmul.f32 %v13755_v58, %v1190_v63  ;;  %v1205_v11 = vmul.f32 %v13758_v59, %v1189_v62 }
  0xe1   : > { %1367 = vmatpush1.bf16.msra.mxu0 %v1320_v57 }
  0xe2   : > { %v1209_v0 = vpop.permute.xlu1 %1208  ;;  %v1207_v1 = vpop.permute.xlu0 %1206 }
  0xe3   : > { %v1211_v2 = vsel %vm1210_vm6, %v1207_v1, %v1209_v0  ;;  %v1212_v4 = vsel %vm1210_vm6, %v1209_v0, %v1207_v1  ;;  %v13074_v0 = vld [vmem:[%s13493_s19 + $0x4] ss:$8 sps:$4 sm:$0xff]  }
  0xe4   : > { %v1226_v12 = vmul.f32 %v13762_v60, %v1212_v4  ;;  %v1227_v13 = vmul.f32 %v13765_v61, %v1211_v2  ;;  %10365 = vmatprep.mubr.msk.bf16.mxu1 %vm1572_vm10, %v13074_v0  ;;  %v1551_v1 = vld [vmem:[%s13498_s24] sm:$0xff]  ;;  %v1552_v2 = vld [vmem:[%s13498_s24 + $0x8] sm:$0xff] }
  0xe5   : > { %v2485_v4 = vld [vmem:[%s17034_s6] sm:$0xff]  ;;  %v8033_v0 = vld [vmem:[%s13563_s27 + $0x8] sm:$0xff] }
  0xe6   : > { %v1142_v19 = vpop.permute.xlu1 %1141  ;;  %v1140_v20 = vpop.permute.xlu0 %1139  ;;  %v1319_v22 = vpack.c.bf16 %v1227_v13, %v1205_v11  ;;  %v1318_v24 = vpack.c.bf16 %v1226_v12, %v1204_v5  ;;  %v2486_v5 = vld [vmem:[%s17034_s6 + $0x8] sm:$0xff]  ;;  %v2487_v11 = vld [vmem:[%s17034_s6 + $0x10] sm:$0xff]  ;;  %v2488_v12 = vld [vmem:[%s17034_s6 + $0x18] sm:$0xff]  ;;  %s17183_s6 = smov 17  }
  0xe7   : > { %v1146_v30 = vsel %vm1145_vm7, %v1140_v20, %v1142_v19  ;;  %v1147_v31 = vsel %vm1145_vm7, %v1142_v19, %v1140_v20  ;;  %v3304_v13 = vld [vmem:[%s13518_s20] sm:$0xff]  ;;  %v3307_v19 = vld [vmem:[%s13518_s20 + $0x18] sm:$0xff] }
  0xe8   : > { %1368 = vmatprep.subr.bf16.mxu0 %v1319_v22  ;;  %v1160_v37 = vmul.f32 %v13783_v25, %v1147_v31  ;;  %v1161_v10 = vmul.f32 %v13786_v26, %v1146_v30  ;;  %v4305_v20 = vld [vmem:[%s17035_s4] sm:$0xff]  ;;  %v4306_v22 = vld [vmem:[%s17035_s4 + $0x8] sm:$0xff]  ;;  %v4308_v30 = vld [vmem:[%s17035_s4 + $0x18] sm:$0xff] }
  0xe9   : > { %1369 = vmatpush1.bf16.msra.mxu0 %v1318_v24  ;;  %v4307_v24 = vld [vmem:[%s17035_s4 + $0x10] sm:$0xff]  ;;  %v4309_v31 = vld [vmem:[%s17035_s4 + $0x20] sm:$0xff] }
  0xea   : > { %v1165_v32 = vpop.permute.xlu1 %1164  ;;  %v1163_v33 = vpop.permute.xlu0 %1162 }
  0xeb   : > { %v1167_v34 = vsel %vm1166_vm8, %v1163_v33, %v1165_v32  ;;  %v1168_v36 = vsel %vm1166_vm8, %v1165_v32, %v1163_v33  ;;  %v4310_v32 = vld [vmem:[%s17035_s4 + $0x28] sm:$0xff]  ;;  %v4311_v33 = vld [vmem:[%s17035_s4 + $0x30] sm:$0xff] }
  0xec   : > { %v1182_v38 = vmul.f32 %v13790_v28, %v1168_v36  ;;  %v1183_v40 = vmul.f32 %v13793_v29, %v1167_v34  ;;  %v4312_v34 = vld [vmem:[%s17035_s4 + $0x38] sm:$0xff]  ;;  %v5493_v36 = vld [vmem:[%s13538_s29 + $0x30] sm:$0xff]  ;;  %s17181_s4 = smov 15  }
  0xee   : > { %v1317_v41 = vpack.c.bf16 %v1183_v40, %v1161_v10  ;;  %v1316_v42 = vpack.c.bf16 %v1182_v38, %v1160_v37  ;;  %v5494_v37 = vld [vmem:[%s13538_s29 + $0x38] sm:$0xff]  ;;  %v5491_v10 = vld [vmem:[%s13538_s29 + $0x20] sm:$0xff]  ;;  %v5492_v38 = vld [vmem:[%s13538_s29 + $0x28] sm:$0xff] }
  0xef   : > { %v5489_v40 = vld [vmem:[%s13538_s29 + $0x10] sm:$0xff] }
  0xf0   : > { %1370 = vmatprep.subr.bf16.mxu0 %v1317_v41  ;;  %v5490_v41 = vld [vmem:[%s13538_s29 + $0x18] sm:$0xff] }
  0xf1   : > { %1371 = vmatpush1.bf16.msra.mxu0 %v1316_v42  ;;  %v5487_v42 = vld [vmem:[%s13538_s29] sm:$0xff] }
  0xf4   : > { %10362 = vmatmul.mubr.msk.bf16.vlgmr.msra.gmra.mxu0 %vm1345_vm9, %v13071_v43  ;;  %v5488_v43 = vld [vmem:[%s13538_s29 + $0x8] sm:$0xff] }
  0xf7   : > { %v1333_v44 = vpop.permute.xlu0 %1332  ;;  %v1338_v48 = vpop.permute.xlu1 %1337 }
 0x1b4   : > { %v1390_v45 = vpop.f32.mrf.mxu0 }
 0x1b5   : > { %v1391_v46 = vadd.f32 %v1390_v45, %v1333_v44 }
 0x1b6   : > { %v1392_v47 = vpop.f32.mrf.mxu0 }
 0x1b7   : > { %v13808_v49 = vmax.f32 %v1391_v46, 0.0  ;;  %v1393_v51 = vadd.f32 %v1392_v47, %v1333_v44  ;;  %v6302_v44 = vld [vmem:[%s13548_s17] sm:$0xff]  ;;  %v6303_v46 = vld [vmem:[%s13548_s17 + $0x8] sm:$0xff]  ;;  %v6304_v47 = vld [vmem:[%s13548_s17 + $0x10] sm:$0xff] }
 0x1b8   : > { %v1394_v50 = vpop.f32.mrf.mxu0 }
 0x1b9   : > { %v1395_v52 = vadd.f32 %v1394_v50, %v1338_v48  ;;  %1499 = vrot.lane.b32.xlu1 %v13808_v49, %s16986_s16  ;;  %v13814_v56 = vmax.f32 %v1393_v51, 0.0  ;;  %v6305_v51 = vld [vmem:[%s13548_s17 + $0x18] sm:$0xff] }
 0x1ba   : > { %v1396_v53 = vpop.f32.mrf.mxu0 }
 0x1bb   : > { %v13812_v54 = vmax.f32 %v1395_v52, 0.0  ;;  %v1397_v55 = vadd.f32 %v1396_v53, %v1338_v48  ;;  %v8032_v52 = vld [vmem:[%s13563_s27] sm:$0xff] }
 0x1bd   : > { %v13816_v57 = vmax.f32 %v1397_v55, 0.0  ;;  %1501 = vrot.lane.b32.xlu0 %v13812_v54, %s16986_s16  ;;  %1483 = vrot.lane.b32.xlu1 %v13808_v49, %s16976_s11  ;;  %v1539_v62 = vpack.c.bf16 %v13812_v54, %v13808_v49 }
 0x1bf   : > { %v1540_v63 = vpack.c.bf16 %v13816_v57, %v13814_v56 }
 0x1c1   : > { %1485 = vrot.lane.b32.xlu0 %v13812_v54, %s16976_s11  ;;  %1467 = vrot.lane.b32.xlu1 %v13808_v49, %s16957_s18 }
 0x1c5   : > { %1469 = vrot.lane.b32.xlu0 %v13812_v54, %s16957_s18  ;;  %1451 = vrot.lane.b32.xlu1 %v13808_v49, %s16955_s22 }
 0x1c9   : > { %1453 = vrot.lane.b32.xlu0 %v13812_v54, %s16955_s22  ;;  %1435 = vrot.lane.b32.xlu1 %v13808_v49, %s16953_s23 }
 0x1cd   : > { %1437 = vrot.lane.b32.xlu0 %v13812_v54, %s16953_s23  ;;  %1419 = vrot.lane.b32.xlu1 %v13808_v49, %s16950_s1 }
 0x1d1   : > { %1421 = vrot.lane.b32.xlu0 %v13812_v54, %s16950_s1  ;;  %1403 = vrot.lane.b32.xlu1 %v13808_v49, %s16948_s26 }
 0x1d5   : > { %1405 = vrot.lane.b32.xlu0 %v13812_v54, %s16948_s26  ;;  %1503 = vrot.lane.b32.xlu1 %v13814_v56, %s16986_s16 }
 0x1d9   : > { %1505 = vrot.lane.b32.xlu0 %v13816_v57, %s16986_s16  ;;  %1487 = vrot.lane.b32.xlu1 %v13814_v56, %s16976_s11 }
 0x1dd   : > { %1489 = vrot.lane.b32.xlu0 %v13816_v57, %s16976_s11  ;;  %1471 = vrot.lane.b32.xlu1 %v13814_v56, %s16957_s18 }
 0x1e1   : > { %1473 = vrot.lane.b32.xlu0 %v13816_v57, %s16957_s18  ;;  %1515 = vrot.lane.b32.xlu1 %v13808_v49, %s16946_s15 }
 0x1e5   : > { %1517 = vrot.lane.b32.xlu0 %v13812_v54, %s16946_s15  ;;  %1455 = vrot.lane.b32.xlu1 %v13814_v56, %s16955_s22 }
 0x1e9   : > { %1457 = vrot.lane.b32.xlu0 %v13816_v57, %s16955_s22  ;;  %1439 = vrot.lane.b32.xlu1 %v13814_v56, %s16953_s23 }
 0x1ed   : > { %1441 = vrot.lane.b32.xlu0 %v13816_v57, %s16953_s23  ;;  %1423 = vrot.lane.b32.xlu1 %v13814_v56, %s16950_s1 }
 0x1f1   : > { %1425 = vrot.lane.b32.xlu0 %v13816_v57, %s16950_s1  ;;  %1407 = vrot.lane.b32.xlu1 %v13814_v56, %s16948_s26 }
 0x1f5   : > { %1409 = vrot.lane.b32.xlu0 %v13816_v57, %s16948_s26  ;;  %1519 = vrot.lane.b32.xlu1 %v13814_v56, %s16946_s15 }
 0x1f9   : > { %1521 = vrot.lane.b32.xlu0 %v13816_v57, %s16946_s15  ;;  %1555 = vperm.xlu1 %13070, %v1551_v1   ;;  %v8034_v1 = vld [vmem:[%s13563_s27 + $0x10] sm:$0xff] }
 0x1fd   : > { %1560 = vperm.xlu0 %13069, %v1552_v2   ;;  %2491 = vperm.xlu1 %13070, %v2485_v4  }
 0x201   : > { %2496 = vperm.xlu0 %13069, %v2486_v5   ;;  %2501 = vperm.xlu1 %13070, %v2487_v11   ;;  %v8035_v5 = vld [vmem:[%s13563_s27 + $0x18] sm:$0xff]  ;;  %v8784_v11 = vld [vmem:[%s17036_s3 + $0x10] sm:$0xff] }
 0x205   : > { %2506 = vperm.xlu0 %13069, %v2488_v12   ;;  %3310 = vperm.xlu1 %13070, %v3304_v13  }
 0x209   : > { %3315 = vperm.xlu0 %13069, %v3305_v14   ;;  %3320 = vperm.xlu1 %13070, %v3306_v15   ;;  %v8785_v14 = vld [vmem:[%s17036_s3 + $0x18] sm:$0xff]  ;;  %v8782_v15 = vld [vmem:[%s17036_s3] sm:$0xff] }
 0x20d   : > { %3325 = vperm.xlu0 %13069, %v3307_v19   ;;  %4315 = vperm.xlu1 %13070, %v4305_v20  }
 0x211   : > { %4320 = vperm.xlu0 %13069, %v4306_v22   ;;  %4325 = vperm.xlu1 %13070, %v4307_v24   ;;  %v8783_v22 = vld [vmem:[%s17036_s3 + $0x8] sm:$0xff]  ;;  %v9442_v24 = vld [vmem:[%s13583_s30] sm:$0xff]  ;;  %s17180_s3 = smov 1  }
 0x215   : > { %4330 = vperm.xlu0 %13069, %v4308_v30   ;;  %4335 = vperm.xlu1 %13070, %v4309_v31  }
 0x219   : > { %4340 = vperm.xlu0 %13069, %v4310_v32   ;;  %4345 = vperm.xlu1 %13070, %v4311_v33   ;;  %v13075_v32 = vld [vmem:[%s17058_s28 + $0x78] sm:$0xff]  }
 0x21a   : > { %v13076_v33 = vld [vmem:[%s17058_s28 + $0x38] sm:$0xff]   ;;  %10892 = vmatprep.subr.bf16.mxu0 %v13075_v32  ;;  %v13082_v32 = vld [vmem:[%s17058_s28 + $0x20] sm:$0xff]  }
 0x21b   : > { %10893 = vmatpush3.bf16.msra.mxu0 %v13076_v33 }
 0x21d   : > { %4350 = vperm.xlu0 %13069, %v4312_v34   ;;  %5527 = vperm.xlu1 %13070, %v5493_v36   ;;  %v13077_v34 = vld [vmem:[%s17058_s28 + $0x70] sm:$0xff]   ;;  %v9443_v36 = vld [vmem:[%s13583_s30 + $0x8] sm:$0xff] }
 0x21e   : > { %10894 = vmatprep.subr.bf16.mxu0 %v13077_v34 }
 0x221   : > { %5532 = vperm.xlu0 %13069, %v5494_v37   ;;  %5517 = vperm.xlu1 %13070, %v5491_v10  }
 0x225   : > { %5522 = vperm.xlu0 %13069, %v5492_v38   ;;  %5507 = vperm.xlu1 %13070, %v5489_v40   ;;  %v13078_v38 = vld [vmem:[%s17058_s28 + $0x30] sm:$0xff]   ;;  %v13079_v40 = vld [vmem:[%s17058_s28 + $0x68] sm:$0xff]  }
 0x226   : > { %10895 = vmatpush3.bf16.msra.mxu0 %v13078_v38 }
 0x227   : > { %10896 = vmatprep.subr.bf16.mxu0 %v13079_v40 }
 0x229   : > { %5512 = vperm.xlu0 %13069, %v5490_v41   ;;  %5497 = vperm.xlu1 %13070, %v5487_v42  }
 0x22b   : > { %v1500_v45 = vpop.permute.xlu1 %1499 }
 0x22d   : > { %5502 = vperm.xlu0 %13069, %v5488_v43   ;;  %6308 = vperm.xlu1 %13070, %v6302_v44  }
 0x22f   : > { %v1484_v48 = vpop.permute.xlu1 %1483  ;;  %v1502_v50 = vpop.permute.xlu0 %1501 }
 0x231   : > { %6313 = vperm.xlu0 %13069, %v6303_v46   ;;  %6318 = vperm.xlu1 %13070, %v6304_v47   ;;  %v13080_v46 = vld [vmem:[%s17058_s28 + $0x28] sm:$0xff]  }
 0x232   : > { %10897 = vmatpush3.bf16.msra.mxu0 %v13080_v46 }
 0x233   : > { %v13917_v53 = vpop.permute.xlu1 %1467  ;;  %v13919_v55 = vpop.permute.xlu0 %1485 }
 0x235   : > { %6323 = vperm.xlu0 %13069, %v6305_v51   ;;  %8038 = vperm.xlu1 %13070, %v8032_v52   ;;  %v13081_v52 = vld [vmem:[%s17058_s28 + $0x60] sm:$0xff]  }
 0x236   : > { %10898 = vmatprep.subr.bf16.mxu0 %v13081_v52 }
 0x237   : > { %v13923_v2 = vpop.permute.xlu1 %1451  ;;  %v13925_v4 = vpop.permute.xlu0 %1469  ;;  %10899 = vmatpush3.bf16.msra.mxu0 %v13082_v32 }
 0x239   : > { %8043 = vperm.xlu0 %13069, %v8033_v0   ;;  %8048 = vperm.xlu1 %13070, %v8034_v1  }
 0x23b   : > { %v13929_v12 = vpop.permute.xlu1 %1435  ;;  %v13931_v13 = vpop.permute.xlu0 %1453 }
 0x23d   : > { %8053 = vperm.xlu0 %13069, %v8035_v5   ;;  %8798 = vperm.xlu1 %13070, %v8784_v11  }
 0x23f   : > { %v13935_v19 = vpop.permute.xlu1 %1419  ;;  %v13937_v20 = vpop.permute.xlu0 %1437 }
 0x241   : > { %8803 = vperm.xlu0 %13069, %v8785_v14   ;;  %8788 = vperm.xlu1 %13070, %v8782_v15  }
 0x243   : > { %v13941_v30 = vpop.permute.xlu1 %1403  ;;  %v13943_v31 = vpop.permute.xlu0 %1421 }
 0x245   : > { %8793 = vperm.xlu0 %13069, %v8783_v22   ;;  %9446 = vperm.xlu1 %13070, %v9442_v24  }
 0x247   : > { %v1504_v37 = vpop.permute.xlu1 %1503  ;;  %v13949_v10 = vpop.permute.xlu0 %1405 }
 0x248   : > { %v1507_v41 = vsel %vm1276_vm2, %v1500_v45, %v1504_v37  ;;  %v1509_v42 = vsel %vm1276_vm2, %v1504_v37, %v1500_v45 }
 0x249   : > { %9451 = vperm.xlu0 %13069, %v9443_v36   ;;  %v1512_v0 = vmul.f32 %v1509_v42, %v13722_v27  ;;  %v1511_v45 = vmul.f32 %v1507_v41, %v13714_v23  ;;  %v13083_v36 = vld [vmem:[%s17058_s28 + $0x58] sm:$0xff]  }
 0x24a   : > { %10900 = vmatprep.subr.bf16.mxu0 %v13083_v36 }
 0x24b   : > { %v1488_v43 = vpop.permute.xlu1 %1487  ;;  %v1506_v44 = vpop.permute.xlu0 %1505 }
 0x24c   : > { %v1508_v47 = vsel %vm1276_vm2, %v1502_v50, %v1506_v44  ;;  %v1510_v51 = vsel %vm1276_vm2, %v1506_v44, %v1502_v50  ;;  %v1491_v11 = vsel %vm1254_vm1, %v1484_v48, %v1488_v43  ;;  %v1493_v14 = vsel %vm1254_vm1, %v1488_v43, %v1484_v48 }
 0x24d   : > { %v1514_v1 = vmul.f32 %v1510_v51, %v13722_v27  ;;  %v1513_v5 = vmul.f32 %v1508_v47, %v13714_v23  ;;  %v1495_v37 = vmul.f32 %v1491_v11, %v13705_v18  ;;  %v1496_v48 = vmul.f32 %v1493_v14, %v13709_v21  ;;  %v13084_v47 = vld [vmem:[%s17058_s28 + $0x18] sm:$0xff]   ;;  %v14477_v23 = vld [vmem:[%s17063_s2 + $0x210] sm:$0xff]  ;;  %v14484_v27 = vld [vmem:[%s17063_s2 + $0x1c8] sm:$0xff] }
 0x24e   : > { %10901 = vmatpush3.bf16.msra.mxu0 %v13084_v47  ;;  %17074 = vst [vmem:[#allocation63_spill] sm:$0xff] %v14477_v23 }
 0x24f   : > { %v1472_v15 = vpop.permute.xlu1 %1471  ;;  %v1490_v22 = vpop.permute.xlu0 %1489  ;;  %v1546_v50 = vpack.c.bf16 %v1514_v1, %v1512_v0  ;;  %v1545_v24 = vpack.c.bf16 %v1513_v5, %v1511_v45 }
 0x250   : > { %v1492_v33 = vsel %vm1254_vm1, %v13919_v55, %v1490_v22  ;;  %v1494_v34 = vsel %vm1254_vm1, %v1490_v22, %v13919_v55  ;;  %v1475_v41 = vsel %vm1232_vm4, %v13917_v53, %v1472_v15  ;;  %v1477_v55 = vsel %vm1232_vm4, %v1472_v15, %v13917_v53 }
 0x251   : > { %v1497_v38 = vmul.f32 %v1492_v33, %v13705_v18  ;;  %v1498_v40 = vmul.f32 %v1494_v34, %v13709_v21  ;;  %1576 = vmatprep.subr.bf16.mxu1 %v1546_v50  ;;  %v1479_v0 = vmul.f32 %v1475_v41, %v13730_v35  ;;  %v1480_v53 = vmul.f32 %v1477_v55, %v13738_v39  ;;  %v14467_v18 = vld [vmem:[%s17063_s2 + $0x218] sm:$0xff]  ;;  %v14474_v21 = vld [vmem:[%s17063_s2 + $0x1d0] sm:$0xff] }
 0x252   : > { %1577 = vmatpush1.bf16.msra.mxu1 %v1545_v24  ;;  %17073 = vst [vmem:[#allocation62_spill] sm:$0xff] %v14467_v18 }
 0x253   : > { %v13989_v42 = vpop.permute.xlu1 %1515  ;;  %v1474_v43 = vpop.permute.xlu0 %1473  ;;  %v1544_v44 = vpack.c.bf16 %v1498_v40, %v1496_v48  ;;  %v1543_v46 = vpack.c.bf16 %v1497_v38, %v1495_v37 }
 0x254   : > { %v1476_v51 = vsel %vm1232_vm4, %v13925_v4, %v1474_v43  ;;  %v1478_v52 = vsel %vm1232_vm4, %v1474_v43, %v13925_v4 }
 0x255   : > { %v1481_v1 = vmul.f32 %v1476_v51, %v13730_v35  ;;  %v1482_v45 = vmul.f32 %v1478_v52, %v13738_v39  ;;  %1578 = vmatprep.subr.bf16.mxu1 %v1544_v44  ;;  %v14457_v35 = vld [vmem:[%s17063_s2 + $0x220] sm:$0xff]  ;;  %v14464_v39 = vld [vmem:[%s17063_s2 + $0x1d8] sm:$0xff] }
 0x256   : > { %1579 = vmatpush1.bf16.msra.mxu1 %v1543_v46  ;;  %17072 = vst [vmem:[#allocation61_spill] sm:$0xff] %v14457_v35 }
 0x257   : > { %v1456_v5 = vpop.permute.xlu1 %1455  ;;  %v14002_v11 = vpop.permute.xlu0 %1517  ;;  %v1542_v14 = vpack.c.bf16 %v1482_v45, %v1480_v53  ;;  %v1541_v15 = vpack.c.bf16 %v1481_v1, %v1479_v0 }
 0x258   : > { %v1459_v4 = vsel %vm1210_vm6, %v13923_v2, %v1456_v5  ;;  %v1461_v22 = vsel %vm1210_vm6, %v1456_v5, %v13923_v2 }
 0x259   : > { %1580 = vmatprep.subr.bf16.mxu1 %v1542_v14  ;;  %v1463_v34 = vmul.f32 %v1461_v22, %v13762_v60  ;;  %v1464_v36 = vmul.f32 %v1459_v4, %v13765_v61 }
 0x25a   : > { %1581 = vmatpush1.bf16.msra.mxu1 %v1541_v15 }
 0x25b   : > { %v1440_v50 = vpop.permute.xlu1 %1439  ;;  %1582 = vmatprep.subr.bf16.mxu1 %v1540_v63  ;;  %v1458_v24 = vpop.permute.xlu0 %1457 }
 0x25c   : > { %v1460_v32 = vsel %vm1210_vm6, %v13931_v13, %v1458_v24  ;;  %v1462_v33 = vsel %vm1210_vm6, %v1458_v24, %v13931_v13  ;;  %v1443_v56 = vsel %vm1188_vm5, %v13929_v12, %v1440_v50  ;;  %v1445_v57 = vsel %vm1188_vm5, %v1440_v50, %v13929_v12 }
 0x25d   : > { %v1465_v2 = vmul.f32 %v1462_v33, %v13762_v60  ;;  %v1466_v37 = vmul.f32 %v1460_v32, %v13765_v61  ;;  %v1447_v55 = vmul.f32 %v1445_v57, %v13755_v58  ;;  %v1448_v12 = vmul.f32 %v1443_v56, %v13758_v59  ;;  %v14444_v60 = vld [vmem:[%s17063_s2 + $0x1e8] sm:$0xff]  ;;  %v14454_v61 = vld [vmem:[%s17063_s2 + $0x1e0] sm:$0xff] }
 0x25e   : > { %1583 = vmatpush1.bf16.msra.mxu1 %v1539_v62 }
 0x25f   : > { %v1424_v63 = vpop.permute.xlu1 %1423  ;;  %v1442_v13 = vpop.permute.xlu0 %1441  ;;  %v1538_v48 = vpack.c.bf16 %v1466_v37, %v1464_v36  ;;  %v1537_v38 = vpack.c.bf16 %v1465_v2, %v1463_v34 }
 0x260   : > { %v1444_v40 = vsel %vm1188_vm5, %v13937_v20, %v1442_v13  ;;  %v1446_v41 = vsel %vm1188_vm5, %v1442_v13, %v13937_v20  ;;  %v1427_v54 = vsel %vm1166_vm8, %v13935_v19, %v1424_v63  ;;  %v1429_v62 = vsel %vm1166_vm8, %v1424_v63, %v13935_v19 }
 0x261   : > { %v1449_v43 = vmul.f32 %v1446_v41, %v13755_v58  ;;  %v1450_v49 = vmul.f32 %v1444_v40, %v13758_v59  ;;  %1584 = vmatprep.subr.bf16.mxu1 %v1538_v48  ;;  %v1431_v0 = vmul.f32 %v1429_v62, %v13790_v28  ;;  %v1432_v53 = vmul.f32 %v1427_v54, %v13793_v29  ;;  %v13072_v41 = vld [vmem:[%s13493_s19] ss:$8 sps:$4 sm:$0xff]   ;;  %v14421_v58 = vld [vmem:[%s17063_s2 + $0x238] sm:$0xff]  ;;  %v14435_v59 = vld [vmem:[%s17063_s2 + $0x230] sm:$0xff] }
 0x262   : > { %1585 = vmatpush1.bf16.msra.mxu1 %v1537_v38  ;;  %v13090_v54 = vld [vmem:[%s17058_s28] sm:$0xff]   ;;  %17069 = vst [vmem:[#allocation58_spill] sm:$0xff] %v14421_v58  ;;  %17070 = vst [vmem:[#allocation59_spill] sm:$0xff] %v14435_v59 }
 0x263   : > { %v1408_v44 = vpop.permute.xlu1 %1407  ;;  %v1426_v20 = vpop.permute.xlu0 %1425  ;;  %v1536_v46 = vpack.c.bf16 %v1450_v49, %v1448_v12  ;;  %v1535_v47 = vpack.c.bf16 %v1449_v43, %v1447_v55  ;;  %v13086_v55 = vld [vmem:[%s17058_s28 + $0x10] sm:$0xff]   ;;  %v13087_v12 = vld [vmem:[%s17058_s28 + $0x48] sm:$0xff]   ;;  %v13089_v49 = vld [vmem:[%s17058_s28 + $0x40] sm:$0xff]  }
 0x264   : > { %v1428_v51 = vsel %vm1166_vm8, %v13943_v31, %v1426_v20  ;;  %v1430_v52 = vsel %vm1166_vm8, %v1426_v20, %v13943_v31  ;;  %v1411_v45 = vsel %vm1145_vm7, %v13941_v30, %v1408_v44  ;;  %v1413_v5 = vsel %vm1145_vm7, %v1408_v44, %v13941_v30  ;;  %v13088_v43 = vld [vmem:[%s17058_s28 + $0x8] sm:$0xff]  }
 0x265   : > { %v1433_v1 = vmul.f32 %v1430_v52, %v13790_v28  ;;  %v1434_v19 = vmul.f32 %v1428_v51, %v13793_v29  ;;  %1586 = vmatprep.subr.bf16.mxu1 %v1536_v46  ;;  %v1415_v24 = vmul.f32 %v1413_v5, %v13783_v25  ;;  %v1416_v32 = vmul.f32 %v1411_v45, %v13786_v26  ;;  %v14409_v28 = vld [vmem:[%s17063_s2 + $0x180] sm:$0xff]  ;;  %v14418_v29 = vld [vmem:[%s17063_s2 + $0x1f8] sm:$0xff] }
 0x266   : > { %1587 = vmatpush1.bf16.msra.mxu1 %v1535_v47  ;;  %17068 = vst [vmem:[#allocation57_spill] sm:$0xff] %v14409_v28 }
 0x267   : > { %v1520_v14 = vpop.permute.xlu1 %1519  ;;  %v1410_v31 = vpop.permute.xlu0 %1409  ;;  %v1534_v15 = vpack.c.bf16 %v1434_v19, %v1432_v53  ;;  %v1533_v4 = vpack.c.bf16 %v1433_v1, %v1431_v0 }
 0x268   : > { %v1412_v22 = vsel %vm1145_vm7, %v13949_v10, %v1410_v31  ;;  %v1414_v50 = vsel %vm1145_vm7, %v1410_v31, %v13949_v10  ;;  %v1523_v34 = vsel %vm1298_vm0, %v13989_v42, %v1520_v14  ;;  %v1525_v36 = vsel %vm1298_vm0, %v1520_v14, %v13989_v42 }
 0x269   : > { %v1417_v33 = vmul.f32 %v1414_v50, %v13783_v25  ;;  %v1418_v30 = vmul.f32 %v1412_v22, %v13786_v26  ;;  %1588 = vmatprep.subr.bf16.mxu1 %v1534_v15  ;;  %v1527_v63 = vmul.f32 %v1523_v34, %v13701_v17  ;;  %v1528_v42 = vmul.f32 %v1525_v36, %v13698_v16  ;;  %v14147_v22 = vld [vmem:[%s17063_s2 + $0x78] sm:$0xff]  ;;  %v14153_v50 = vld [vmem:[%s17063_s2 + $0x30] sm:$0xff]  ;;  %v14181_v34 = vld [vmem:[%s17063_s2 + $0x60] sm:$0xff] }
 0x26a   : > { %1589 = vmatpush1.bf16.msra.mxu1 %v1533_v4  ;;  %v14144_v4 = vld [vmem:[%s17063_s2 + $0x38] sm:$0xff]  ;;  %v14399_v25 = vld [vmem:[%s17063_s2 + $0x188] sm:$0xff]  ;;  %v14406_v26 = vld [vmem:[%s17063_s2 + $0x140] sm:$0xff] }
 0x26b   : > { %v1522_v10 = vpop.permute.xlu0 %1521  ;;  %v1532_v2 = vpack.c.bf16 %v1418_v30, %v1416_v32  ;;  %v1531_v37 = vpack.c.bf16 %v1417_v33, %v1415_v24  ;;  %v14156_v24 = vld [vmem:[%s17063_s2 + $0x70] sm:$0xff]  ;;  %v14166_v32 = vld [vmem:[%s17063_s2 + $0x28] sm:$0xff]  ;;  %v14178_v30 = vld [vmem:[%s17063_s2 + $0x20] sm:$0xff]  ;;  %17067 = vst [vmem:[#allocation56_spill] sm:$0xff] %v14399_v25 }
 0x26c   : > { %v1524_v56 = vsel %vm1298_vm0, %v14002_v11, %v1522_v10  ;;  %v1526_v57 = vsel %vm1298_vm0, %v1522_v10, %v14002_v11  ;;  %v13085_v11 = vld [vmem:[%s17058_s28 + $0x50] sm:$0xff]   ;;  %v14169_v33 = vld [vmem:[%s17063_s2 + $0x68] sm:$0xff]  ;;  %v14194_v36 = vld [vmem:[%s17063_s2 + $0x18] sm:$0xff] }
 0x26d   : > { %v1529_v13 = vmul.f32 %v1524_v56, %v13701_v17  ;;  %v1530_v48 = vmul.f32 %v1526_v57, %v13698_v16  ;;  %1590 = vmatprep.subr.bf16.mxu1 %v1532_v2  ;;  %10902 = vmatprep.subr.bf16.mxu0 %v13085_v11  ;;  %v14197_v10 = vld [vmem:[%s17063_s2 + $0x58] sm:$0xff]  ;;  %v14204_v2 = vld [vmem:[%s17063_s2 + $0x10] sm:$0xff]  ;;  %v14214_v56 = vld [vmem:[%s17063_s2 + $0x8] sm:$0xff] }
 0x26e   : > { %1591 = vmatpush1.bf16.msra.mxu1 %v1531_v37  ;;  %10903 = vmatpush3.bf16.msra.mxu0 %v13086_v55  ;;  %v14207_v37 = vld [vmem:[%s17063_s2 + $0x50] sm:$0xff]  ;;  %v14217_v57 = vld [vmem:[%s17063_s2 + $0x48] sm:$0xff]  ;;  %v14379_v17 = vld [vmem:[%s17063_s2 + $0x198] sm:$0xff] }
 0x26f   : > { %v1548_v38 = vpack.c.bf16 %v1530_v48, %v1528_v42  ;;  %v1547_v40 = vpack.c.bf16 %v1529_v13, %v1527_v63  ;;  %10904 = vmatprep.subr.bf16.mxu0 %v13087_v12  ;;  %v14224_v63 = vld [vmem:[%s17063_s2] sm:$0xff]  ;;  %v14232_v13 = vld [vmem:[%s17063_s2 + $0xb8] sm:$0xff]  ;;  %17065 = vst [vmem:[#allocation54_spill] sm:$0xff] %v14379_v17  ;;  %v14386_v16 = vld [vmem:[%s17063_s2 + $0x150] sm:$0xff] }
 0x270   : > { %v14227_v42 = vld [vmem:[%s17063_s2 + $0x40] sm:$0xff]  ;;  %v14235_v48 = vld [vmem:[%s17063_s2 + $0xf8] sm:$0xff] }
 0x271   : > { %1606 = vmatprep.subr.bf16.mxu1 %v1548_v38 }
 0x272   : > { %1607 = vmatpush2.bf16.msra.mxu1 %v1547_v40  ;;  %10905 = vmatpush3.bf16.msra.mxu0 %v13088_v43  ;;  %v14250_v43 = vld [vmem:[%s17063_s2 + $0xb0] sm:$0xff] }
 0x273   : > { %10906 = vmatprep.subr.bf16.mxu0 %v13089_v49  ;;  %11806 = vmatprep.subr.mxu1 %v14144_v4  ;;  %v14257_v49 = vld [vmem:[%s17063_s2 + $0xf0] sm:$0xff] }
 0x274   : > { %v1556_v62 = vpop.permute.xlu1 %1555 }
 0x275   : > { %1609 = vmatmul.mubr.bf16.vlgmr.msra.gmra.mxu1 %v13072_v41 }
 0x276   : > { %10907 = vmatpush3.bf16.msra.mxu0 %v13090_v54  ;;  %11807 = vmatpush3.msra.mxu1 %v14144_v4  ;;  %v14359_v54 = vld [vmem:[%s17063_s2 + $0x1a8] sm:$0xff] }
 0x277   : > { %11825 = vmatprep.subr.mxu0 %v14147_v22  ;;  %11808 = vmatprep.subr.mxu1 %v14153_v50 }
 0x278   : > { %v1561_v51 = vpop.permute.xlu0 %1560  ;;  %11809 = vmatpush3.msra.mxu1 %v14153_v50 }
 0x279   : > { %11810 = vmatprep.subr.mxu1 %v14166_v32 }
 0x27a   : > { %11811 = vmatpush3.msra.mxu1 %v14166_v32 }
 0x27b   : > { %11812 = vmatprep.subr.mxu1 %v14178_v30 }
 0x27c   : > { %11813 = vmatpush3.msra.mxu1 %v14178_v30 }
 0x27d   : > { %11814 = vmatprep.subr.mxu1 %v14194_v36 }
 0x27e   : > { %11815 = vmatpush3.msra.mxu1 %v14194_v36 }
 0x27f   : > { %11816 = vmatprep.subr.mxu1 %v14204_v2 }
 0x280   : > { %11817 = vmatpush3.msra.mxu1 %v14204_v2 }
 0x281   : > { %11818 = vmatprep.subr.mxu1 %v14214_v56 }
 0x282   : > { %11819 = vmatpush3.msra.mxu1 %v14214_v56 }
 0x283   : > { %11820 = vmatprep.subr.mxu1 %v14224_v63 }
 0x284   : > { %11821 = vmatpush3.msra.mxu1 %v14224_v63 }
 0x285   : > { %11844 = vmatprep.subr.mxu1 %v14232_v13 }
 0x335   : > { %v1610_v44 = vpop.f32.mrf.mxu1 }
 0x336   : > { %v1611_v20 = vadd.f32 %v1610_v44, %v1556_v62  ;;  %v14270_v44 = vld [vmem:[%s17063_s2 + $0xe8] sm:$0xff] }
 0x337   : > { %v1612_v46 = vpop.f32.mrf.mxu1 }
 0x338   : > { %v1619_v47 = vmax.f32 %v1611_v20, 0.0  ;;  %v1613_v0 = vadd.f32 %v1612_v46, %v1556_v62  ;;  %v14267_v62 = vld [vmem:[%s17063_s2 + $0xa8] sm:$0xff]  ;;  %v14278_v20 = vld [vmem:[%s17063_s2 + $0xa0] sm:$0xff] }
 0x339   : > { %v1614_v52 = vpop.f32.mrf.mxu1  ;;  %v14281_v46 = vld [vmem:[%s17063_s2 + $0xe0] sm:$0xff] }
 0x33a   : > { %v1615_v53 = vadd.f32 %v1614_v52, %v1561_v51  ;;  %9702 = vrot.lane.b32.xlu1 %v1619_v47, %s16986_s16  ;;  %v14098_v5 = vmax.f32 %v1613_v0, 0.0  ;;  %v14298_v52 = vld [vmem:[%s17063_s2 + $0x90] sm:$0xff] }
 0x33b   : > { %v1616_v1 = vpop.f32.mrf.mxu1  ;;  %v14301_v0 = vld [vmem:[%s17063_s2 + $0xd0] sm:$0xff] }
 0x33c   : > { %v1621_v19 = vmax.f32 %v1615_v53, 0.0  ;;  %v1617_v45 = vadd.f32 %v1616_v1, %v1561_v51  ;;  %17059 = vst [vmem:[#allocation49_spill] sm:$0xff] %v14098_v5  ;;  %v14291_v51 = vld [vmem:[%s17063_s2 + $0xd8] sm:$0xff]  ;;  %v14308_v53 = vld [vmem:[%s17063_s2 + $0x88] sm:$0xff] }
 0x33d   : > { %v14311_v1 = vld [vmem:[%s17063_s2 + $0xc8] sm:$0xff] }
 0x33e   : > { %v14100_v14 = vmax.f32 %v1617_v45, 0.0  ;;  %9686 = vrot.lane.b32.xlu1 %v1619_v47, %s16976_s11  ;;  %9704 = vrot.lane.b32.xlu0 %v1621_v19, %s16986_s16  ;;  %v14108_v15 = vpack.c.bf16 %v1621_v19, %v1619_v47  ;;  %v14321_v45 = vld [vmem:[%s17063_s2 + $0xc0] sm:$0xff] }
 0x340   : > { %17060 = vst [vmem:[#allocation50_spill] sm:$0xff] %v14100_v14  ;;  %v14106_v31 = vpack.c.bf16 %v14100_v14, %v14098_v5  ;;  %17062 = vst [vmem:[#allocation52_spill] sm:$0xff] %v14108_v15 }
 0x342   : > { %17061 = vst [vmem:[#allocation51_spill] sm:$0xff] %v14106_v31  ;;  %9670 = vrot.lane.b32.xlu1 %v1619_v47, %s16957_s18  ;;  %1785 = vmatprep.mubr.bf16.mxu0 %v14106_v31  ;;  %v14447_v31 = vld [vmem:[%s17063_s2 + $0x228] sm:$0xff] }
 0x343   : > { %9688 = vrot.lane.b32.xlu0 %v1621_v19, %s16976_s11  ;;  %1786 = vmatmul.mubr.bf16.vlgmr.msra.gmra.mxu0 %v14108_v15  ;;  %v14432_v15 = vld [vmem:[%s17063_s2 + $0x1f0] sm:$0xff]  ;;  %17071 = vst [vmem:[#allocation60_spill] sm:$0xff] %v14447_v31 }
 0x344   : > { %11826 = vmatpush3.msra.mxu0 %v14147_v22 }
 0x345   : > { %11827 = vmatprep.subr.mxu0 %v14156_v24 }
 0x346   : > { %9654 = vrot.lane.b32.xlu1 %v1619_v47, %s16955_s22  ;;  %11828 = vmatpush3.msra.mxu0 %v14156_v24 }
 0x347   : > { %9672 = vrot.lane.b32.xlu0 %v1621_v19, %s16957_s18  ;;  %11829 = vmatprep.subr.mxu0 %v14169_v33 }
 0x348   : > { %11830 = vmatpush3.msra.mxu0 %v14169_v33 }
 0x349   : > { %11831 = vmatprep.subr.mxu0 %v14181_v34 }
 0x34a   : > { %9638 = vrot.lane.b32.xlu1 %v1619_v47, %s16953_s23  ;;  %11832 = vmatpush3.msra.mxu0 %v14181_v34 }
 0x34b   : > { %9656 = vrot.lane.b32.xlu0 %v1621_v19, %s16955_s22  ;;  %11833 = vmatprep.subr.mxu0 %v14197_v10 }
 0x34c   : > { %11834 = vmatpush3.msra.mxu0 %v14197_v10 }
 0x34d   : > { %11835 = vmatprep.subr.mxu0 %v14207_v37 }
 0x34e   : > { %9622 = vrot.lane.b32.xlu1 %v1619_v47, %s16950_s1  ;;  %11836 = vmatpush3.msra.mxu0 %v14207_v37 }
 0x34f   : > { %9640 = vrot.lane.b32.xlu0 %v1621_v19, %s16953_s23  ;;  %11837 = vmatprep.subr.mxu0 %v14217_v57 }
 0x350   : > { %11838 = vmatpush3.msra.mxu0 %v14217_v57 }
 0x351   : > { %11839 = vmatprep.subr.mxu0 %v14227_v42 }
 0x352   : > { %9606 = vrot.lane.b32.xlu1 %v1619_v47, %s16948_s26  ;;  %11840 = vmatpush3.msra.mxu0 %v14227_v42 }
 0x353   : > { %9624 = vrot.lane.b32.xlu0 %v1621_v19, %s16950_s1  ;;  %11863 = vmatprep.subr.mxu0 %v14235_v48 }
 0x356   : > { %9718 = vrot.lane.b32.xlu1 %v1619_v47, %s16946_s15  ;;  %v14288_v47 = vld [vmem:[%s17063_s2 + $0x98] sm:$0xff] }
 0x357   : > { %9608 = vrot.lane.b32.xlu0 %v1621_v19, %s16948_s26 }
 0x35a   : > { %9706 = vrot.lane.b32.xlu1 %v14098_v5, %s16986_s16 }
 0x35b   : > { %9720 = vrot.lane.b32.xlu0 %v1621_v19, %s16946_s15  ;;  %v14318_v19 = vld [vmem:[%s17063_s2 + $0x80] sm:$0xff]  ;;  %s17094_s15 = sld [smem:[#allocation8_spill]] }
 0x35e   : > { %9690 = vrot.lane.b32.xlu1 %v14098_v5, %s16976_s11 }
 0x35f   : > { %9708 = vrot.lane.b32.xlu0 %v14100_v14, %s16986_s16  ;;  %s17131_s16 = sld [smem:[#allocation20_spill]] }
 0x362   : > { %9674 = vrot.lane.b32.xlu1 %v14098_v5, %s16957_s18 }
 0x363   : > { %9692 = vrot.lane.b32.xlu0 %v14100_v14, %s16976_s11  ;;  %s17126_s11 = sld [smem:[#allocation21_spill]] }
 0x366   : > { %9658 = vrot.lane.b32.xlu1 %v14098_v5, %s16955_s22 }
 0x367   : > { %9676 = vrot.lane.b32.xlu0 %v14100_v14, %s16957_s18  ;;  %s17102_s18 = sld [smem:[#allocation9_spill]] }
 0x36a   : > { %9642 = vrot.lane.b32.xlu1 %v14098_v5, %s16953_s23 }
 0x36b   : > { %9660 = vrot.lane.b32.xlu0 %v14100_v14, %s16955_s22  ;;  %s17101_s22 = sld [smem:[#allocation19_spill]] }
 0x36e   : > { %9626 = vrot.lane.b32.xlu1 %v14098_v5, %s16950_s1 }
 0x36f   : > { %9644 = vrot.lane.b32.xlu0 %v14100_v14, %s16953_s23  ;;  %s17100_s23 = sld [smem:[#allocation18_spill]] }
 0x372   : > { %9610 = vrot.lane.b32.xlu1 %v14098_v5, %s16948_s26  ;;  %v14396_v5 = vld [vmem:[%s17063_s2 + $0x148] sm:$0xff] }
 0x373   : > { %9628 = vrot.lane.b32.xlu0 %v14100_v14, %s16950_s1  ;;  %s17098_s1 = sld [smem:[#allocation16_spill]] }
 0x377   : > { %9612 = vrot.lane.b32.xlu0 %v14100_v14, %s16948_s26  ;;  %v14389_v14 = vld [vmem:[%s17063_s2 + $0x190] sm:$0xff]  ;;  %s17095_s26 = sld [smem:[#allocation6_spill]] }
 0x378   : > { %17066 = vst [vmem:[#allocation55_spill] sm:$0xff] %v14389_v14 }
 0x403   : > { %v10908_v38 = vpop.f32.mrf.mxu0 }
 0x405   : > { %v10909_v40 = vpop.f32.mrf.mxu0 }
 0x406   : > { %v14241_v41 = vadd.f32 %v10909_v40, %v10908_v38  ;;  %v14330_v38 = vld [vmem:[%s17063_s2 + $0x178] sm:$0xff] }
 0x407   : > { %v10911_v11 = vpop.f32.mrf.mxu0  ;;  %v14333_v40 = vld [vmem:[%s17063_s2 + $0x1b8] sm:$0xff] }
 0x408   : > { %11822 = vmatprep.mubr.msk.f32.mxu1 %vm1802_vm11, %v14241_v41  ;;  %11841 = vmatprep.mubr.msk.f32.mxu0 %vm1802_vm11, %v14241_v41 }
 0x409   : > { %v10912_v55 = vpop.f32.mrf.mxu0 }
 0x40a   : > { %v14247_v12 = vadd.f32 %v10912_v55, %v10911_v11  ;;  %v14344_v11 = vld [vmem:[%s17063_s2 + $0x170] sm:$0xff] }
 0x40b   : > { %v14347_v55 = vld [vmem:[%s17063_s2 + $0x1b0] sm:$0xff] }
 0x40c   : > { %11823 = vmatmul.mubr.msk.f32.vlgmr.msra.gmra.mxu1 %vm1802_vm11, %v14247_v12  ;;  %11842 = vmatmul.mubr.msk.f32.vlgmr.msra.gmra.mxu0 %vm1802_vm11, %v14247_v12 }
 0x40d   : > { %11845 = vmatpush3.msra.mxu1 %v14232_v13  ;;  %11864 = vmatpush3.msra.mxu0 %v14235_v48 }
 0x40e   : > { %11846 = vmatprep.subr.mxu1 %v14250_v43  ;;  %11860 = vmatprep.mubr.msk.f32.mxu1 %vm1802_vm11, %v14241_v41 }
 0x40f   : > { %11865 = vmatprep.subr.mxu0 %v14257_v49  ;;  %11879 = vmatprep.mubr.msk.f32.mxu0 %vm1802_vm11, %v14241_v41 }
 0x410   : > { %11847 = vmatpush3.msra.mxu1 %v14250_v43  ;;  %11866 = vmatpush3.msra.mxu0 %v14257_v49 }
 0x411   : > { %11848 = vmatprep.subr.mxu1 %v14267_v62  ;;  %11867 = vmatprep.subr.mxu0 %v14270_v44 }
 0x412   : > { %11849 = vmatpush3.msra.mxu1 %v14267_v62  ;;  %11868 = vmatpush3.msra.mxu0 %v14270_v44 }
 0x413   : > { %11850 = vmatprep.subr.mxu1 %v14278_v20  ;;  %11869 = vmatprep.subr.mxu0 %v14281_v46 }
 0x414   : > { %11851 = vmatpush3.msra.mxu1 %v14278_v20  ;;  %11870 = vmatpush3.msra.mxu0 %v14281_v46 }
 0x415   : > { %11852 = vmatprep.subr.mxu1 %v14288_v47  ;;  %11871 = vmatprep.subr.mxu0 %v14291_v51 }
 0x416   : > { %11853 = vmatpush3.msra.mxu1 %v14288_v47  ;;  %11872 = vmatpush3.msra.mxu0 %v14291_v51 }
 0x417   : > { %11854 = vmatprep.subr.mxu1 %v14298_v52  ;;  %11873 = vmatprep.subr.mxu0 %v14301_v0 }
 0x418   : > { %11855 = vmatpush3.msra.mxu1 %v14298_v52  ;;  %11874 = vmatpush3.msra.mxu0 %v14301_v0 }
 0x419   : > { %11856 = vmatprep.subr.mxu1 %v14308_v53  ;;  %11875 = vmatprep.subr.mxu0 %v14311_v1 }
 0x41a   : > { %11857 = vmatpush3.msra.mxu1 %v14308_v53  ;;  %11876 = vmatpush3.msra.mxu0 %v14311_v1 }
 0x41b   : > { %11858 = vmatprep.subr.mxu1 %v14318_v19  ;;  %11877 = vmatprep.subr.mxu0 %v14321_v45 }
 0x41c   : > { %11859 = vmatpush3.msra.mxu1 %v14318_v19  ;;  %11878 = vmatpush3.msra.mxu0 %v14321_v45 }
 0x41d   : > { %11861 = vmatmul.mubr.msk.f32.vlgmr.msra.gmra.mxu1 %vm1802_vm11, %v14247_v12  ;;  %11880 = vmatmul.mubr.msk.f32.vlgmr.msra.gmra.mxu0 %vm1802_vm11, %v14247_v12 }
 0x41e   : > { %11882 = vmatprep.subr.mxu1 %v14330_v38  ;;  %11901 = vmatprep.subr.mxu0 %v14333_v40 }
 0x41f   : > { %11883 = vmatpush3.msra.mxu1 %v14330_v38  ;;  %11898 = vmatprep.mubr.msk.f32.mxu1 %vm1802_vm11, %v14241_v41 }
 0x420   : > { %11902 = vmatpush3.msra.mxu0 %v14333_v40  ;;  %11917 = vmatprep.mubr.msk.f32.mxu0 %vm1802_vm11, %v14241_v41 }
 0x421   : > { %11884 = vmatprep.subr.mxu1 %v14344_v11  ;;  %11903 = vmatprep.subr.mxu0 %v14347_v55 }
 0x422   : > { %11885 = vmatpush3.msra.mxu1 %v14344_v11  ;;  %11904 = vmatpush3.msra.mxu0 %v14347_v55 }
 0x423   : > { %11886 = vmatprep.subr.mxu1 %v14356_v6  ;;  %11905 = vmatprep.subr.mxu0 %v14359_v54 }
 0x424   : > { %11887 = vmatpush3.msra.mxu1 %v14356_v6  ;;  %11906 = vmatpush3.msra.mxu0 %v14359_v54 }
 0x425   : > { %11888 = vmatprep.subr.mxu1 %v14366_v3  ;;  %11907 = vmatprep.subr.mxu0 %v14369_v7 }
 0x426   : > { %11889 = vmatpush3.msra.mxu1 %v14366_v3  ;;  %11908 = vmatpush3.msra.mxu0 %v14369_v7  ;;  %v17079_v7 = vpack.c.bf16 %v14247_v12, %v14241_v41 }
 0x427   : > { %11890 = vmatprep.subr.mxu1 %v14376_v9  ;;  %11909 = vmatprep.subr.mxu0 %v14379_v17 }
 0x428   : > { %11891 = vmatpush3.msra.mxu1 %v14376_v9  ;;  %11910 = vmatpush3.msra.mxu0 %v14379_v17 }
 0x429   : > { %11892 = vmatprep.subr.mxu1 %v14386_v16  ;;  %11911 = vmatprep.subr.mxu0 %v14389_v14 }
 0x42a   : > { %11893 = vmatpush3.msra.mxu1 %v14386_v16  ;;  %11912 = vmatpush3.msra.mxu0 %v14389_v14 }
 0x42b   : > { %11894 = vmatprep.subr.mxu1 %v14396_v5  ;;  %11913 = vmatprep.subr.mxu0 %v14399_v25 }
 0x42c   : > { %11895 = vmatpush3.msra.mxu1 %v14396_v5  ;;  %11914 = vmatpush3.msra.mxu0 %v14399_v25 }
 0x42d   : > { %11896 = vmatprep.subr.mxu1 %v14406_v26  ;;  %11915 = vmatprep.subr.mxu0 %v14409_v28 }
 0x42e   : > { %11897 = vmatpush3.msra.mxu1 %v14406_v26  ;;  %11916 = vmatpush3.msra.mxu0 %v14409_v28 }
 0x42f   : > { %11899 = vmatmul.mubr.msk.f32.vlgmr.msra.gmra.mxu1 %vm1802_vm11, %v14247_v12  ;;  %11918 = vmatmul.mubr.msk.f32.vlgmr.msra.gmra.mxu0 %vm1802_vm11, %v14247_v12 }
 0x430   : > { %11920 = vmatprep.subr.mxu1 %v14418_v29  ;;  %11939 = vmatprep.subr.mxu0 %v14421_v58 }
 0x431   : > { %11921 = vmatpush3.msra.mxu1 %v14418_v29  ;;  %11936 = vmatprep.mubr.msk.f32.mxu1 %vm1802_vm11, %v14241_v41 }
 0x432   : > { %11940 = vmatpush3.msra.mxu0 %v14421_v58  ;;  %11955 = vmatprep.mubr.msk.f32.mxu0 %vm1802_vm11, %v14241_v41  ;;  %v13094_v41 = vld [vmem:[%s17078_s0 + $0x14] ss:$8 sps:$4 sm:$0xff]  }
 0x433   : > { %11922 = vmatprep.subr.mxu1 %v14432_v15  ;;  %11941 = vmatprep.subr.mxu0 %v14435_v59 }
 0x434   : > { %11923 = vmatpush3.msra.mxu1 %v14432_v15  ;;  %11942 = vmatpush3.msra.mxu0 %v14435_v59 }
 0x435   : > { %11924 = vmatprep.subr.mxu1 %v14444_v60  ;;  %11943 = vmatprep.subr.mxu0 %v14447_v31 }
 0x436   : > { %11925 = vmatpush3.msra.mxu1 %v14444_v60  ;;  %11944 = vmatpush3.msra.mxu0 %v14447_v31  ;;  %v14497_v31 = vld [vmem:[%s17063_s2 + $0x200] sm:$0xff] }
 0x437   : > { %11926 = vmatprep.subr.mxu1 %v14454_v61  ;;  %11945 = vmatprep.subr.mxu0 %v14457_v35  ;;  %17076 = vst [vmem:[#allocation65_spill] sm:$0xff] %v14497_v31 }
 0x438   : > { %11927 = vmatpush3.msra.mxu1 %v14454_v61  ;;  %11946 = vmatpush3.msra.mxu0 %v14457_v35  ;;  %v14494_v35 = vld [vmem:[%s17063_s2 + $0x1c0] sm:$0xff] }
 0x439   : > { %11928 = vmatprep.subr.mxu1 %v14464_v39  ;;  %11947 = vmatprep.subr.mxu0 %v14467_v18 }
 0x43a   : > { %11929 = vmatpush3.msra.mxu1 %v14464_v39  ;;  %11948 = vmatpush3.msra.mxu0 %v14467_v18 }
 0x43b   : > { %11930 = vmatprep.subr.mxu1 %v14474_v21  ;;  %11949 = vmatprep.subr.mxu0 %v14477_v23 }
 0x43c   : > { %11931 = vmatpush3.msra.mxu1 %v14474_v21  ;;  %11950 = vmatpush3.msra.mxu0 %v14477_v23  ;;  %v17077_v23 = vmov 0  }
 0x43d   : > { %11932 = vmatprep.subr.mxu1 %v14484_v27  ;;  %11951 = vmatprep.subr.mxu0 %v14487_v8 }
 0x43e   : > { %11933 = vmatpush3.msra.mxu1 %v14484_v27  ;;  %11952 = vmatpush3.msra.mxu0 %v14487_v8 }
 0x43f   : > { %11934 = vmatprep.subr.mxu1 %v14494_v35  ;;  %11953 = vmatprep.subr.mxu0 %v14497_v31 }
 0x440   : > { %11935 = vmatpush3.msra.mxu1 %v14494_v35  ;;  %11954 = vmatpush3.msra.mxu0 %v14497_v31 }
 0x441   : > { %11937 = vmatmul.mubr.msk.f32.vlgmr.msra.gmra.mxu1 %vm1802_vm11, %v14247_v12  ;;  %11956 = vmatmul.mubr.msk.f32.vlgmr.msra.gmra.mxu0 %vm1802_vm11, %v14247_v12 }
 0x442   : > { %2533 = vmatprep.subr.bf16.mxu1 %v17077_v23  ;;  %11958 = vmatprep.subr.mxu0 %v14144_v4 }
 0x443   : > { %11959 = vmatpush3.msra.mxu0 %v14144_v4  ;;  %v13091_v4 = vld [vmem:[%s17078_s0 + $0x4] ss:$8 sps:$4 sm:$0xff]  }
 0x444   : > { %11960 = vmatprep.subr.mxu0 %v14153_v50  ;;  %10458 = vmatprep.mubr.msk.bf16.mxu1 %vm1572_vm10, %v13091_v4 }
 0x445   : > { %11961 = vmatpush3.msra.mxu0 %v14153_v50 }
 0x446   : > { %11962 = vmatprep.subr.mxu0 %v14166_v32 }
 0x447   : > { %11963 = vmatpush3.msra.mxu0 %v14166_v32 }
 0x448   : > { %11964 = vmatprep.subr.mxu0 %v14178_v30 }
 0x449   : > { %11965 = vmatpush3.msra.mxu0 %v14178_v30 }
 0x44a   : > { %11966 = vmatprep.subr.mxu0 %v14194_v36 }
 0x44b   : > { %11967 = vmatpush3.msra.mxu0 %v14194_v36 }
 0x44c   : > { %11968 = vmatprep.subr.mxu0 %v14204_v2 }
 0x44d   : > { %11969 = vmatpush3.msra.mxu0 %v14204_v2 }
 0x44e   : > { %11970 = vmatprep.subr.mxu0 %v14214_v56 }
 0x44f   : > { %11971 = vmatpush3.msra.mxu0 %v14214_v56 }
 0x450   : > { %11972 = vmatprep.subr.mxu0 %v14224_v63 }
 0x451   : > { %11973 = vmatpush3.msra.mxu0 %v14224_v63 }
 0x452   : > { %11980 = vmatprep.subr.mxu0 %v14147_v22 }
 0x4cc   : > { %v11824_v50 = vpop.f32.mrf.mxu1  ;;  %v11843_v30 = vpop.f32.mrf.mxu0 }
 0x4ce   : > { %v1875_v32 = vpop.f32.mrf.mxu1  ;;  %v1959_v31 = vpop.f32.mrf.mxu0 }
 0x4dd   : > { %v11862_v36 = vpop.f32.mrf.mxu1  ;;  %v11881_v2 = vpop.f32.mrf.mxu0 }
 0x4df   : > { %v2043_v8 = vpop.f32.mrf.mxu1  ;;  %v2127_v59 = vpop.f32.mrf.mxu0 }
 0x4ef   : > { %v11900_v18 = vpop.f32.mrf.mxu1  ;;  %v11919_v56 = vpop.f32.mrf.mxu0 }
 0x4f1   : > { %v2211_v58 = vpop.f32.mrf.mxu1  ;;  %v2295_v63 = vpop.f32.mrf.mxu0 }
 0x4f2   : > { %v2478_v17 = vpack.c.bf16 %v11919_v56, %v2295_v63  ;;  %v2477_v4 = vpack.c.bf16 %v11900_v18, %v2211_v58  ;;  %v2472_v58 = vpack.c.bf16 %v11824_v50, %v1875_v32 }
 0x501   : > { %v11938_v28 = vpop.f32.mrf.mxu1  ;;  %v11957_v18 = vpop.f32.mrf.mxu0 }
 0x503   : > { %v2379_v25 = vpop.f32.mrf.mxu1 }
 0x504   : > { %v2479_v14 = vpack.c.bf16 %v11938_v28, %v2379_v25  ;;  %v2475_v25 = vpack.c.bf16 %v11881_v2, %v2127_v59  ;;  %v2474_v28 = vpack.c.bf16 %v11862_v36, %v2043_v8  ;;  %v13096_v8 = vld [vmem:[%s17078_s0 + $0x10] ss:$8 sps:$4 sm:$0xff]  }
 0x506   : > { %2534 = vmatpush1.bf16.msra.mxu1 %v2479_v14  ;;  %v13093_v14 = vld [vmem:[%s17078_s0] ss:$8 sps:$4 sm:$0xff]   ;;  %s17156_s0 = sld [smem:[#allocation22_spill]] }
 0x507   : > { %2535 = vmatprep.subr.bf16.mxu1 %v17077_v23 }
 0x50a   : > { %2536 = vmatpush1.bf16.msra.mxu1 %v2478_v17  ;;  %v2473_v17 = vpack.c.bf16 %v11843_v30, %v1959_v31  ;;  %v2492_v31 = vpop.permute.xlu1 %2491 }
 0x50b   : > { %2537 = vmatprep.subr.bf16.mxu1 %v17077_v23 }
 0x50e   : > { %2538 = vmatpush1.bf16.msra.mxu1 %v2477_v4 }
 0x50f   : > { %2539 = vmatprep.subr.bf16.mxu1 %v17077_v23 }
 0x512   : > { %2540 = vmatpush1.bf16.msra.mxu1 %v17079_v7  ;;  %v2463_v7 = vpop.f32.mrf.mxu0 }
 0x513   : > { %2541 = vmatprep.subr.bf16.mxu1 %v17077_v23  ;;  %v2480_v59 = vpack.c.bf16 %v11957_v18, %v2463_v7 }
 0x516   : > { %2542 = vmatpush1.bf16.msra.mxu1 %v2475_v25 }
 0x517   : > { %2543 = vmatprep.subr.bf16.mxu1 %v17077_v23 }
 0x51a   : > { %2544 = vmatpush1.bf16.msra.mxu1 %v2474_v28 }
 0x51b   : > { %2545 = vmatprep.subr.bf16.mxu1 %v17077_v23 }
 0x51e   : > { %2546 = vmatpush1.bf16.msra.mxu1 %v2473_v17 }
 0x51f   : > { %2547 = vmatprep.subr.bf16.mxu1 %v17077_v23 }
 0x522   : > { %2548 = vmatpush1.bf16.msra.mxu1 %v2472_v58 }
 0x523   : > { %2563 = vmatprep.subr.bf16.mxu1 %v17077_v23 }
 0x526   : > { %2564 = vmatpush2.bf16.msra.mxu1 %v2480_v59 }
 0x527   : > { %12002 = vmatprep.subr.mxu1 %v14232_v13 }
 0x529   : > { %2566 = vmatmul.mubr.bf16.vlgmr.msra.gmra.mxu1 %v13093_v14 }
 0x52a   : > { %10459 = vmatprep.mubr.msk.bf16.mxu1 %vm1572_vm10, %v13094_v41  ;;  %12003 = vmatpush3.msra.mxu1 %v14232_v13 }
 0x52b   : > { %12004 = vmatprep.subr.mxu1 %v14250_v43 }
 0x52c   : > { %12005 = vmatpush3.msra.mxu1 %v14250_v43 }
 0x52d   : > { %12006 = vmatprep.subr.mxu1 %v14267_v62 }
 0x52e   : > { %12007 = vmatpush3.msra.mxu1 %v14267_v62 }
 0x52f   : > { %12008 = vmatprep.subr.mxu1 %v14278_v20 }
 0x530   : > { %12009 = vmatpush3.msra.mxu1 %v14278_v20  ;;  %v2497_v20 = vpop.permute.xlu0 %2496 }
 0x531   : > { %2574 = vmatmul.mubr.bf16.gmra.mxu1 %v13096_v8  ;;  %12010 = vmatprep.subr.mxu1 %v14288_v47 }
 0x532   : > { %12011 = vmatpush3.msra.mxu1 %v14288_v47 }
 0x533   : > { %12012 = vmatprep.subr.mxu1 %v14298_v52 }
 0x534   : > { %12013 = vmatpush3.msra.mxu1 %v14298_v52  ;;  %v2507_v56 = vpop.permute.xlu0 %2506 }
 0x535   : > { %12014 = vmatprep.subr.mxu1 %v14308_v53 }
 0x536   : > { %12015 = vmatpush3.msra.mxu1 %v14308_v53 }
 0x537   : > { %12016 = vmatprep.subr.mxu1 %v14318_v19 }
 0x538   : > { %12017 = vmatpush3.msra.mxu1 %v14318_v19  ;;  %v2502_v19 = vpop.permute.xlu1 %2501 }
 0x539   : > { %12046 = vmatprep.subr.mxu1 %v14330_v38 }
 0x5e9   : > { %v2567_v13 = vpop.f32.mrf.mxu1 }
 0x5ea   : > { %v2568_v12 = vadd.f32 %v2567_v13, %v2492_v31 }
 0x5eb   : > { %v2569_v43 = vpop.f32.mrf.mxu1 }
 0x5ec   : > { %v14563_v62 = vmax.f32 %v2568_v12, 0.0 }
 0x5ed   : > { %v2570_v47 = vpop.f32.mrf.mxu1 }
 0x5ee   : > { %v2571_v50 = vadd.f32 %v2570_v47, %v2497_v20  ;;  %11974 = vmatprep.mubr.msk.f32.mxu0 %vm1802_vm11, %v14563_v62  ;;  %12018 = vmatprep.mubr.msk.f32.mxu1 %vm1802_vm11, %v14563_v62 }
 0x5ef   : > { %v2572_v52 = vpop.f32.mrf.mxu1 }
 0x5f0   : > { %v14569_v53 = vmax.f32 %v2571_v50, 0.0 }
 0x5f1   : > { %v2575_v32 = vpop.f32.mrf.mxu1 }
 0x5f2   : > { %v2576_v30 = vadd.f32 %v2575_v32, %v2502_v19  ;;  %11975 = vmatmul.mubr.msk.f32.vlgmr.msra.gmra.mxu0 %vm1802_vm11, %v14569_v53  ;;  %12019 = vmatmul.mubr.msk.f32.vlgmr.msra.gmra.mxu1 %vm1802_vm11, %v14569_v53 }
 0x5f3   : > { %11981 = vmatpush3.msra.mxu0 %v14147_v22  ;;  %12047 = vmatpush3.msra.mxu1 %v14330_v38  ;;  %v2577_v36 = vpop.f32.mrf.mxu1 }
 0x5f4   : > { %v14577_v2 = vmax.f32 %v2576_v30, 0.0  ;;  %11982 = vmatprep.subr.mxu0 %v14156_v24  ;;  %12048 = vmatprep.subr.mxu1 %v14344_v11 }
 0x5f5   : > { %11983 = vmatpush3.msra.mxu0 %v14156_v24  ;;  %12049 = vmatpush3.msra.mxu1 %v14344_v11  ;;  %v2578_v63 = vpop.f32.mrf.mxu1  ;;  %v13100_v24 = vld [vmem:[%s17088_s25 + $0x8] ss:$12 sps:$4 sm:$0xff]  }
 0x5f6   : > { %v2579_v4 = vadd.f32 %v2578_v63, %v2507_v56  ;;  %11984 = vmatprep.subr.mxu0 %v14169_v33  ;;  %12050 = vmatprep.subr.mxu1 %v14356_v6 }
 0x5f7   : > { %11977 = vmatprep.mubr.msk.f32.mxu0 %vm1802_vm11, %v14577_v2  ;;  %11985 = vmatpush3.msra.mxu0 %v14169_v33  ;;  %v2580_v22 = vpop.f32.mrf.mxu1 }
 0x5f8   : > { %v14588_v38 = vmax.f32 %v2579_v4, 0.0  ;;  %12021 = vmatprep.mubr.msk.f32.mxu1 %vm1802_vm11, %v14577_v2  ;;  %12051 = vmatpush3.msra.mxu1 %v14356_v6  ;;  %v17081_v6 = vld [vmem:[#allocation54_spill] sm:$0xff] }
 0x5f9   : > { %11986 = vmatprep.subr.mxu0 %v14181_v34  ;;  %12052 = vmatprep.subr.mxu1 %v14366_v3 }
 0x5fa   : > { %11987 = vmatpush3.msra.mxu0 %v14181_v34  ;;  %12053 = vmatpush3.msra.mxu1 %v14366_v3  ;;  %v17080_v3 = vld [vmem:[#allocation53_spill] sm:$0xff]  ;;  %v3287_v22 = vpack.c.bf16 %v14588_v38, %v14577_v2 }
 0x5fb   : > { %11988 = vmatprep.subr.mxu0 %v14197_v10  ;;  %12054 = vmatprep.subr.mxu1 %v14376_v9 }
 0x5fc   : > { %11978 = vmatmul.mubr.msk.f32.gmra.mxu0 %vm1802_vm11, %v14588_v38  ;;  %12022 = vmatmul.mubr.msk.f32.gmra.mxu1 %vm1802_vm11, %v14588_v38 }
 0x5fd   : > { %11989 = vmatpush3.msra.mxu0 %v14197_v10  ;;  %12055 = vmatpush3.msra.mxu1 %v14376_v9  ;;  %v17082_v9 = vld [vmem:[#allocation55_spill] sm:$0xff] }
 0x5fe   : > { %11990 = vmatprep.subr.mxu0 %v14207_v37  ;;  %11996 = vmatprep.mubr.msk.f32.mxu0 %vm1802_vm11, %v14563_v62 }
 0x5ff   : > { %12056 = vmatprep.subr.mxu1 %v14386_v16  ;;  %12062 = vmatprep.mubr.msk.f32.mxu1 %vm1802_vm11, %v14563_v62 }
 0x600   : > { %11991 = vmatpush3.msra.mxu0 %v14207_v37  ;;  %12057 = vmatpush3.msra.mxu1 %v14386_v16  ;;  %v17083_v16 = vld [vmem:[#allocation56_spill] sm:$0xff] }
 0x601   : > { %11992 = vmatprep.subr.mxu0 %v14217_v57  ;;  %12058 = vmatprep.subr.mxu1 %v14396_v5 }
 0x602   : > { %11993 = vmatpush3.msra.mxu0 %v14217_v57  ;;  %12059 = vmatpush3.msra.mxu1 %v14396_v5  ;;  %v17093_v5 = vld [vmem:[#allocation65_spill] sm:$0xff] }
 0x603   : > { %11994 = vmatprep.subr.mxu0 %v14227_v42  ;;  %12060 = vmatprep.subr.mxu1 %v14406_v26 }
 0x604   : > { %11995 = vmatpush3.msra.mxu0 %v14227_v42  ;;  %12061 = vmatpush3.msra.mxu1 %v14406_v26  ;;  %v17091_v26 = vld [vmem:[#allocation63_spill] sm:$0xff] }
 0x605   : > { %11997 = vmatmul.mubr.msk.f32.vlgmr.msra.gmra.mxu0 %vm1802_vm11, %v14569_v53  ;;  %12024 = vmatprep.subr.mxu0 %v14235_v48 }
 0x606   : > { %12063 = vmatmul.mubr.msk.f32.vlgmr.msra.gmra.mxu1 %vm1802_vm11, %v14569_v53  ;;  %12090 = vmatprep.subr.mxu1 %v14418_v29 }
 0x607   : > { %11999 = vmatprep.mubr.msk.f32.mxu0 %vm1802_vm11, %v14577_v2  ;;  %12025 = vmatpush3.msra.mxu0 %v14235_v48 }
 0x608   : > { %12065 = vmatprep.mubr.msk.f32.mxu1 %vm1802_vm11, %v14577_v2  ;;  %12091 = vmatpush3.msra.mxu1 %v14418_v29  ;;  %v17092_v29 = vld [vmem:[#allocation64_spill] sm:$0xff] }
 0x609   : > { %12026 = vmatprep.subr.mxu0 %v14257_v49  ;;  %12092 = vmatprep.subr.mxu1 %v14432_v15 }
 0x60a   : > { %12027 = vmatpush3.msra.mxu0 %v14257_v49  ;;  %12093 = vmatpush3.msra.mxu1 %v14432_v15  ;;  %v13099_v15 = vld [vmem:[%s17088_s25 + $0x4] ss:$12 sps:$4 sm:$0xff]  }
 0x60b   : > { %12000 = vmatmul.mubr.msk.f32.gmra.mxu0 %vm1802_vm11, %v14588_v38  ;;  %12028 = vmatprep.subr.mxu0 %v14270_v44 }
 0x60c   : > { %12066 = vmatmul.mubr.msk.f32.gmra.mxu1 %vm1802_vm11, %v14588_v38  ;;  %12094 = vmatprep.subr.mxu1 %v14444_v60 }
 0x60d   : > { %12029 = vmatpush3.msra.mxu0 %v14270_v44  ;;  %12040 = vmatprep.mubr.msk.f32.mxu0 %vm1802_vm11, %v14563_v62 }
 0x60e   : > { %12095 = vmatpush3.msra.mxu1 %v14444_v60  ;;  %12106 = vmatprep.mubr.msk.f32.mxu1 %vm1802_vm11, %v14563_v62  ;;  %v17089_v60 = vld [vmem:[#allocation61_spill] sm:$0xff] }
 0x60f   : > { %12030 = vmatprep.subr.mxu0 %v14281_v46  ;;  %12096 = vmatprep.subr.mxu1 %v14454_v61 }
 0x610   : > { %12031 = vmatpush3.msra.mxu0 %v14281_v46  ;;  %12097 = vmatpush3.msra.mxu1 %v14454_v61  ;;  %v17090_v61 = vld [vmem:[#allocation62_spill] sm:$0xff] }
 0x611   : > { %12032 = vmatprep.subr.mxu0 %v14291_v51  ;;  %12098 = vmatprep.subr.mxu1 %v14464_v39 }
 0x612   : > { %12033 = vmatpush3.msra.mxu0 %v14291_v51  ;;  %12099 = vmatpush3.msra.mxu1 %v14464_v39  ;;  %v17087_v39 = vld [vmem:[#allocation60_spill] sm:$0xff] }
 0x613   : > { %12034 = vmatprep.subr.mxu0 %v14301_v0  ;;  %12100 = vmatprep.subr.mxu1 %v14474_v21 }
 0x614   : > { %12035 = vmatpush3.msra.mxu0 %v14301_v0  ;;  %12101 = vmatpush3.msra.mxu1 %v14474_v21  ;;  %v17084_v21 = vld [vmem:[#allocation57_spill] sm:$0xff] }
 0x615   : > { %12036 = vmatprep.subr.mxu0 %v14311_v1  ;;  %12102 = vmatprep.subr.mxu1 %v14484_v27 }
 0x616   : > { %12037 = vmatpush3.msra.mxu0 %v14311_v1  ;;  %12103 = vmatpush3.msra.mxu1 %v14484_v27  ;;  %v17085_v27 = vld [vmem:[#allocation58_spill] sm:$0xff] }
 0x617   : > { %12038 = vmatprep.subr.mxu0 %v14321_v45  ;;  %12104 = vmatprep.subr.mxu1 %v14494_v35 }
 0x618   : > { %12039 = vmatpush3.msra.mxu0 %v14321_v45  ;;  %12105 = vmatpush3.msra.mxu1 %v14494_v35  ;;  %v17086_v35 = vld [vmem:[#allocation59_spill] sm:$0xff] }
 0x619   : > { %12041 = vmatmul.mubr.msk.f32.vlgmr.msra.gmra.mxu0 %vm1802_vm11, %v14569_v53  ;;  %12068 = vmatprep.subr.mxu0 %v14333_v40 }
 0x61a   : > { %12107 = vmatmul.mubr.msk.f32.vlgmr.msra.gmra.mxu1 %vm1802_vm11, %v14569_v53  ;;  %12043 = vmatprep.mubr.msk.f32.mxu0 %vm1802_vm11, %v14577_v2 }
 0x61b   : > { %12069 = vmatpush3.msra.mxu0 %v14333_v40  ;;  %12109 = vmatprep.mubr.msk.f32.mxu1 %vm1802_vm11, %v14577_v2 }
 0x61c   : > { %12070 = vmatprep.subr.mxu0 %v14347_v55 }
 0x61d   : > { %12071 = vmatpush3.msra.mxu0 %v14347_v55 }
 0x61e   : > { %12044 = vmatmul.mubr.msk.f32.gmra.mxu0 %vm1802_vm11, %v14588_v38  ;;  %12072 = vmatprep.subr.mxu0 %v14359_v54 }
 0x61f   : > { %12110 = vmatmul.mubr.msk.f32.gmra.mxu1 %vm1802_vm11, %v14588_v38  ;;  %12073 = vmatpush3.msra.mxu0 %v14359_v54 }
 0x620   : > { %12084 = vmatprep.mubr.msk.f32.mxu0 %vm1802_vm11, %v14563_v62  ;;  %12074 = vmatprep.subr.mxu0 %v17080_v3 }
 0x621   : > { %12075 = vmatpush3.msra.mxu0 %v17080_v3  ;;  %3397 = vmatprep.mubr.bf16.mxu1 %v13099_v15 }
 0x622   : > { %12076 = vmatprep.subr.mxu0 %v17081_v6 }
 0x623   : > { %12077 = vmatpush3.msra.mxu0 %v17081_v6 }
 0x624   : > { %12078 = vmatprep.subr.mxu0 %v17082_v9 }
 0x625   : > { %12079 = vmatpush3.msra.mxu0 %v17082_v9 }
 0x626   : > { %12080 = vmatprep.subr.mxu0 %v17083_v16 }
 0x627   : > { %12081 = vmatpush3.msra.mxu0 %v17083_v16 }
 0x628   : > { %12082 = vmatprep.subr.mxu0 %v17084_v21 }
 0x629   : > { %12083 = vmatpush3.msra.mxu0 %v17084_v21  ;;  %v3286_v21 = vpack.c.bf16 %v14569_v53, %v14563_v62 }
 0x62a   : > { %12085 = vmatmul.mubr.msk.f32.vlgmr.msra.gmra.mxu0 %vm1802_vm11, %v14569_v53  ;;  %12112 = vmatprep.subr.mxu0 %v17085_v27 }
 0x62b   : > { %12087 = vmatprep.mubr.msk.f32.mxu0 %vm1802_vm11, %v14577_v2  ;;  %12113 = vmatpush3.msra.mxu0 %v17085_v27  ;;  %v13101_v27 = vld [vmem:[%s17088_s25 + $0x20] ss:$12 sps:$4 sm:$0xff]  }
 0x62c   : > { %12114 = vmatprep.subr.mxu0 %v17086_v35 }
 0x62d   : > { %12115 = vmatpush3.msra.mxu0 %v17086_v35  ;;  %v13102_v35 = vld [vmem:[%s17088_s25 + $0x1c] ss:$12 sps:$4 sm:$0xff]  }
 0x62e   : > { %12088 = vmatmul.mubr.msk.f32.gmra.mxu0 %vm1802_vm11, %v14588_v38  ;;  %12116 = vmatprep.subr.mxu0 %v17087_v39 }
 0x62f   : > { %12117 = vmatpush3.msra.mxu0 %v17087_v39  ;;  %12128 = vmatprep.mubr.msk.f32.mxu0 %vm1802_vm11, %v14563_v62  ;;  %v13104_v62 = vld [vmem:[%s17088_s25 + $0x18] ss:$12 sps:$4 sm:$0xff]   ;;  %v13106_v39 = vld [vmem:[%s17094_s15 + $0x10] sm:$0xff]  }
 0x630   : > { %12118 = vmatprep.subr.mxu0 %v17089_v60 }
 0x631   : > { %12119 = vmatpush3.msra.mxu0 %v17089_v60  ;;  %v13107_v60 = vld [vmem:[%s17094_s15 + $0x8] sm:$0xff]  }
 0x632   : > { %12120 = vmatprep.subr.mxu0 %v17090_v61 }
 0x633   : > { %12121 = vmatpush3.msra.mxu0 %v17090_v61  ;;  %v13108_v61 = vld [vmem:[%s17094_s15] sm:$0xff]  }
 0x634   : > { %12122 = vmatprep.subr.mxu0 %v17091_v26 }
 0x635   : > { %12123 = vmatpush3.msra.mxu0 %v17091_v26 }
 0x636   : > { %12124 = vmatprep.subr.mxu0 %v17092_v29 }
 0x637   : > { %12125 = vmatpush3.msra.mxu0 %v17092_v29 }
 0x638   : > { %12126 = vmatprep.subr.mxu0 %v17093_v5 }
 0x639   : > { %12127 = vmatpush3.msra.mxu0 %v17093_v5 }
 0x63a   : > { %12129 = vmatmul.mubr.msk.f32.vlgmr.msra.gmra.mxu0 %vm1802_vm11, %v14569_v53  ;;  %v13105_v53 = vld [vmem:[%s17094_s15 + $0x18] sm:$0xff]  }
 0x63b   : > { %12131 = vmatprep.mubr.msk.f32.mxu0 %vm1802_vm11, %v14577_v2 }
 0x63e   : > { %12132 = vmatmul.mubr.msk.f32.gmra.mxu0 %vm1802_vm11, %v14588_v38  ;;  %v13097_v38 = vld [vmem:[%s17088_s25] ss:$12 sps:$4 sm:$0xff]  }
 0x63f   : > { %12138 = vmatprep.mubr.msk.bf16.mxu0 %vm3358_vm12, %v13100_v24  ;;  %v3311_v24 = vpop.permute.xlu1 %3310 }
 0x6b2   : > { %v14732_v33 = vpop.f32.mrf.mxu0  ;;  %v12020_v34 = vpop.f32.mrf.mxu1 }
 0x6b4   : > { %v14734_v10 = vpop.f32.mrf.mxu0  ;;  %v2834_v37 = vpop.f32.mrf.mxu1 }
 0x6b5   : > { %v3282_v52 = vpack.c.bf16 %v12020_v34, %v2834_v37  ;;  %v3278_v2 = vpack.c.bf16 %v14732_v33, %v14734_v10 }
 0x6bc   : > { %v11979_v57 = vpop.f32.mrf.mxu0  ;;  %v12023_v42 = vpop.f32.mrf.mxu1 }
 0x6be   : > { %v2674_v48 = vpop.f32.mrf.mxu0  ;;  %v2844_v49 = vpop.f32.mrf.mxu1 }
 0x6bf   : > { %v3283_v47 = vpack.c.bf16 %v12023_v42, %v2844_v49  ;;  %v3279_v9 = vpack.c.bf16 %v11979_v57, %v2674_v48  ;;  %v3316_v42 = vpop.permute.xlu0 %3315 }
 0x6c5   : > { %v11998_v54 = vpop.f32.mrf.mxu0 }
 0x6c6   : > { %v12064_v44 = vpop.f32.mrf.mxu1 }
 0x6c7   : > { %v2749_v46 = vpop.f32.mrf.mxu0 }
 0x6c8   : > { %v3004_v51 = vpop.f32.mrf.mxu1  ;;  %v3280_v63 = vpack.c.bf16 %v11998_v54, %v2749_v46 }
 0x6c9   : > { %v3288_v36 = vpack.c.bf16 %v12064_v44, %v3004_v51 }
 0x6cb   : > { %v12001_v0 = vpop.f32.mrf.mxu0 }
 0x6cc   : > { %v12067_v1 = vpop.f32.mrf.mxu1 }
 0x6cd   : > { %v2759_v45 = vpop.f32.mrf.mxu0 }
 0x6ce   : > { %v3014_v40 = vpop.f32.mrf.mxu1  ;;  %v3281_v32 = vpack.c.bf16 %v12001_v0, %v2759_v45  ;;  %v3321_v45 = vpop.permute.xlu1 %3320 }
 0x6cf   : > { %v3289_v19 = vpack.c.bf16 %v12067_v1, %v3014_v40 }
 0x6d9   : > { %v12042_v11 = vpop.f32.mrf.mxu0 }
 0x6da   : > { %v12108_v55 = vpop.f32.mrf.mxu1 }
 0x6db   : > { %v2919_v25 = vpop.f32.mrf.mxu0 }
 0x6dc   : > { %v3174_v28 = vpop.f32.mrf.mxu1  ;;  %v3284_v8 = vpack.c.bf16 %v12042_v11, %v2919_v25 }
 0x6dd   : > { %v3292_v41 = vpack.c.bf16 %v12108_v55, %v3174_v28 }
 0x6de   : > { %v12045_v17 = vpop.f32.mrf.mxu0 }
 0x6df   : > { %v12111_v18 = vpop.f32.mrf.mxu1 }
 0x6e0   : > { %v2929_v58 = vpop.f32.mrf.mxu0 }
 0x6e1   : > { %v3285_v7 = vpack.c.bf16 %v12045_v17, %v2929_v58  ;;  %v3184_v59 = vpop.f32.mrf.mxu1  ;;  %v3326_v58 = vpop.permute.xlu0 %3325 }
 0x6e2   : > { %v3293_v14 = vpack.c.bf16 %v12111_v18, %v3184_v59 }
 0x6e4   : > { %11090 = vmatprep.subr.bf16.mxu1 %v3293_v14 }
 0x6e5   : > { %11091 = vmatpush3.bf16.msra.mxu1 %v3285_v7 }
 0x6e6   : > { %11092 = vmatprep.subr.bf16.mxu1 %v3292_v41 }
 0x6e9   : > { %11093 = vmatpush3.bf16.msra.mxu1 %v3284_v8 }
 0x6ea   : > { %v12086_v31 = vpop.f32.mrf.mxu0 }
 0x6ec   : > { %v3089_v13 = vpop.f32.mrf.mxu0 }
 0x6ed   : > { %v3290_v50 = vpack.c.bf16 %v12086_v31, %v3089_v13  ;;  %v14772_v13 = vld [vmem:[%s17095_s26 + $0x18] sm:$0xff] }
 0x6ee   : > { %v12089_v12 = vpop.f32.mrf.mxu0 }
 0x6f0   : > { %v3099_v43 = vpop.f32.mrf.mxu0 }
 0x6f1   : > { %v3291_v20 = vpack.c.bf16 %v12089_v12, %v3099_v43  ;;  %v14777_v12 = vld [vmem:[%s17095_s26 + $0x8] sm:$0xff]  ;;  %v14781_v43 = vld [vmem:[%s17095_s26 + $0x10] sm:$0xff] }
 0x6f3   : > { %11094 = vmatprep.subr.bf16.mxu1 %v3291_v20  ;;  %v14786_v20 = vld [vmem:[%s17095_s26] sm:$0xff] }
 0x6f4   : > { %11095 = vmatpush3.bf16.msra.mxu1 %v3283_v47  ;;  %v14791_v47 = vld [vmem:[%s17095_s26 + $0x38] sm:$0xff] }
 0x6f5   : > { %11096 = vmatprep.subr.bf16.mxu1 %v3290_v50 }
 0x6f8   : > { %11097 = vmatpush3.bf16.msra.mxu1 %v3282_v52 }
 0x6f9   : > { %11098 = vmatprep.subr.bf16.mxu1 %v3289_v19 }
 0x6fa   : > { %v12130_v30 = vpop.f32.mrf.mxu0 }
 0x6fc   : > { %v3259_v56 = vpop.f32.mrf.mxu0  ;;  %11099 = vmatpush3.bf16.msra.mxu1 %v3281_v32  ;;  %v14807_v32 = vld [vmem:[%s17095_s26 + $0x30] sm:$0xff] }
 0x6fd   : > { %11100 = vmatprep.subr.bf16.mxu1 %v3288_v36  ;;  %v3294_v16 = vpack.c.bf16 %v12130_v30, %v3259_v56  ;;  %v14825_v56 = vld [vmem:[%s17095_s26 + $0x68] sm:$0xff] }
 0x6fe   : > { %v12133_v4 = vpop.f32.mrf.mxu0 }
 0x700   : > { %v3269_v3 = vpop.f32.mrf.mxu0  ;;  %11101 = vmatpush3.bf16.msra.mxu1 %v3280_v63  ;;  %v14834_v63 = vld [vmem:[%s17095_s26 + $0x28] sm:$0xff] }
 0x701   : > { %v3295_v6 = vpack.c.bf16 %v12133_v4, %v3269_v3  ;;  %11102 = vmatprep.subr.bf16.mxu1 %v3287_v22  ;;  %v14843_v4 = vld [vmem:[%s17095_s26 + $0x60] sm:$0xff]  ;;  %v14863_v3 = vld [vmem:[%s17095_s26 + $0x88] sm:$0xff] }
 0x702   : > { %v14852_v22 = vld [vmem:[%s17095_s26 + $0x20] sm:$0xff] }
 0x703   : > { %12134 = vmatprep.subr.bf16.mxu0 %v3295_v6 }
 0x704   : > { %11103 = vmatpush3.bf16.msra.mxu1 %v3279_v9  ;;  %12135 = vmatpush3.bf16.msra.mxu0 %v3295_v6  ;;  %v14869_v6 = vld [vmem:[%s17095_s26 + $0x58] sm:$0xff]  ;;  %v14876_v9 = vld [vmem:[%s17095_s26 + $0x80] sm:$0xff] }
 0x705   : > { %11104 = vmatprep.subr.bf16.mxu1 %v3286_v21  ;;  %12136 = vmatprep.subr.bf16.mxu0 %v3294_v16  ;;  %v14899_v21 = vld [vmem:[%s17095_s26 + $0x78] sm:$0xff] }
 0x708   : > { %11105 = vmatpush3.bf16.msra.mxu1 %v3278_v2  ;;  %12137 = vmatpush3.bf16.msra.mxu0 %v3294_v16  ;;  %v14887_v16 = vld [vmem:[%s17095_s26 + $0x50] sm:$0xff] }
 0x709   : > { %12142 = vmatprep.subr.bf16.mxu0 %v13105_v53  ;;  %13008 = vmatprep.subr.mxu1 %v14772_v13  ;;  %v14909_v2 = vld [vmem:[%s17095_s26 + $0x70] sm:$0xff] }
 0x70b   : > { %3398 = vmatmul.mubr.bf16.vlgmr.msra.gmra.mxu1 %v13097_v38  ;;  %12139 = vmatmul.mubr.msk.bf16.vlgmr.msra.gmra.mxu0 %vm3358_vm12, %v13101_v27  ;;  %v13111_v38 = vld [vmem:[%s17098_s1 + $0x4] ss:$12 sps:$4 sm:$0xff]   ;;  %v13112_v27 = vld [vmem:[%s17098_s1 + $0x8] ss:$12 sps:$4 sm:$0xff]  }
 0x70c   : > { %3405 = vmatprep.mubr.bf16.mxu1 %v13102_v35  ;;  %12143 = vmatpush3.bf16.msra.mxu0 %v13105_v53 }
 0x70d   : > { %12144 = vmatprep.subr.bf16.mxu0 %v13106_v39  ;;  %13010 = vmatpush3.msra.mxu1 %v14772_v13 }
 0x70e   : > { %13009 = vmatprep.subr.mxu1 %v14781_v43 }
 0x70f   : > { %13011 = vmatpush3.msra.mxu1 %v14781_v43 }
 0x710   : > { %12145 = vmatpush3.bf16.msra.mxu0 %v13106_v39  ;;  %12184 = vmatprep.subr.mxu1 %v14791_v47 }
 0x711   : > { %12146 = vmatprep.subr.bf16.mxu0 %v13107_v60 }
 0x713   : > { %3406 = vmatmul.mubr.bf16.gmra.mxu1 %v13104_v62 }
 0x714   : > { %12147 = vmatpush3.bf16.msra.mxu0 %v13107_v60 }
 0x715   : > { %12148 = vmatprep.subr.bf16.mxu0 %v13108_v61 }
 0x718   : > { %12149 = vmatpush3.bf16.msra.mxu0 %v13108_v61 }
 0x719   : > { %12154 = vmatprep.subr.mxu0 %v14777_v12 }
 0x7cb   : > { %v11106_v26 = vpop.f32.mrf.mxu1  ;;  %v12140_v29 = vpop.f32.mrf.mxu0 }
 0x7cd   : > { %v11107_v5 = vpop.f32.mrf.mxu1  ;;  %v3448_v15 = vpop.f32.mrf.mxu0 }
 0x7ce   : > { %v11108_v33 = vadd.f32 %v11107_v5, %v11106_v26 }
 0x7cf   : > { %v11109_v34 = vpop.f32.mrf.mxu1  ;;  %v12141_v10 = vpop.f32.mrf.mxu0 }
 0x7d0   : > { %v3400_v37 = vadd.f32 %v11108_v33, %v3311_v24 }
 0x7d1   : > { %v11110_v57 = vpop.f32.mrf.mxu1  ;;  %v3451_v54 = vpop.f32.mrf.mxu0 }
 0x7d2   : > { %v11111_v48 = vadd.f32 %v11110_v57, %v11109_v34  ;;  %v3449_v44 = vadd.f32 %v3448_v15, %v3400_v37 }
 0x7d3   : > { %v11112_v49 = vpop.f32.mrf.mxu1 }
 0x7d4   : > { %v3403_v46 = vadd.f32 %v11111_v48, %v3316_v42  ;;  %v14751_v11 = vmax.f32 %v3449_v44, 0.0 }
 0x7d5   : > { %v11113_v51 = vpop.f32.mrf.mxu1 }
 0x7d6   : > { %v11114_v0 = vadd.f32 %v11113_v51, %v11112_v49  ;;  %v3452_v1 = vadd.f32 %v3451_v54, %v3403_v46 }
 0x7d7   : > { %v11115_v40 = vpop.f32.mrf.mxu1 }
 0x7d8   : > { %v3408_v55 = vadd.f32 %v11114_v0, %v3321_v45  ;;  %v14753_v25 = vmax.f32 %v3452_v1, 0.0 }
 0x7d9   : > { %v11116_v28 = vpop.f32.mrf.mxu1 }
 0x7da   : > { %v11117_v17 = vadd.f32 %v11116_v28, %v11115_v40  ;;  %v14757_v18 = vpack.c.bf16 %v14753_v25, %v14751_v11  ;;  %v3457_v7 = vadd.f32 %v12140_v29, %v3408_v55 }
 0x7dc   : > { %17096 = vst [vmem:[#allocation53_spill] sm:$0xff] %v14757_v18  ;;  %v3411_v59 = vadd.f32 %v11117_v17, %v3326_v58  ;;  %12150 = vmatprep.mubr.msk.bf16.mxu0 %vm1802_vm11, %v14757_v18  ;;  %v14761_v41 = vmax.f32 %v3457_v7, 0.0  ;;  %v15615_v18 = vld [vmem:[%s17063_s2 + $0x1e0] sm:$0xff] }
 0x7dd   : > { %17111 = vst [vmem:[#allocation63_spill] sm:$0xff] %v15615_v18 }
 0x7de   : > { %v3460_v14 = vadd.f32 %v12141_v10, %v3411_v59 }
 0x7e0   : > { %v14763_v8 = vmax.f32 %v3460_v14, 0.0  ;;  %v13113_v14 = vld [vmem:[%s17098_s1 + $0x20] ss:$12 sps:$4 sm:$0xff]  }
 0x7e2   : > { %v14767_v31 = vpack.c.bf16 %v14763_v8, %v14761_v41 }
 0x7e4   : > { %17097 = vst [vmem:[#allocation54_spill] sm:$0xff] %v14767_v31  ;;  %12151 = vmatmul.mubr.msk.bf16.vlgmr.msra.gmra.mxu0 %vm1802_vm11, %v14767_v31  ;;  %v15619_v31 = vld [vmem:[%s17063_s2 + $0x220] sm:$0xff] }
 0x7e5   : > { %12155 = vmatpush3.msra.mxu0 %v14777_v12  ;;  %17112 = vst [vmem:[#allocation64_spill] sm:$0xff] %v15619_v31 }
 0x7e6   : > { %12156 = vmatprep.subr.mxu0 %v14786_v20 }
 0x7e7   : > { %12157 = vmatpush3.msra.mxu0 %v14786_v20 }
 0x7e8   : > { %12164 = vmatprep.subr.mxu0 %v14772_v13 }
 0x8a4   : > { %v14796_v50 = vpop.f32.mrf.mxu0 }
 0x8a5   : > { %12171 = vmatprep.mubr.msk.f32.mxu1 %vm1572_vm10, %v14796_v50 }
 0x8a6   : > { %v14800_v52 = vpop.f32.mrf.mxu0 }
 0x8a7   : > { %12158 = vmatprep.mubr.msk.f32.mxu0 %vm1572_vm10, %v14800_v52 }
 0x8a8   : > { %v14804_v19 = vpop.f32.mrf.mxu0 }
 0x8a9   : > { %12172 = vmatmul.mubr.msk.f32.vlgmr.msra.gmra.mxu1 %vm1572_vm10, %v14804_v19 }
 0x8aa   : > { %v14813_v36 = vpop.f32.mrf.mxu0  ;;  %12185 = vmatpush3.msra.mxu1 %v14791_v47  ;;  %12188 = vmatprep.mubr.msk.f32.mxu1 %vm1572_vm10, %v14800_v52 }
 0x8ab   : > { %12159 = vmatmul.mubr.msk.f32.vlgmr.msra.gmra.mxu0 %vm1572_vm10, %v14813_v36  ;;  %12186 = vmatprep.subr.mxu1 %v14807_v32 }
 0x8ac   : > { %12161 = vmatprep.mubr.msk.f32.mxu0 %vm1572_vm10, %v14796_v50  ;;  %12187 = vmatpush3.msra.mxu1 %v14807_v32 }
 0x8ad   : > { %12189 = vmatmul.mubr.msk.f32.vlgmr.msra.gmra.mxu1 %vm1572_vm10, %v14813_v36  ;;  %12165 = vmatpush3.msra.mxu0 %v14772_v13 }
 0x8ae   : > { %12191 = vmatprep.mubr.msk.f32.mxu1 %vm1572_vm10, %v14796_v50  ;;  %12166 = vmatprep.subr.mxu0 %v14781_v43 }
 0x8af   : > { %12162 = vmatmul.mubr.msk.f32.gmra.mxu0 %vm1572_vm10, %v14804_v19  ;;  %12204 = vmatprep.subr.mxu1 %v14825_v56 }
 0x8b0   : > { %12168 = vmatprep.mubr.msk.f32.mxu0 %vm1572_vm10, %v14800_v52  ;;  %12167 = vmatpush3.msra.mxu0 %v14781_v43 }
 0x8b1   : > { %12192 = vmatmul.mubr.msk.f32.gmra.mxu1 %vm1572_vm10, %v14804_v19  ;;  %12174 = vmatprep.subr.mxu0 %v14834_v63 }
 0x8b2   : > { %12205 = vmatpush3.msra.mxu1 %v14825_v56  ;;  %12208 = vmatprep.mubr.msk.f32.mxu1 %vm1572_vm10, %v14800_v52 }
 0x8b3   : > { %12169 = vmatmul.mubr.msk.f32.vlgmr.msra.gmra.mxu0 %vm1572_vm10, %v14813_v36  ;;  %12206 = vmatprep.subr.mxu1 %v14843_v4 }
 0x8b4   : > { %12175 = vmatpush3.msra.mxu0 %v14834_v63  ;;  %12178 = vmatprep.mubr.msk.f32.mxu0 %vm1572_vm10, %v14800_v52 }
 0x8b5   : > { %12207 = vmatpush3.msra.mxu1 %v14843_v4  ;;  %12176 = vmatprep.subr.mxu0 %v14852_v22 }
 0x8b6   : > { %12209 = vmatmul.mubr.msk.f32.vlgmr.msra.gmra.mxu1 %vm1572_vm10, %v14813_v36  ;;  %12177 = vmatpush3.msra.mxu0 %v14852_v22 }
 0x8b7   : > { %12211 = vmatprep.mubr.msk.f32.mxu1 %vm1572_vm10, %v14796_v50  ;;  %12179 = vmatmul.mubr.msk.f32.vlgmr.msra.gmra.mxu0 %vm1572_vm10, %v14813_v36 }
 0x8b8   : > { %12181 = vmatprep.mubr.msk.f32.mxu0 %vm1572_vm10, %v14796_v50  ;;  %12224 = vmatprep.subr.mxu1 %v14863_v3 }
 0x8b9   : > { %12225 = vmatpush3.msra.mxu1 %v14863_v3  ;;  %12194 = vmatprep.subr.mxu0 %v14869_v6 }
 0x8ba   : > { %12212 = vmatmul.mubr.msk.f32.gmra.mxu1 %vm1572_vm10, %v14804_v19  ;;  %12226 = vmatprep.subr.mxu1 %v14876_v9 }
 0x8bb   : > { %12228 = vmatprep.mubr.msk.f32.mxu1 %vm1572_vm10, %v14800_v52  ;;  %12182 = vmatmul.mubr.msk.f32.gmra.mxu0 %vm1572_vm10, %v14804_v19 }
 0x8bc   : > { %12195 = vmatpush3.msra.mxu0 %v14869_v6  ;;  %12198 = vmatprep.mubr.msk.f32.mxu0 %vm1572_vm10, %v14800_v52 }
 0x8bd   : > { %12227 = vmatpush3.msra.mxu1 %v14876_v9  ;;  %12196 = vmatprep.subr.mxu0 %v14887_v16 }
 0x8be   : > { %12229 = vmatmul.mubr.msk.f32.vlgmr.msra.gmra.mxu1 %vm1572_vm10, %v14813_v36  ;;  %12197 = vmatpush3.msra.mxu0 %v14887_v16 }
 0x8bf   : > { %12231 = vmatprep.mubr.msk.f32.mxu1 %vm1572_vm10, %v14796_v50  ;;  %12199 = vmatmul.mubr.msk.f32.vlgmr.msra.gmra.mxu0 %vm1572_vm10, %v14813_v36 }
 0x8c0   : > { %12201 = vmatprep.mubr.msk.f32.mxu0 %vm1572_vm10, %v14796_v50  ;;  %12214 = vmatprep.subr.mxu0 %v14899_v21 }
 0x8c1   : > { %12215 = vmatpush3.msra.mxu0 %v14899_v21 }
 0x8c2   : > { %12232 = vmatmul.mubr.msk.f32.gmra.mxu1 %vm1572_vm10, %v14804_v19  ;;  %12216 = vmatprep.subr.mxu0 %v14909_v2 }
 0x8c3   : > { %12202 = vmatmul.mubr.msk.f32.gmra.mxu0 %vm1572_vm10, %v14804_v19  ;;  %12238 = vmatprep.mubr.msk.bf16.mxu1 %vm3358_vm12, %v13112_v27 }
 0x8c4   : > { %12218 = vmatprep.mubr.msk.f32.mxu0 %vm1572_vm10, %v14800_v52  ;;  %12217 = vmatpush3.msra.mxu0 %v14909_v2 }
 0x8c7   : > { %12219 = vmatmul.mubr.msk.f32.vlgmr.msra.gmra.mxu0 %vm1572_vm10, %v14813_v36 }
 0x8c8   : > { %12221 = vmatprep.mubr.msk.f32.mxu0 %vm1572_vm10, %v14796_v50 }
 0x8cb   : > { %12222 = vmatmul.mubr.msk.f32.gmra.mxu0 %vm1572_vm10, %v14804_v19 }
 0x8cc   : > { %4457 = vmatprep.mubr.bf16.mxu0 %v13111_v38  ;;  %v13120_v38 = vld [vmem:[%s17098_s1 + $0x38] ss:$12 sps:$4 sm:$0xff]  }
 0x969   : > { %v14932_v35 = vpop.f32.mrf.mxu1 }
 0x96b   : > { %v14934_v62 = vpop.f32.mrf.mxu0  ;;  %v14936_v53 = vpop.f32.mrf.mxu1 }
 0x96d   : > { %v14938_v39 = vpop.f32.mrf.mxu0  ;;  %v12190_v60 = vpop.f32.mrf.mxu1 }
 0x96f   : > { %v14940_v61 = vpop.f32.mrf.mxu0  ;;  %v3900_v26 = vpop.f32.mrf.mxu1 }
 0x971   : > { %v14942_v29 = vpop.f32.mrf.mxu0  ;;  %v12193_v5 = vpop.f32.mrf.mxu1 }
 0x973   : > { %v14944_v15 = vpop.f32.mrf.mxu0  ;;  %v3910_v24 = vpop.f32.mrf.mxu1 }
 0x974   : > { %v4278_v23 = vpack.c.bf16 %v12193_v5, %v3910_v24  ;;  %v17099_v24 = vpack.c.bf16 %v14804_v19, %v14796_v50  ;;  %v13116_v50 = vld [vmem:[%s17098_s1 + $0x18] ss:$12 sps:$4 sm:$0xff]   ;;  %v13119_v19 = vld [vmem:[%s17098_s1 + $0x30] ss:$12 sps:$4 sm:$0xff]  }
 0x975   : > { %v3724_v33 = vpop.f32.mrf.mxu0 }
 0x976   : > { %v12210_v34 = vpop.f32.mrf.mxu1 }
 0x977   : > { %v12180_v10 = vpop.f32.mrf.mxu0 }
 0x978   : > { %v4076_v37 = vpop.f32.mrf.mxu1 }
 0x979   : > { %v3812_v57 = vpop.f32.mrf.mxu0 }
 0x97a   : > { %v12213_v42 = vpop.f32.mrf.mxu1 }
 0x97b   : > { %v12183_v48 = vpop.f32.mrf.mxu0 }
 0x97c   : > { %v4086_v49 = vpop.f32.mrf.mxu1 }
 0x97d   : > { %v3822_v54 = vpop.f32.mrf.mxu0 }
 0x97e   : > { %v12230_v44 = vpop.f32.mrf.mxu1  ;;  %v4276_v5 = vpack.c.bf16 %v12183_v48, %v3822_v54 }
 0x97f   : > { %v12200_v46 = vpop.f32.mrf.mxu0 }
 0x980   : > { %v4252_v51 = vpop.f32.mrf.mxu1 }
 0x981   : > { %v3988_v0 = vpop.f32.mrf.mxu0  ;;  %v4287_v17 = vpack.c.bf16 %v12230_v44, %v4252_v51  ;;  %v4277_v44 = vpack.c.bf16 %v12190_v60, %v3900_v26  ;;  %v13121_v51 = vld [vmem:[%s17098_s1 + $0x50] ss:$12 sps:$4 sm:$0xff]   ;;  %v4273_v26 = vpack.c.bf16 %v14944_v15, %v3724_v33  ;;  %v4316_v33 = vpop.permute.xlu1 %4315 }
 0x982   : > { %v12233_v1 = vpop.f32.mrf.mxu1  ;;  %v4281_v60 = vpack.c.bf16 %v12200_v46, %v3988_v0  ;;  %v13114_v15 = vld [vmem:[%s17098_s1 + $0x1c] ss:$12 sps:$4 sm:$0xff]  }
 0x983   : > { %v12203_v45 = vpop.f32.mrf.mxu0 }
 0x984   : > { %v4262_v40 = vpop.f32.mrf.mxu1 }
 0x985   : > { %v4288_v55 = vpack.c.bf16 %v12233_v1, %v4262_v40  ;;  %v3998_v28 = vpop.f32.mrf.mxu0  ;;  %v4284_v40 = vpack.c.bf16 %v12213_v42, %v4086_v49  ;;  %v4321_v49 = vpop.permute.xlu0 %4320 }
 0x987   : > { %12234 = vmatprep.subr.bf16.mxu1 %v4288_v55  ;;  %v12220_v58 = vpop.f32.mrf.mxu0 }
 0x988   : > { %12235 = vmatpush3.bf16.msra.mxu1 %v4288_v55 }
 0x989   : > { %12236 = vmatprep.subr.bf16.mxu1 %v4287_v17  ;;  %v4164_v7 = vpop.f32.mrf.mxu0 }
 0x98a   : > { %v4285_v1 = vpack.c.bf16 %v12220_v58, %v4164_v7 }
 0x98b   : > { %v12223_v59 = vpop.f32.mrf.mxu0 }
 0x98c   : > { %12237 = vmatpush3.bf16.msra.mxu1 %v4287_v17 }
 0x98d   : > { %v4174_v27 = vpop.f32.mrf.mxu0  ;;  %12246 = vmatprep.subr.mxu1 %v14777_v12 }
 0x98e   : > { %v4286_v30 = vpack.c.bf16 %v12223_v59, %v4174_v27  ;;  %v4326_v59 = vpop.permute.xlu1 %4325 }
 0x98f   : > { %12239 = vmatmul.mubr.msk.bf16.vlgmr.msra.gmra.mxu1 %vm3358_vm12, %v13113_v14 }
 0x990   : > { %11176 = vmatprep.subr.bf16.mxu0 %v4286_v30  ;;  %12242 = vmatprep.mubr.msk.bf16.mxu1 %vm3358_vm12, %v13120_v38  ;;  %v4283_v30 = vpack.c.bf16 %v12210_v34, %v4076_v37  ;;  %v4272_v34 = vpack.c.bf16 %v14940_v61, %v14942_v29 }
 0x991   : > { %11177 = vmatpush3.bf16.msra.mxu0 %v4278_v23  ;;  %12247 = vmatpush3.msra.mxu1 %v14777_v12  ;;  %v4275_v23 = vpack.c.bf16 %v12180_v10, %v3812_v57  ;;  %v4282_v12 = vpack.c.bf16 %v12203_v45, %v3998_v28  ;;  %v4279_v10 = vpack.c.bf16 %v14813_v36, %v14800_v52  ;;  %v13117_v52 = vld [vmem:[%s17098_s1 + $0x34] ss:$12 sps:$4 sm:$0xff]   ;;  %v13122_v36 = vld [vmem:[%s17098_s1 + $0x4c] ss:$12 sps:$4 sm:$0xff]  }
 0x992   : > { %11178 = vmatprep.subr.bf16.mxu0 %v4285_v1  ;;  %12248 = vmatprep.subr.mxu1 %v14786_v20 }
 0x993   : > { %12249 = vmatpush3.msra.mxu1 %v14786_v20  ;;  %v4274_v20 = vpack.c.bf16 %v14932_v35, %v14936_v53  ;;  %v4271_v35 = vpack.c.bf16 %v14934_v62, %v14938_v39  ;;  %v13109_v53 = vld [vmem:[%s17098_s1] ss:$12 sps:$4 sm:$0xff]   ;;  %v13124_v62 = vld [vmem:[%s17098_s1 + $0x48] ss:$12 sps:$4 sm:$0xff]   ;;  %s17157_s1 = sld [smem:[#allocation24_spill]] }
 0x994   : > { %12262 = vmatprep.subr.mxu1 %v14772_v13 }
 0x995   : > { %11179 = vmatpush3.bf16.msra.mxu0 %v4277_v44 }
 0x996   : > { %11180 = vmatprep.subr.bf16.mxu0 %v4284_v40 }
 0x997   : > { %12243 = vmatmul.mubr.msk.bf16.gmra.mxu1 %vm3358_vm12, %v13121_v51 }
 0x999   : > { %11181 = vmatpush3.bf16.msra.mxu0 %v4276_v5  ;;  %v4331_v5 = vpop.permute.xlu0 %4330 }
 0x99a   : > { %11182 = vmatprep.subr.bf16.mxu0 %v4283_v30 }
 0x99d   : > { %11183 = vmatpush3.bf16.msra.mxu0 %v4275_v23 }
 0x99e   : > { %11184 = vmatprep.subr.bf16.mxu0 %v4282_v12 }
 0x9a1   : > { %11185 = vmatpush3.bf16.msra.mxu0 %v4274_v20 }
 0x9a2   : > { %11186 = vmatprep.subr.bf16.mxu0 %v4281_v60 }
 0x9a5   : > { %11187 = vmatpush3.bf16.msra.mxu0 %v4273_v26 }
 0x9a6   : > { %11188 = vmatprep.subr.bf16.mxu0 %v17099_v24 }
 0x9a9   : > { %11189 = vmatpush3.bf16.msra.mxu0 %v4272_v34 }
 0x9aa   : > { %11190 = vmatprep.subr.bf16.mxu0 %v4279_v10 }
 0x9ad   : > { %11191 = vmatpush3.bf16.msra.mxu0 %v4271_v35 }
 0x9ae   : > { %12294 = vmatprep.subr.mxu0 %v14791_v47 }
 0x9b0   : > { %4458 = vmatmul.mubr.bf16.vlgmr.msra.gmra.mxu0 %v13109_v53 }
 0x9b1   : > { %4465 = vmatprep.mubr.bf16.mxu0 %v13114_v15  ;;  %12295 = vmatpush3.msra.mxu0 %v14791_v47  ;;  %v4341_v15 = vpop.permute.xlu0 %4340 }
 0x9b2   : > { %12296 = vmatprep.subr.mxu0 %v14807_v32 }
 0x9b3   : > { %12297 = vmatpush3.msra.mxu0 %v14807_v32 }
 0x9b4   : > { %12326 = vmatprep.subr.mxu0 %v14825_v56 }
 0x9b8   : > { %4466 = vmatmul.mubr.bf16.gmra.mxu0 %v13116_v50 }
 0x9b9   : > { %4473 = vmatprep.mubr.bf16.mxu0 %v13117_v52 }
 0x9c0   : > { %4474 = vmatmul.mubr.bf16.gmra.mxu0 %v13119_v19 }
 0x9c1   : > { %4481 = vmatprep.mubr.bf16.mxu0 %v13122_v36 }
 0x9c8   : > { %4482 = vmatmul.mubr.bf16.gmra.mxu0 %v13124_v62 }
 0xa4f   : > { %v12240_v39 = vpop.f32.mrf.mxu1 }
 0xa51   : > { %v4524_v29 = vpop.f32.mrf.mxu1 }
 0xa53   : > { %v12241_v32 = vpop.f32.mrf.mxu1 }
 0xa55   : > { %v4527_v45 = vpop.f32.mrf.mxu1 }
 0xa57   : > { %v12244_v44 = vpop.f32.mrf.mxu1 }
 0xa59   : > { %v4540_v60 = vpop.f32.mrf.mxu1 }
 0xa5b   : > { %v12245_v35 = vpop.f32.mrf.mxu1 }
 0xa5d   : > { %v4543_v36 = vpop.f32.mrf.mxu1 }
 0xa70   : > { %v11192_v61 = vpop.f32.mrf.mxu0 }
 0xa72   : > { %v11193_v47 = vpop.f32.mrf.mxu0 }
 0xa73   : > { %v11194_v37 = vadd.f32 %v11193_v47, %v11192_v61 }
 0xa74   : > { %v11195_v57 = vpop.f32.mrf.mxu0 }
 0xa75   : > { %v4460_v42 = vadd.f32 %v11194_v37, %v4316_v33 }
 0xa76   : > { %v11196_v48 = vpop.f32.mrf.mxu0 }
 0xa77   : > { %v11197_v54 = vadd.f32 %v11196_v48, %v11195_v57  ;;  %v4525_v46 = vadd.f32 %v4524_v29, %v4460_v42  ;;  %v4351_v48 = vpop.permute.xlu0 %4350 }
 0xa78   : > { %v11198_v0 = vpop.f32.mrf.mxu0 }
 0xa79   : > { %v14981_v55 = vmax.f32 %v4525_v46, 0.0  ;;  %v4463_v28 = vadd.f32 %v11197_v54, %v4321_v49 }
 0xa7a   : > { %v11199_v17 = vpop.f32.mrf.mxu0 }
 0xa7b   : > { %v11200_v58 = vadd.f32 %v11199_v17, %v11198_v0  ;;  %v4528_v7 = vadd.f32 %v4527_v45, %v4463_v28  ;;  %12250 = vmatprep.mubr.msk.f32.mxu1 %vm1572_vm10, %v14981_v55  ;;  %12298 = vmatprep.mubr.msk.f32.mxu0 %vm1572_vm10, %v14981_v55 }
 0xa7c   : > { %v11201_v14 = vpop.f32.mrf.mxu0 }
 0xa7d   : > { %v4468_v38 = vadd.f32 %v11200_v58, %v4326_v59  ;;  %v14987_v27 = vmax.f32 %v4528_v7, 0.0 }
 0xa7e   : > { %v11202_v1 = vpop.f32.mrf.mxu0 }
 0xa7f   : > { %v4533_v51 = vadd.f32 %v12240_v39, %v4468_v38  ;;  %v11203_v40 = vadd.f32 %v11202_v1, %v11201_v14  ;;  %12251 = vmatmul.mubr.msk.f32.vlgmr.msra.gmra.mxu1 %vm1572_vm10, %v14987_v27  ;;  %12299 = vmatmul.mubr.msk.f32.vlgmr.msra.gmra.mxu0 %vm1572_vm10, %v14987_v27 }
 0xa80   : > { %v11204_v30 = vpop.f32.mrf.mxu0  ;;  %12263 = vmatpush3.msra.mxu1 %v14772_v13  ;;  %12327 = vmatpush3.msra.mxu0 %v14825_v56  ;;  %v4336_v13 = vpop.permute.xlu1 %4335 }
 0xa81   : > { %v14995_v23 = vmax.f32 %v4533_v51, 0.0  ;;  %v4471_v12 = vadd.f32 %v11203_v40, %v4331_v5  ;;  %12264 = vmatprep.subr.mxu1 %v14781_v43  ;;  %12328 = vmatprep.subr.mxu0 %v14843_v4 }
 0xa82   : > { %v11205_v20 = vpop.f32.mrf.mxu0  ;;  %12265 = vmatpush3.msra.mxu1 %v14781_v43  ;;  %12329 = vmatpush3.msra.mxu0 %v14843_v4 }
 0xa83   : > { %v4536_v26 = vadd.f32 %v12241_v32, %v4471_v12  ;;  %v11206_v24 = vadd.f32 %v11205_v20, %v11204_v30  ;;  %12253 = vmatprep.mubr.msk.f32.mxu1 %vm1572_vm10, %v14995_v23  ;;  %12301 = vmatprep.mubr.msk.f32.mxu0 %vm1572_vm10, %v14995_v23 }
 0xa84   : > { %v11207_v56 = vpop.f32.mrf.mxu0  ;;  %12278 = vmatprep.subr.mxu1 %v14834_v63  ;;  %12358 = vmatprep.subr.mxu0 %v14863_v3  ;;  %v4346_v29 = vpop.permute.xlu1 %4345 }
 0xa85   : > { %v15007_v34 = vmax.f32 %v4536_v26, 0.0  ;;  %v4476_v10 = vadd.f32 %v11206_v24, %v4336_v13 }
 0xa86   : > { %v11208_v43 = vpop.f32.mrf.mxu0 }
 0xa87   : > { %v4541_v4 = vadd.f32 %v4540_v60, %v4476_v10  ;;  %v11209_v53 = vadd.f32 %v11208_v43, %v11207_v56  ;;  %12254 = vmatmul.mubr.msk.f32.gmra.mxu1 %vm1572_vm10, %v15007_v34  ;;  %12302 = vmatmul.mubr.msk.f32.gmra.mxu0 %vm1572_vm10, %v15007_v34 }
 0xa88   : > { %v11210_v50 = vpop.f32.mrf.mxu0 }
 0xa89   : > { %v15013_v52 = vmax.f32 %v4541_v4, 0.0  ;;  %v4479_v19 = vadd.f32 %v11209_v53, %v4341_v15 }
 0xa8a   : > { %v11211_v62 = vpop.f32.mrf.mxu0 }
 0xa8b   : > { %v4544_v39 = vadd.f32 %v4543_v36, %v4479_v19  ;;  %v11212_v61 = vadd.f32 %v11211_v62, %v11210_v50  ;;  %12256 = vmatprep.mubr.msk.f32.mxu1 %vm1572_vm10, %v15013_v52  ;;  %12304 = vmatprep.mubr.msk.f32.mxu0 %vm1572_vm10, %v15013_v52 }
 0xa8c   : > { %v11213_v47 = vpop.f32.mrf.mxu0 }
 0xa8d   : > { %v15019_v33 = vmax.f32 %v4544_v39, 0.0  ;;  %v4484_v37 = vadd.f32 %v11212_v61, %v4346_v29 }
 0xa8e   : > { %v11214_v57 = vpop.f32.mrf.mxu0 }
 0xa8f   : > { %v4549_v32 = vadd.f32 %v12244_v44, %v4484_v37  ;;  %v11215_v42 = vadd.f32 %v11214_v57, %v11213_v47  ;;  %12257 = vmatmul.mubr.msk.f32.gmra.mxu1 %vm1572_vm10, %v15019_v33  ;;  %12305 = vmatmul.mubr.msk.f32.gmra.mxu0 %vm1572_vm10, %v15019_v33 }
 0xa91   : > { %v15025_v49 = vmax.f32 %v4549_v32, 0.0  ;;  %v4487_v54 = vadd.f32 %v11215_v42, %v4351_v48 }
 0xa93   : > { %v4552_v46 = vadd.f32 %v12245_v35, %v4487_v54  ;;  %12259 = vmatprep.mubr.msk.f32.mxu1 %vm1572_vm10, %v15025_v49  ;;  %12307 = vmatprep.mubr.msk.f32.mxu0 %vm1572_vm10, %v15025_v49 }
 0xa95   : > { %v15031_v0 = vmax.f32 %v4552_v46, 0.0 }
 0xa97   : > { %12260 = vmatmul.mubr.msk.f32.gmra.mxu1 %vm1572_vm10, %v15031_v0  ;;  %12308 = vmatmul.mubr.msk.f32.gmra.mxu0 %vm1572_vm10, %v15031_v0 }
 0xa98   : > { %12266 = vmatprep.mubr.msk.f32.mxu1 %vm1572_vm10, %v14981_v55  ;;  %12330 = vmatprep.mubr.msk.f32.mxu0 %vm1572_vm10, %v14981_v55 }
 0xa9b   : > { %12267 = vmatmul.mubr.msk.f32.vlgmr.msra.gmra.mxu1 %vm1572_vm10, %v14987_v27  ;;  %12331 = vmatmul.mubr.msk.f32.vlgmr.msra.gmra.mxu0 %vm1572_vm10, %v14987_v27 }
 0xa9c   : > { %12269 = vmatprep.mubr.msk.f32.mxu1 %vm1572_vm10, %v14995_v23  ;;  %12333 = vmatprep.mubr.msk.f32.mxu0 %vm1572_vm10, %v14995_v23 }
 0xa9d   : > { %12279 = vmatpush3.msra.mxu1 %v14834_v63  ;;  %12359 = vmatpush3.msra.mxu0 %v14863_v3  ;;  %v13127_v63 = vld [vmem:[%s17100_s23 + $0x4] ss:$20 sps:$4 sm:$0xff]  }
 0xa9e   : > { %12280 = vmatprep.subr.mxu1 %v14852_v22  ;;  %12360 = vmatprep.subr.mxu0 %v14876_v9 }
 0xa9f   : > { %12270 = vmatmul.mubr.msk.f32.gmra.mxu1 %vm1572_vm10, %v15007_v34  ;;  %12334 = vmatmul.mubr.msk.f32.gmra.mxu0 %vm1572_vm10, %v15007_v34 }
 0xaa0   : > { %12272 = vmatprep.mubr.msk.f32.mxu1 %vm1572_vm10, %v15013_v52  ;;  %12336 = vmatprep.mubr.msk.f32.mxu0 %vm1572_vm10, %v15013_v52 }
 0xaa1   : > { %12281 = vmatpush3.msra.mxu1 %v14852_v22  ;;  %12361 = vmatpush3.msra.mxu0 %v14876_v9  ;;  %v13139_v22 = vld [vmem:[%s17100_s23 + $0xc] ss:$20 sps:$4 sm:$0xff]  }
 0xaa2   : > { %12310 = vmatprep.subr.mxu1 %v14869_v6 }
 0xaa3   : > { %12273 = vmatmul.mubr.msk.f32.gmra.mxu1 %vm1572_vm10, %v15019_v33  ;;  %12337 = vmatmul.mubr.msk.f32.gmra.mxu0 %vm1572_vm10, %v15019_v33 }
 0xaa4   : > { %12275 = vmatprep.mubr.msk.f32.mxu1 %vm1572_vm10, %v15025_v49  ;;  %12339 = vmatprep.mubr.msk.f32.mxu0 %vm1572_vm10, %v15025_v49 }
 0xaa7   : > { %12276 = vmatmul.mubr.msk.f32.gmra.mxu1 %vm1572_vm10, %v15031_v0  ;;  %12340 = vmatmul.mubr.msk.f32.gmra.mxu0 %vm1572_vm10, %v15031_v0 }
 0xaa8   : > { %12282 = vmatprep.mubr.msk.f32.mxu1 %vm1572_vm10, %v14981_v55  ;;  %12362 = vmatprep.mubr.msk.f32.mxu0 %vm1572_vm10, %v14981_v55 }
 0xaab   : > { %12283 = vmatmul.mubr.msk.f32.vlgmr.msra.gmra.mxu1 %vm1572_vm10, %v14987_v27  ;;  %12363 = vmatmul.mubr.msk.f32.vlgmr.msra.gmra.mxu0 %vm1572_vm10, %v14987_v27 }
 0xaac   : > { %12285 = vmatprep.mubr.msk.f32.mxu1 %vm1572_vm10, %v14995_v23  ;;  %12365 = vmatprep.mubr.msk.f32.mxu0 %vm1572_vm10, %v14995_v23 }
 0xaad   : > { %12311 = vmatpush3.msra.mxu1 %v14869_v6 }
 0xaae   : > { %12312 = vmatprep.subr.mxu1 %v14887_v16 }
 0xaaf   : > { %12286 = vmatmul.mubr.msk.f32.gmra.mxu1 %vm1572_vm10, %v15007_v34  ;;  %12366 = vmatmul.mubr.msk.f32.gmra.mxu0 %vm1572_vm10, %v15007_v34 }
 0xab0   : > { %12288 = vmatprep.mubr.msk.f32.mxu1 %vm1572_vm10, %v15013_v52  ;;  %12368 = vmatprep.mubr.msk.f32.mxu0 %vm1572_vm10, %v15013_v52 }
 0xab1   : > { %12313 = vmatpush3.msra.mxu1 %v14887_v16 }
 0xab2   : > { %12342 = vmatprep.subr.mxu1 %v14899_v21 }
 0xab3   : > { %12289 = vmatmul.mubr.msk.f32.gmra.mxu1 %vm1572_vm10, %v15019_v33  ;;  %12369 = vmatmul.mubr.msk.f32.gmra.mxu0 %vm1572_vm10, %v15019_v33 }
 0xab4   : > { %12291 = vmatprep.mubr.msk.f32.mxu1 %vm1572_vm10, %v15025_v49  ;;  %12371 = vmatprep.mubr.msk.f32.mxu0 %vm1572_vm10, %v15025_v49 }
 0xab7   : > { %12292 = vmatmul.mubr.msk.f32.gmra.mxu1 %vm1572_vm10, %v15031_v0  ;;  %12372 = vmatmul.mubr.msk.f32.gmra.mxu0 %vm1572_vm10, %v15031_v0 }
 0xab8   : > { %12314 = vmatprep.mubr.msk.f32.mxu1 %vm1572_vm10, %v14981_v55  ;;  %5744 = vmatprep.mubr.bf16.mxu0 %v13139_v22 }
 0xabb   : > { %12315 = vmatmul.mubr.msk.f32.vlgmr.msra.gmra.mxu1 %vm1572_vm10, %v14987_v27 }
 0xabc   : > { %12317 = vmatprep.mubr.msk.f32.mxu1 %vm1572_vm10, %v14995_v23  ;;  %12343 = vmatpush3.msra.mxu1 %v14899_v21 }
 0xabd   : > { %12344 = vmatprep.subr.mxu1 %v14909_v2 }
 0xabe   : > { %12345 = vmatpush3.msra.mxu1 %v14909_v2 }
 0xabf   : > { %12318 = vmatmul.mubr.msk.f32.gmra.mxu1 %vm1572_vm10, %v15007_v34 }
 0xac0   : > { %12320 = vmatprep.mubr.msk.f32.mxu1 %vm1572_vm10, %v15013_v52 }
 0xac3   : > { %12321 = vmatmul.mubr.msk.f32.gmra.mxu1 %vm1572_vm10, %v15019_v33 }
 0xac4   : > { %12323 = vmatprep.mubr.msk.f32.mxu1 %vm1572_vm10, %v15025_v49 }
 0xac7   : > { %12324 = vmatmul.mubr.msk.f32.gmra.mxu1 %vm1572_vm10, %v15031_v0 }
 0xac8   : > { %12346 = vmatprep.mubr.msk.f32.mxu1 %vm1572_vm10, %v14981_v55 }
 0xacb   : > { %12347 = vmatmul.mubr.msk.f32.vlgmr.msra.gmra.mxu1 %vm1572_vm10, %v14987_v27 }
 0xacc   : > { %12349 = vmatprep.mubr.msk.f32.mxu1 %vm1572_vm10, %v14995_v23 }
 0xacf   : > { %12350 = vmatmul.mubr.msk.f32.gmra.mxu1 %vm1572_vm10, %v15007_v34 }
 0xad0   : > { %12352 = vmatprep.mubr.msk.f32.mxu1 %vm1572_vm10, %v15013_v52 }
 0xad3   : > { %12353 = vmatmul.mubr.msk.f32.gmra.mxu1 %vm1572_vm10, %v15019_v33 }
 0xad4   : > { %12355 = vmatprep.mubr.msk.f32.mxu1 %vm1572_vm10, %v15025_v49 }
 0xad7   : > { %12356 = vmatmul.mubr.msk.f32.gmra.mxu1 %vm1572_vm10, %v15031_v0 }
 0xad8   : > { %5679 = vmatprep.mubr.bf16.mxu1 %v13127_v63 }
 0xb3f   : > { %v15149_v3 = vpop.f32.mrf.mxu1  ;;  %v12300_v6 = vpop.f32.mrf.mxu0 }
 0xb41   : > { %v15151_v9 = vpop.f32.mrf.mxu1  ;;  %v4968_v16 = vpop.f32.mrf.mxu0 }
 0xb42   : > { %v5439_v54 = vpack.c.bf16 %v12300_v6, %v4968_v16 }
 0xb47   : > { %v15153_v21 = vpop.f32.mrf.mxu1  ;;  %v12303_v2 = vpop.f32.mrf.mxu0 }
 0xb49   : > { %v15155_v45 = vpop.f32.mrf.mxu1  ;;  %v4978_v28 = vpop.f32.mrf.mxu0 }
 0xb4a   : > { %v5440_v37 = vpack.c.bf16 %v12303_v2, %v4978_v28 }
 0xb4f   : > { %v15157_v17 = vpop.f32.mrf.mxu1  ;;  %v12306_v58 = vpop.f32.mrf.mxu0 }
 0xb51   : > { %v15159_v7 = vpop.f32.mrf.mxu1  ;;  %v4988_v59 = vpop.f32.mrf.mxu0 }
 0xb52   : > { %v5441_v36 = vpack.c.bf16 %v12306_v58, %v4988_v59  ;;  %v5429_v6 = vpack.c.bf16 %v15157_v17, %v15159_v7  ;;  %v5427_v17 = vpack.c.bf16 %v15149_v3, %v15151_v9  ;;  %v13130_v3 = vld [vmem:[%s17100_s23 + $0x28] ss:$20 sps:$4 sm:$0xff]  }
 0xb57   : > { %v12261_v14 = vpop.f32.mrf.mxu1  ;;  %v12309_v38 = vpop.f32.mrf.mxu0 }
 0xb59   : > { %v4683_v1 = vpop.f32.mrf.mxu1  ;;  %v4998_v44 = vpop.f32.mrf.mxu0 }
 0xb5a   : > { %v5442_v51 = vpack.c.bf16 %v12309_v38, %v4998_v44 }
 0xb5b   : > { %v12268_v40 = vpop.f32.mrf.mxu1  ;;  %v15161_v5 = vpop.f32.mrf.mxu0 }
 0xb5c   : > { %11302 = vmatprep.subr.bf16.mxu1 %v5442_v51 }
 0xb5d   : > { %v4758_v30 = vpop.f32.mrf.mxu1  ;;  %v15163_v12 = vpop.f32.mrf.mxu0 }
 0xb5e   : > { %v5451_v20 = vpack.c.bf16 %v15161_v5, %v15163_v12  ;;  %v5431_v58 = vpack.c.bf16 %v12268_v40, %v4758_v30  ;;  %v13150_v5 = vld [vmem:[%s17100_s23 + $0x80] ss:$20 sps:$4 sm:$0xff]  }
 0xb5f   : > { %v12271_v60 = vpop.f32.mrf.mxu1  ;;  %v15167_v26 = vpop.f32.mrf.mxu0  ;;  %v13153_v12 = vld [vmem:[%s17101_s22] sm:$0xff]  }
 0xb61   : > { %v4768_v24 = vpop.f32.mrf.mxu1  ;;  %v15169_v13 = vpop.f32.mrf.mxu0 }
 0xb62   : > { %v5432_v48 = vpack.c.bf16 %v12271_v60, %v4768_v24 }
 0xb63   : > { %v12274_v56 = vpop.f32.mrf.mxu1  ;;  %v15171_v10 = vpop.f32.mrf.mxu0 }
 0xb65   : > { %v4778_v43 = vpop.f32.mrf.mxu1  ;;  %v15173_v35 = vpop.f32.mrf.mxu0 }
 0xb66   : > { %v5433_v47 = vpack.c.bf16 %v12274_v56, %v4778_v43  ;;  %v5430_v56 = vpack.c.bf16 %v12261_v14, %v4683_v1  ;;  %v5428_v14 = vpack.c.bf16 %v15153_v21, %v15155_v45 }
 0xb67   : > { %v12277_v4 = vpop.f32.mrf.mxu1  ;;  %v15175_v53 = vpop.f32.mrf.mxu0 }
 0xb69   : > { %v4788_v15 = vpop.f32.mrf.mxu1  ;;  %v15177_v50 = vpop.f32.mrf.mxu0 }
 0xb6a   : > { %v5434_v19 = vpack.c.bf16 %v12277_v4, %v4788_v15 }
 0xb6b   : > { %v12284_v62 = vpop.f32.mrf.mxu1  ;;  %v15179_v39 = vpop.f32.mrf.mxu0 }
 0xb6c   : > { %11303 = vmatpush3.bf16.msra.mxu1 %v5434_v19 }
 0xb6d   : > { %v4863_v61 = vpop.f32.mrf.mxu1  ;;  %v15181_v29 = vpop.f32.mrf.mxu0  ;;  %11304 = vmatprep.subr.bf16.mxu1 %v5441_v36 }
 0xb6e   : > { %v5435_v24 = vpack.c.bf16 %v12284_v62, %v4863_v61 }
 0xb6f   : > { %v12287_v57 = vpop.f32.mrf.mxu1  ;;  %v12367_v32 = vpop.f32.mrf.mxu0 }
 0xb70   : > { %11305 = vmatpush3.bf16.msra.mxu1 %v5433_v47  ;;  %v13125_v47 = vld [vmem:[%s17100_s23] ss:$20 sps:$4 sm:$0xff]  }
 0xb71   : > { %v4873_v42 = vpop.f32.mrf.mxu1  ;;  %11306 = vmatprep.subr.bf16.mxu1 %v5440_v37  ;;  %v5398_v63 = vpop.f32.mrf.mxu0 }
 0xb72   : > { %v5436_v40 = vpack.c.bf16 %v12287_v57, %v4873_v42  ;;  %v13128_v57 = vld [vmem:[%s17100_s23 + $0x2c] ss:$20 sps:$4 sm:$0xff]   ;;  %v5460_v61 = vpack.c.bf16 %v12367_v32, %v5398_v63  ;;  %v13136_v63 = vld [vmem:[%s17100_s23 + $0x7c] ss:$20 sps:$4 sm:$0xff]  }
 0xb73   : > { %v12290_v46 = vpop.f32.mrf.mxu1  ;;  %v12370_v38 = vpop.f32.mrf.mxu0 }
 0xb74   : > { %11307 = vmatpush3.bf16.msra.mxu1 %v5432_v48  ;;  %v13133_v48 = vld [vmem:[%s17100_s23 + $0x54] ss:$20 sps:$4 sm:$0xff]  }
 0xb75   : > { %v4883_v22 = vpop.f32.mrf.mxu1  ;;  %11308 = vmatprep.subr.bf16.mxu1 %v5439_v54  ;;  %v5408_v43 = vpop.f32.mrf.mxu0 }
 0xb76   : > { %v5437_v28 = vpack.c.bf16 %v12290_v46, %v4883_v22  ;;  %v5461_v21 = vpack.c.bf16 %v12370_v38, %v5408_v43  ;;  %v5459_v46 = vpack.c.bf16 %v15179_v39, %v15181_v29 }
 0xb77   : > { %v12293_v59 = vpop.f32.mrf.mxu1  ;;  %v12373_v30 = vpop.f32.mrf.mxu0 }
 0xb78   : > { %11309 = vmatpush3.bf16.msra.mxu1 %v5431_v58 }
 0xb79   : > { %v4893_v44 = vpop.f32.mrf.mxu1  ;;  %v5418_v15 = vpop.f32.mrf.mxu0 }
 0xb7a   : > { %v5438_v51 = vpack.c.bf16 %v12293_v59, %v4893_v44  ;;  %v5462_v36 = vpack.c.bf16 %v12373_v30, %v5418_v15  ;;  %v13131_v59 = vld [vmem:[%s17100_s23 + $0x50] ss:$20 sps:$4 sm:$0xff]   ;;  %v5454_v30 = vpack.c.bf16 %v15175_v53, %v15177_v50  ;;  %v5445_v53 = vpack.c.bf16 %v15019_v33, %v15013_v52  ;;  %v13137_v33 = vld [vmem:[%s17100_s23 + $0x8] ss:$20 sps:$4 sm:$0xff]  }
 0xb7b   : > { %v15183_v2 = vpop.f32.mrf.mxu1  ;;  %v5452_v50 = vpack.c.bf16 %v15167_v26, %v15169_v13  ;;  %v5443_v52 = vpack.c.bf16 %v14987_v27, %v14981_v55  ;;  %v13142_v26 = vld [vmem:[%s17100_s23 + $0x34] ss:$20 sps:$4 sm:$0xff]   ;;  %v13144_v13 = vld [vmem:[%s17100_s23 + $0x30] ss:$20 sps:$4 sm:$0xff]  }
 0xb7c   : > { %11310 = vmatprep.subr.bf16.mxu1 %v5438_v51 }
 0xb7d   : > { %v15185_v4 = vpop.f32.mrf.mxu1  ;;  %11311 = vmatpush3.bf16.msra.mxu1 %v5430_v56  ;;  %v13134_v56 = vld [vmem:[%s17100_s23 + $0x78] ss:$20 sps:$4 sm:$0xff]  }
 0xb7e   : > { %11312 = vmatprep.subr.bf16.mxu1 %v5437_v28  ;;  %v13140_v28 = vld [vmem:[%s17100_s23 + $0x10] ss:$20 sps:$4 sm:$0xff]  }
 0xb7f   : > { %v15189_v16 = vpop.f32.mrf.mxu1 }
 0xb81   : > { %v5083_v60 = vpop.f32.mrf.mxu1  ;;  %11313 = vmatpush3.bf16.msra.mxu1 %v5429_v6 }
 0xb82   : > { %11314 = vmatprep.subr.bf16.mxu1 %v5436_v40  ;;  %v5448_v43 = vpack.c.bf16 %v15189_v16, %v5083_v60  ;;  %v5447_v40 = vpack.c.bf16 %v15183_v2, %v15185_v4  ;;  %v5446_v16 = vpack.c.bf16 %v15031_v0, %v15025_v49  ;;  %v5453_v60 = vpack.c.bf16 %v15171_v10, %v15173_v35  ;;  %v13149_v49 = vld [vmem:[%s17100_s23 + $0x88] ss:$20 sps:$4 sm:$0xff]  }
 0xb83   : > { %v12322_v1 = vpop.f32.mrf.mxu1  ;;  %v5444_v0 = vpack.c.bf16 %v15007_v34, %v14995_v23  ;;  %v13147_v10 = vld [vmem:[%s17100_s23 + $0x5c] ss:$20 sps:$4 sm:$0xff]   ;;  %v13145_v23 = vld [vmem:[%s17100_s23 + $0x58] ss:$20 sps:$4 sm:$0xff]  }
 0xb84   : > { %v13152_v34 = vld [vmem:[%s17100_s23 + $0x84] ss:$20 sps:$4 sm:$0xff]  }
 0xb85   : > { %v5093_v19 = vpop.f32.mrf.mxu1  ;;  %11315 = vmatpush3.bf16.msra.mxu1 %v5428_v14  ;;  %v13141_v14 = vld [vmem:[%s17100_s23 + $0x38] ss:$20 sps:$4 sm:$0xff]  }
 0xb86   : > { %11316 = vmatprep.subr.bf16.mxu1 %v5435_v24  ;;  %v5449_v39 = vpack.c.bf16 %v12322_v1, %v5093_v19  ;;  %v13148_v1 = vld [vmem:[%s17100_s23 + $0x60] ss:$20 sps:$4 sm:$0xff]  }
 0xb87   : > { %v12325_v7 = vpop.f32.mrf.mxu1 }
 0xb89   : > { %v5103_v37 = vpop.f32.mrf.mxu1  ;;  %11317 = vmatpush3.bf16.msra.mxu1 %v5427_v17 }
 0xb8a   : > { %12374 = vmatprep.subr.bf16.mxu1 %v5462_v36  ;;  %v5450_v44 = vpack.c.bf16 %v12325_v7, %v5103_v37 }
 0xb8b   : > { %v12348_v42 = vpop.f32.mrf.mxu1 }
 0xb8c   : > { %5680 = vmatmul.mubr.bf16.vlgmr.msra.gmra.mxu1 %v13125_v47 }
 0xb8d   : > { %v5283_v45 = vpop.f32.mrf.mxu1  ;;  %12375 = vmatpush3.bf16.msra.mxu1 %v5462_v36  ;;  %5687 = vmatprep.mubr.bf16.mxu1 %v13128_v57 }
 0xb8e   : > { %12376 = vmatprep.subr.bf16.mxu1 %v5461_v21  ;;  %v5455_v6 = vpack.c.bf16 %v12348_v42, %v5283_v45 }
 0xb8f   : > { %v12351_v62 = vpop.f32.mrf.mxu1 }
 0xb91   : > { %v5293_v9 = vpop.f32.mrf.mxu1  ;;  %12377 = vmatpush3.bf16.msra.mxu1 %v5461_v21 }
 0xb92   : > { %12378 = vmatprep.subr.bf16.mxu1 %v5460_v61  ;;  %v5456_v29 = vpack.c.bf16 %v12351_v62, %v5293_v9 }
 0xb93   : > { %v12354_v54 = vpop.f32.mrf.mxu1 }
 0xb94   : > { %5688 = vmatmul.mubr.bf16.gmra.mxu1 %v13130_v3 }
 0xb95   : > { %v5303_v22 = vpop.f32.mrf.mxu1  ;;  %12379 = vmatpush3.bf16.msra.mxu1 %v5460_v61  ;;  %5695 = vmatprep.mubr.bf16.mxu1 %v13133_v48 }
 0xb96   : > { %12380 = vmatprep.subr.bf16.mxu1 %v5459_v46  ;;  %v5457_v51 = vpack.c.bf16 %v12354_v54, %v5303_v22 }
 0xb97   : > { %v12357_v58 = vpop.f32.mrf.mxu1 }
 0xb99   : > { %v5313_v32 = vpop.f32.mrf.mxu1  ;;  %12381 = vmatpush3.bf16.msra.mxu1 %v5459_v46 }
 0xb9a   : > { %v5458_v38 = vpack.c.bf16 %v12357_v58, %v5313_v32 }
 0xb9c   : > { %5696 = vmatmul.mubr.bf16.gmra.mxu1 %v13131_v59  ;;  %11342 = vmatprep.subr.bf16.mxu0 %v5458_v38  ;;  %v5533_v59 = vpop.permute.xlu0 %5532  ;;  %v5528_v38 = vpop.permute.xlu1 %5527 }
 0xb9d   : > { %11343 = vmatpush3.bf16.msra.mxu0 %v5450_v44  ;;  %5703 = vmatprep.mubr.bf16.mxu1 %v13136_v63 }
 0xb9e   : > { %11344 = vmatprep.subr.bf16.mxu0 %v5457_v51 }
 0xba1   : > { %11345 = vmatpush3.bf16.msra.mxu0 %v5449_v39 }
 0xba2   : > { %11346 = vmatprep.subr.bf16.mxu0 %v5456_v29  ;;  %v5523_v29 = vpop.permute.xlu0 %5522 }
 0xba4   : > { %5704 = vmatmul.mubr.bf16.gmra.mxu1 %v13134_v56 }
 0xba5   : > { %11347 = vmatpush3.bf16.msra.mxu0 %v5448_v43  ;;  %12382 = vmatprep.mubr.msk.bf16.mxu1 %vm1802_vm11, %v13140_v28 }
 0xba6   : > { %11348 = vmatprep.subr.bf16.mxu0 %v5455_v6  ;;  %v5518_v6 = vpop.permute.xlu1 %5517 }
 0xba9   : > { %11349 = vmatpush3.bf16.msra.mxu0 %v5447_v40 }
 0xbaa   : > { %11350 = vmatprep.subr.bf16.mxu0 %v5454_v30 }
 0xbac   : > { %12383 = vmatmul.mubr.msk.bf16.vlgmr.msra.gmra.mxu1 %vm1802_vm11, %v13141_v14 }
 0xbad   : > { %11351 = vmatpush3.bf16.msra.mxu0 %v5446_v16  ;;  %12386 = vmatprep.mubr.msk.bf16.mxu1 %vm1802_vm11, %v13148_v1 }
 0xbae   : > { %11352 = vmatprep.subr.bf16.mxu0 %v5453_v60 }
 0xbb1   : > { %11353 = vmatpush3.bf16.msra.mxu0 %v5445_v53 }
 0xbb2   : > { %11354 = vmatprep.subr.bf16.mxu0 %v5452_v50 }
 0xbb4   : > { %12387 = vmatmul.mubr.msk.bf16.gmra.mxu1 %vm1802_vm11, %v13149_v49  ;;  %v5513_v49 = vpop.permute.xlu0 %5512 }
 0xbb5   : > { %11355 = vmatpush3.bf16.msra.mxu0 %v5444_v0 }
 0xbb6   : > { %11356 = vmatprep.subr.bf16.mxu0 %v5451_v20 }
 0xbb9   : > { %11357 = vmatpush3.bf16.msra.mxu0 %v5443_v52 }
 0xbbc   : > { %5745 = vmatmul.mubr.bf16.vlgmr.msra.gmra.mxu0 %v13137_v33 }
 0xbbd   : > { %5752 = vmatprep.mubr.bf16.mxu0 %v13142_v26 }
 0xbc4   : > { %5753 = vmatmul.mubr.bf16.gmra.mxu0 %v13144_v13 }
 0xbc5   : > { %5760 = vmatprep.mubr.bf16.mxu0 %v13147_v10 }
 0xbcc   : > { %5761 = vmatmul.mubr.bf16.gmra.mxu0 %v13145_v23  ;;  %v5508_v23 = vpop.permute.xlu1 %5507 }
 0xbcd   : > { %5768 = vmatprep.mubr.bf16.mxu0 %v13152_v34 }
 0xbd4   : > { %5769 = vmatmul.mubr.bf16.gmra.mxu0 %v13150_v5 }
 0xbd5   : > { %12398 = vmatprep.mubr.msk.bf16.mxu0 %vm1802_vm11, %v13153_v12 }
 0xc4c   : > { %v15241_v55 = vpop.f32.mrf.mxu1 }
 0xc4e   : > { %v15243_v27 = vpop.f32.mrf.mxu1 }
 0xc50   : > { %v11321_v20 = vpop.f32.mrf.mxu1 }
 0xc52   : > { %v11322_v35 = vpop.f32.mrf.mxu1 }
 0xc54   : > { %v11324_v2 = vpop.f32.mrf.mxu1 }
 0xc56   : > { %v11325_v4 = vpop.f32.mrf.mxu1 }
 0xc57   : > { %v11326_v13 = vadd.f32 %v11325_v4, %v11324_v2  ;;  %v5503_v2 = vpop.permute.xlu0 %5502 }
 0xc58   : > { %v11327_v24 = vpop.f32.mrf.mxu1 }
 0xc5a   : > { %v11328_v15 = vpop.f32.mrf.mxu1 }
 0xc5b   : > { %v11329_v16 = vadd.f32 %v11328_v15, %v11327_v24 }
 0xc5c   : > { %v11330_v19 = vpop.f32.mrf.mxu1 }
 0xc5e   : > { %v11331_v17 = vpop.f32.mrf.mxu1 }
 0xc5f   : > { %v11332_v14 = vadd.f32 %v11331_v17, %v11330_v19 }
 0xc60   : > { %v11333_v7 = vpop.f32.mrf.mxu1 }
 0xc61   : > { %v5698_v34 = vadd.f32 %v11332_v14, %v5518_v6 }
 0xc62   : > { %v11334_v36 = vpop.f32.mrf.mxu1 }
 0xc63   : > { %v11335_v56 = vadd.f32 %v11334_v36, %v11333_v7  ;;  %v11323_v36 = vadd.f32 %v11322_v35, %v11321_v20 }
 0xc64   : > { %v11336_v47 = vpop.f32.mrf.mxu1 }
 0xc65   : > { %v5701_v60 = vadd.f32 %v11335_v56, %v5523_v29  ;;  %v5498_v29 = vpop.permute.xlu1 %5497 }
 0xc66   : > { %v11337_v37 = vpop.f32.mrf.mxu1 }
 0xc67   : > { %v11338_v40 = vadd.f32 %v11337_v37, %v11336_v47  ;;  %v5693_v47 = vadd.f32 %v11329_v16, %v5513_v49  ;;  %v13154_v16 = vld [vmem:[%s17101_s22 + $0x8] sm:$0xff]   ;;  %v13159_v49 = vld [vmem:[%s17101_s22 + $0x30] sm:$0xff]  }
 0xc68   : > { %v11339_v57 = vpop.f32.mrf.mxu1 }
 0xc69   : > { %v5706_v0 = vadd.f32 %v11338_v40, %v5528_v38 }
 0xc6a   : > { %v11340_v21 = vpop.f32.mrf.mxu1 }
 0xc6b   : > { %v11341_v52 = vadd.f32 %v11340_v21, %v11339_v57  ;;  %v11320_v57 = vadd.f32 %v15243_v27, %v15241_v55  ;;  %v5690_v21 = vadd.f32 %v11326_v13, %v5508_v23  ;;  %v15274_v13 = vld [vmem:[%s17063_s2 + $0x78] sm:$0xff] }
 0xc6c   : > { %v15245_v61 = vpop.f32.mrf.mxu1 }
 0xc6d   : > { %v5709_v24 = vadd.f32 %v11341_v52, %v5533_v59  ;;  %v5682_v59 = vadd.f32 %v11320_v57, %v5498_v29  ;;  %v13161_v52 = vld [vmem:[%s17102_s18 + $0x8] sm:$0xff]  }
 0xc6e   : > { %v15247_v9 = vpop.f32.mrf.mxu1  ;;  %12414 = vmatprep.subr.bf16.mxu1 %v13161_v52 }
 0xc6f   : > { %12415 = vmatpush3.bf16.msra.mxu1 %v13161_v52 }
 0xc70   : > { %v12385_v46 = vpop.f32.mrf.mxu1 }
 0xc72   : > { %v15249_v32 = vpop.f32.mrf.mxu1 }
 0xc74   : > { %v12388_v51 = vpop.f32.mrf.mxu1 }
 0xc76   : > { %v5827_v43 = vpop.f32.mrf.mxu1 }
 0xc78   : > { %v12389_v53 = vpop.f32.mrf.mxu1 }
 0xc7a   : > { %v5830_v19 = vpop.f32.mrf.mxu1 }
 0xc7c   : > { %v11358_v42 = vpop.f32.mrf.mxu0 }
 0xc7e   : > { %v11359_v45 = vpop.f32.mrf.mxu0 }
 0xc7f   : > { %v11360_v20 = vadd.f32 %v11359_v45, %v11358_v42 }
 0xc80   : > { %v11361_v62 = vpop.f32.mrf.mxu0 }
 0xc81   : > { %v5747_v55 = vadd.f32 %v11360_v20, %v5682_v59  ;;  %v15303_v59 = vld [vmem:[%s17063_s2 + $0x28] sm:$0xff] }
 0xc82   : > { %v11362_v3 = vpop.f32.mrf.mxu0 }
 0xc83   : > { %v5812_v45 = vadd.f32 %v15247_v9, %v5747_v55  ;;  %v13156_v9 = vld [vmem:[%s17101_s22 + $0x18] sm:$0xff]   ;;  %v15333_v55 = vld [vmem:[%s17063_s2 + $0x10] sm:$0xff] }
 0xc84   : > { %v11364_v48 = vpop.f32.mrf.mxu0 }
 0xc86   : > { %v11365_v54 = vpop.f32.mrf.mxu0 }
 0xc87   : > { %v11366_v15 = vadd.f32 %v11365_v54, %v11364_v48 }
 0xc88   : > { %v11367_v22 = vpop.f32.mrf.mxu0 }
 0xc89   : > { %v5755_v35 = vadd.f32 %v11366_v15, %v5690_v21  ;;  %v13164_v15 = vld [vmem:[%s17102_s18 + $0x10] sm:$0xff]  }
 0xc8a   : > { %v11368_v58 = vpop.f32.mrf.mxu0 }
 0xc8b   : > { %v11369_v5 = vadd.f32 %v11368_v58, %v11367_v22  ;;  %v5685_v58 = vadd.f32 %v11323_v36, %v5503_v2  ;;  %v5820_v27 = vadd.f32 %v15245_v61, %v5755_v35  ;;  %v5842_v61 = vmax.f32 %v5812_v45, 0.0  ;;  %v15367_v45 = vld [vmem:[%s17063_s2 + $0xf8] sm:$0xff] }
 0xc8c   : > { %v11370_v63 = vpop.f32.mrf.mxu0 }
 0xc8d   : > { %v5758_v4 = vadd.f32 %v11369_v5, %v5693_v47 }
 0xc8e   : > { %v11371_v44 = vpop.f32.mrf.mxu0 }
 0xc8f   : > { %v11372_v33 = vadd.f32 %v11371_v44, %v11370_v63  ;;  %v11363_v63 = vadd.f32 %v11362_v3, %v11361_v62  ;;  %v5823_v54 = vadd.f32 %v12385_v46, %v5758_v4  ;;  %v5844_v46 = vmax.f32 %v5820_v27, 0.0  ;;  %v15337_v27 = vld [vmem:[%s17063_s2 + $0x50] sm:$0xff] }
 0xc90   : > { %v11373_v39 = vpop.f32.mrf.mxu0 }
 0xc91   : > { %v5763_v37 = vadd.f32 %v11372_v33, %v5698_v34  ;;  %v5750_v48 = vadd.f32 %v11363_v63, %v5685_v58  ;;  %v5845_v42 = vmax.f32 %v5823_v54, 0.0  ;;  %v13162_v33 = vld [vmem:[%s17102_s18 + $0x18] sm:$0xff]   ;;  %v15313_v54 = vld [vmem:[%s17063_s2 + $0x20] sm:$0xff] }
 0xc92   : > { %v11374_v28 = vpop.f32.mrf.mxu0  ;;  %17103 = vst [vmem:[#allocation55_spill] sm:$0xff] %v15313_v54 }
 0xc93   : > { %v11375_v1 = vadd.f32 %v11374_v28, %v11373_v39  ;;  %v5828_v56 = vadd.f32 %v5827_v43, %v5763_v37 }
 0xc94   : > { %v11376_v30 = vpop.f32.mrf.mxu0 }
 0xc95   : > { %v5766_v7 = vadd.f32 %v11375_v1, %v5701_v60  ;;  %v5846_v62 = vmax.f32 %v5828_v56, 0.0  ;;  %v5867_v1 = vpack.c.bf16 %v5845_v42, %v5844_v46  ;;  %v13155_v60 = vld [vmem:[%s17101_s22 + $0x10] sm:$0xff]   ;;  %v15363_v42 = vld [vmem:[%s17063_s2 + $0xb8] sm:$0xff] }
 0xc96   : > { %v11377_v50 = vpop.f32.mrf.mxu0  ;;  %v15293_v56 = vld [vmem:[%s17063_s2 + $0x30] sm:$0xff] }
 0xc97   : > { %v11378_v26 = vadd.f32 %v11377_v50, %v11376_v30  ;;  %v5831_v44 = vadd.f32 %v5830_v19, %v5766_v7  ;;  %v13158_v50 = vld [vmem:[%s17101_s22 + $0x28] sm:$0xff]  }
 0xc98   : > { %v11379_v10 = vpop.f32.mrf.mxu0 }
 0xc99   : > { %v5771_v12 = vadd.f32 %v11378_v26, %v5706_v0  ;;  %v5847_v40 = vmax.f32 %v5831_v44, 0.0  ;;  %v13160_v0 = vld [vmem:[%s17101_s22 + $0x38] sm:$0xff]   ;;  %v13163_v26 = vld [vmem:[%s17102_s18] sm:$0xff]  }
 0xc9a   : > { %v11380_v17 = vpop.f32.mrf.mxu0  ;;  %12420 = vmatprep.subr.bf16.mxu1 %v13163_v26 }
 0xc9b   : > { %v11381_v39 = vadd.f32 %v11380_v17, %v11379_v10  ;;  %v5836_v38 = vadd.f32 %v12388_v51, %v5771_v12  ;;  %v5815_v51 = vadd.f32 %v15249_v32, %v5750_v48  ;;  %v5868_v14 = vpack.c.bf16 %v5847_v40, %v5846_v62  ;;  %v15307_v48 = vld [vmem:[%s17063_s2 + $0x68] sm:$0xff]  ;;  %v15323_v40 = vld [vmem:[%s17063_s2 + $0x18] sm:$0xff] }
 0xc9c   : > { %v15343_v62 = vld [vmem:[%s17063_s2 + $0x8] sm:$0xff] }
 0xc9d   : > { %v5774_v22 = vadd.f32 %v11381_v39, %v5709_v24  ;;  %v5848_v6 = vmax.f32 %v5836_v38, 0.0  ;;  %v5843_v43 = vmax.f32 %v5815_v51, 0.0  ;;  %v15353_v51 = vld [vmem:[%s17063_s2] sm:$0xff] }
 0xc9f   : > { %v5839_v28 = vadd.f32 %v12389_v53, %v5774_v22  ;;  %v5866_v32 = vpack.c.bf16 %v5843_v43, %v5842_v61  ;;  %v13157_v53 = vld [vmem:[%s17101_s22 + $0x20] sm:$0xff]   ;;  %v15284_v22 = vld [vmem:[%s17063_s2 + $0x38] sm:$0xff] }
 0xca1   : > { %v5849_v30 = vmax.f32 %v5839_v28, 0.0  ;;  %v15297_v28 = vld [vmem:[%s17063_s2 + $0x70] sm:$0xff] }
 0xca3   : > { %v5869_v3 = vpack.c.bf16 %v5849_v30, %v5848_v6  ;;  %v15317_v6 = vld [vmem:[%s17063_s2 + $0x60] sm:$0xff]  ;;  %v15327_v30 = vld [vmem:[%s17063_s2 + $0x58] sm:$0xff] }
 0xca5   : > { %12390 = vmatprep.subr.bf16.mxu0 %v5869_v3 }
 0xca6   : > { %12391 = vmatpush3.bf16.msra.mxu0 %v5869_v3  ;;  %v15347_v3 = vld [vmem:[%s17063_s2 + $0x48] sm:$0xff] }
 0xca7   : > { %12392 = vmatprep.subr.bf16.mxu0 %v5868_v14 }
 0xcaa   : > { %12393 = vmatpush3.bf16.msra.mxu0 %v5868_v14  ;;  %v15357_v14 = vld [vmem:[%s17063_s2 + $0x40] sm:$0xff] }
 0xcab   : > { %12394 = vmatprep.subr.bf16.mxu0 %v5867_v1 }
 0xcae   : > { %12395 = vmatpush3.bf16.msra.mxu0 %v5867_v1 }
 0xcaf   : > { %12396 = vmatprep.subr.bf16.mxu0 %v5866_v32 }
 0xcb2   : > { %12397 = vmatpush3.bf16.msra.mxu0 %v5866_v32 }
 0xcb3   : > { %12432 = vmatprep.subr.bf16.mxu0 %v13162_v33 }
 0xcb5   : > { %12399 = vmatmul.mubr.msk.bf16.vlgmr.msra.gmra.mxu0 %vm1802_vm11, %v13154_v16 }
 0xcb6   : > { %12402 = vmatprep.mubr.msk.bf16.mxu0 %vm1802_vm11, %v13155_v60  ;;  %12433 = vmatpush3.bf16.msra.mxu0 %v13162_v33 }
 0xcb7   : > { %12460 = vmatprep.subr.mxu0 %v15274_v13 }
 0xcbd   : > { %12403 = vmatmul.mubr.msk.bf16.gmra.mxu0 %vm1802_vm11, %v13156_v9 }
 0xcbe   : > { %12406 = vmatprep.mubr.msk.bf16.mxu0 %vm1802_vm11, %v13157_v53 }
 0xcc5   : > { %12407 = vmatmul.mubr.msk.bf16.gmra.mxu0 %vm1802_vm11, %v13158_v50 }
 0xcc6   : > { %12410 = vmatprep.mubr.msk.bf16.mxu0 %vm1802_vm11, %v13159_v49 }
 0xccd   : > { %12411 = vmatmul.mubr.msk.bf16.gmra.mxu0 %vm1802_vm11, %v13160_v0 }
 0xd75   : > { %v12400_v10 = vpop.f32.mrf.mxu0 }
 0xd77   : > { %v5968_v23 = vpop.f32.mrf.mxu0 }
 0xd79   : > { %v12401_v34 = vpop.f32.mrf.mxu0 }
 0xd7a   : > { %v6032_v63 = vpack.c.bf16 %v12401_v34, %v12400_v10 }
 0xd7b   : > { %v5971_v5 = vpop.f32.mrf.mxu0 }
 0xd7c   : > { %v6031_v37 = vpack.c.bf16 %v5971_v5, %v5968_v23 }
 0xd7d   : > { %v12404_v12 = vpop.f32.mrf.mxu0 }
 0xd7f   : > { %v5984_v7 = vpop.f32.mrf.mxu0 }
 0xd81   : > { %v12405_v36 = vpop.f32.mrf.mxu0 }
 0xd82   : > { %v6036_v17 = vpack.c.bf16 %v12405_v36, %v12404_v12 }
 0xd83   : > { %v5987_v47 = vpop.f32.mrf.mxu0 }
 0xd84   : > { %v6035_v19 = vpack.c.bf16 %v5987_v47, %v5984_v7  ;;  %v6309_v7 = vpop.permute.xlu1 %6308 }
 0xd85   : > { %v12408_v24 = vpop.f32.mrf.mxu0 }
 0xd86   : > { %12416 = vmatprep.mubr.msk.bf16.mxu1 %vm1572_vm10, %v6035_v19 }
 0xd87   : > { %12417 = vmatmul.mubr.msk.bf16.vlgmr.msra.gmra.mxu1 %vm1572_vm10, %v6036_v17  ;;  %v6000_v39 = vpop.f32.mrf.mxu0 }
 0xd88   : > { %12422 = vmatprep.mubr.msk.bf16.mxu1 %vm1572_vm10, %v6031_v37  ;;  %12421 = vmatpush3.bf16.msra.mxu1 %v13163_v26 }
 0xd89   : > { %v12409_v57 = vpop.f32.mrf.mxu0  ;;  %12426 = vmatprep.subr.bf16.mxu1 %v13164_v15 }
 0xd8a   : > { %v6163_v20 = vpack.c.bf16 %v12409_v57, %v12408_v24  ;;  %v6314_v57 = vpop.permute.xlu0 %6313 }
 0xd8b   : > { %v6003_v21 = vpop.f32.mrf.mxu0 }
 0xd8c   : > { %v6162_v4 = vpack.c.bf16 %v6003_v21, %v6000_v39 }
 0xd8d   : > { %v12412_v2 = vpop.f32.mrf.mxu0 }
 0xd8f   : > { %12423 = vmatmul.mubr.msk.bf16.vlgmr.msra.gmra.mxu1 %vm1572_vm10, %v6032_v63  ;;  %v6016_v38 = vpop.f32.mrf.mxu0  ;;  %v6319_v63 = vpop.permute.xlu1 %6318 }
 0xd90   : > { %12427 = vmatpush3.bf16.msra.mxu1 %v13164_v15  ;;  %12428 = vmatprep.mubr.msk.bf16.mxu1 %vm1572_vm10, %v6162_v4 }
 0xd91   : > { %v12413_v44 = vpop.f32.mrf.mxu0  ;;  %12438 = vmatprep.subr.mxu1 %v15284_v22 }
 0xd92   : > { %v6233_v35 = vpack.c.bf16 %v12413_v44, %v12412_v2  ;;  %v6324_v44 = vpop.permute.xlu0 %6323 }
 0xd93   : > { %v6019_v58 = vpop.f32.mrf.mxu0 }
 0xd94   : > { %v6232_v29 = vpack.c.bf16 %v6019_v58, %v6016_v38  ;;  %v15393_v58 = vld [vmem:[%s17063_s2 + $0xb0] sm:$0xff]  ;;  %v15605_v38 = vld [vmem:[%s17063_s2 + $0x228] sm:$0xff] }
 0xd95   : > { %17110 = vst [vmem:[#allocation62_spill] sm:$0xff] %v15605_v38 }
 0xd96   : > { %12434 = vmatprep.mubr.msk.bf16.mxu0 %vm1572_vm10, %v6232_v29  ;;  %v15397_v29 = vld [vmem:[%s17063_s2 + $0xf0] sm:$0xff] }
 0xd97   : > { %12429 = vmatmul.mubr.msk.bf16.vlgmr.msra.gmra.mxu1 %vm1572_vm10, %v6163_v20  ;;  %12435 = vmatmul.mubr.msk.bf16.vlgmr.msra.gmra.mxu0 %vm1572_vm10, %v6233_v35  ;;  %v15405_v35 = vld [vmem:[%s17063_s2 + $0xa8] sm:$0xff] }
 0xd98   : > { %12439 = vmatpush3.msra.mxu1 %v15284_v22  ;;  %12461 = vmatpush3.msra.mxu0 %v15274_v13 }
 0xd99   : > { %12440 = vmatprep.subr.mxu1 %v15293_v56  ;;  %12462 = vmatprep.subr.mxu0 %v15297_v28 }
 0xd9a   : > { %12441 = vmatpush3.msra.mxu1 %v15293_v56  ;;  %12463 = vmatpush3.msra.mxu0 %v15297_v28 }
 0xd9b   : > { %12442 = vmatprep.subr.mxu1 %v15303_v59  ;;  %12464 = vmatprep.subr.mxu0 %v15307_v48 }
 0xd9c   : > { %12443 = vmatpush3.msra.mxu1 %v15303_v59  ;;  %12465 = vmatpush3.msra.mxu0 %v15307_v48 }
 0xd9d   : > { %12444 = vmatprep.subr.mxu1 %v15313_v54  ;;  %12466 = vmatprep.subr.mxu0 %v15317_v6 }
 0xd9e   : > { %12445 = vmatpush3.msra.mxu1 %v15313_v54  ;;  %12467 = vmatpush3.msra.mxu0 %v15317_v6 }
 0xd9f   : > { %12446 = vmatprep.subr.mxu1 %v15323_v40  ;;  %12468 = vmatprep.subr.mxu0 %v15327_v30 }
 0xda0   : > { %12447 = vmatpush3.msra.mxu1 %v15323_v40  ;;  %12469 = vmatpush3.msra.mxu0 %v15327_v30 }
 0xda1   : > { %12448 = vmatprep.subr.mxu1 %v15333_v55  ;;  %12470 = vmatprep.subr.mxu0 %v15337_v27 }
 0xda2   : > { %12449 = vmatpush3.msra.mxu1 %v15333_v55  ;;  %12471 = vmatpush3.msra.mxu0 %v15337_v27 }
 0xda3   : > { %12450 = vmatprep.subr.mxu1 %v15343_v62  ;;  %12472 = vmatprep.subr.mxu0 %v15347_v3 }
 0xda4   : > { %12451 = vmatpush3.msra.mxu1 %v15343_v62  ;;  %12473 = vmatpush3.msra.mxu0 %v15347_v3 }
 0xda5   : > { %12452 = vmatprep.subr.mxu1 %v15353_v51  ;;  %12474 = vmatprep.subr.mxu0 %v15357_v14 }
 0xda6   : > { %12453 = vmatpush3.msra.mxu1 %v15353_v51  ;;  %12475 = vmatpush3.msra.mxu0 %v15357_v14 }
 0xda7   : > { %12482 = vmatprep.subr.mxu1 %v15363_v42  ;;  %12504 = vmatprep.subr.mxu0 %v15367_v45 }
 0xe47   : > { %v12418_v46 = vpop.f32.mrf.mxu1 }
 0xe49   : > { %v6086_v43 = vpop.f32.mrf.mxu1 }
 0xe4b   : > { %v12419_v1 = vpop.f32.mrf.mxu1 }
 0xe4d   : > { %v6089_v61 = vpop.f32.mrf.mxu1 }
 0xe4f   : > { %v12424_v32 = vpop.f32.mrf.mxu1 }
 0xe50   : > { %v6156_v33 = vadd.f32 %v12424_v32, %v12418_v46  ;;  %v15409_v46 = vld [vmem:[%s17063_s2 + $0xe8] sm:$0xff]  ;;  %v15437_v32 = vld [vmem:[%s17063_s2 + $0xd8] sm:$0xff] }
 0xe51   : > { %v6147_v16 = vpop.f32.mrf.mxu1 }
 0xe52   : > { %v6148_v49 = vadd.f32 %v6147_v16, %v6086_v43  ;;  %v15419_v43 = vld [vmem:[%s17063_s2 + $0xa0] sm:$0xff]  ;;  %v15443_v16 = vld [vmem:[%s17063_s2 + $0x90] sm:$0xff] }
 0xe53   : > { %v12425_v60 = vpop.f32.mrf.mxu1 }
 0xe54   : > { %v6159_v47 = vadd.f32 %v12425_v60, %v12419_v1  ;;  %v15425_v1 = vld [vmem:[%s17063_s2 + $0xe0] sm:$0xff]  ;;  %v15447_v60 = vld [vmem:[%s17063_s2 + $0xd0] sm:$0xff] }
 0xe55   : > { %v6150_v9 = vpop.f32.mrf.mxu1 }
 0xe56   : > { %v6151_v34 = vadd.f32 %v6150_v9, %v6089_v61  ;;  %v15433_v61 = vld [vmem:[%s17063_s2 + $0x98] sm:$0xff]  ;;  %v15453_v9 = vld [vmem:[%s17063_s2 + $0x88] sm:$0xff] }
 0xe57   : > { %v12430_v53 = vpop.f32.mrf.mxu1  ;;  %v12436_v50 = vpop.f32.mrf.mxu0 }
 0xe58   : > { %v6230_v5 = vadd.f32 %v12430_v53, %v6156_v33  ;;  %v15457_v53 = vld [vmem:[%s17063_s2 + $0xc8] sm:$0xff]  ;;  %v15491_v33 = vld [vmem:[%s17063_s2 + $0x170] sm:$0xff] }
 0xe59   : > { %v6213_v0 = vpop.f32.mrf.mxu1  ;;  %v6283_v52 = vpop.f32.mrf.mxu0 }
 0xe5a   : > { %v6228_v26 = vadd.f32 %v6213_v0, %v6148_v49  ;;  %v6300_v15 = vadd.f32 %v12436_v50, %v6230_v5  ;;  %v15463_v50 = vld [vmem:[%s17063_s2 + $0x80] sm:$0xff]  ;;  %v15477_v0 = vld [vmem:[%s17063_s2 + $0x178] sm:$0xff] }
 0xe5b   : > { %v12431_v10 = vpop.f32.mrf.mxu1  ;;  %v12437_v23 = vpop.f32.mrf.mxu0  ;;  %v15467_v49 = vld [vmem:[%s17063_s2 + $0xc0] sm:$0xff] }
 0xe5c   : > { %v6298_v12 = vadd.f32 %v6283_v52, %v6228_v26  ;;  %v6231_v37 = vadd.f32 %v12431_v10, %v6159_v47  ;;  %v15378_v2 = vadd.f32 %v6319_v63, %v6300_v15  ;;  %v15481_v52 = vld [vmem:[%s17063_s2 + $0x1b8] sm:$0xff]  ;;  %v15495_v26 = vld [vmem:[%s17063_s2 + $0x1b0] sm:$0xff]  ;;  %v15505_v10 = vld [vmem:[%s17063_s2 + $0x168] sm:$0xff] }
 0xe5d   : > { %v6216_v36 = vpop.f32.mrf.mxu1  ;;  %v6286_v24 = vpop.f32.mrf.mxu0  ;;  %v15523_v5 = vld [vmem:[%s17063_s2 + $0x1a0] sm:$0xff]  ;;  %v15543_v47 = vld [vmem:[%s17063_s2 + $0x190] sm:$0xff] }
 0xe5e   : > { %v15370_v19 = vadd.f32 %v6309_v7, %v6298_v12  ;;  %v6229_v17 = vadd.f32 %v6216_v36, %v6151_v34  ;;  %17106 = vst [vmem:[#allocation58_spill] sm:$0xff] %v15378_v2  ;;  %v6301_v4 = vadd.f32 %v12437_v23, %v6231_v37  ;;  %v15509_v23 = vld [vmem:[%s17063_s2 + $0x1a8] sm:$0xff]  ;;  %v15519_v34 = vld [vmem:[%s17063_s2 + $0x160] sm:$0xff]  ;;  %v15529_v12 = vld [vmem:[%s17063_s2 + $0x158] sm:$0xff] }
 0xe5f   : > { %v15533_v7 = vld [vmem:[%s17063_s2 + $0x198] sm:$0xff]  ;;  %v15539_v36 = vld [vmem:[%s17063_s2 + $0x150] sm:$0xff]  ;;  %v15559_v15 = vld [vmem:[%s17063_s2 + $0x140] sm:$0xff] }
 0xe60   : > { %17104 = vst [vmem:[#allocation56_spill] sm:$0xff] %v15370_v19  ;;  %v6299_v39 = vadd.f32 %v6286_v24, %v6229_v17  ;;  %12454 = vmatprep.mubr.msk.f32.mxu1 %vm1802_vm11, %v15370_v19  ;;  %12476 = vmatprep.mubr.msk.f32.mxu0 %vm1802_vm11, %v15370_v19  ;;  %v15400_v20 = vadd.f32 %v6324_v44, %v6301_v4  ;;  %v15549_v17 = vld [vmem:[%s17063_s2 + $0x148] sm:$0xff]  ;;  %v15563_v37 = vld [vmem:[%s17063_s2 + $0x180] sm:$0xff]  ;;  %v15587_v63 = vld [vmem:[%s17063_s2 + $0x1f0] sm:$0xff] }
 0xe61   : > { %v15553_v24 = vld [vmem:[%s17063_s2 + $0x188] sm:$0xff]  ;;  %v15591_v4 = vld [vmem:[%s17063_s2 + $0x230] sm:$0xff] }
 0xe62   : > { %v15376_v21 = vadd.f32 %v6314_v57, %v6299_v39  ;;  %17107 = vst [vmem:[#allocation59_spill] sm:$0xff] %v15400_v20  ;;  %v15573_v39 = vld [vmem:[%s17063_s2 + $0x1f8] sm:$0xff]  ;;  %17108 = vst [vmem:[#allocation60_spill] sm:$0xff] %v15591_v4  ;;  %v15601_v44 = vld [vmem:[%s17063_s2 + $0x1e8] sm:$0xff] }
 0xe63   : > { %v15577_v57 = vld [vmem:[%s17063_s2 + $0x238] sm:$0xff]  ;;  %17109 = vst [vmem:[#allocation61_spill] sm:$0xff] %v15601_v44 }
 0xe64   : > { %17105 = vst [vmem:[#allocation57_spill] sm:$0xff] %v15376_v21  ;;  %12455 = vmatmul.mubr.msk.f32.vlgmr.msra.gmra.mxu1 %vm1802_vm11, %v15376_v21  ;;  %12477 = vmatmul.mubr.msk.f32.vlgmr.msra.gmra.mxu0 %vm1802_vm11, %v15376_v21 }
 0xe65   : > { %12483 = vmatpush3.msra.mxu1 %v15363_v42  ;;  %12505 = vmatpush3.msra.mxu0 %v15367_v45 }
 0xe66   : > { %12457 = vmatprep.mubr.msk.f32.mxu1 %vm1802_vm11, %v15378_v2  ;;  %12479 = vmatprep.mubr.msk.f32.mxu0 %vm1802_vm11, %v15378_v2 }
 0xe67   : > { %12484 = vmatprep.subr.mxu1 %v15393_v58  ;;  %12506 = vmatprep.subr.mxu0 %v15397_v29 }
 0xe68   : > { %12485 = vmatpush3.msra.mxu1 %v15393_v58  ;;  %12507 = vmatpush3.msra.mxu0 %v15397_v29 }
 0xe69   : > { %12486 = vmatprep.subr.mxu1 %v15405_v35  ;;  %12508 = vmatprep.subr.mxu0 %v15409_v46 }
 0xe6a   : > { %12458 = vmatmul.mubr.msk.f32.gmra.mxu1 %vm1802_vm11, %v15400_v20  ;;  %12480 = vmatmul.mubr.msk.f32.gmra.mxu0 %vm1802_vm11, %v15400_v20 }
 0xe6b   : > { %12487 = vmatpush3.msra.mxu1 %v15405_v35  ;;  %12509 = vmatpush3.msra.mxu0 %v15409_v46 }
 0xe6c   : > { %12488 = vmatprep.subr.mxu1 %v15419_v43  ;;  %12498 = vmatprep.mubr.msk.f32.mxu1 %vm1802_vm11, %v15370_v19 }
 0xe6d   : > { %12510 = vmatprep.subr.mxu0 %v15425_v1  ;;  %12520 = vmatprep.mubr.msk.f32.mxu0 %vm1802_vm11, %v15370_v19 }
 0xe6e   : > { %12489 = vmatpush3.msra.mxu1 %v15419_v43  ;;  %12511 = vmatpush3.msra.mxu0 %v15425_v1 }
 0xe6f   : > { %12490 = vmatprep.subr.mxu1 %v15433_v61  ;;  %12512 = vmatprep.subr.mxu0 %v15437_v32 }
 0xe70   : > { %12491 = vmatpush3.msra.mxu1 %v15433_v61  ;;  %12513 = vmatpush3.msra.mxu0 %v15437_v32 }
 0xe71   : > { %12492 = vmatprep.subr.mxu1 %v15443_v16  ;;  %12514 = vmatprep.subr.mxu0 %v15447_v60 }
 0xe72   : > { %12493 = vmatpush3.msra.mxu1 %v15443_v16  ;;  %12515 = vmatpush3.msra.mxu0 %v15447_v60 }
 0xe73   : > { %12494 = vmatprep.subr.mxu1 %v15453_v9  ;;  %12516 = vmatprep.subr.mxu0 %v15457_v53 }
 0xe74   : > { %12495 = vmatpush3.msra.mxu1 %v15453_v9  ;;  %12517 = vmatpush3.msra.mxu0 %v15457_v53 }
 0xe75   : > { %12496 = vmatprep.subr.mxu1 %v15463_v50  ;;  %12518 = vmatprep.subr.mxu0 %v15467_v49 }
 0xe76   : > { %12497 = vmatpush3.msra.mxu1 %v15463_v50  ;;  %12519 = vmatpush3.msra.mxu0 %v15467_v49 }
 0xe77   : > { %12499 = vmatmul.mubr.msk.f32.vlgmr.msra.gmra.mxu1 %vm1802_vm11, %v15376_v21  ;;  %12521 = vmatmul.mubr.msk.f32.vlgmr.msra.gmra.mxu0 %vm1802_vm11, %v15376_v21 }
 0xe78   : > { %12526 = vmatprep.subr.mxu1 %v15477_v0  ;;  %12548 = vmatprep.subr.mxu0 %v15481_v52 }
 0xe79   : > { %12501 = vmatprep.mubr.msk.f32.mxu1 %vm1802_vm11, %v15378_v2  ;;  %12523 = vmatprep.mubr.msk.f32.mxu0 %vm1802_vm11, %v15378_v2 }
 0xe7a   : > { %12527 = vmatpush3.msra.mxu1 %v15477_v0  ;;  %12549 = vmatpush3.msra.mxu0 %v15481_v52 }
 0xe7b   : > { %12528 = vmatprep.subr.mxu1 %v15491_v33  ;;  %12550 = vmatprep.subr.mxu0 %v15495_v26 }
 0xe7c   : > { %12529 = vmatpush3.msra.mxu1 %v15491_v33  ;;  %12551 = vmatpush3.msra.mxu0 %v15495_v26 }
 0xe7d   : > { %12502 = vmatmul.mubr.msk.f32.gmra.mxu1 %vm1802_vm11, %v15400_v20  ;;  %12524 = vmatmul.mubr.msk.f32.gmra.mxu0 %vm1802_vm11, %v15400_v20 }
 0xe7e   : > { %12530 = vmatprep.subr.mxu1 %v15505_v10  ;;  %12552 = vmatprep.subr.mxu0 %v15509_v23 }
 0xe7f   : > { %12531 = vmatpush3.msra.mxu1 %v15505_v10  ;;  %12542 = vmatprep.mubr.msk.f32.mxu1 %vm1802_vm11, %v15370_v19 }
 0xe80   : > { %12553 = vmatpush3.msra.mxu0 %v15509_v23  ;;  %12564 = vmatprep.mubr.msk.f32.mxu0 %vm1802_vm11, %v15370_v19 }
 0xe81   : > { %12532 = vmatprep.subr.mxu1 %v15519_v34  ;;  %12554 = vmatprep.subr.mxu0 %v15523_v5 }
 0xe82   : > { %12533 = vmatpush3.msra.mxu1 %v15519_v34  ;;  %12555 = vmatpush3.msra.mxu0 %v15523_v5 }
 0xe83   : > { %12534 = vmatprep.subr.mxu1 %v15529_v12  ;;  %12556 = vmatprep.subr.mxu0 %v15533_v7 }
 0xe84   : > { %12535 = vmatpush3.msra.mxu1 %v15529_v12  ;;  %12557 = vmatpush3.msra.mxu0 %v15533_v7 }
 0xe85   : > { %12536 = vmatprep.subr.mxu1 %v15539_v36  ;;  %12558 = vmatprep.subr.mxu0 %v15543_v47 }
 0xe86   : > { %12537 = vmatpush3.msra.mxu1 %v15539_v36  ;;  %12559 = vmatpush3.msra.mxu0 %v15543_v47 }
 0xe87   : > { %12538 = vmatprep.subr.mxu1 %v15549_v17  ;;  %12560 = vmatprep.subr.mxu0 %v15553_v24 }
 0xe88   : > { %12539 = vmatpush3.msra.mxu1 %v15549_v17  ;;  %12561 = vmatpush3.msra.mxu0 %v15553_v24 }
 0xe89   : > { %12540 = vmatprep.subr.mxu1 %v15559_v15  ;;  %12562 = vmatprep.subr.mxu0 %v15563_v37 }
 0xe8a   : > { %12541 = vmatpush3.msra.mxu1 %v15559_v15  ;;  %12563 = vmatpush3.msra.mxu0 %v15563_v37 }
 0xe8b   : > { %12543 = vmatmul.mubr.msk.f32.vlgmr.msra.gmra.mxu1 %vm1802_vm11, %v15376_v21  ;;  %12565 = vmatmul.mubr.msk.f32.vlgmr.msra.gmra.mxu0 %vm1802_vm11, %v15376_v21 }
 0xe8c   : > { %12570 = vmatprep.subr.mxu1 %v15573_v39  ;;  %12592 = vmatprep.subr.mxu0 %v15577_v57 }
 0xe8d   : > { %12545 = vmatprep.mubr.msk.f32.mxu1 %vm1802_vm11, %v15378_v2  ;;  %12567 = vmatprep.mubr.msk.f32.mxu0 %vm1802_vm11, %v15378_v2 }
 0xe8e   : > { %12571 = vmatpush3.msra.mxu1 %v15573_v39  ;;  %12593 = vmatpush3.msra.mxu0 %v15577_v57 }
 0xe8f   : > { %12572 = vmatprep.subr.mxu1 %v15587_v63  ;;  %12594 = vmatprep.subr.mxu0 %v15591_v4 }
 0xe90   : > { %12573 = vmatpush3.msra.mxu1 %v15587_v63  ;;  %12595 = vmatpush3.msra.mxu0 %v15591_v4  ;;  %v15659_v4 = vld [vmem:[%s17063_s2 + $0x200] sm:$0xff] }
 0xe91   : > { %12546 = vmatmul.mubr.msk.f32.gmra.mxu1 %vm1802_vm11, %v15400_v20  ;;  %12568 = vmatmul.mubr.msk.f32.gmra.mxu0 %vm1802_vm11, %v15400_v20 }
 0xe92   : > { %12574 = vmatprep.subr.mxu1 %v15601_v44  ;;  %12596 = vmatprep.subr.mxu0 %v15605_v38 }
 0xe93   : > { %12575 = vmatpush3.msra.mxu1 %v15601_v44  ;;  %12586 = vmatprep.mubr.msk.f32.mxu1 %vm1802_vm11, %v15370_v19  ;;  %v15625_v44 = vld [vmem:[%s17063_s2 + $0x1d8] sm:$0xff] }
 0xe94   : > { %12597 = vmatpush3.msra.mxu0 %v15605_v38  ;;  %12608 = vmatprep.mubr.msk.f32.mxu0 %vm1802_vm11, %v15370_v19  ;;  %17113 = vst [vmem:[#allocation65_spill] sm:$0xff] %v15625_v44  ;;  %v15629_v38 = vld [vmem:[%s17063_s2 + $0x218] sm:$0xff]  ;;  %v15635_v19 = vld [vmem:[%s17063_s2 + $0x1d0] sm:$0xff] }
 0xe95   : > { %12576 = vmatprep.subr.mxu1 %v15615_v18  ;;  %12598 = vmatprep.subr.mxu0 %v15619_v31  ;;  %17114 = vst [vmem:[#allocation66_spill] sm:$0xff] %v15629_v38 }
 0xe96   : > { %12577 = vmatpush3.msra.mxu1 %v15615_v18  ;;  %12599 = vmatpush3.msra.mxu0 %v15619_v31  ;;  %v15639_v18 = vld [vmem:[%s17063_s2 + $0x210] sm:$0xff]  ;;  %v15645_v31 = vld [vmem:[%s17063_s2 + $0x1c8] sm:$0xff] }
 0xe97   : > { %12578 = vmatprep.subr.mxu1 %v15625_v44  ;;  %12600 = vmatprep.subr.mxu0 %v15629_v38 }
 0xe98   : > { %12579 = vmatpush3.msra.mxu1 %v15625_v44  ;;  %12601 = vmatpush3.msra.mxu0 %v15629_v38  ;;  %v15649_v44 = vld [vmem:[%s17063_s2 + $0x208] sm:$0xff]  ;;  %v15655_v38 = vld [vmem:[%s17063_s2 + $0x1c0] sm:$0xff] }
 0xe99   : > { %12580 = vmatprep.subr.mxu1 %v15635_v19  ;;  %12602 = vmatprep.subr.mxu0 %v15639_v18 }
 0xe9a   : > { %12581 = vmatpush3.msra.mxu1 %v15635_v19  ;;  %12603 = vmatpush3.msra.mxu0 %v15639_v18 }
 0xe9b   : > { %12582 = vmatprep.subr.mxu1 %v15645_v31  ;;  %12604 = vmatprep.subr.mxu0 %v15649_v44 }
 0xe9c   : > { %12583 = vmatpush3.msra.mxu1 %v15645_v31  ;;  %12605 = vmatpush3.msra.mxu0 %v15649_v44 }
 0xe9d   : > { %12584 = vmatprep.subr.mxu1 %v15655_v38  ;;  %12606 = vmatprep.subr.mxu0 %v15659_v4 }
 0xe9e   : > { %12585 = vmatpush3.msra.mxu1 %v15655_v38  ;;  %12607 = vmatpush3.msra.mxu0 %v15659_v4 }
 0xe9f   : > { %12587 = vmatmul.mubr.msk.f32.vlgmr.msra.gmra.mxu1 %vm1802_vm11, %v15376_v21  ;;  %12609 = vmatmul.mubr.msk.f32.vlgmr.msra.gmra.mxu0 %vm1802_vm11, %v15376_v21 }
 0xea0   : > { %12614 = vmatprep.subr.mxu1 %v15284_v22  ;;  %12636 = vmatprep.subr.mxu0 %v15274_v13 }
 0xea1   : > { %12589 = vmatprep.mubr.msk.f32.mxu1 %vm1802_vm11, %v15378_v2  ;;  %12611 = vmatprep.mubr.msk.f32.mxu0 %vm1802_vm11, %v15378_v2 }
 0xea2   : > { %12615 = vmatpush3.msra.mxu1 %v15284_v22  ;;  %12637 = vmatpush3.msra.mxu0 %v15274_v13  ;;  %v17115_v13 = vld [vmem:[#allocation60_spill] sm:$0xff]  ;;  %v17116_v22 = vld [vmem:[#allocation61_spill] sm:$0xff] }
 0xea3   : > { %12616 = vmatprep.subr.mxu1 %v15293_v56  ;;  %12638 = vmatprep.subr.mxu0 %v15297_v28 }
 0xea4   : > { %12617 = vmatpush3.msra.mxu1 %v15293_v56  ;;  %12639 = vmatpush3.msra.mxu0 %v15297_v28  ;;  %v17117_v56 = vld [vmem:[#allocation62_spill] sm:$0xff]  ;;  %v17118_v28 = vld [vmem:[#allocation63_spill] sm:$0xff] }
 0xea5   : > { %12590 = vmatmul.mubr.msk.f32.gmra.mxu1 %vm1802_vm11, %v15400_v20  ;;  %12612 = vmatmul.mubr.msk.f32.gmra.mxu0 %vm1802_vm11, %v15400_v20 }
 0xea6   : > { %12618 = vmatprep.subr.mxu1 %v15303_v59  ;;  %12640 = vmatprep.subr.mxu0 %v15307_v48 }
 0xea7   : > { %12619 = vmatpush3.msra.mxu1 %v15303_v59  ;;  %12630 = vmatprep.mubr.msk.f32.mxu1 %vm1802_vm11, %v14751_v11  ;;  %v17119_v59 = vld [vmem:[#allocation64_spill] sm:$0xff] }
 0xea8   : > { %12641 = vmatpush3.msra.mxu0 %v15307_v48  ;;  %12652 = vmatprep.mubr.msk.f32.mxu0 %vm1802_vm11, %v14751_v11  ;;  %v17120_v48 = vld [vmem:[#allocation65_spill] sm:$0xff] }
 0xea9   : > { %12620 = vmatprep.subr.mxu1 %v15313_v54  ;;  %12642 = vmatprep.subr.mxu0 %v15317_v6 }
 0xeaa   : > { %12621 = vmatpush3.msra.mxu1 %v15313_v54  ;;  %12643 = vmatpush3.msra.mxu0 %v15317_v6  ;;  %v17121_v6 = vld [vmem:[#allocation66_spill] sm:$0xff] }
 0xeab   : > { %12622 = vmatprep.subr.mxu1 %v15323_v40  ;;  %12644 = vmatprep.subr.mxu0 %v15327_v30 }
 0xeac   : > { %12623 = vmatpush3.msra.mxu1 %v15323_v40  ;;  %12645 = vmatpush3.msra.mxu0 %v15327_v30 }
 0xead   : > { %12624 = vmatprep.subr.mxu1 %v15333_v55  ;;  %12646 = vmatprep.subr.mxu0 %v15337_v27 }
 0xeae   : > { %12625 = vmatpush3.msra.mxu1 %v15333_v55  ;;  %12647 = vmatpush3.msra.mxu0 %v15337_v27 }
 0xeaf   : > { %12626 = vmatprep.subr.mxu1 %v15343_v62  ;;  %12648 = vmatprep.subr.mxu0 %v15347_v3 }
 0xeb0   : > { %12627 = vmatpush3.msra.mxu1 %v15343_v62  ;;  %12649 = vmatpush3.msra.mxu0 %v15347_v3 }
 0xeb1   : > { %12628 = vmatprep.subr.mxu1 %v15353_v51  ;;  %12650 = vmatprep.subr.mxu0 %v15357_v14 }
 0xeb2   : > { %12629 = vmatpush3.msra.mxu1 %v15353_v51  ;;  %12651 = vmatpush3.msra.mxu0 %v15357_v14 }
 0xeb3   : > { %12631 = vmatmul.mubr.msk.f32.vlgmr.msra.gmra.mxu1 %vm1802_vm11, %v14753_v25  ;;  %12653 = vmatmul.mubr.msk.f32.vlgmr.msra.gmra.mxu0 %vm1802_vm11, %v14753_v25 }
 0xeb4   : > { %12658 = vmatprep.subr.mxu1 %v15363_v42  ;;  %12680 = vmatprep.subr.mxu0 %v15367_v45 }
 0xeb5   : > { %12633 = vmatprep.mubr.msk.f32.mxu1 %vm1802_vm11, %v14761_v41  ;;  %12655 = vmatprep.mubr.msk.f32.mxu0 %vm1802_vm11, %v14761_v41 }
 0xeb6   : > { %12659 = vmatpush3.msra.mxu1 %v15363_v42  ;;  %12681 = vmatpush3.msra.mxu0 %v15367_v45 }
 0xeb7   : > { %12660 = vmatprep.subr.mxu1 %v15393_v58  ;;  %12682 = vmatprep.subr.mxu0 %v15397_v29 }
 0xeb8   : > { %12661 = vmatpush3.msra.mxu1 %v15393_v58  ;;  %12683 = vmatpush3.msra.mxu0 %v15397_v29  ;;  %v13165_v29 = vld [vmem:[%s17126_s11 + $0x8] ss:$12 sps:$4 sm:$0xff]  }
 0xeb9   : > { %12634 = vmatmul.mubr.msk.f32.gmra.mxu1 %vm1802_vm11, %v14763_v8  ;;  %12656 = vmatmul.mubr.msk.f32.gmra.mxu0 %vm1802_vm11, %v14763_v8 }
 0xeba   : > { %12662 = vmatprep.subr.mxu1 %v15405_v35  ;;  %12684 = vmatprep.subr.mxu0 %v15409_v46 }
 0xebb   : > { %12663 = vmatpush3.msra.mxu1 %v15405_v35  ;;  %12674 = vmatprep.mubr.msk.f32.mxu1 %vm1802_vm11, %v14751_v11 }
 0xebc   : > { %12685 = vmatpush3.msra.mxu0 %v15409_v46  ;;  %12696 = vmatprep.mubr.msk.f32.mxu0 %vm1802_vm11, %v14751_v11 }
 0xebd   : > { %12664 = vmatprep.subr.mxu1 %v15419_v43  ;;  %12686 = vmatprep.subr.mxu0 %v15425_v1 }
 0xebe   : > { %12665 = vmatpush3.msra.mxu1 %v15419_v43  ;;  %12687 = vmatpush3.msra.mxu0 %v15425_v1 }
 0xebf   : > { %12666 = vmatprep.subr.mxu1 %v15433_v61  ;;  %12688 = vmatprep.subr.mxu0 %v15437_v32 }
 0xec0   : > { %12667 = vmatpush3.msra.mxu1 %v15433_v61  ;;  %12689 = vmatpush3.msra.mxu0 %v15437_v32 }
 0xec1   : > { %12668 = vmatprep.subr.mxu1 %v15443_v16  ;;  %12690 = vmatprep.subr.mxu0 %v15447_v60 }
 0xec2   : > { %12669 = vmatpush3.msra.mxu1 %v15443_v16  ;;  %12691 = vmatpush3.msra.mxu0 %v15447_v60 }
 0xec3   : > { %12670 = vmatprep.subr.mxu1 %v15453_v9  ;;  %12692 = vmatprep.subr.mxu0 %v15457_v53 }
 0xec4   : > { %12671 = vmatpush3.msra.mxu1 %v15453_v9  ;;  %12693 = vmatpush3.msra.mxu0 %v15457_v53  ;;  %v13169_v53 = vld [vmem:[%s17126_s11 + $0x4] ss:$12 sps:$4 sm:$0xff]  }
 0xec5   : > { %12672 = vmatprep.subr.mxu1 %v15463_v50  ;;  %12694 = vmatprep.subr.mxu0 %v15467_v49 }
 0xec6   : > { %12673 = vmatpush3.msra.mxu1 %v15463_v50  ;;  %12695 = vmatpush3.msra.mxu0 %v15467_v49 }
 0xec7   : > { %12675 = vmatmul.mubr.msk.f32.vlgmr.msra.gmra.mxu1 %vm1802_vm11, %v14753_v25  ;;  %12697 = vmatmul.mubr.msk.f32.vlgmr.msra.gmra.mxu0 %vm1802_vm11, %v14753_v25 }
 0xec8   : > { %12702 = vmatprep.subr.mxu1 %v15477_v0  ;;  %12724 = vmatprep.subr.mxu0 %v15481_v52 }
 0xec9   : > { %12677 = vmatprep.mubr.msk.f32.mxu1 %vm1802_vm11, %v14761_v41  ;;  %12699 = vmatprep.mubr.msk.f32.mxu0 %vm1802_vm11, %v14761_v41 }
 0xeca   : > { %12703 = vmatpush3.msra.mxu1 %v15477_v0  ;;  %12725 = vmatpush3.msra.mxu0 %v15481_v52 }
 0xecb   : > { %12704 = vmatprep.subr.mxu1 %v15491_v33  ;;  %12726 = vmatprep.subr.mxu0 %v15495_v26 }
 0xecc   : > { %12705 = vmatpush3.msra.mxu1 %v15491_v33  ;;  %12727 = vmatpush3.msra.mxu0 %v15495_v26 }
 0xecd   : > { %12678 = vmatmul.mubr.msk.f32.gmra.mxu1 %vm1802_vm11, %v14763_v8  ;;  %12700 = vmatmul.mubr.msk.f32.gmra.mxu0 %vm1802_vm11, %v14763_v8 }
 0xece   : > { %12706 = vmatprep.subr.mxu1 %v15505_v10  ;;  %12728 = vmatprep.subr.mxu0 %v15509_v23 }
 0xecf   : > { %12707 = vmatpush3.msra.mxu1 %v15505_v10  ;;  %12718 = vmatprep.mubr.msk.f32.mxu1 %vm1802_vm11, %v14751_v11 }
 0xed0   : > { %12729 = vmatpush3.msra.mxu0 %v15509_v23  ;;  %12740 = vmatprep.mubr.msk.f32.mxu0 %vm1802_vm11, %v14751_v11 }
 0xed1   : > { %12708 = vmatprep.subr.mxu1 %v15519_v34  ;;  %12730 = vmatprep.subr.mxu0 %v15523_v5 }
 0xed2   : > { %12709 = vmatpush3.msra.mxu1 %v15519_v34  ;;  %12731 = vmatpush3.msra.mxu0 %v15523_v5 }
 0xed3   : > { %12710 = vmatprep.subr.mxu1 %v15529_v12  ;;  %12732 = vmatprep.subr.mxu0 %v15533_v7 }
 0xed4   : > { %12711 = vmatpush3.msra.mxu1 %v15529_v12  ;;  %12733 = vmatpush3.msra.mxu0 %v15533_v7 }
 0xed5   : > { %12712 = vmatprep.subr.mxu1 %v15539_v36  ;;  %12734 = vmatprep.subr.mxu0 %v15543_v47 }
 0xed6   : > { %12713 = vmatpush3.msra.mxu1 %v15539_v36  ;;  %12735 = vmatpush3.msra.mxu0 %v15543_v47 }
 0xed7   : > { %12714 = vmatprep.subr.mxu1 %v15549_v17  ;;  %12736 = vmatprep.subr.mxu0 %v15553_v24 }
 0xed8   : > { %12715 = vmatpush3.msra.mxu1 %v15549_v17  ;;  %12737 = vmatpush3.msra.mxu0 %v15553_v24 }
 0xed9   : > { %12716 = vmatprep.subr.mxu1 %v15559_v15  ;;  %12738 = vmatprep.subr.mxu0 %v15563_v37 }
 0xeda   : > { %12717 = vmatpush3.msra.mxu1 %v15559_v15  ;;  %12739 = vmatpush3.msra.mxu0 %v15563_v37 }
 0xedb   : > { %12719 = vmatmul.mubr.msk.f32.vlgmr.msra.gmra.mxu1 %vm1802_vm11, %v14753_v25  ;;  %12741 = vmatmul.mubr.msk.f32.vlgmr.msra.gmra.mxu0 %vm1802_vm11, %v14753_v25 }
 0xedc   : > { %12746 = vmatprep.subr.mxu1 %v15573_v39  ;;  %12768 = vmatprep.subr.mxu0 %v15577_v57 }
 0xedd   : > { %12721 = vmatprep.mubr.msk.f32.mxu1 %vm1802_vm11, %v14761_v41  ;;  %12743 = vmatprep.mubr.msk.f32.mxu0 %vm1802_vm11, %v14761_v41 }
 0xede   : > { %12747 = vmatpush3.msra.mxu1 %v15573_v39  ;;  %12769 = vmatpush3.msra.mxu0 %v15577_v57 }
 0xedf   : > { %12748 = vmatprep.subr.mxu1 %v15587_v63  ;;  %12770 = vmatprep.subr.mxu0 %v17115_v13 }
 0xee0   : > { %12749 = vmatpush3.msra.mxu1 %v15587_v63  ;;  %12771 = vmatpush3.msra.mxu0 %v17115_v13 }
 0xee1   : > { %12722 = vmatmul.mubr.msk.f32.gmra.mxu1 %vm1802_vm11, %v14763_v8  ;;  %12744 = vmatmul.mubr.msk.f32.gmra.mxu0 %vm1802_vm11, %v14763_v8 }
 0xee2   : > { %12750 = vmatprep.subr.mxu1 %v17116_v22  ;;  %12772 = vmatprep.subr.mxu0 %v17117_v56 }
 0xee3   : > { %12751 = vmatpush3.msra.mxu1 %v17116_v22  ;;  %12762 = vmatprep.mubr.msk.f32.mxu1 %vm1802_vm11, %v14751_v11 }
 0xee4   : > { %12773 = vmatpush3.msra.mxu0 %v17117_v56  ;;  %12784 = vmatprep.mubr.msk.f32.mxu0 %vm1802_vm11, %v14751_v11 }
 0xee5   : > { %12752 = vmatprep.subr.mxu1 %v17118_v28  ;;  %12774 = vmatprep.subr.mxu0 %v17119_v59 }
 0xee6   : > { %12753 = vmatpush3.msra.mxu1 %v17118_v28  ;;  %12775 = vmatpush3.msra.mxu0 %v17119_v59 }
 0xee7   : > { %12754 = vmatprep.subr.mxu1 %v17120_v48  ;;  %12776 = vmatprep.subr.mxu0 %v17121_v6 }
 0xee8   : > { %12755 = vmatpush3.msra.mxu1 %v17120_v48  ;;  %12777 = vmatpush3.msra.mxu0 %v17121_v6 }
 0xee9   : > { %12756 = vmatprep.subr.mxu1 %v15635_v19  ;;  %12778 = vmatprep.subr.mxu0 %v15639_v18 }
 0xeea   : > { %12757 = vmatpush3.msra.mxu1 %v15635_v19  ;;  %12779 = vmatpush3.msra.mxu0 %v15639_v18 }
 0xeeb   : > { %12758 = vmatprep.subr.mxu1 %v15645_v31  ;;  %12780 = vmatprep.subr.mxu0 %v15649_v44 }
 0xeec   : > { %12759 = vmatpush3.msra.mxu1 %v15645_v31  ;;  %12781 = vmatpush3.msra.mxu0 %v15649_v44 }
 0xeed   : > { %12760 = vmatprep.subr.mxu1 %v15655_v38  ;;  %12782 = vmatprep.subr.mxu0 %v15659_v4 }
 0xeee   : > { %12761 = vmatpush3.msra.mxu1 %v15655_v38  ;;  %12783 = vmatpush3.msra.mxu0 %v15659_v4 }
 0xeef   : > { %12763 = vmatmul.mubr.msk.f32.vlgmr.msra.gmra.mxu1 %vm1802_vm11, %v14753_v25  ;;  %12785 = vmatmul.mubr.msk.f32.vlgmr.msra.gmra.mxu0 %vm1802_vm11, %v14753_v25 }
 0xef0   : > { %12765 = vmatprep.mubr.msk.f32.mxu1 %vm1802_vm11, %v14761_v41  ;;  %12787 = vmatprep.mubr.msk.f32.mxu0 %vm1802_vm11, %v14761_v41 }
 0xef3   : > { %12766 = vmatmul.mubr.msk.f32.gmra.mxu1 %vm1802_vm11, %v14763_v8  ;;  %12788 = vmatmul.mubr.msk.f32.gmra.mxu0 %vm1802_vm11, %v14763_v8 }
 0xef4   : > { %12794 = vmatprep.mubr.msk.bf16.mxu0 %vm3358_vm12, %v13165_v29  ;;  %7832 = vmatprep.mubr.bf16.mxu1 %v13169_v53 }
 0xf24   : > { %v15868_v11 = vpop.f32.mrf.mxu1  ;;  %v15870_v18 = vpop.f32.mrf.mxu0 }
 0xf25   : > { %17122 = vst [vmem:[#allocation60_spill] sm:$0xff] %v15868_v11  ;;  %17123 = vst [vmem:[#allocation61_spill] sm:$0xff] %v15870_v18 }
 0xf26   : > { %v15872_v31 = vpop.f32.mrf.mxu1  ;;  %v15874_v40 = vpop.f32.mrf.mxu0 }
 0xf27   : > { %17124 = vst [vmem:[#allocation62_spill] sm:$0xff] %v15872_v31  ;;  %17125 = vst [vmem:[#allocation63_spill] sm:$0xff] %v15874_v40 }
 0xf2a   : > { %v15880_v30 = vpop.f32.mrf.mxu1  ;;  %v15882_v55 = vpop.f32.mrf.mxu0 }
 0xf2b   : > { %17127 = vst [vmem:[#allocation64_spill] sm:$0xff] %v15880_v30 }
 0xf2c   : > { %v15884_v8 = vpop.f32.mrf.mxu1  ;;  %v15886_v27 = vpop.f32.mrf.mxu0 }
 0xf2d   : > { %17128 = vst [vmem:[#allocation65_spill] sm:$0xff] %v15884_v8 }
 0xf37   : > { %v15892_v51 = vpop.f32.mrf.mxu1  ;;  %v15894_v14 = vpop.f32.mrf.mxu0 }
 0xf39   : > { %v15896_v42 = vpop.f32.mrf.mxu1  ;;  %v15898_v45 = vpop.f32.mrf.mxu0 }
 0xf3d   : > { %v15904_v58 = vpop.f32.mrf.mxu1  ;;  %v15912_v43 = vpop.f32.mrf.mxu0 }
 0xf3f   : > { %v15907_v35 = vpop.f32.mrf.mxu1  ;;  %v15920_v16 = vpop.f32.mrf.mxu0 }
 0xf4b   : > { %v15914_v1 = vpop.f32.mrf.mxu1  ;;  %v15922_v60 = vpop.f32.mrf.mxu0 }
 0xf4d   : > { %v15916_v61 = vpop.f32.mrf.mxu1  ;;  %v15924_v9 = vpop.f32.mrf.mxu0 }
 0xf51   : > { %v15927_v50 = vpop.f32.mrf.mxu0  ;;  %v15933_v26 = vpop.f32.mrf.mxu1 }
 0xf53   : > { %v15929_v49 = vpop.f32.mrf.mxu0  ;;  %v15935_v10 = vpop.f32.mrf.mxu1 }
 0xf5f   : > { %v12610_v0 = vpop.f32.mrf.mxu0  ;;  %v15937_v23 = vpop.f32.mrf.mxu1 }
 0xf61   : > { %v7003_v52 = vpop.f32.mrf.mxu0  ;;  %v15939_v34 = vpop.f32.mrf.mxu1 }
 0xf62   : > { %v15931_v33 = vpack.c.bf16 %v12610_v0, %v7003_v52 }
 0xf64   : > { %17129 = vst [vmem:[#allocation66_spill] sm:$0xff] %v15931_v33 }
 0xf65   : > { %v12591_v5 = vpop.f32.mrf.mxu1  ;;  %v15941_v12 = vpop.f32.mrf.mxu0 }
 0xf66   : > { %17130 = vst [vmem:[#allocation67_spill] sm:$0xff] %v15941_v12  ;;  %v13166_v12 = vld [vmem:[%s17126_s11 + $0x20] ss:$12 sps:$4 sm:$0xff]  }
 0xf67   : > { %v6928_v7 = vpop.f32.mrf.mxu1  ;;  %v15943_v36 = vpop.f32.mrf.mxu0 }
 0xf68   : > { %v7037_v20 = vpack.c.bf16 %v12591_v5, %v6928_v7  ;;  %v13170_v5 = vld [vmem:[%s17126_s11 + $0x18] ss:$12 sps:$4 sm:$0xff]  }
 0xf69   : > { %v17152_v7 = vld [vmem:[#allocation60_spill] sm:$0xff] }
 0xf73   : > { %v15945_v47 = vpop.f32.mrf.mxu1  ;;  %v15947_v17 = vpop.f32.mrf.mxu0 }
 0xf75   : > { %v15949_v24 = vpop.f32.mrf.mxu1  ;;  %v15951_v15 = vpop.f32.mrf.mxu0 }
 0xf79   : > { %v15953_v37 = vpop.f32.mrf.mxu1  ;;  %v15955_v39 = vpop.f32.mrf.mxu0 }
 0xf7b   : > { %v15957_v57 = vpop.f32.mrf.mxu1  ;;  %v15959_v63 = vpop.f32.mrf.mxu0 }
 0xf87   : > { %v12676_v4 = vpop.f32.mrf.mxu1  ;;  %v12698_v44 = vpop.f32.mrf.mxu0 }
 0xf89   : > { %v7296_v13 = vpop.f32.mrf.mxu1  ;;  %v7381_v22 = vpop.f32.mrf.mxu0 }
 0xf8a   : > { %v7746_v18 = vpack.c.bf16 %v12698_v44, %v7381_v22  ;;  %v17155_v44 = vld [vmem:[#allocation55_spill] sm:$0xff] }
 0xf8b   : > { %v13319_v22 = vld [vmem:[%s17063_s2 + $0x70] sm:$0xff] }
 0xf8d   : > { %v12679_v56 = vpop.f32.mrf.mxu1  ;;  %v12701_v28 = vpop.f32.mrf.mxu0 }
 0xf8f   : > { %v7306_v59 = vpop.f32.mrf.mxu1  ;;  %v7391_v48 = vpop.f32.mrf.mxu0 }
 0xf90   : > { %v7747_v8 = vpack.c.bf16 %v12701_v28, %v7391_v48  ;;  %v13321_v28 = vld [vmem:[%s17063_s2 + $0x68] sm:$0xff]  ;;  %v13323_v48 = vld [vmem:[%s17063_s2 + $0x60] sm:$0xff] }
 0xf9b   : > { %v12720_v6 = vpop.f32.mrf.mxu1  ;;  %v12742_v29 = vpop.f32.mrf.mxu0 }
 0xf9d   : > { %v7466_v53 = vpop.f32.mrf.mxu1  ;;  %v7551_v0 = vpop.f32.mrf.mxu0 }
 0xfa1   : > { %v12723_v52 = vpop.f32.mrf.mxu1  ;;  %v12745_v25 = vpop.f32.mrf.mxu0 }
 0xfa3   : > { %v7476_v62 = vpop.f32.mrf.mxu1  ;;  %v7561_v41 = vpop.f32.mrf.mxu0 }
 0xfa4   : > { %v7751_v2 = vpack.c.bf16 %v12745_v25, %v7561_v41  ;;  %v7034_v25 = vpack.c.bf16 %v15922_v60, %v15924_v9  ;;  %v7748_v41 = vpack.c.bf16 %v12720_v6, %v7466_v53  ;;  %v13167_v9 = vld [vmem:[%s17126_s11] ss:$12 sps:$4 sm:$0xff]  }
 0xfa5   : > { %v13324_v6 = vld [vmem:[%s17063_s2 + $0x8] sm:$0xff]  ;;  %v13326_v53 = vld [vmem:[%s17063_s2] sm:$0xff] }
 0xfaf   : > { %v12764_v32 = vpop.f32.mrf.mxu1  ;;  %v12786_v3 = vpop.f32.mrf.mxu0 }
 0xfb1   : > { %v7636_v19 = vpop.f32.mrf.mxu1  ;;  %v7721_v46 = vpop.f32.mrf.mxu0 }
 0xfb2   : > { %v7752_v30 = vpack.c.bf16 %v12764_v32, %v7636_v19  ;;  %v7754_v40 = vpack.c.bf16 %v12786_v3, %v7721_v46  ;;  %v7036_v3 = vpack.c.bf16 %v15937_v23, %v15939_v34  ;;  %v17135_v19 = vld [vmem:[#allocation54_spill] sm:$0xff]  ;;  %v17138_v46 = vpack.c.bf16 %v15914_v1, %v15916_v61  ;;  %v17145_v61 = vld [vmem:[#allocation64_spill] sm:$0xff] }
 0xfb3   : > { %v12767_v38 = vpop.f32.mrf.mxu1  ;;  %v12789_v54 = vpop.f32.mrf.mxu0  ;;  %v17140_v32 = vld [vmem:[#allocation58_spill] sm:$0xff] }
 0xfb4   : > { %v13172_v1 = vld [vmem:[%s17126_s11 + $0x1c] ss:$12 sps:$4 sm:$0xff]   ;;  %s17186_s11 = sld [smem:[#allocation25_spill]] }
 0xfb5   : > { %v7646_v31 = vpop.f32.mrf.mxu1  ;;  %v7731_v11 = vpop.f32.mrf.mxu0  ;;  %v17151_v34 = vld [vmem:[#allocation66_spill] sm:$0xff] }
 0xfb6   : > { %v7753_v33 = vpack.c.bf16 %v12767_v38, %v7646_v31  ;;  %v7755_v21 = vpack.c.bf16 %v12789_v54, %v7731_v11  ;;  %v7029_v54 = vpack.c.bf16 %v15912_v43, %v15920_v16  ;;  %v7745_v11 = vpack.c.bf16 %v12679_v56, %v7306_v59  ;;  %v13175_v31 = vld [vmem:[%s17131_s16 + $0x4] ss:$12 sps:$4 sm:$0xff]   ;;  %v13320_v56 = vld [vmem:[%s17063_s2 + $0x18] sm:$0xff] }
 0xfb7   : > { %v7741_v38 = vpack.c.bf16 %v15953_v37, %v15957_v57  ;;  %v17141_v16 = vld [vmem:[#allocation59_spill] sm:$0xff]  ;;  %v13315_v37 = vld [vmem:[%s17063_s2 + $0x78] sm:$0xff] }
 0xfb8   : > { %11606 = vmatprep.subr.bf16.mxu1 %v7753_v33  ;;  %12790 = vmatprep.subr.bf16.mxu0 %v7755_v21  ;;  %v7031_v60 = vpack.c.bf16 %v17141_v16, %v17140_v32  ;;  %v13176_v57 = vld [vmem:[%s17131_s16 + $0x18] ss:$12 sps:$4 sm:$0xff]   ;;  %v13322_v59 = vld [vmem:[%s17063_s2 + $0x10] sm:$0xff] }
 0xfb9   : > { %11607 = vmatpush3.bf16.msra.mxu1 %v7747_v8  ;;  %12791 = vmatpush3.bf16.msra.mxu0 %v7755_v21  ;;  %v7750_v8 = vpack.c.bf16 %v12742_v29, %v7551_v0  ;;  %v7744_v21 = vpack.c.bf16 %v12676_v4, %v7296_v13  ;;  %v13317_v4 = vld [vmem:[%s17063_s2 + $0x28] sm:$0xff]  ;;  %v13318_v13 = vld [vmem:[%s17063_s2 + $0x20] sm:$0xff]  ;;  %v13325_v29 = vld [vmem:[%s17063_s2 + $0x58] sm:$0xff] }
 0xfba   : > { %11608 = vmatprep.subr.bf16.mxu1 %v7752_v30  ;;  %12792 = vmatprep.subr.bf16.mxu0 %v7754_v40  ;;  %v17133_v30 = vpack.c.bf16 %v15904_v58, %v15907_v35  ;;  %v17136_v58 = vpack.c.bf16 %v15882_v55, %v15886_v27  ;;  %v17137_v35 = vld [vmem:[#allocation53_spill] sm:$0xff]  ;;  %v17143_v27 = vld [vmem:[#allocation63_spill] sm:$0xff] }
 0xfbb   : > { %v17142_v55 = vld [vmem:[#allocation61_spill] sm:$0xff]  ;;  %v13327_v0 = vld [vmem:[%s17063_s2 + $0x50] sm:$0xff] }
 0xfbd   : > { %11609 = vmatpush3.bf16.msra.mxu1 %v7746_v18  ;;  %12793 = vmatpush3.bf16.msra.mxu0 %v7754_v40  ;;  %v17132_v18 = vpack.c.bf16 %v15894_v14, %v15898_v45  ;;  %v7743_v40 = vpack.c.bf16 %v15955_v39, %v15959_v63  ;;  %v7033_v14 = vpack.c.bf16 %v15933_v26, %v15935_v10  ;;  %v17148_v26 = vld [vmem:[#allocation57_spill] sm:$0xff]  ;;  %v17149_v10 = vld [vmem:[#allocation56_spill] sm:$0xff] }
 0xfbe   : > { %11610 = vmatprep.subr.bf16.mxu1 %v7751_v2  ;;  %11638 = vmatprep.subr.bf16.mxu0 %v7037_v20  ;;  %v7035_v2 = vpack.c.bf16 %v15927_v50, %v15929_v49  ;;  %v7749_v20 = vpack.c.bf16 %v12723_v52, %v7476_v62  ;;  %v7742_v62 = vpack.c.bf16 %v15947_v17, %v15951_v15  ;;  %v17146_v49 = vld [vmem:[#allocation65_spill] sm:$0xff]  ;;  %v13316_v39 = vld [vmem:[%s17063_s2 + $0x30] sm:$0xff] }
 0xfbf   : > { %v17134_v45 = vpack.c.bf16 %v15892_v51, %v15896_v42  ;;  %v7740_v51 = vpack.c.bf16 %v15945_v47, %v15949_v24  ;;  %v17139_v42 = vld [vmem:[#allocation67_spill] sm:$0xff]  ;;  %v17144_v50 = vpack.c.bf16 %v17142_v55, %v17143_v27  ;;  %v17147_v33 = vpack.c.bf16 %v17145_v61, %v17146_v49  ;;  %v13314_v15 = vld [vmem:[%s17063_s2 + $0x38] sm:$0xff] }
 0xfc0   : > { %12795 = vmatmul.mubr.msk.bf16.vlgmr.msra.gmra.mxu0 %vm3358_vm12, %v13166_v12  ;;  %v7039_v43 = vpack.c.bf16 %v17139_v42, %v15943_v36  ;;  %v17150_v23 = vpack.c.bf16 %v17148_v26, %v17149_v10  ;;  %v13173_v12 = vld [vmem:[%s17131_s16] ss:$12 sps:$4 sm:$0xff]   ;;  %v13178_v17 = vld [vmem:[%s17131_s16 + $0x1c] ss:$12 sps:$4 sm:$0xff]  }
 0xfc1   : > { %11611 = vmatpush3.bf16.msra.mxu1 %v7745_v11  ;;  %11639 = vmatpush3.bf16.msra.mxu0 %v7029_v54  ;;  %v17153_v36 = vld [vmem:[#allocation62_spill] sm:$0xff]  ;;  %v16043_v52 = vld [vmem:[%s17063_s2 + $0xb8] sm:$0xff] }
 0xfc2   : > { %11612 = vmatprep.subr.bf16.mxu1 %v7750_v8  ;;  %11640 = vmatprep.subr.bf16.mxu0 %v7036_v3  ;;  %v17154_v47 = vpack.c.bf16 %v17152_v7, %v17153_v36  ;;  %v13179_v24 = vld [vmem:[%s17131_s16 + $0x8] ss:$12 sps:$4 sm:$0xff]   ;;  %v13180_v63 = vld [vmem:[%s17131_s16 + $0x20] ss:$12 sps:$4 sm:$0xff]  }
 0xfc3   : > { %7966 = vmatprep.mubr.bf16.mxu0 %v13175_v31  ;;  %v13329_v54 = vld [vmem:[%s17063_s2 + $0x48] sm:$0xff]  ;;  %v13330_v11 = vld [vmem:[%s17063_s2 + $0x40] sm:$0xff]  ;;  %v13331_v31 = vld [vmem:[%s17063_s2 + $0xf8] sm:$0xff] }
 0xfc5   : > { %11613 = vmatpush3.bf16.msra.mxu1 %v7744_v21  ;;  %11641 = vmatpush3.bf16.msra.mxu0 %v17132_v18 }
 0xfc6   : > { %11614 = vmatprep.subr.bf16.mxu1 %v7749_v20  ;;  %11642 = vmatprep.subr.bf16.mxu0 %v7035_v2 }
 0xfc9   : > { %11615 = vmatpush3.bf16.msra.mxu1 %v7743_v40  ;;  %11643 = vmatpush3.bf16.msra.mxu0 %v17133_v30 }
 0xfca   : > { %11616 = vmatprep.subr.bf16.mxu1 %v7748_v41  ;;  %11644 = vmatprep.subr.bf16.mxu0 %v7034_v25 }
 0xfcd   : > { %11617 = vmatpush3.bf16.msra.mxu1 %v7742_v62  ;;  %11645 = vmatpush3.bf16.msra.mxu0 %v17134_v45 }
 0xfce   : > { %11618 = vmatprep.subr.bf16.mxu1 %v17135_v19  ;;  %11646 = vmatprep.subr.bf16.mxu0 %v7033_v14 }
 0xfd1   : > { %11619 = vmatpush3.bf16.msra.mxu1 %v7741_v38  ;;  %11647 = vmatpush3.bf16.msra.mxu0 %v17136_v58 }
 0xfd2   : > { %11620 = vmatprep.subr.bf16.mxu1 %v17137_v35  ;;  %11648 = vmatprep.subr.bf16.mxu0 %v17138_v46 }
 0xfd5   : > { %11621 = vmatpush3.bf16.msra.mxu1 %v7740_v51  ;;  %11649 = vmatpush3.bf16.msra.mxu0 %v17144_v50 }
 0xfd6   : > { %11650 = vmatprep.subr.bf16.mxu0 %v7031_v60  ;;  %12798 = vmatprep.subr.bf16.mxu1 %v7039_v43  ;;  %v8039_v60 = vpop.permute.xlu1 %8038 }
 0xfd8   : > { %7833 = vmatmul.mubr.bf16.vlgmr.msra.gmra.mxu1 %v13167_v9 }
 0xfd9   : > { %11651 = vmatpush3.bf16.msra.mxu0 %v17147_v33  ;;  %12799 = vmatpush3.bf16.msra.mxu1 %v7039_v43 }
 0xfda   : > { %11652 = vmatprep.subr.bf16.mxu0 %v17150_v23  ;;  %12800 = vmatprep.subr.bf16.mxu1 %v17151_v34 }
 0xfdb   : > { %7840 = vmatprep.mubr.bf16.mxu1 %v13172_v1 }
 0xfdd   : > { %11653 = vmatpush3.bf16.msra.mxu0 %v17154_v47  ;;  %12801 = vmatpush3.bf16.msra.mxu1 %v17151_v34  ;;  %v8044_v34 = vpop.permute.xlu0 %8043 }
 0xfde   : > { %12806 = vmatprep.subr.mxu0 %v13314_v15  ;;  %12828 = vmatprep.subr.mxu1 %v13315_v37 }
 0xfe0   : > { %7841 = vmatmul.mubr.bf16.gmra.mxu1 %v13170_v5  ;;  %7967 = vmatmul.mubr.bf16.vlgmr.msra.gmra.mxu0 %v13173_v12 }
 0xfe1   : > { %7974 = vmatprep.mubr.bf16.mxu0 %v13178_v17  ;;  %12802 = vmatprep.mubr.msk.bf16.mxu1 %vm3358_vm12, %v13179_v24 }
 0xfe2   : > { %12807 = vmatpush3.msra.mxu0 %v13314_v15 }
 0xfe3   : > { %12808 = vmatprep.subr.mxu0 %v13316_v39 }
 0xfe4   : > { %12809 = vmatpush3.msra.mxu0 %v13316_v39 }
 0xfe5   : > { %12810 = vmatprep.subr.mxu0 %v13317_v4 }
 0xfe6   : > { %12811 = vmatpush3.msra.mxu0 %v13317_v4 }
 0xfe7   : > { %12812 = vmatprep.subr.mxu0 %v17155_v44 }
 0xfe8   : > { %7975 = vmatmul.mubr.bf16.gmra.mxu0 %v13176_v57  ;;  %12803 = vmatmul.mubr.msk.bf16.vlgmr.msra.gmra.mxu1 %vm3358_vm12, %v13180_v63  ;;  %v8049_v57 = vpop.permute.xlu1 %8048 }
 0xfe9   : > { %12829 = vmatpush3.msra.mxu1 %v13315_v37  ;;  %12813 = vmatpush3.msra.mxu0 %v13318_v13 }
 0xfea   : > { %12830 = vmatprep.subr.mxu1 %v13319_v22  ;;  %12814 = vmatprep.subr.mxu0 %v13320_v56 }
 0xfeb   : > { %12831 = vmatpush3.msra.mxu1 %v13319_v22  ;;  %12815 = vmatpush3.msra.mxu0 %v13320_v56 }
 0xfec   : > { %12832 = vmatprep.subr.mxu1 %v13321_v28  ;;  %12816 = vmatprep.subr.mxu0 %v13322_v59 }
 0xfed   : > { %12833 = vmatpush3.msra.mxu1 %v13321_v28  ;;  %12817 = vmatpush3.msra.mxu0 %v13322_v59  ;;  %v8054_v28 = vpop.permute.xlu0 %8053 }
 0xfee   : > { %12834 = vmatprep.subr.mxu1 %v13323_v48  ;;  %12818 = vmatprep.subr.mxu0 %v13324_v6 }
 0xfef   : > { %12835 = vmatpush3.msra.mxu1 %v13323_v48  ;;  %12819 = vmatpush3.msra.mxu0 %v13324_v6 }
 0xff0   : > { %12836 = vmatprep.subr.mxu1 %v13325_v29  ;;  %12820 = vmatprep.subr.mxu0 %v13326_v53 }
 0xff1   : > { %12837 = vmatpush3.msra.mxu1 %v13325_v29  ;;  %12821 = vmatpush3.msra.mxu0 %v13326_v53  ;;  %v13332_v29 = vld [vmem:[%s17063_s2 + $0xb0] sm:$0xff] }
 0xff2   : > { %12838 = vmatprep.subr.mxu1 %v13327_v0  ;;  %12850 = vmatprep.subr.mxu0 %v16043_v52  ;;  %v13333_v53 = vld [vmem:[%s17063_s2 + $0xf0] sm:$0xff] }
 0xff3   : > { %12839 = vmatpush3.msra.mxu1 %v13327_v0 }
 0xff4   : > { %12840 = vmatprep.subr.mxu1 %v13329_v54 }
 0xff5   : > { %12841 = vmatpush3.msra.mxu1 %v13329_v54  ;;  %v13335_v54 = vld [vmem:[%s17063_s2 + $0xe8] sm:$0xff] }
 0xff6   : > { %12842 = vmatprep.subr.mxu1 %v13330_v11 }
 0xff7   : > { %12843 = vmatpush3.msra.mxu1 %v13330_v11  ;;  %v13336_v11 = vld [vmem:[%s17063_s2 + $0xa0] sm:$0xff] }
 0xff8   : > { %12872 = vmatprep.subr.mxu1 %v13331_v31 }
0x1080   : > { %v12796_v3 = vpop.f32.mrf.mxu0 }
0x1082   : > { %v7883_v8 = vpop.f32.mrf.mxu0 }
0x1084   : > { %v12797_v2 = vpop.f32.mrf.mxu0 }
0x1086   : > { %v7886_v40 = vpop.f32.mrf.mxu0 }
0x1098   : > { %v11622_v21 = vpop.f32.mrf.mxu1 }
0x109a   : > { %v11623_v20 = vpop.f32.mrf.mxu1 }
0x109b   : > { %v11624_v45 = vadd.f32 %v11623_v20, %v11622_v21  ;;  %v13340_v21 = vld [vmem:[%s17063_s2 + $0x90] sm:$0xff]  ;;  %v13342_v20 = vld [vmem:[%s17063_s2 + $0x88] sm:$0xff] }
0x109c   : > { %v11625_v18 = vpop.f32.mrf.mxu1 }
0x109d   : > { %v7884_v51 = vadd.f32 %v11624_v45, %v7883_v8  ;;  %v13339_v8 = vld [vmem:[%s17063_s2 + $0xd8] sm:$0xff]  ;;  %v13350_v45 = vld [vmem:[%s17063_s2 + $0x168] sm:$0xff] }
0x109e   : > { %v11626_v25 = vpop.f32.mrf.mxu1 }
0x109f   : > { %v11627_v42 = vadd.f32 %v11626_v25, %v11625_v18  ;;  %v13343_v18 = vld [vmem:[%s17063_s2 + $0xc8] sm:$0xff]  ;;  %v13345_v25 = vld [vmem:[%s17063_s2 + $0xc0] sm:$0xff] }
0x10a0   : > { %v11628_v41 = vpop.f32.mrf.mxu1  ;;  %v11654_v30 = vpop.f32.mrf.mxu0 }
0x10a1   : > { %v7887_v61 = vadd.f32 %v11627_v42, %v7886_v40  ;;  %v13344_v40 = vld [vmem:[%s17063_s2 + $0x80] sm:$0xff]  ;;  %v13357_v42 = vld [vmem:[%s17063_s2 + $0x190] sm:$0xff] }
0x10a2   : > { %v11629_v62 = vpop.f32.mrf.mxu1  ;;  %v11655_v14 = vpop.f32.mrf.mxu0 }
0x10a3   : > { %v11656_v58 = vadd.f32 %v11655_v14, %v11654_v30  ;;  %v11630_v43 = vadd.f32 %v11629_v62, %v11628_v41  ;;  %v13346_v41 = vld [vmem:[%s17063_s2 + $0x178] sm:$0xff]  ;;  %v13348_v62 = vld [vmem:[%s17063_s2 + $0x170] sm:$0xff] }
0x10a4   : > { %v11631_v19 = vpop.f32.mrf.mxu1  ;;  %v11657_v38 = vpop.f32.mrf.mxu0  ;;  %v13347_v30 = vld [vmem:[%s17063_s2 + $0x1b8] sm:$0xff]  ;;  %v13349_v14 = vld [vmem:[%s17063_s2 + $0x1b0] sm:$0xff] }
0x10a5   : > { %v7969_v55 = vadd.f32 %v11656_v58, %v7884_v51  ;;  %v7892_v49 = vadd.f32 %v12796_v3, %v11630_v43  ;;  %v13338_v3 = vld [vmem:[%s17063_s2 + $0x98] sm:$0xff]  ;;  %v13353_v58 = vld [vmem:[%s17063_s2 + $0x1a0] sm:$0xff]  ;;  %v13356_v51 = vld [vmem:[%s17063_s2 + $0x150] sm:$0xff] }
0x10a6   : > { %v11632_v35 = vpop.f32.mrf.mxu1  ;;  %v11658_v46 = vpop.f32.mrf.mxu0  ;;  %v13358_v43 = vld [vmem:[%s17063_s2 + $0x148] sm:$0xff] }
0x10a7   : > { %v11659_v9 = vadd.f32 %v11658_v46, %v11657_v38  ;;  %v11633_v27 = vadd.f32 %v11632_v35, %v11631_v19  ;;  %v13351_v19 = vld [vmem:[%s17063_s2 + $0x1a8] sm:$0xff]  ;;  %v13352_v38 = vld [vmem:[%s17063_s2 + $0x160] sm:$0xff]  ;;  %v13354_v35 = vld [vmem:[%s17063_s2 + $0x158] sm:$0xff] }
0x10a8   : > { %v11660_v32 = vpop.f32.mrf.mxu0  ;;  %v12804_v16 = vpop.f32.mrf.mxu1  ;;  %v13355_v46 = vld [vmem:[%s17063_s2 + $0x198] sm:$0xff] }
0x10a9   : > { %v7972_v7 = vadd.f32 %v11659_v9, %v7887_v61  ;;  %v7895_v36 = vadd.f32 %v12797_v2, %v11633_v27  ;;  %v13341_v2 = vld [vmem:[%s17063_s2 + $0xd0] sm:$0xff]  ;;  %v13362_v9 = vld [vmem:[%s17063_s2 + $0x1f8] sm:$0xff]  ;;  %v13367_v61 = vld [vmem:[%s17063_s2 + $0x228] sm:$0xff] }
0x10aa   : > { %v11661_v50 = vpop.f32.mrf.mxu0  ;;  %v8017_v1 = vpop.f32.mrf.mxu1  ;;  %v13364_v27 = vld [vmem:[%s17063_s2 + $0x1f0] sm:$0xff] }
0x10ab   : > { %v11662_v33 = vadd.f32 %v11661_v50, %v11660_v32  ;;  %v8018_v26 = vadd.f32 %v8017_v1, %v7969_v55  ;;  %v13359_v32 = vld [vmem:[%s17063_s2 + $0x188] sm:$0xff]  ;;  %v13363_v55 = vld [vmem:[%s17063_s2 + $0x238] sm:$0xff]  ;;  %v13365_v50 = vld [vmem:[%s17063_s2 + $0x230] sm:$0xff] }
0x10ac   : > { %v11663_v10 = vpop.f32.mrf.mxu0  ;;  %v12805_v23 = vpop.f32.mrf.mxu1  ;;  %v13366_v1 = vld [vmem:[%s17063_s2 + $0x1e8] sm:$0xff] }
0x10ad   : > { %v7977_v5 = vadd.f32 %v11662_v33, %v7892_v49  ;;  %v8056_v12 = vadd.f32 %v8039_v60, %v8018_v26  ;;  %v13361_v60 = vld [vmem:[%s17063_s2 + $0x180] sm:$0xff]  ;;  %v13370_v26 = vld [vmem:[%s17063_s2 + $0x1d8] sm:$0xff] }
0x10ae   : > { %v11664_v47 = vpop.f32.mrf.mxu0  ;;  %v8020_v17 = vpop.f32.mrf.mxu1  ;;  %v13368_v49 = vld [vmem:[%s17063_s2 + $0x1e0] sm:$0xff] }
0x10af   : > { %v8026_v24 = vadd.f32 %v12804_v16, %v7977_v5  ;;  %v16049_v15 = vmax.f32 %v8056_v12, 0.0  ;;  %v11665_v37 = vadd.f32 %v11664_v47, %v11663_v10  ;;  %v8021_v39 = vadd.f32 %v8020_v17, %v7972_v7  ;;  %v13360_v16 = vld [vmem:[%s17063_s2 + $0x140] sm:$0xff]  ;;  %v13371_v10 = vld [vmem:[%s17063_s2 + $0x218] sm:$0xff]  ;;  %v13374_v5 = vld [vmem:[%s17063_s2 + $0x1c8] sm:$0xff] }
0x10b0   : > { %v13369_v33 = vld [vmem:[%s17063_s2 + $0x220] sm:$0xff]  ;;  %v13375_v12 = vld [vmem:[%s17063_s2 + $0x208] sm:$0xff] }
0x10b1   : > { %v8058_v63 = vadd.f32 %v8049_v57, %v8026_v24  ;;  %v7980_v4 = vadd.f32 %v11665_v37, %v7895_v36  ;;  %v8057_v44 = vadd.f32 %v8044_v34, %v8021_v39  ;;  %12822 = vmatprep.mubr.msk.f32.mxu0 %vm1802_vm11, %v16049_v15  ;;  %12844 = vmatprep.mubr.msk.f32.mxu1 %vm1802_vm11, %v16049_v15  ;;  %v13373_v34 = vld [vmem:[%s17063_s2 + $0x210] sm:$0xff]  ;;  %v13376_v7 = vld [vmem:[%s17063_s2 + $0x1c0] sm:$0xff] }
0x10b2   : > { %v13377_v36 = vld [vmem:[%s17063_s2 + $0x200] sm:$0xff]  ;;  %v13184_v17 = vld [vmem:[%s17156_s0 + $0x8] ss:$12 sps:$4 sm:$0xff]  }
0x10b3   : > { %v16055_v13 = vmax.f32 %v8058_v63, 0.0  ;;  %v8029_v22 = vadd.f32 %v12805_v23, %v7980_v4  ;;  %v16057_v56 = vmax.f32 %v8057_v44, 0.0  ;;  %v13372_v23 = vld [vmem:[%s17063_s2 + $0x1d0] sm:$0xff] }
0x10b4   : > { %v13183_v47 = vld [vmem:[%s17156_s0 + $0x4] ss:$12 sps:$4 sm:$0xff]  }
0x10b5   : > { %v8059_v59 = vadd.f32 %v8054_v28, %v8029_v22  ;;  %12823 = vmatmul.mubr.msk.f32.vlgmr.msra.gmra.mxu0 %vm1802_vm11, %v16057_v56  ;;  %12845 = vmatmul.mubr.msk.f32.vlgmr.msra.gmra.mxu1 %vm1802_vm11, %v16057_v56  ;;  %v8764_v48 = vpack.c.bf16 %v16057_v56, %v16049_v15 }
0x10b6   : > { %12851 = vmatpush3.msra.mxu0 %v16043_v52  ;;  %12873 = vmatpush3.msra.mxu1 %v13331_v31  ;;  %v13334_v52 = vld [vmem:[%s17063_s2 + $0xa8] sm:$0xff]  ;;  %v13337_v31 = vld [vmem:[%s17063_s2 + $0xe0] sm:$0xff]  ;;  %s17158_s2 = sld [smem:[#allocation10_spill]] }
0x10b7   : > { %v16066_v6 = vmax.f32 %v8059_v59, 0.0  ;;  %12825 = vmatprep.mubr.msk.f32.mxu0 %vm1802_vm11, %v16055_v13  ;;  %12847 = vmatprep.mubr.msk.f32.mxu1 %vm1802_vm11, %v16055_v13 }
0x10b8   : > { %12852 = vmatprep.subr.mxu0 %v13332_v29  ;;  %12874 = vmatprep.subr.mxu1 %v13333_v53 }
0x10b9   : > { %12853 = vmatpush3.msra.mxu0 %v13332_v29  ;;  %12875 = vmatpush3.msra.mxu1 %v13333_v53  ;;  %v8765_v0 = vpack.c.bf16 %v16066_v6, %v16055_v13 }
0x10ba   : > { %12854 = vmatprep.subr.mxu0 %v13334_v52  ;;  %12876 = vmatprep.subr.mxu1 %v13335_v54 }
0x10bb   : > { %12826 = vmatmul.mubr.msk.f32.gmra.mxu0 %vm1802_vm11, %v16066_v6  ;;  %12848 = vmatmul.mubr.msk.f32.gmra.mxu1 %vm1802_vm11, %v16066_v6 }
0x10bc   : > { %12855 = vmatpush3.msra.mxu0 %v13334_v52  ;;  %12877 = vmatpush3.msra.mxu1 %v13335_v54 }
0x10bd   : > { %12856 = vmatprep.subr.mxu0 %v13336_v11  ;;  %12866 = vmatprep.mubr.msk.f32.mxu0 %vm1802_vm11, %v16049_v15 }
0x10be   : > { %12878 = vmatprep.subr.mxu1 %v13337_v31  ;;  %12888 = vmatprep.mubr.msk.f32.mxu1 %vm1802_vm11, %v16049_v15 }
0x10bf   : > { %12857 = vmatpush3.msra.mxu0 %v13336_v11  ;;  %12879 = vmatpush3.msra.mxu1 %v13337_v31 }
0x10c0   : > { %12858 = vmatprep.subr.mxu0 %v13338_v3  ;;  %12880 = vmatprep.subr.mxu1 %v13339_v8 }
0x10c1   : > { %12859 = vmatpush3.msra.mxu0 %v13338_v3  ;;  %12881 = vmatpush3.msra.mxu1 %v13339_v8 }
0x10c2   : > { %12860 = vmatprep.subr.mxu0 %v13340_v21  ;;  %12882 = vmatprep.subr.mxu1 %v13341_v2 }
0x10c3   : > { %12861 = vmatpush3.msra.mxu0 %v13340_v21  ;;  %12883 = vmatpush3.msra.mxu1 %v13341_v2 }
0x10c4   : > { %12862 = vmatprep.subr.mxu0 %v13342_v20  ;;  %12884 = vmatprep.subr.mxu1 %v13343_v18 }
0x10c5   : > { %12863 = vmatpush3.msra.mxu0 %v13342_v20  ;;  %12885 = vmatpush3.msra.mxu1 %v13343_v18 }
0x10c6   : > { %12864 = vmatprep.subr.mxu0 %v13344_v40  ;;  %12886 = vmatprep.subr.mxu1 %v13345_v25 }
0x10c7   : > { %12865 = vmatpush3.msra.mxu0 %v13344_v40  ;;  %12887 = vmatpush3.msra.mxu1 %v13345_v25 }
0x10c8   : > { %12867 = vmatmul.mubr.msk.f32.vlgmr.msra.gmra.mxu0 %vm1802_vm11, %v16057_v56  ;;  %12889 = vmatmul.mubr.msk.f32.vlgmr.msra.gmra.mxu1 %vm1802_vm11, %v16057_v56 }
0x10c9   : > { %12894 = vmatprep.subr.mxu0 %v13346_v41  ;;  %12916 = vmatprep.subr.mxu1 %v13347_v30 }
0x10ca   : > { %12869 = vmatprep.mubr.msk.f32.mxu0 %vm1802_vm11, %v16055_v13  ;;  %12891 = vmatprep.mubr.msk.f32.mxu1 %vm1802_vm11, %v16055_v13 }
0x10cb   : > { %12895 = vmatpush3.msra.mxu0 %v13346_v41  ;;  %12917 = vmatpush3.msra.mxu1 %v13347_v30 }
0x10cc   : > { %12896 = vmatprep.subr.mxu0 %v13348_v62  ;;  %12918 = vmatprep.subr.mxu1 %v13349_v14 }
0x10cd   : > { %12897 = vmatpush3.msra.mxu0 %v13348_v62  ;;  %12919 = vmatpush3.msra.mxu1 %v13349_v14 }
0x10ce   : > { %12870 = vmatmul.mubr.msk.f32.gmra.mxu0 %vm1802_vm11, %v16066_v6  ;;  %12892 = vmatmul.mubr.msk.f32.gmra.mxu1 %vm1802_vm11, %v16066_v6 }
0x10cf   : > { %12898 = vmatprep.subr.mxu0 %v13350_v45  ;;  %12920 = vmatprep.subr.mxu1 %v13351_v19 }
0x10d0   : > { %12899 = vmatpush3.msra.mxu0 %v13350_v45  ;;  %12910 = vmatprep.mubr.msk.f32.mxu0 %vm1802_vm11, %v16049_v15 }
0x10d1   : > { %12921 = vmatpush3.msra.mxu1 %v13351_v19  ;;  %12932 = vmatprep.mubr.msk.f32.mxu1 %vm1802_vm11, %v16049_v15 }
0x10d2   : > { %12900 = vmatprep.subr.mxu0 %v13352_v38  ;;  %12922 = vmatprep.subr.mxu1 %v13353_v58 }
0x10d3   : > { %12901 = vmatpush3.msra.mxu0 %v13352_v38  ;;  %12923 = vmatpush3.msra.mxu1 %v13353_v58 }
0x10d4   : > { %12902 = vmatprep.subr.mxu0 %v13354_v35  ;;  %12924 = vmatprep.subr.mxu1 %v13355_v46 }
0x10d5   : > { %12903 = vmatpush3.msra.mxu0 %v13354_v35  ;;  %12925 = vmatpush3.msra.mxu1 %v13355_v46 }
0x10d6   : > { %12904 = vmatprep.subr.mxu0 %v13356_v51  ;;  %12926 = vmatprep.subr.mxu1 %v13357_v42 }
0x10d7   : > { %12905 = vmatpush3.msra.mxu0 %v13356_v51  ;;  %12927 = vmatpush3.msra.mxu1 %v13357_v42 }
0x10d8   : > { %12906 = vmatprep.subr.mxu0 %v13358_v43  ;;  %12928 = vmatprep.subr.mxu1 %v13359_v32 }
0x10d9   : > { %12907 = vmatpush3.msra.mxu0 %v13358_v43  ;;  %12929 = vmatpush3.msra.mxu1 %v13359_v32 }
0x10da   : > { %12908 = vmatprep.subr.mxu0 %v13360_v16  ;;  %12930 = vmatprep.subr.mxu1 %v13361_v60 }
0x10db   : > { %12909 = vmatpush3.msra.mxu0 %v13360_v16  ;;  %12931 = vmatpush3.msra.mxu1 %v13361_v60  ;;  %v13185_v60 = vld [vmem:[%s17156_s0 + $0x20] ss:$12 sps:$4 sm:$0xff]  }
0x10dc   : > { %12911 = vmatmul.mubr.msk.f32.vlgmr.msra.gmra.mxu0 %vm1802_vm11, %v16057_v56  ;;  %12933 = vmatmul.mubr.msk.f32.vlgmr.msra.gmra.mxu1 %vm1802_vm11, %v16057_v56 }
0x10dd   : > { %12938 = vmatprep.subr.mxu0 %v13362_v9  ;;  %12960 = vmatprep.subr.mxu1 %v13363_v55 }
0x10de   : > { %12913 = vmatprep.mubr.msk.f32.mxu0 %vm1802_vm11, %v16055_v13  ;;  %12935 = vmatprep.mubr.msk.f32.mxu1 %vm1802_vm11, %v16055_v13 }
0x10df   : > { %12939 = vmatpush3.msra.mxu0 %v13362_v9  ;;  %12961 = vmatpush3.msra.mxu1 %v13363_v55 }
0x10e0   : > { %12940 = vmatprep.subr.mxu0 %v13364_v27  ;;  %12962 = vmatprep.subr.mxu1 %v13365_v50 }
0x10e1   : > { %12941 = vmatpush3.msra.mxu0 %v13364_v27  ;;  %12963 = vmatpush3.msra.mxu1 %v13365_v50 }
0x10e2   : > { %12914 = vmatmul.mubr.msk.f32.gmra.mxu0 %vm1802_vm11, %v16066_v6  ;;  %12936 = vmatmul.mubr.msk.f32.gmra.mxu1 %vm1802_vm11, %v16066_v6 }
0x10e3   : > { %12942 = vmatprep.subr.mxu0 %v13366_v1  ;;  %12964 = vmatprep.subr.mxu1 %v13367_v61 }
0x10e4   : > { %12943 = vmatpush3.msra.mxu0 %v13366_v1  ;;  %12954 = vmatprep.mubr.msk.f32.mxu0 %vm1802_vm11, %v16049_v15 }
0x10e5   : > { %12965 = vmatpush3.msra.mxu1 %v13367_v61  ;;  %12976 = vmatprep.mubr.msk.f32.mxu1 %vm1802_vm11, %v16049_v15  ;;  %v13204_v15 = vld [vmem:[%s17158_s2 + $0x24] ss:$8 sps:$4 sm:$0xff]  }
0x10e6   : > { %12944 = vmatprep.subr.mxu0 %v13368_v49  ;;  %12966 = vmatprep.subr.mxu1 %v13369_v33 }
0x10e7   : > { %12945 = vmatpush3.msra.mxu0 %v13368_v49  ;;  %12967 = vmatpush3.msra.mxu1 %v13369_v33 }
0x10e8   : > { %12946 = vmatprep.subr.mxu0 %v13370_v26  ;;  %12968 = vmatprep.subr.mxu1 %v13371_v10 }
0x10e9   : > { %12947 = vmatpush3.msra.mxu0 %v13370_v26  ;;  %12969 = vmatpush3.msra.mxu1 %v13371_v10  ;;  %v13181_v10 = vld [vmem:[%s17156_s0] ss:$12 sps:$4 sm:$0xff]  }
0x10ea   : > { %12948 = vmatprep.subr.mxu0 %v13372_v23  ;;  %12970 = vmatprep.subr.mxu1 %v13373_v34 }
0x10eb   : > { %12949 = vmatpush3.msra.mxu0 %v13372_v23  ;;  %12971 = vmatpush3.msra.mxu1 %v13373_v34  ;;  %v13188_v23 = vld [vmem:[%s17156_s0 + $0x1c] ss:$12 sps:$4 sm:$0xff]   ;;  %v13196_v34 = vld [vmem:[%s17158_s2 + $0x30] ss:$8 sps:$4 sm:$0xff]  }
0x10ec   : > { %12950 = vmatprep.subr.mxu0 %v13374_v5  ;;  %12972 = vmatprep.subr.mxu1 %v13375_v12 }
0x10ed   : > { %12951 = vmatpush3.msra.mxu0 %v13374_v5  ;;  %12973 = vmatpush3.msra.mxu1 %v13375_v12  ;;  %v13198_v5 = vld [vmem:[%s17158_s2 + $0x34] ss:$8 sps:$4 sm:$0xff]  }
0x10ee   : > { %12952 = vmatprep.subr.mxu0 %v13376_v7  ;;  %12974 = vmatprep.subr.mxu1 %v13377_v36 }
0x10ef   : > { %12953 = vmatpush3.msra.mxu0 %v13376_v7  ;;  %12975 = vmatpush3.msra.mxu1 %v13377_v36 }
0x10f0   : > { %12955 = vmatmul.mubr.msk.f32.vlgmr.msra.gmra.mxu0 %vm1802_vm11, %v16057_v56  ;;  %12977 = vmatmul.mubr.msk.f32.vlgmr.msra.gmra.mxu1 %vm1802_vm11, %v16057_v56  ;;  %v13202_v56 = vld [vmem:[%s17158_s2 + $0x20] ss:$8 sps:$4 sm:$0xff]  }
0x10f1   : > { %12957 = vmatprep.mubr.msk.f32.mxu0 %vm1802_vm11, %v16055_v13  ;;  %12979 = vmatprep.mubr.msk.f32.mxu1 %vm1802_vm11, %v16055_v13  ;;  %v13186_v13 = vld [vmem:[%s17156_s0 + $0x18] ss:$12 sps:$4 sm:$0xff]   ;;  %s17177_s0 = smov 112  }
0x10f4   : > { %12958 = vmatmul.mubr.msk.f32.gmra.mxu0 %vm1802_vm11, %v16066_v6  ;;  %12980 = vmatmul.mubr.msk.f32.gmra.mxu1 %vm1802_vm11, %v16066_v6  ;;  %v17159_v6 = vmov 0  }
0x10f5   : > { %8874 = vmatprep.mubr.bf16.mxu0 %v13183_v47  ;;  %12986 = vmatprep.mubr.msk.bf16.mxu1 %vm3358_vm12, %v13184_v17  ;;  %v8804_v47 = vpop.permute.xlu0 %8803 }
0x1175   : > { %v16175_v24 = vpop.f32.mrf.mxu0  ;;  %v12846_v37 = vpop.f32.mrf.mxu1 }
0x1177   : > { %v16177_v39 = vpop.f32.mrf.mxu0  ;;  %v8227_v57 = vpop.f32.mrf.mxu1 }
0x1178   : > { %v8758_v49 = vpack.c.bf16 %v12846_v37, %v8227_v57  ;;  %v8756_v26 = vpack.c.bf16 %v16175_v24, %v16177_v39  ;;  %v8799_v37 = vpop.permute.xlu1 %8798 }
0x117b   : > { %v12827_v63 = vpop.f32.mrf.mxu0  ;;  %v12849_v4 = vpop.f32.mrf.mxu1 }
0x117d   : > { %v8152_v44 = vpop.f32.mrf.mxu0  ;;  %v8237_v22 = vpop.f32.mrf.mxu1 }
0x117e   : > { %v8759_v1 = vpack.c.bf16 %v12849_v4, %v8237_v22  ;;  %v8757_v33 = vpack.c.bf16 %v12827_v63, %v8152_v44 }
0x1188   : > { %v12868_v28 = vpop.f32.mrf.mxu0  ;;  %v12890_v59 = vpop.f32.mrf.mxu1 }
0x118a   : > { %v8312_v29 = vpop.f32.mrf.mxu0  ;;  %v8397_v53 = vpop.f32.mrf.mxu1 }
0x118b   : > { %v8762_v32 = vpack.c.bf16 %v12890_v59, %v8397_v53  ;;  %v8760_v27 = vpack.c.bf16 %v12868_v28, %v8312_v29  ;;  %v8794_v28 = vpop.permute.xlu0 %8793  ;;  %v8789_v29 = vpop.permute.xlu1 %8788 }
0x118e   : > { %v12871_v52 = vpop.f32.mrf.mxu0  ;;  %v12893_v54 = vpop.f32.mrf.mxu1 }
0x1190   : > { %v8322_v11 = vpop.f32.mrf.mxu0  ;;  %v8407_v31 = vpop.f32.mrf.mxu1 }
0x1191   : > { %v8763_v51 = vpack.c.bf16 %v12893_v54, %v8407_v31  ;;  %v8761_v9 = vpack.c.bf16 %v12871_v52, %v8322_v11 }
0x119c   : > { %v12912_v3 = vpop.f32.mrf.mxu0  ;;  %v12934_v8 = vpop.f32.mrf.mxu1 }
0x119e   : > { %v8482_v21 = vpop.f32.mrf.mxu0  ;;  %v8567_v2 = vpop.f32.mrf.mxu1 }
0x119f   : > { %v8768_v55 = vpack.c.bf16 %v12934_v8, %v8567_v2  ;;  %v8766_v61 = vpack.c.bf16 %v12912_v3, %v8482_v21 }
0x11a2   : > { %v12915_v20 = vpop.f32.mrf.mxu0  ;;  %v12937_v18 = vpop.f32.mrf.mxu1 }
0x11a4   : > { %v8492_v40 = vpop.f32.mrf.mxu0  ;;  %v8577_v25 = vpop.f32.mrf.mxu1 }
0x11a5   : > { %v8769_v16 = vpack.c.bf16 %v12937_v18, %v8577_v25  ;;  %v8767_v50 = vpack.c.bf16 %v12915_v20, %v8492_v40 }
0x11b0   : > { %v12956_v41 = vpop.f32.mrf.mxu0  ;;  %v12978_v30 = vpop.f32.mrf.mxu1 }
0x11b2   : > { %v8652_v62 = vpop.f32.mrf.mxu0  ;;  %v8737_v14 = vpop.f32.mrf.mxu1 }
0x11b3   : > { %v8770_v42 = vpack.c.bf16 %v12956_v41, %v8652_v62  ;;  %v8772_v43 = vpack.c.bf16 %v12978_v30, %v8737_v14 }
0x11b4   : > { %v12959_v45 = vpop.f32.mrf.mxu0  ;;  %v12981_v19 = vpop.f32.mrf.mxu1 }
0x11b6   : > { %v8662_v38 = vpop.f32.mrf.mxu0  ;;  %v8747_v58 = vpop.f32.mrf.mxu1 }
0x11b7   : > { %v8771_v35 = vpack.c.bf16 %v12959_v45, %v8662_v38  ;;  %v8773_v46 = vpack.c.bf16 %v12981_v19, %v8747_v58  ;;  %v13195_v45 = vld [vmem:[%s17158_s2 + $0x74] ss:$8 sps:$4 sm:$0xff]   ;;  %v13190_v19 = vld [vmem:[%s17157_s1 + $0x8] sm:$0xff]   ;;  %v13193_v58 = vld [vmem:[%s17158_s2 + $0x70] ss:$8 sps:$4 sm:$0xff]  }
0x11b8   : > { %v13191_v38 = vld [vmem:[%s17157_s1 + $0x10] sm:$0xff]  }
0x11b9   : > { %11766 = vmatprep.subr.bf16.mxu0 %v8771_v35  ;;  %12982 = vmatprep.subr.bf16.mxu1 %v8773_v46  ;;  %v13201_v35 = vld [vmem:[%s17158_s2 + $0x64] ss:$8 sps:$4 sm:$0xff]  }
0x11ba   : > { %11767 = vmatpush3.bf16.msra.mxu0 %v8763_v51  ;;  %12983 = vmatpush3.bf16.msra.mxu1 %v8773_v46  ;;  %v13199_v46 = vld [vmem:[%s17158_s2 + $0x60] ss:$8 sps:$4 sm:$0xff]   ;;  %v13207_v51 = vld [vmem:[%s17158_s2 + $0x54] ss:$8 sps:$4 sm:$0xff]  }
0x11bb   : > { %11768 = vmatprep.subr.bf16.mxu0 %v8770_v42  ;;  %12984 = vmatprep.subr.bf16.mxu1 %v8772_v43  ;;  %v13192_v42 = vld [vmem:[%s17157_s1 + $0x18] sm:$0xff]  }
0x11be   : > { %11769 = vmatpush3.bf16.msra.mxu0 %v8762_v32  ;;  %12985 = vmatpush3.bf16.msra.mxu1 %v8772_v43  ;;  %v13205_v43 = vld [vmem:[%s17158_s2 + $0x50] ss:$8 sps:$4 sm:$0xff]   ;;  %v13210_v32 = vld [vmem:[%s17158_s2 + $0x14] ss:$8 sps:$4 sm:$0xff]  }
0x11bf   : > { %11770 = vmatprep.subr.bf16.mxu0 %v8769_v16  ;;  %v13208_v16 = vld [vmem:[%s17158_s2 + $0x10] ss:$8 sps:$4 sm:$0xff]  }
0x11c1   : > { %12987 = vmatmul.mubr.msk.bf16.vlgmr.msra.gmra.mxu1 %vm3358_vm12, %v13185_v60  ;;  %v13213_v60 = vld [vmem:[%s17158_s2 + $0x44] ss:$8 sps:$4 sm:$0xff]  }
0x11c2   : > { %11771 = vmatpush3.bf16.msra.mxu0 %v8761_v9  ;;  %v13211_v9 = vld [vmem:[%s17158_s2 + $0x40] ss:$8 sps:$4 sm:$0xff]  }
0x11c3   : > { %11772 = vmatprep.subr.bf16.mxu0 %v8768_v55  ;;  %v13216_v55 = vld [vmem:[%s17158_s2 + $0x4] ss:$8 sps:$4 sm:$0xff]  }
0x11c6   : > { %11773 = vmatpush3.bf16.msra.mxu0 %v8760_v27  ;;  %v13214_v27 = vld [vmem:[%s17158_s2] ss:$8 sps:$4 sm:$0xff]  }
0x11c7   : > { %11774 = vmatprep.subr.bf16.mxu0 %v8767_v50  ;;  %v13219_v50 = vld [vmem:[%s17158_s2 + $0xb4] ss:$8 sps:$4 sm:$0xff]  }
0x11ca   : > { %11775 = vmatpush3.bf16.msra.mxu0 %v8759_v1  ;;  %v13222_v1 = vld [vmem:[%s17158_s2 + $0xf4] ss:$8 sps:$4 sm:$0xff]  }
0x11cb   : > { %11776 = vmatprep.subr.bf16.mxu0 %v8766_v61  ;;  %v16220_v61 = vpop.permute.xlu0 %9451 }
0x11ce   : > { %11777 = vmatpush3.bf16.msra.mxu0 %v8758_v49  ;;  %v16222_v49 = vpop.permute.xlu1 %9446 }
0x11cf   : > { %11778 = vmatprep.subr.bf16.mxu0 %v8765_v0  ;;  %v13189_v0 = vld [vmem:[%s17157_s1] sm:$0xff]   ;;  %s17178_s1 = smov 113  }
0x11d0   : > { %12994 = vmatprep.mubr.msk.bf16.mxu1 %vm3358_vm12, %v13189_v0 }
0x11d2   : > { %11779 = vmatpush3.bf16.msra.mxu0 %v8757_v33  ;;  %v9705_v33 = vpop.permute.xlu0 %9704 }
0x11d3   : > { %11780 = vmatprep.subr.bf16.mxu0 %v8764_v48 }
0x11d6   : > { %11781 = vmatpush3.bf16.msra.mxu0 %v8756_v26  ;;  %v9703_v26 = vpop.permute.xlu1 %9702 }
0x11d7   : > { %9207 = vmatprep.subr.bf16.mxu0 %v13198_v5 }
0x11d9   : > { %8875 = vmatmul.mubr.bf16.vlgmr.msra.gmra.mxu0 %v13181_v10  ;;  %v16224_v10 = vpop.permute.xlu0 %9688 }
0x11da   : > { %8882 = vmatprep.mubr.bf16.mxu0 %v13188_v23  ;;  %9208 = vmatpush1.bf16.msra.mxu0 %v13196_v34  ;;  %v16226_v23 = vpop.permute.xlu1 %9686 }
0x11db   : > { %9209 = vmatprep.subr.bf16.mxu0 %v13204_v15 }
0x11de   : > { %9210 = vmatpush1.bf16.msra.mxu0 %v13202_v56  ;;  %v16230_v0 = vpop.permute.xlu1 %9670 }
0x11df   : > { %9211 = vmatprep.subr.bf16.mxu0 %v13210_v32 }
0x11e1   : > { %8883 = vmatmul.mubr.bf16.gmra.mxu0 %v13186_v13  ;;  %v16228_v13 = vpop.permute.xlu0 %9672 }
0x11e2   : > { %9231 = vmatprep.mubr.bf16.mxu0 %v17159_v6  ;;  %9212 = vmatpush1.bf16.msra.mxu0 %v13208_v16  ;;  %v16234_v5 = vpop.permute.xlu1 %9654  ;;  %v17162_v16 = vld [vmem:[#allocation37_spill] sm:$0xff] }
0x11e3   : > { %9213 = vmatprep.subr.bf16.mxu0 %v13216_v55  ;;  %v13238_v55 = vld [vmem:[%s17158_s2 + $0xc0] ss:$8 sps:$4 sm:$0xff]  }
0x11e5   : > { %v16232_v34 = vpop.permute.xlu0 %9656 }
0x11e6   : > { %9214 = vmatpush1.bf16.msra.mxu0 %v13214_v27  ;;  %v16238_v56 = vpop.permute.xlu1 %9638 }
0x11e7   : > { %9403 = vmatprep.subr.bf16.mxu0 %v13222_v1 }
0x11e9   : > { %v16236_v15 = vpop.permute.xlu0 %9640 }
0x1281   : > { %v12988_v7 = vpop.f32.mrf.mxu1 }
0x1283   : > { %v8925_v24 = vpop.f32.mrf.mxu1 }
0x1285   : > { %v12989_v63 = vpop.f32.mrf.mxu1 }
0x1287   : > { %v8928_v54 = vpop.f32.mrf.mxu1 }
0x1299   : > { %v11782_v48 = vpop.f32.mrf.mxu0 }
0x129b   : > { %v11783_v12 = vpop.f32.mrf.mxu0 }
0x129c   : > { %v11784_v44 = vadd.f32 %v11783_v12, %v11782_v48  ;;  %v16240_v48 = vpop.permute.xlu0 %9624  ;;  %v16242_v12 = vpop.permute.xlu1 %9622 }
0x129d   : > { %v11785_v36 = vpop.f32.mrf.mxu0 }
0x129e   : > { %v8877_v31 = vadd.f32 %v11784_v44, %v8789_v29 }
0x129f   : > { %v11786_v17 = vpop.f32.mrf.mxu0 }
0x12a0   : > { %v11787_v57 = vadd.f32 %v11786_v17, %v11785_v36  ;;  %v8926_v20 = vadd.f32 %v8925_v24, %v8877_v31  ;;  %v16246_v36 = vpop.permute.xlu1 %9606 }
0x12a1   : > { %v11788_v39 = vpop.f32.mrf.mxu0 }
0x12a2   : > { %v8880_v52 = vadd.f32 %v11787_v57, %v8794_v28  ;;  %v8940_v30 = vmax.f32 %v8926_v20, 0.0 }
0x12a3   : > { %v11789_v4 = vpop.f32.mrf.mxu0 }
0x12a4   : > { %v11790_v22 = vadd.f32 %v11789_v4, %v11788_v39  ;;  %v8929_v21 = vadd.f32 %v8928_v54, %v8880_v52  ;;  %v16250_v17 = vpop.permute.xlu1 %9718  ;;  %v13217_v4 = vld [vmem:[%s17158_s2 + $0xb0] ss:$8 sps:$4 sm:$0xff]   ;;  %v13228_v52 = vld [vmem:[%s17158_s2 + $0xe4] ss:$8 sps:$4 sm:$0xff]   ;;  %v13223_v54 = vld [vmem:[%s17158_s2 + $0xa0] ss:$8 sps:$4 sm:$0xff]  }
0x12a5   : > { %v11791_v59 = vpop.f32.mrf.mxu0 }
0x12a6   : > { %v8885_v53 = vadd.f32 %v11790_v22, %v8799_v37  ;;  %v8941_v25 = vmax.f32 %v8929_v21, 0.0  ;;  %v13225_v22 = vld [vmem:[%s17158_s2 + $0xa4] ss:$8 sps:$4 sm:$0xff]  }
0x12a7   : > { %v11792_v11 = vpop.f32.mrf.mxu0 }
0x12a8   : > { %v11793_v3 = vadd.f32 %v11792_v11, %v11791_v59  ;;  %v8934_v8 = vadd.f32 %v12988_v7, %v8885_v53  ;;  %v8952_v14 = vpack.c.bf16 %v8941_v25, %v8940_v30  ;;  %v16244_v7 = vpop.permute.xlu0 %9608  ;;  %v9707_v57 = vpop.permute.xlu1 %9706  ;;  %v13220_v59 = vld [vmem:[%s17158_s2 + $0xf0] ss:$8 sps:$4 sm:$0xff]  }
0x12a9   : > { %v9712_v30 = vsel %vm1276_vm2, %v9707_v57, %v9703_v26 }
0x12aa   : > { %v8888_v2 = vadd.f32 %v11793_v3, %v8804_v47  ;;  %v8942_v40 = vmax.f32 %v8934_v8, 0.0  ;;  %v13231_v3 = vld [vmem:[%s17158_s2 + $0x94] ss:$8 sps:$4 sm:$0xff]   ;;  %v13226_v8 = vld [vmem:[%s17158_s2 + $0xe0] ss:$8 sps:$4 sm:$0xff]  }
0x12ac   : > { %v8937_v18 = vadd.f32 %v12989_v63, %v8888_v2  ;;  %v16248_v47 = vpop.permute.xlu0 %9720  ;;  %v9691_v31 = vpop.permute.xlu1 %9690  ;;  %v13234_v2 = vld [vmem:[%s17158_s2 + $0xd4] ss:$8 sps:$4 sm:$0xff]  }
0x12ad   : > { %v9696_v32 = vsel %vm1254_vm1, %v9691_v31, %v16226_v23 }
0x12ae   : > { %v8943_v41 = vmax.f32 %v8937_v18, 0.0 }
0x12b0   : > { %v8953_v62 = vpack.c.bf16 %v8943_v41, %v8942_v40  ;;  %v9709_v37 = vpop.permute.xlu0 %9708  ;;  %v13229_v40 = vld [vmem:[%s17158_s2 + $0x90] ss:$8 sps:$4 sm:$0xff]   ;;  %v13237_v41 = vld [vmem:[%s17158_s2 + $0x84] ss:$8 sps:$4 sm:$0xff]  }
0x12b1   : > { %v9713_v18 = vsel %vm1276_vm2, %v9709_v37, %v9705_v33 }
0x12b2   : > { %12990 = vmatprep.subr.bf16.mxu1 %v8953_v62 }
0x12b3   : > { %12991 = vmatpush3.bf16.msra.mxu1 %v8953_v62  ;;  %v13232_v62 = vld [vmem:[%s17158_s2 + $0xd0] ss:$8 sps:$4 sm:$0xff]  }
0x12b4   : > { %12992 = vmatprep.subr.bf16.mxu1 %v8952_v14  ;;  %v9693_v29 = vpop.permute.xlu0 %9692 }
0x12b5   : > { %v9695_v27 = vsel %vm1254_vm1, %v16224_v10, %v9693_v29 }
0x12b7   : > { %12993 = vmatpush3.bf16.msra.mxu1 %v8952_v14 }
0x12b8   : > { %9121 = vmatprep.subr.bf16.mxu1 %v13195_v45  ;;  %v9677_v25 = vpop.permute.xlu0 %9676  ;;  %v9711_v45 = vsel %vm1276_vm2, %v9705_v33, %v9709_v37 }
0x12b9   : > { %v9681_v37 = vsel %vm1232_vm4, %v9677_v25, %v16228_v13 }
0x12ba   : > { %12995 = vmatmul.mubr.msk.bf16.vlgmr.msra.gmra.mxu1 %vm3358_vm12, %v13190_v19  ;;  %v17161_v19 = vld [vmem:[#allocation38_spill] sm:$0xff] }
0x12bb   : > { %12998 = vmatprep.mubr.msk.bf16.mxu1 %vm3358_vm12, %v13191_v38  ;;  %9122 = vmatpush1.bf16.msra.mxu1 %v13193_v58  ;;  %v9717_v38 = vmul.f32 %v9713_v18, %v17161_v19  ;;  %v9675_v58 = vpop.permute.xlu1 %9674 }
0x12bc   : > { %9123 = vmatprep.subr.bf16.mxu1 %v13201_v35  ;;  %v13240_v35 = vld [vmem:[%s17158_s2 + $0xc4] ss:$8 sps:$4 sm:$0xff]   ;;  %v9661_v33 = vpop.permute.xlu0 %9660 }
0x12bf   : > { %9124 = vmatpush1.bf16.msra.mxu1 %v13199_v46  ;;  %v9697_v46 = vsel %vm1254_vm1, %v9693_v29, %v16224_v10  ;;  %v17165_v29 = vld [vmem:[#allocation40_spill] sm:$0xff] }
0x12c0   : > { %9125 = vmatprep.subr.bf16.mxu1 %v13207_v51  ;;  %v13235_v51 = vld [vmem:[%s17158_s2 + $0x80] ss:$8 sps:$4 sm:$0xff]   ;;  %s17179_s2 = smov 127  }
0x12c2   : > { %12999 = vmatmul.mubr.msk.bf16.gmra.mxu1 %vm3358_vm12, %v13192_v42  ;;  %v9710_v42 = vsel %vm1276_vm2, %v9703_v26, %v9707_v57 }
0x12c3   : > { %9126 = vmatpush1.bf16.msra.mxu1 %v13205_v43  ;;  %9145 = vmatprep.mubr.bf16.mxu1 %v17159_v6  ;;  %v9715_v43 = vmul.f32 %v9712_v30, %v17161_v19  ;;  %v9665_v30 = vsel %vm1210_vm6, %v9661_v33, %v16232_v34 }
0x12c4   : > { %9127 = vmatprep.subr.bf16.mxu1 %v13213_v60  ;;  %v9716_v60 = vmul.f32 %v9711_v45, %v17162_v16 }
0x12c5   : > { %v9747_v26 = vpack.c.bf16 %v9717_v38, %v9715_v43 }
0x12c7   : > { %9128 = vmatpush1.bf16.msra.mxu1 %v13211_v9 }
0x12c8   : > { %9303 = vmatprep.subr.bf16.mxu1 %v13219_v50  ;;  %v17163_v50 = vld [vmem:[#allocation36_spill] sm:$0xff] }
0x12c9   : > { %v9701_v1 = vmul.f32 %v9697_v46, %v17163_v50  ;;  %v9699_v57 = vmul.f32 %v9696_v32, %v17163_v50 }
0x137a   : > { %v12996_v24 = vpop.f32.mrf.mxu1 }
0x137c   : > { %v9020_v39 = vpop.f32.mrf.mxu1 }
0x137e   : > { %v12997_v63 = vpop.f32.mrf.mxu1 }
0x137f   : > { %v9060_v44 = vpack.c.bf16 %v12997_v63, %v12996_v24  ;;  %v9714_v24 = vmul.f32 %v9710_v42, %v17162_v16  ;;  %v9659_v63 = vpop.permute.xlu1 %9658  ;;  %v17169_v42 = vld [vmem:[#allocation43_spill] sm:$0xff] }
0x1380   : > { %v9023_v28 = vpop.f32.mrf.mxu1  ;;  %v9668_v43 = vmul.f32 %v9665_v30, %v17169_v42 }
0x1381   : > { %v9051_v53 = vpack.c.bf16 %v9023_v28, %v9020_v39  ;;  %10834 = vmatmul.mubr.msk.bf16.vlgmr.msra.gmra.mxu1 %vm1802_vm11, %v9060_v44  ;;  %v9694_v39 = vsel %vm1254_vm1, %v16226_v23, %v9691_v31  ;;  %v9680_v44 = vsel %vm1232_vm4, %v9675_v58, %v16230_v0  ;;  %v9678_v31 = vsel %vm1232_vm4, %v16230_v0, %v9675_v58 }
0x1382   : > { %9304 = vmatpush1.bf16.msra.mxu1 %v13217_v4  ;;  %v16258_v11 = vpop.f32.mrf.mxu1  ;;  %9327 = vmatprep.mubr.bf16.mxu1 %v17159_v6  ;;  %v9746_v4 = vpack.c.bf16 %v9716_v60, %v9714_v24  ;;  %v9662_v0 = vsel %vm1210_vm6, %v16234_v5, %v9659_v63  ;;  %v9664_v58 = vsel %vm1210_vm6, %v9659_v63, %v16234_v5  ;;  %v17170_v60 = vld [vmem:[#allocation42_spill] sm:$0xff] }
0x1383   : > { %10843 = vmatmul.mubr.msk.bf16.vlgmr.msra.gmra.mxu0 %vm1802_vm11, %v9051_v53  ;;  %9305 = vmatprep.subr.bf16.mxu1 %v13225_v22  ;;  %v17164_v22 = vld [vmem:[#allocation35_spill] sm:$0xff]  ;;  %v9685_v53 = vmul.f32 %v9681_v37, %v17165_v29  ;;  %v9666_v5 = vmul.f32 %v9664_v58, %v17169_v42 }
0x1384   : > { %9404 = vmatpush1.bf16.msra.mxu0 %v13220_v59  ;;  %v9036_v21 = vpop.f32.mrf.mxu1  ;;  %9427 = vmatprep.mubr.bf16.mxu0 %v17159_v6  ;;  %v9700_v28 = vmul.f32 %v9695_v27, %v17164_v22  ;;  %v9679_v59 = vsel %vm1232_vm4, %v16228_v13, %v9677_v25  ;;  %v9663_v25 = vsel %vm1210_vm6, %v16232_v34, %v9661_v33 }
0x1385   : > { %9405 = vmatprep.subr.bf16.mxu0 %v13228_v52  ;;  %v9745_v52 = vpack.c.bf16 %v9701_v1, %v9699_v57  ;;  %v17171_v1 = vld [vmem:[#allocation52_spill] sm:$0xff] }
0x1386   : > { %9306 = vmatpush1.bf16.msra.mxu1 %v13223_v54  ;;  %v13001_v14 = vpop.f32.mrf.mxu1  ;;  %v9698_v54 = vmul.f32 %v9694_v39, %v17164_v22  ;;  %v17172_v39 = vld [vmem:[#allocation41_spill] sm:$0xff] }
0x1387   : > { %9307 = vmatprep.subr.bf16.mxu1 %v13231_v3  ;;  %v9342_v23 = vpack.c.bf16 %v13001_v14, %v16258_v11  ;;  %v9683_v3 = vmul.f32 %v9680_v44, %v17165_v29  ;;  %v9643_v11 = vpop.permute.xlu1 %9642 }
0x1388   : > { %9406 = vmatpush1.bf16.msra.mxu0 %v13226_v8  ;;  %v9039_v9 = vpop.f32.mrf.mxu1  ;;  %v9645_v8 = vpop.permute.xlu0 %9644  ;;  %v9744_v13 = vpack.c.bf16 %v9700_v28, %v9698_v54  ;;  %v9646_v34 = vsel %vm1188_vm5, %v16238_v56, %v9643_v11  ;;  %v9648_v33 = vsel %vm1188_vm5, %v9643_v11, %v16238_v56  ;;  %v17174_v54 = vld [vmem:[#allocation47_spill] sm:$0xff] }
0x1389   : > { %9407 = vmatprep.subr.bf16.mxu0 %v13234_v2  ;;  %v9242_v10 = vpack.c.bf16 %v9039_v9, %v9036_v21  ;;  %v17166_v21 = vld [vmem:[#allocation39_spill] sm:$0xff]  ;;  %v9743_v18 = vpack.c.bf16 %v9685_v53, %v9683_v3  ;;  %v9647_v38 = vsel %vm1188_vm5, %v16236_v15, %v9645_v8  ;;  %v9649_v32 = vsel %vm1188_vm5, %v9645_v8, %v16236_v15  ;;  %v17175_v8 = vld [vmem:[#allocation46_spill] sm:$0xff] }
0x138a   : > { %9308 = vmatpush1.bf16.msra.mxu1 %v13229_v40  ;;  %v9684_v2 = vmul.f32 %v9679_v59, %v17166_v21  ;;  %v9682_v40 = vmul.f32 %v9678_v31, %v17166_v21  ;;  %v9653_v9 = vmul.f32 %v9647_v38, %v17170_v60  ;;  %v9740_v15 = vpack.c.bf16 %v9668_v43, %v9666_v5 }
0x138b   : > { %9309 = vmatprep.subr.bf16.mxu1 %v13237_v41  ;;  %v9627_v46 = vpop.permute.xlu1 %9626  ;;  %v9652_v57 = vmul.f32 %v9649_v32, %v17172_v39  ;;  %v9650_v56 = vmul.f32 %v9648_v33, %v17172_v39 }
0x138c   : > { %9408 = vmatpush1.bf16.msra.mxu0 %v13232_v62  ;;  %v9742_v41 = vpack.c.bf16 %v9684_v2, %v9682_v40  ;;  %v17167_v62 = vld [vmem:[#allocation44_spill] sm:$0xff]  ;;  %v9629_v45 = vpop.permute.xlu0 %9628  ;;  %v9630_v37 = vsel %vm1166_vm8, %v16242_v12, %v9627_v46  ;;  %v9632_v53 = vsel %vm1166_vm8, %v9627_v46, %v16242_v12 }
0x138d   : > { %9409 = vmatprep.subr.bf16.mxu0 %v13240_v35  ;;  %v9669_v14 = vmul.f32 %v9663_v25, %v17167_v62  ;;  %v9667_v35 = vmul.f32 %v9662_v0, %v17167_v62  ;;  %v9631_v27 = vsel %vm1166_vm8, %v16240_v48, %v9629_v45  ;;  %v9634_v11 = vmul.f32 %v9632_v53, %v17174_v54  ;;  %v17176_v25 = vld [vmem:[#allocation45_spill] sm:$0xff] }
0x138e   : > { %9310 = vmatpush1.bf16.msra.mxu1 %v13235_v51  ;;  %v17168_v51 = vld [vmem:[#allocation51_spill] sm:$0xff] }
0x138f   : > { %9764 = vmatprep.subr.bf16.mxu1 %v9747_v26  ;;  %v9651_v26 = vmul.f32 %v9646_v34, %v17170_v60  ;;  %v9611_v63 = vpop.permute.xlu1 %9610 }
0x1390   : > { %9410 = vmatpush1.bf16.msra.mxu0 %v13238_v55  ;;  %v9741_v55 = vpack.c.bf16 %v9669_v14, %v9667_v35  ;;  %v9613_v24 = vpop.permute.xlu0 %9612  ;;  %v9616_v12 = vsel %vm1145_vm7, %v9611_v63, %v16246_v36 }
0x1391   : > { %10860 = vmatmul.mubr.msk.bf16.vlgmr.msra.gmra.mxu1 %vm1802_vm11, %v9242_v10  ;;  %v9633_v10 = vsel %vm1166_vm8, %v9629_v45, %v16240_v48  ;;  %v9739_v28 = vpack.c.bf16 %v9653_v9, %v9651_v26  ;;  %v9615_v59 = vsel %vm1145_vm7, %v16244_v7, %v9613_v24  ;;  %v9614_v48 = vsel %vm1145_vm7, %v16246_v36, %v9611_v63 }
0x1392   : > { %9765 = vmatpush1.bf16.msra.mxu1 %v9746_v4  ;;  %v17173_v4 = vld [vmem:[#allocation48_spill] sm:$0xff]  ;;  %v9636_v31 = vmul.f32 %v9633_v10, %v17174_v54  ;;  %v9617_v3 = vsel %vm1145_vm7, %v9613_v24, %v16244_v7  ;;  %v9618_v30 = vmul.f32 %v9616_v12, %v17176_v25  ;;  %v9863_v12 = vld [vmem:[%s17187_s14 + $0x8] sm:$0xff] }
0x1393   : > { %10877 = vmatmul.mubr.msk.bf16.vlgmr.msra.gmra.mxu0 %vm1802_vm11, %v9342_v23  ;;  %9766 = vmatprep.subr.bf16.mxu1 %v9745_v52  ;;  %v9637_v44 = vmul.f32 %v9631_v27, %v17173_v4  ;;  %v9635_v23 = vmul.f32 %v9630_v37, %v17173_v4  ;;  %v9738_v52 = vpack.c.bf16 %v9652_v57, %v9650_v56 }
0x1394   : > { %v9736_v40 = vpack.c.bf16 %v9636_v31, %v9634_v11  ;;  %v9620_v0 = vmul.f32 %v9617_v3, %v17176_v25  ;;  %v17189_v11 = vld [vmem:[#allocation50_spill] sm:$0xff] }
0x1395   : > { %v9737_v2 = vpack.c.bf16 %v9637_v44, %v9635_v23 }
0x1396   : > { %9767 = vmatpush1.bf16.msra.mxu1 %v9744_v13  ;;  %v9621_v13 = vmul.f32 %v9615_v59, %v17175_v8  ;;  %v9734_v7 = vpack.c.bf16 %v9620_v0, %v9618_v30 }
0x1397   : > { %9768 = vmatprep.subr.bf16.mxu1 %v9743_v18  ;;  %v9619_v18 = vmul.f32 %v9614_v48, %v17175_v8 }
0x139a   : > { %9769 = vmatpush1.bf16.msra.mxu1 %v9742_v41  ;;  %v9735_v41 = vpack.c.bf16 %v9621_v13, %v9619_v18  ;;  %v17188_v13 = vld [vmem:[#allocation49_spill] sm:$0xff] }
0x139b   : > { %9770 = vmatprep.subr.bf16.mxu1 %v17168_v51 }
0x139e   : > { %9771 = vmatpush1.bf16.msra.mxu1 %v17171_v1 }
0x139f   : > { %9772 = vmatprep.subr.bf16.mxu1 %v9741_v55 }
0x13a2   : > { %9773 = vmatpush1.bf16.msra.mxu1 %v9740_v15 }
0x13a3   : > { %9774 = vmatprep.subr.bf16.mxu1 %v9739_v28 }
0x13a6   : > { %9775 = vmatpush1.bf16.msra.mxu1 %v9738_v52 }
0x13a7   : > { %9776 = vmatprep.subr.bf16.mxu1 %v9737_v2  ;;  %v9862_v2 = vld [vmem:[%s17187_s14] sm:$0xff] }
0x13aa   : > { %9777 = vmatpush1.bf16.msra.mxu1 %v9736_v40 }
0x13ab   : > { %9778 = vmatprep.subr.bf16.mxu1 %v9735_v41 }
0x13ae   : > { %9779 = vmatpush1.bf16.msra.mxu1 %v9734_v7 }
0x1441   : > { %v9147_v14 = vpop.f32.mrf.mxu1 }
0x1443   : > { %v9233_v45 = vpop.f32.mrf.mxu0  ;;  %v9149_v38 = vpop.f32.mrf.mxu1 }
0x1444   : > { %v9234_v51 = vadd.f32 %v9233_v45, %v9147_v14 }
0x1445   : > { %v9235_v58 = vpop.f32.mrf.mxu0  ;;  %v9151_v35 = vpop.f32.mrf.mxu1 }
0x1446   : > { %v9236_v32 = vadd.f32 %v9235_v58, %v9149_v38 }
0x1447   : > { %v9237_v46 = vpop.f32.mrf.mxu0  ;;  %v9153_v36 = vpop.f32.mrf.mxu1 }
0x1448   : > { %v9238_v27 = vadd.f32 %v9237_v46, %v9151_v35 }
0x1449   : > { %v9239_v34 = vpop.f32.mrf.mxu0 }
0x144a   : > { %v9240_v15 = vadd.f32 %v9239_v34, %v9153_v36 }
0x1451   : > { %v9329_v43 = vpop.f32.mrf.mxu1 }
0x1452   : > { %v9338_v9 = vadd.f32 %v9329_v43, %v9234_v51 }
0x1453   : > { %v9331_v55 = vpop.f32.mrf.mxu1  ;;  %v9429_v5 = vpop.f32.mrf.mxu0 }
0x1454   : > { %v9339_v1 = vadd.f32 %v9331_v55, %v9236_v32  ;;  %v9438_v33 = vadd.f32 %v9429_v5, %v9338_v9 }
0x1455   : > { %v9333_v26 = vpop.f32.mrf.mxu1  ;;  %v9431_v24 = vpop.f32.mrf.mxu0 }
0x1456   : > { %v16386_v37 = vadd.f32 %v16222_v49, %v9438_v33  ;;  %v9340_v57 = vadd.f32 %v9333_v26, %v9238_v27  ;;  %v9439_v44 = vadd.f32 %v9431_v24, %v9339_v1 }
0x1457   : > { %v9335_v63 = vpop.f32.mrf.mxu1  ;;  %v9433_v10 = vpop.f32.mrf.mxu0 }
0x1458   : > { %v9341_v28 = vadd.f32 %v9335_v63, %v9240_v15  ;;  %v9440_v56 = vadd.f32 %v9433_v10, %v9340_v57  ;;  %9554 = vrot.lane.b32.xlu1 %v16386_v37, %s17177_s0  ;;  %v16394_v52 = vadd.f32 %v16222_v49, %v9439_v44  ;;  %v13246_v49 = vld [vmem:[%s17186_s11 + $0x4] ss:$8 sps:$4 sm:$0xff]  }
0x1459   : > { %v9435_v59 = vpop.f32.mrf.mxu0  ;;  %10883 = vmatprep.mubr.msk.bf16.mxu0 %vm1572_vm10, %v13246_v49 }
0x145a   : > { %v16391_v53 = vadd.f32 %v16220_v61, %v9440_v56  ;;  %v9441_v23 = vadd.f32 %v9435_v59, %v9341_v28 }
0x145c   : > { %v16397_v48 = vadd.f32 %v16220_v61, %v9441_v23  ;;  %9538 = vrot.lane.b32.xlu1 %v16386_v37, %s17178_s1  ;;  %9556 = vrot.lane.b32.xlu0 %v16391_v53, %s17177_s0  ;;  %v9594_v31 = vpack.c.bf16 %v16391_v53, %v16386_v37  ;;  %v13243_v61 = vld [vmem:[%s17185_s9 + $0x4] ss:$8 sps:$4 sm:$0xff]  }
0x145d   : > { %10880 = vmatprep.mubr.msk.bf16.mxu1 %vm1572_vm10, %v13243_v61 }
0x145e   : > { %v9595_v3 = vpack.c.bf16 %v16397_v48, %v16394_v52 }
0x1460   : > { %9522 = vrot.lane.b32.xlu1 %v16386_v37, %s17179_s2  ;;  %9540 = vrot.lane.b32.xlu0 %v16391_v53, %s17178_s1 }
0x1464   : > { %9506 = vrot.lane.b32.xlu1 %v16386_v37, %s17180_s3  ;;  %9524 = vrot.lane.b32.xlu0 %v16391_v53, %s17179_s2 }
0x1468   : > { %9490 = vrot.lane.b32.xlu1 %v16386_v37, %s17181_s4  ;;  %9508 = vrot.lane.b32.xlu0 %v16391_v53, %s17180_s3 }
0x146c   : > { %9474 = vrot.lane.b32.xlu1 %v16386_v37, %s17182_s5  ;;  %9492 = vrot.lane.b32.xlu0 %v16391_v53, %s17181_s4 }
0x1470   : > { %9458 = vrot.lane.b32.xlu1 %v16386_v37, %s17183_s6  ;;  %9476 = vrot.lane.b32.xlu0 %v16391_v53, %s17182_s5 }
0x1474   : > { %9570 = vrot.lane.b32.xlu1 %v16386_v37, %s17184_s8  ;;  %9460 = vrot.lane.b32.xlu0 %v16391_v53, %s17183_s6 }
0x1478   : > { %9558 = vrot.lane.b32.xlu1 %v16394_v52, %s17177_s0  ;;  %9572 = vrot.lane.b32.xlu0 %v16391_v53, %s17184_s8 }
0x147c   : > { %9542 = vrot.lane.b32.xlu1 %v16394_v52, %s17178_s1  ;;  %9560 = vrot.lane.b32.xlu0 %v16397_v48, %s17177_s0 }
0x1480   : > { %9526 = vrot.lane.b32.xlu1 %v16394_v52, %s17179_s2  ;;  %9544 = vrot.lane.b32.xlu0 %v16397_v48, %s17178_s1 }
0x1484   : > { %9510 = vrot.lane.b32.xlu1 %v16394_v52, %s17180_s3  ;;  %9528 = vrot.lane.b32.xlu0 %v16397_v48, %s17179_s2 }
0x1488   : > { %9494 = vrot.lane.b32.xlu1 %v16394_v52, %s17181_s4  ;;  %9512 = vrot.lane.b32.xlu0 %v16397_v48, %s17180_s3 }
0x148c   : > { %9478 = vrot.lane.b32.xlu1 %v16394_v52, %s17182_s5  ;;  %9496 = vrot.lane.b32.xlu0 %v16397_v48, %s17181_s4 }
0x1490   : > { %9462 = vrot.lane.b32.xlu1 %v16394_v52, %s17183_s6  ;;  %9480 = vrot.lane.b32.xlu0 %v16397_v48, %s17182_s5 }
0x1494   : > { %9574 = vrot.lane.b32.xlu1 %v16394_v52, %s17184_s8  ;;  %9464 = vrot.lane.b32.xlu0 %v16397_v48, %s17183_s6 }
0x1498   : > { %9722 = vrot.lane.b32.xlu1 %v17188_v13, %s17184_s8  ;;  %9576 = vrot.lane.b32.xlu0 %v16397_v48, %s17184_s8 }
0x149c   : > { %9866 = vperm.xlu1 %13070, %v9862_v2   ;;  %9724 = vrot.lane.b32.xlu0 %v17189_v11, %s17184_s8 }
0x14a0   : > { %9871 = vperm.xlu0 %13069, %v9863_v12  }
0x14ca   : > { %v9555_v18 = vpop.permute.xlu1 %9554 }
0x14ce   : > { %v9539_v40 = vpop.permute.xlu1 %9538  ;;  %v9557_v0 = vpop.permute.xlu0 %9556 }
0x14d2   : > { %v9523_v41 = vpop.permute.xlu1 %9522  ;;  %v9541_v30 = vpop.permute.xlu0 %9540 }
0x14d6   : > { %v9507_v7 = vpop.permute.xlu1 %9506  ;;  %v9525_v14 = vpop.permute.xlu0 %9524 }
0x14da   : > { %v16475_v45 = vpop.permute.xlu1 %9490  ;;  %v9509_v38 = vpop.permute.xlu0 %9508 }
0x14de   : > { %v16477_v58 = vpop.permute.xlu1 %9474  ;;  %v16479_v35 = vpop.permute.xlu0 %9492 }
0x14e2   : > { %v16481_v46 = vpop.permute.xlu1 %9458  ;;  %v16483_v36 = vpop.permute.xlu0 %9476 }
0x14e6   : > { %v16485_v51 = vpop.permute.xlu1 %9570  ;;  %v16487_v34 = vpop.permute.xlu0 %9460 }
0x14ea   : > { %v9559_v43 = vpop.permute.xlu1 %9558  ;;  %v16489_v32 = vpop.permute.xlu0 %9572 }
0x14eb   : > { %v9562_v9 = vsel %vm1276_vm2, %v9555_v18, %v9559_v43  ;;  %v9564_v55 = vsel %vm1276_vm2, %v9559_v43, %v9555_v18 }
0x14ec   : > { %v9566_v26 = vmul.f32 %v9562_v9, %v17162_v16  ;;  %v9567_v24 = vmul.f32 %v9564_v55, %v17161_v19 }
0x14ee   : > { %v9543_v5 = vpop.permute.xlu1 %9542  ;;  %v9561_v27 = vpop.permute.xlu0 %9560 }
0x14ef   : > { %v9563_v1 = vsel %vm1276_vm2, %v9557_v0, %v9561_v27  ;;  %v9565_v33 = vsel %vm1276_vm2, %v9561_v27, %v9557_v0  ;;  %v9546_v63 = vsel %vm1254_vm1, %v9539_v40, %v9543_v5  ;;  %v9548_v10 = vsel %vm1254_vm1, %v9543_v5, %v9539_v40 }
0x14f0   : > { %v9568_v15 = vmul.f32 %v9563_v1, %v17162_v16  ;;  %v9569_v57 = vmul.f32 %v9565_v33, %v17161_v19  ;;  %v9550_v49 = vmul.f32 %v9546_v63, %v17164_v22  ;;  %v9551_v13 = vmul.f32 %v9548_v10, %v17163_v50 }
0x14f2   : > { %v9600_v44 = vpack.c.bf16 %v9568_v15, %v9566_v26  ;;  %v9527_v28 = vpop.permute.xlu1 %9526  ;;  %v9545_v56 = vpop.permute.xlu0 %9544  ;;  %v9601_v59 = vpack.c.bf16 %v9569_v57, %v9567_v24 }
0x14f3   : > { %v9547_v23 = vsel %vm1254_vm1, %v9541_v30, %v9545_v56  ;;  %v9549_v61 = vsel %vm1254_vm1, %v9545_v56, %v9541_v30  ;;  %v9530_v12 = vsel %vm1232_vm4, %v9523_v41, %v9527_v28  ;;  %v9532_v18 = vsel %vm1232_vm4, %v9527_v28, %v9523_v41 }
0x14f4   : > { %v9552_v2 = vmul.f32 %v9547_v23, %v17164_v22  ;;  %v9553_v11 = vmul.f32 %v9549_v61, %v17163_v50  ;;  %9819 = vmatprep.subr.bf16.mxu0 %v9601_v59  ;;  %v9534_v5 = vmul.f32 %v9530_v12, %v17166_v21  ;;  %v9535_v27 = vmul.f32 %v9532_v18, %v17165_v29 }
0x14f5   : > { %9820 = vmatpush1.bf16.msra.mxu0 %v9600_v44 }
0x14f6   : > { %v9598_v40 = vpack.c.bf16 %v9552_v2, %v9550_v49  ;;  %v9511_v0 = vpop.permute.xlu1 %9510  ;;  %v9529_v43 = vpop.permute.xlu0 %9528  ;;  %v9599_v30 = vpack.c.bf16 %v9553_v11, %v9551_v13 }
0x14f7   : > { %v9531_v9 = vsel %vm1232_vm4, %v9525_v14, %v9529_v43  ;;  %v9533_v55 = vsel %vm1232_vm4, %v9529_v43, %v9525_v14  ;;  %v9514_v57 = vsel %vm1210_vm6, %v9507_v7, %v9511_v0  ;;  %v9516_v44 = vsel %vm1210_vm6, %v9511_v0, %v9507_v7 }
0x14f8   : > { %v9536_v1 = vmul.f32 %v9531_v9, %v17166_v21  ;;  %v9537_v33 = vmul.f32 %v9533_v55, %v17165_v29  ;;  %9821 = vmatprep.subr.bf16.mxu0 %v9599_v30  ;;  %v9519_v28 = vmul.f32 %v9514_v57, %v17167_v62  ;;  %v9518_v52 = vmul.f32 %v9516_v44, %v17169_v42 }
0x14f9   : > { %9822 = vmatpush1.bf16.msra.mxu0 %v9598_v40 }
0x14fa   : > { %v9596_v41 = vpack.c.bf16 %v9536_v1, %v9534_v5  ;;  %v9495_v26 = vpop.permute.xlu1 %9494  ;;  %v9513_v24 = vpop.permute.xlu0 %9512  ;;  %v9597_v15 = vpack.c.bf16 %v9537_v33, %v9535_v27 }
0x14fb   : > { %v9515_v14 = vsel %vm1210_vm6, %v9509_v38, %v9513_v24  ;;  %v9517_v63 = vsel %vm1210_vm6, %v9513_v24, %v9509_v38  ;;  %v9498_v23 = vsel %vm1188_vm5, %v16475_v45, %v9495_v26  ;;  %v9500_v48 = vsel %vm1188_vm5, %v9495_v26, %v16475_v45 }
0x14fc   : > { %v9521_v10 = vmul.f32 %v9515_v14, %v17167_v62  ;;  %9823 = vmatprep.subr.bf16.mxu0 %v9597_v15  ;;  %v9520_v38 = vmul.f32 %v9517_v63, %v17169_v42  ;;  %v9502_v40 = vmul.f32 %v9500_v48, %v17172_v39 }
0x14fd   : > { %9824 = vmatpush1.bf16.msra.mxu0 %v9596_v41 }
0x14fe   : > { %v9479_v56 = vpop.permute.xlu1 %9478  ;;  %9825 = vmatprep.subr.bf16.mxu0 %v9595_v3  ;;  %v9497_v59 = vpop.permute.xlu0 %9496  ;;  %v9593_v13 = vpack.c.bf16 %v9521_v10, %v9519_v28  ;;  %v9503_v3 = vmul.f32 %v9498_v23, %v17170_v60  ;;  %v9592_v12 = vpack.c.bf16 %v9520_v38, %v9518_v52  ;;  %v17191_v52 = vld [vmem:[#allocation34_spill] sm:$0xff] }
0x14ff   : > { %v9499_v61 = vsel %vm1188_vm5, %v16479_v35, %v9497_v59  ;;  %v9501_v7 = vsel %vm1188_vm5, %v9497_v59, %v16479_v35  ;;  %v9482_v18 = vsel %vm1166_vm8, %v16477_v58, %v9479_v56  ;;  %v9484_v0 = vsel %vm1166_vm8, %v9479_v56, %v16477_v58  ;;  %v17190_v56 = vld [vmem:[#allocation33_spill] sm:$0xff] }
0x1500   : > { %v9505_v49 = vmul.f32 %v9499_v61, %v17170_v60  ;;  %v9504_v2 = vmul.f32 %v9501_v7, %v17172_v39  ;;  %v9487_v43 = vmul.f32 %v9482_v18, %v17173_v4  ;;  %v9486_v26 = vmul.f32 %v9484_v0, %v17174_v54 }
0x1501   : > { %9826 = vmatpush1.bf16.msra.mxu0 %v9594_v31 }
0x1502   : > { %v9463_v11 = vpop.permute.xlu1 %9462  ;;  %9827 = vmatprep.subr.bf16.mxu0 %v9593_v13  ;;  %v9481_v35 = vpop.permute.xlu0 %9480  ;;  %v9591_v31 = vpack.c.bf16 %v9505_v49, %v9503_v3  ;;  %v9590_v30 = vpack.c.bf16 %v9504_v2, %v9502_v40 }
0x1503   : > { %v9483_v45 = vsel %vm1166_vm8, %v16483_v36, %v9481_v35  ;;  %v9485_v37 = vsel %vm1166_vm8, %v9481_v35, %v16483_v36  ;;  %v9466_v5 = vsel %vm1145_vm7, %v16481_v46, %v9463_v11  ;;  %v9468_v1 = vsel %vm1145_vm7, %v9463_v11, %v16481_v46 }
0x1504   : > { %v9489_v53 = vmul.f32 %v9483_v45, %v17173_v4  ;;  %v9488_v36 = vmul.f32 %v9485_v37, %v17174_v54  ;;  %v9471_v24 = vmul.f32 %v9466_v5, %v17175_v8  ;;  %v9470_v63 = vmul.f32 %v9468_v1, %v17176_v25  ;;  %v13241_v37 = vld [vmem:[%s17185_s9] ss:$8 sps:$4 sm:$0xff]   ;;  %s17192_s9 = sld [smem:[#allocation28_spill]] }
0x1505   : > { %9828 = vmatpush1.bf16.msra.mxu0 %v9592_v12 }
0x1506   : > { %v9575_v9 = vpop.permute.xlu1 %9574  ;;  %9829 = vmatprep.subr.bf16.mxu0 %v9591_v31  ;;  %v9465_v55 = vpop.permute.xlu0 %9464  ;;  %v9589_v41 = vpack.c.bf16 %v9489_v53, %v9487_v43  ;;  %v13244_v53 = vld [vmem:[%s17186_s11] ss:$8 sps:$4 sm:$0xff]   ;;  %s17193_s11 = sld [smem:[#allocation29_spill]] }
0x1507   : > { %v9467_v27 = vsel %vm1145_vm7, %v16487_v34, %v9465_v55  ;;  %v9469_v58 = vsel %vm1145_vm7, %v9465_v55, %v16487_v34  ;;  %v9588_v34 = vpack.c.bf16 %v9488_v36, %v9486_v26  ;;  %v9580_v46 = vsel %vm1298_vm0, %v9575_v9, %v16485_v51 }
0x1508   : > { %v9473_v33 = vmul.f32 %v9467_v27, %v17175_v8  ;;  %v9472_v15 = vmul.f32 %v9469_v58, %v17176_v25  ;;  %v9578_v61 = vsel %vm1298_vm0, %v16485_v51, %v9575_v9  ;;  %v9583_v7 = vmul.f32 %v9580_v46, %v17190_v56 }
0x1509   : > { %9830 = vmatpush1.bf16.msra.mxu0 %v9590_v30  ;;  %v9582_v12 = vmul.f32 %v9578_v61, %v17191_v52 }
0x150a   : > { %v9723_v57 = vpop.permute.xlu1 %9722  ;;  %9831 = vmatprep.subr.bf16.mxu0 %v9589_v41  ;;  %v9577_v14 = vpop.permute.xlu0 %9576  ;;  %v9587_v23 = vpack.c.bf16 %v9473_v33, %v9471_v24  ;;  %v9586_v49 = vpack.c.bf16 %v9472_v15, %v9470_v63 }
0x150b   : > { %v9581_v10 = vsel %vm1298_vm0, %v9577_v14, %v16489_v32  ;;  %v9726_v44 = vsel %vm1298_vm0, %v16250_v17, %v9723_v57  ;;  %v9579_v28 = vsel %vm1298_vm0, %v16489_v32, %v9577_v14  ;;  %v9728_v38 = vsel %vm1298_vm0, %v9723_v57, %v16250_v17 }
0x150c   : > { %v9585_v59 = vmul.f32 %v9581_v10, %v17190_v56  ;;  %v9730_v32 = vmul.f32 %v9726_v44, %v17191_v52  ;;  %v9584_v48 = vmul.f32 %v9579_v28, %v17191_v52  ;;  %v9731_v51 = vmul.f32 %v9728_v38, %v17190_v56  ;;  %v13249_v44 = vld [vmem:[%s17192_s9 + $0x4] ss:$8 sps:$4 sm:$0xff]  }
0x150d   : > { %9832 = vmatpush1.bf16.msra.mxu0 %v9588_v34  ;;  %v10030_v28 = vld [vmem:[%s17193_s11] sm:$0xff] }
0x150e   : > { %9833 = vmatprep.subr.bf16.mxu0 %v9587_v23  ;;  %v9725_v13 = vpop.permute.xlu0 %9724  ;;  %v9603_v35 = vpack.c.bf16 %v9585_v59, %v9583_v7  ;;  %v9602_v40 = vpack.c.bf16 %v9584_v48, %v9582_v12  ;;  %v10031_v59 = vld [vmem:[%s17193_s11 + $0x8] sm:$0xff] }
0x150f   : > { %v9727_v17 = vsel %vm1298_vm0, %v16248_v47, %v9725_v13  ;;  %v9729_v3 = vsel %vm1298_vm0, %v9725_v13, %v16248_v47 }
0x1510   : > { %v9732_v2 = vmul.f32 %v9727_v17, %v17191_v52  ;;  %v9733_v11 = vmul.f32 %v9729_v3, %v17190_v56 }
0x1511   : > { %9834 = vmatpush1.bf16.msra.mxu0 %v9586_v49 }
0x1512   : > { %v9748_v18 = vpack.c.bf16 %v9732_v2, %v9730_v32  ;;  %9849 = vmatprep.subr.bf16.mxu0 %v9603_v35  ;;  %v9749_v45 = vpack.c.bf16 %v9733_v11, %v9731_v51 }
0x1514   : > { %9794 = vmatprep.subr.bf16.mxu1 %v9749_v45 }
0x1515   : > { %9795 = vmatpush2.bf16.msra.mxu1 %v9748_v18  ;;  %9850 = vmatpush2.bf16.msra.mxu0 %v9602_v40 }
0x1517   : > { %v9867_v0 = vpop.permute.xlu1 %9866 }
0x1518   : > { %9797 = vmatmul.mubr.bf16.vlgmr.msra.gmra.mxu1 %v13241_v37  ;;  %9852 = vmatmul.mubr.bf16.vlgmr.msra.gmra.mxu0 %v13244_v53 }
0x1519   : > { %10149 = vmatprep.mubr.bf16.mxu0 %v17159_v6  ;;  %10886 = vmatprep.mubr.msk.bf16.mxu1 %vm1572_vm10, %v13249_v44 }
0x151b   : > { %v9872_v58 = vpop.permute.xlu0 %9871 }
0x15d8   : > { %v9798_v47 = vpop.f32.mrf.mxu1  ;;  %v9853_v31 = vpop.f32.mrf.mxu0 }
0x15d9   : > { %v9854_v43 = vadd.f32 %v9853_v31, %v9798_v47 }
0x15da   : > { %v9800_v30 = vpop.f32.mrf.mxu1  ;;  %v9855_v9 = vpop.f32.mrf.mxu0 }
0x15db   : > { %v9874_v55 = vadd.f32 %v9867_v0, %v9854_v43  ;;  %v9856_v5 = vadd.f32 %v9855_v9, %v9800_v30 }
0x15dc   : > { %v9802_v36 = vpop.f32.mrf.mxu1  ;;  %v9857_v27 = vpop.f32.mrf.mxu0 }
0x15dd   : > { %v16628_v1 = vmax.f32 %v9874_v55, 0.0  ;;  %v9858_v33 = vadd.f32 %v9857_v27, %v9802_v36  ;;  %v9875_v24 = vadd.f32 %v9867_v0, %v9856_v5 }
0x15de   : > { %v9804_v41 = vpop.f32.mrf.mxu1  ;;  %v9859_v26 = vpop.f32.mrf.mxu0 }
0x15df   : > { %v9876_v15 = vadd.f32 %v9872_v58, %v9858_v33  ;;  %v9860_v57 = vadd.f32 %v9859_v26, %v9804_v41  ;;  %9978 = vrot.lane.b32.xlu1 %v16628_v1, %s17177_s0  ;;  %v16634_v63 = vmax.f32 %v9875_v24, 0.0 }
0x15e1   : > { %v16632_v6 = vmax.f32 %v9876_v15, 0.0  ;;  %v9877_v14 = vadd.f32 %v9872_v58, %v9860_v57 }
0x15e3   : > { %v16636_v34 = vmax.f32 %v9877_v14, 0.0  ;;  %9962 = vrot.lane.b32.xlu1 %v16628_v1, %s17178_s1  ;;  %9980 = vrot.lane.b32.xlu0 %v16632_v6, %s17177_s0  ;;  %v10018_v46 = vpack.c.bf16 %v16632_v6, %v16628_v1 }
0x15e5   : > { %v10019_v10 = vpack.c.bf16 %v16636_v34, %v16634_v63 }
0x15e7   : > { %9946 = vrot.lane.b32.xlu1 %v16628_v1, %s17179_s2  ;;  %9964 = vrot.lane.b32.xlu0 %v16632_v6, %s17178_s1 }
0x15eb   : > { %9930 = vrot.lane.b32.xlu1 %v16628_v1, %s17180_s3  ;;  %9948 = vrot.lane.b32.xlu0 %v16632_v6, %s17179_s2 }
0x15ef   : > { %9914 = vrot.lane.b32.xlu1 %v16628_v1, %s17181_s4  ;;  %9932 = vrot.lane.b32.xlu0 %v16632_v6, %s17180_s3 }
0x15f3   : > { %9898 = vrot.lane.b32.xlu1 %v16628_v1, %s17182_s5  ;;  %9916 = vrot.lane.b32.xlu0 %v16632_v6, %s17181_s4 }
0x15f7   : > { %9882 = vrot.lane.b32.xlu1 %v16628_v1, %s17183_s6  ;;  %9900 = vrot.lane.b32.xlu0 %v16632_v6, %s17182_s5 }
0x15fb   : > { %9982 = vrot.lane.b32.xlu1 %v16634_v63, %s17177_s0  ;;  %9884 = vrot.lane.b32.xlu0 %v16632_v6, %s17183_s6 }
0x15ff   : > { %9966 = vrot.lane.b32.xlu1 %v16634_v63, %s17178_s1  ;;  %9984 = vrot.lane.b32.xlu0 %v16636_v34, %s17177_s0 }
0x1603   : > { %9950 = vrot.lane.b32.xlu1 %v16634_v63, %s17179_s2  ;;  %9968 = vrot.lane.b32.xlu0 %v16636_v34, %s17178_s1 }
0x1607   : > { %9994 = vrot.lane.b32.xlu1 %v16628_v1, %s17184_s8  ;;  %9952 = vrot.lane.b32.xlu0 %v16636_v34, %s17179_s2 }
0x160b   : > { %9934 = vrot.lane.b32.xlu1 %v16634_v63, %s17180_s3  ;;  %9996 = vrot.lane.b32.xlu0 %v16632_v6, %s17184_s8 }
0x160f   : > { %9918 = vrot.lane.b32.xlu1 %v16634_v63, %s17181_s4  ;;  %9936 = vrot.lane.b32.xlu0 %v16636_v34, %s17180_s3 }
0x1613   : > { %9902 = vrot.lane.b32.xlu1 %v16634_v63, %s17182_s5  ;;  %9920 = vrot.lane.b32.xlu0 %v16636_v34, %s17181_s4 }
0x1617   : > { %9886 = vrot.lane.b32.xlu1 %v16634_v63, %s17183_s6  ;;  %9904 = vrot.lane.b32.xlu0 %v16636_v34, %s17182_s5  ;;  %s10352_s5 = sshll.u32 %s17198_s10, 1 }
0x1618   : > { %s1132_s3 = scalar_lea.vmem %s13621_s21, %s10352_s5 }
0x161b   : > { %9998 = vrot.lane.b32.xlu1 %v16634_v63, %s17184_s8  ;;  %9888 = vrot.lane.b32.xlu0 %v16636_v34, %s17183_s6 }
0x161f   : > { %10034 = vperm.xlu1 %13070, %v10030_v28   ;;  %10000 = vrot.lane.b32.xlu0 %v16636_v34, %s17184_s8  ;;  %s1135_s8 = scalar_lea.vmem %s13626_s12, %s17198_s10 }
0x1623   : > { %10039 = vperm.xlu0 %13069, %v10031_v59  }
0x1651   : > { %v9979_v23 = vpop.permute.xlu1 %9978 }
0x1655   : > { %v9963_v38 = vpop.permute.xlu1 %9962  ;;  %v9981_v61 = vpop.permute.xlu0 %9980 }
0x1659   : > { %v9947_v7 = vpop.permute.xlu1 %9946  ;;  %v9965_v49 = vpop.permute.xlu0 %9964 }
0x165d   : > { %v9931_v13 = vpop.permute.xlu1 %9930  ;;  %v9949_v32 = vpop.permute.xlu0 %9948 }
0x1661   : > { %v16708_v48 = vpop.permute.xlu1 %9914  ;;  %v9933_v17 = vpop.permute.xlu0 %9932 }
0x1665   : > { %v16710_v3 = vpop.permute.xlu1 %9898  ;;  %v16712_v51 = vpop.permute.xlu0 %9916 }
0x1669   : > { %v16714_v2 = vpop.permute.xlu1 %9882  ;;  %v16716_v11 = vpop.permute.xlu0 %9900 }
0x166d   : > { %v9983_v35 = vpop.permute.xlu1 %9982  ;;  %v16718_v12 = vpop.permute.xlu0 %9884 }
0x166e   : > { %v9986_v18 = vsel %vm1276_vm2, %v9979_v23, %v9983_v35  ;;  %v9988_v45 = vsel %vm1276_vm2, %v9983_v35, %v9979_v23 }
0x166f   : > { %v9990_v31 = vmul.f32 %v9986_v18, %v17162_v16  ;;  %v9991_v0 = vmul.f32 %v9988_v45, %v17161_v19 }
0x1671   : > { %v9967_v40 = vpop.permute.xlu1 %9966  ;;  %v9985_v37 = vpop.permute.xlu0 %9984 }
0x1672   : > { %v9987_v53 = vsel %vm1276_vm2, %v9981_v61, %v9985_v37  ;;  %v9989_v47 = vsel %vm1276_vm2, %v9985_v37, %v9981_v61  ;;  %v9970_v9 = vsel %vm1254_vm1, %v9963_v38, %v9967_v40  ;;  %v9972_v55 = vsel %vm1254_vm1, %v9967_v40, %v9963_v38 }
0x1673   : > { %v9992_v43 = vmul.f32 %v9987_v53, %v17162_v16  ;;  %v9993_v30 = vmul.f32 %v9989_v47, %v17161_v19  ;;  %v9974_v16 = vmul.f32 %v9970_v9, %v17164_v22  ;;  %v9975_v19 = vmul.f32 %v9972_v55, %v17163_v50 }
0x1675   : > { %v10024_v5 = vpack.c.bf16 %v9992_v43, %v9990_v31  ;;  %v9951_v36 = vpop.permute.xlu1 %9950  ;;  %v9969_v27 = vpop.permute.xlu0 %9968  ;;  %v10025_v58 = vpack.c.bf16 %v9993_v30, %v9991_v0 }
0x1676   : > { %v9971_v33 = vsel %vm1254_vm1, %v9965_v49, %v9969_v27  ;;  %v9973_v41 = vsel %vm1254_vm1, %v9969_v27, %v9965_v49  ;;  %v9954_v15 = vsel %vm1232_vm4, %v9947_v7, %v9951_v36  ;;  %v9956_v57 = vsel %vm1232_vm4, %v9951_v36, %v9947_v7 }
0x1677   : > { %v9976_v26 = vmul.f32 %v9971_v33, %v17164_v22  ;;  %v9977_v24 = vmul.f32 %v9973_v41, %v17163_v50  ;;  %10054 = vmatprep.subr.bf16.mxu1 %v10025_v58  ;;  %v9958_v50 = vmul.f32 %v9954_v15, %v17166_v21  ;;  %v9959_v38 = vmul.f32 %v9956_v57, %v17165_v29 }
0x1678   : > { %10055 = vmatpush1.bf16.msra.mxu1 %v10024_v5 }
0x1679   : > { %v10022_v14 = vpack.c.bf16 %v9976_v26, %v9974_v16  ;;  %v16748_v44 = vpop.permute.xlu1 %9994  ;;  %v9953_v28 = vpop.permute.xlu0 %9952  ;;  %v10023_v59 = vpack.c.bf16 %v9977_v24, %v9975_v19 }
0x167a   : > { %v9955_v23 = vsel %vm1232_vm4, %v9949_v32, %v9953_v28  ;;  %v9957_v22 = vsel %vm1232_vm4, %v9953_v28, %v9949_v32 }
0x167b   : > { %v9960_v61 = vmul.f32 %v9955_v23, %v17166_v21  ;;  %v9961_v7 = vmul.f32 %v9957_v22, %v17165_v29  ;;  %10056 = vmatprep.subr.bf16.mxu1 %v10023_v59 }
0x167c   : > { %10057 = vmatpush1.bf16.msra.mxu1 %v10022_v14 }
0x167d   : > { %v10020_v49 = vpack.c.bf16 %v9960_v61, %v9958_v50  ;;  %v9935_v35 = vpop.permute.xlu1 %9934  ;;  %v16758_v18 = vpop.permute.xlu0 %9996  ;;  %v10021_v45 = vpack.c.bf16 %v9961_v7, %v9959_v38 }
0x167e   : > { %v9938_v40 = vsel %vm1210_vm6, %v9931_v13, %v9935_v35  ;;  %v9940_v32 = vsel %vm1210_vm6, %v9935_v35, %v9931_v13 }
0x167f   : > { %10058 = vmatprep.subr.bf16.mxu1 %v10021_v45  ;;  %v9942_v47 = vmul.f32 %v9940_v32, %v17169_v42  ;;  %v9943_v31 = vmul.f32 %v9938_v40, %v17167_v62  ;;  %v13247_v45 = vld [vmem:[%s17192_s9] ss:$8 sps:$4 sm:$0xff]  }
0x1680   : > { %10059 = vmatpush1.bf16.msra.mxu1 %v10020_v49 }
0x1681   : > { %v9919_v37 = vpop.permute.xlu1 %9918  ;;  %10060 = vmatprep.subr.bf16.mxu1 %v10019_v10  ;;  %v9937_v29 = vpop.permute.xlu0 %9936 }
0x1682   : > { %v9939_v21 = vsel %vm1210_vm6, %v9933_v17, %v9937_v29  ;;  %v9941_v53 = vsel %vm1210_vm6, %v9937_v29, %v9933_v17  ;;  %v9922_v63 = vsel %vm1188_vm5, %v16708_v48, %v9919_v37  ;;  %v9924_v34 = vsel %vm1188_vm5, %v9919_v37, %v16708_v48 }
0x1683   : > { %v9944_v0 = vmul.f32 %v9941_v53, %v17169_v42  ;;  %v9945_v13 = vmul.f32 %v9939_v21, %v17167_v62  ;;  %v9926_v9 = vmul.f32 %v9924_v34, %v17172_v39  ;;  %v9927_v48 = vmul.f32 %v9922_v63, %v17170_v60 }
0x1684   : > { %10061 = vmatpush1.bf16.msra.mxu1 %v10018_v46 }
0x1685   : > { %v10016_v10 = vpack.c.bf16 %v9944_v0, %v9942_v47  ;;  %v9903_v17 = vpop.permute.xlu1 %9902  ;;  %v9921_v43 = vpop.permute.xlu0 %9920  ;;  %v10017_v30 = vpack.c.bf16 %v9945_v13, %v9943_v31 }
0x1686   : > { %v9923_v62 = vsel %vm1188_vm5, %v16712_v51, %v9921_v43  ;;  %v9925_v42 = vsel %vm1188_vm5, %v9921_v43, %v16712_v51  ;;  %v9906_v6 = vsel %vm1166_vm8, %v16710_v3, %v9903_v17  ;;  %v9908_v46 = vsel %vm1166_vm8, %v9903_v17, %v16710_v3  ;;  %v10103_v43 = vld [vmem:[%s13613_s13] sm:$0x1] }
0x1687   : > { %v9928_v55 = vmul.f32 %v9925_v42, %v17172_v39  ;;  %v9929_v1 = vmul.f32 %v9923_v62, %v17170_v60  ;;  %10062 = vmatprep.subr.bf16.mxu1 %v10017_v30  ;;  %v9910_v58 = vmul.f32 %v9908_v46, %v17174_v54  ;;  %v9911_v33 = vmul.f32 %v9906_v6, %v17173_v4  ;;  %v10104_v62 = vld [vmem:[#allocation2] sm:$0x1] }
0x1688   : > { %10063 = vmatpush1.bf16.msra.mxu1 %v10016_v10  ;;  %v13432_v30 = vmov 0.0  }
0x1689   : > { %v10014_v5 = vpack.c.bf16 %v9928_v55, %v9926_v9  ;;  %v9887_v51 = vpop.permute.xlu1 %9886  ;;  %v9905_v36 = vpop.permute.xlu0 %9904  ;;  %v10015_v27 = vpack.c.bf16 %v9929_v1, %v9927_v48  ;;  %v13434_v55 = vmov 1966171168  }
0x168a   : > { %v9907_v39 = vsel %vm1166_vm8, %v16716_v11, %v9905_v36  ;;  %v9909_v60 = vsel %vm1166_vm8, %v9905_v36, %v16716_v11  ;;  %v9890_v16 = vsel %vm1145_vm7, %v16714_v2, %v9887_v51  ;;  %v9892_v19 = vsel %vm1145_vm7, %v9887_v51, %v16714_v2  ;;  %v17194_v51 = vld [vmem:[#allocation32_spill] sm:$0xff] }
0x168b   : > { %v9912_v41 = vmul.f32 %v9909_v60, %v17174_v54  ;;  %v9913_v3 = vmul.f32 %v9907_v39, %v17173_v4  ;;  %10064 = vmatprep.subr.bf16.mxu1 %v10015_v27  ;;  %v9894_v57 = vmul.f32 %v9892_v19, %v17176_v25  ;;  %v9895_v14 = vmul.f32 %v9890_v16, %v17175_v8 }
0x168c   : > { %10065 = vmatpush1.bf16.msra.mxu1 %v10014_v5  ;;  %v10209_v1 = vunpack.c.l.s4 %v13434_v55 }
0x168d   : > { %v10012_v26 = vpack.c.bf16 %v9912_v41, %v9910_v58  ;;  %v9999_v11 = vpop.permute.xlu1 %9998  ;;  %v9889_v24 = vpop.permute.xlu0 %9888  ;;  %v10013_v15 = vpack.c.bf16 %v9913_v3, %v9911_v33  ;;  %v17195_v58 = vld [vmem:[#allocation30_spill] sm:$0xff] }
0x168e   : > { %v9891_v54 = vsel %vm1145_vm7, %v16718_v12, %v9889_v24  ;;  %v9893_v4 = vsel %vm1145_vm7, %v9889_v24, %v16718_v12  ;;  %v10002_v59 = vsel %vm1298_vm0, %v16748_v44, %v9999_v11  ;;  %v10004_v23 = vsel %vm1298_vm0, %v9999_v11, %v16748_v44 }
0x168f   : > { %v9896_v28 = vmul.f32 %v9893_v4, %v17176_v25  ;;  %v9897_v2 = vmul.f32 %v9891_v54, %v17175_v8  ;;  %10066 = vmatprep.subr.bf16.mxu1 %v10013_v15  ;;  %v10006_v38 = vmul.f32 %v10002_v59, %v17191_v52  ;;  %v10007_v61 = vmul.f32 %v10004_v23, %v17190_v56 }
0x1690   : > { %10067 = vmatpush1.bf16.msra.mxu1 %v10012_v26  ;;  %v10210_v46 = vunpack.c.0.s8 %v10209_v1  ;;  %v17196_v26 = vlaneseq }
0x1691   : > { %v10010_v12 = vpack.c.bf16 %v9896_v28, %v9894_v57  ;;  %v10001_v22 = vpop.permute.xlu0 %10000  ;;  %v10011_v50 = vpack.c.bf16 %v9897_v2, %v9895_v14 }
0x1692   : > { %v10003_v25 = vsel %vm1298_vm0, %v16758_v18, %v10001_v22  ;;  %v10005_v8 = vsel %vm1298_vm0, %v10001_v22, %v16758_v18  ;;  %v10213_v33 = vsub.s32 %v10210_v46, %v17195_v58  ;;  %vm10225_vm14 = vcmp.lt.s32.totalorder %v17196_v26, 256 }
0x1693   : > { %v10008_v7 = vmul.f32 %v10003_v25, %v17191_v52  ;;  %v10009_v44 = vmul.f32 %v10005_v8, %v17190_v56  ;;  %10068 = vmatprep.subr.bf16.mxu1 %v10011_v50 }
0x1694   : > { %10069 = vmatpush1.bf16.msra.mxu1 %v10010_v12 }
0x1695   : > { %v10026_v49 = vpack.c.bf16 %v10008_v7, %v10006_v38  ;;  %v10027_v35 = vpack.c.bf16 %v10009_v44, %v10007_v61 }
0x1697   : > { %10084 = vmatprep.subr.bf16.mxu1 %v10027_v35 }
0x1698   : > { %10085 = vmatpush2.bf16.msra.mxu1 %v10026_v49 }
0x169a   : > { %v10035_v40 = vpop.permute.xlu1 %10034 }
0x169b   : > { %10087 = vmatmul.mubr.bf16.vlgmr.msra.gmra.mxu1 %v13247_v45 }
0x169e   : > { %v10040_v29 = vpop.permute.xlu0 %10039 }
0x175b   : > { %v10088_v32 = vpop.f32.mrf.mxu1 }
0x175c   : > { %v10089_v20 = vadd.f32 %v10088_v32, %v10035_v40 }
0x175d   : > { %v10090_v18 = vpop.f32.mrf.mxu1 }
0x175e   : > { %v10091_v37 = vadd.f32 %v10090_v18, %v10035_v40  ;;  %v10097_v53 = vmax.f32 %v10089_v20, 0.0 }
0x175f   : > { %v10092_v21 = vpop.f32.mrf.mxu1 }
0x1760   : > { %v10098_v52 = vmax.f32 %v10091_v37, 0.0  ;;  %v10093_v47 = vadd.f32 %v10092_v21, %v10040_v29 }
0x1761   : > { %v10094_v56 = vpop.f32.mrf.mxu1 }
0x1762   : > { %v10158_v31 = vmax.f32 %v10097_v53, %v10098_v52  ;;  %v10095_v0 = vadd.f32 %v10094_v56, %v10040_v29  ;;  %v10099_v13 = vmax.f32 %v10093_v47, 0.0 }
0x1764   : > { %v10100_v63 = vmax.f32 %v10095_v0, 0.0  ;;  %10159 = vmax.xlane.f32.xlu1 %v10158_v31  ;;  %v10101_v17 = vpack.c.bf16 %v10099_v13, %v10097_v53 }
0x1766   : > { %v10102_v34 = vpack.c.bf16 %v10100_v63, %v10098_v52  ;;  %v10161_v10 = vmax.f32 %v10099_v13, %v10100_v63 }
0x1768   : > { %10162 = vmax.xlane.f32.xlu0 %v10161_v10  ;;  %10131 = vmatprep.subr.bf16.mxu0 %v10102_v34 }
0x1769   : > { %10132 = vmatpush1.bf16.msra.mxu0 %v10101_v17 }
0x176a   : > { %13002 = vmatprep.subr.bf16.mxu0 %v13432_v30 }
0x176c   : > { %10887 = vmatmul.mubr.msk.bf16.vlgmr.msra.gmra.mxu0 %vm1572_vm10, %v10103_v43 }
0x176d   : > { %13004 = vmatprep.mubr.msk.bf16.mxu0 %vm13433_vm13, %v13432_v30 }
0x177e   : > { %10107 = vperm.xlu0 %13069, %v10104_v62  }
0x17ed   : > { %v10160_v42 = vpop.xlane.xlu1 %10159 }
0x17f1   : > { %v10163_v9 = vpop.xlane.xlu0 %10162 }
0x17f2   : > { %v10164_v48 = vpack.c.bf16 %v10163_v9, %v10160_v42 }
0x17f4   : > { %13003 = vmatpush3.bf16.msra.mxu0 %v10164_v48 }
0x17f7   : > { %13005 = vmatmul.mubr.msk.bf16.vlgmr.msra.gmra.mxu0 %vm1572_vm10, %v10103_v43 }
0x17f9   : > { %v10108_v6 = vpop.permute.xlu0 %10107 }
0x17fa   : > { %v10113_v36 = vrot.slane %v10108_v6, %v17194_v51 }
0x182c   : > { %v10151_v5 = vpop.f32.mrf.mxu0 }
0x182d   : > { %v10152_v39 = vadd.f32 %v10151_v5, %v10113_v36 }
0x182e   : > { %v10153_v27 = vpop.f32.mrf.mxu0 }
0x182f   : > { %v10154_v60 = vadd.f32 %v10153_v27, %v10113_v36 }
0x1830   : > { %v10155_v41 = vpop.f32.mrf.mxu0 }
0x1831   : > { %v10207_v3 = vcombine.low %v10152_v39, %v10154_v60 }
0x1832   : > { %v10156_v16 = vpop.f32.mrf.mxu0 }
0x1833   : > { %v10214_v19 = vrot.slane %v10207_v3, %v10213_v33 }
0x1835   : > { %v10221_v11 = vrot.slane %v10214_v19, %v10213_v33 }
0x1837   : > { %10227 = vst.msk [vmem:[%s1132_s3] sm:$0x3] %vm10225_vm14, %v10221_v11 }
0x18b7   : > { %v10199_v24 = vpop.f32.mrf.mxu0 }
0x18b8   : > { %v10200_v15 = vadd.f32 %v10199_v24, %v10104_v62 }
0x18b9   : > { %v13006_v54 = vpop.f32.mrf.mxu0 }
0x18ba   : > { %10229 = vst.msk [vmem:[%s1135_s8] sm:$0x1] %vm10228_vm15, %v10200_v15 }
0x18bb   : > { %v10202_v4 = vpop.f32.mrf.mxu0 }
0x18bd   : > { %v13007_v57 = vpop.f32.mrf.mxu0 }
0x18be PF: > { %s88_s7 = sadd.s32 1, %s13384_s7  }
0x18bf   : > { %p85_p4 = scmp.ge.s32.totalorder %s88_s7, 4  }
0x18c1   :  { %87 = sbr.rel (!%p85_p4) target bundleno = 73 (0x49), region = 270 }

</bundles_post_ra>
